<compile_context>
chip_gen: v5e
topology: v5e:2x2
jax: 0.10.0
libtpu: 0.0.40
codegen_flags: <defaults>
</compile_context>

<pallas_src>
import jax
import jax.numpy as jnp
from jax.experimental import pallas as pl
from jax.experimental.pallas import tpu as pltpu


_VMEM_LIMIT = 32 * 1024 * 1024  # safe on every generation (v7x physical = 64 MiB)


def _round_up(x, m):
    return (x + m - 1) // m * m


# ---------------------------------------------------------------------------
# Kernel 1: conv1 as matmul on im2col patches.  cols:(1,400,256) @ w:(256,32)
# ---------------------------------------------------------------------------
def _conv1_kernel(cols_ref, w_ref, b_ref, o_ref):
    acc = jnp.dot(cols_ref[0], w_ref[...], preferred_element_type=jnp.float32)
    acc = jnp.maximum(acc + b_ref[...], 0.0)
    o_ref[0] = acc.astype(o_ref.dtype)


def conv1_pallas(cols, w, b):
    n, m, k = cols.shape
    oc = w.shape[1]
    return pl.pallas_call(
        _conv1_kernel,
        out_shape=jax.ShapeDtypeStruct((n, m, oc), jnp.bfloat16),
        grid=(n,),
        in_specs=[
            pl.BlockSpec((1, m, k), lambda i: (i, 0, 0)),
            pl.BlockSpec((k, oc), lambda i: (0, 0)),     # resident weight
            pl.BlockSpec((1, oc), lambda i: (0, 0)),     # resident bias
        ],
        out_specs=pl.BlockSpec((1, m, oc), lambda i: (i, 0, 0)),
        compiler_params=pltpu.CompilerParams(
            dimension_semantics=("parallel",),
            vmem_limit_bytes=_VMEM_LIMIT,
        ),
    )(cols, w, b)


# ---------------------------------------------------------------------------
# Kernel 2: conv2 (matmul on im2col cols) + conv3 (3x3 / stride 1) fused.
#   cols2 : (1, 81, 512)  bf16   (81 = 9x9 conv2 output positions)
#   w2    : (512, 64)     bf16,  b2 : (1, 64) f32
#   w3    : (9, 64, 64)   bf16   (per-offset ic->oc mats),  b3 : (1, 64) f32
#   out   : (1, 49, 64)   bf16   (49 = 7x7 conv3 output positions)
# conv3 is computed as 9 shifted-slice matmuls over the flattened 9x9 grid;
# rows r = oh*9 + ow are over-computed for all ow (61 rows cover every needed
# r with oh,ow in 0..6) and the unwanted ow>6 rows are dropped at store time.
# ---------------------------------------------------------------------------
def _conv23_kernel(cols2_ref, w2_ref, b2_ref, w3_ref, b3_ref, o_ref):
    x2 = jnp.dot(cols2_ref[0], w2_ref[...], preferred_element_type=jnp.float32)
    x2 = jnp.maximum(x2 + b2_ref[...], 0.0).astype(jnp.bfloat16)      # (81, 64)

    acc = jnp.zeros((61, 64), jnp.float32)
    for di in range(3):
        for dj in range(3):
            base = di * 9 + dj
            acc = acc + jnp.dot(x2[base:base + 61, :], w3_ref[di * 3 + dj],
                                preferred_element_type=jnp.float32)
    x3 = jnp.maximum(acc + b3_ref[...], 0.0).astype(o_ref.dtype)      # (61, 64)

    for oh in range(7):                       # keep only ow in 0..6 of each row
        o_ref[0, oh * 7:(oh + 1) * 7, :] = x3[oh * 9:oh * 9 + 7, :]


def conv23_pallas(cols2, w2, b2, w3, b3):
    n = cols2.shape[0]
    return pl.pallas_call(
        _conv23_kernel,
        out_shape=jax.ShapeDtypeStruct((n, 49, 64), jnp.bfloat16),
        grid=(n,),
        in_specs=[
            pl.BlockSpec((1, 81, 512), lambda i: (i, 0, 0)),
            pl.BlockSpec((512, 64), lambda i: (0, 0)),
            pl.BlockSpec((1, 64), lambda i: (0, 0)),
            pl.BlockSpec((9, 64, 64), lambda i: (0, 0, 0)),
            pl.BlockSpec((1, 64), lambda i: (0, 0)),
        ],
        out_specs=pl.BlockSpec((1, 49, 64), lambda i: (i, 0, 0)),
        compiler_params=pltpu.CompilerParams(
            dimension_semantics=("parallel",),
            vmem_limit_bytes=_VMEM_LIMIT,
        ),
    )(cols2, w2, b2, w3, b3)


# ---------------------------------------------------------------------------
# Kernel 3: fused FC stack  q_pad = relu(x @ W1 + b1) @ W2pad + b2pad
# W2/b2 are zero-padded to 128 columns -> lane-dense output store.
# ---------------------------------------------------------------------------
def _fc_kernel(x_ref, w1_ref, b1_ref, w2_ref, b2_ref, o_ref):
    h = jnp.dot(x_ref[...], w1_ref[...], preferred_element_type=jnp.float32)
    h = jnp.maximum(h + b1_ref[...], 0.0)
    q = jnp.dot(h.astype(jnp.bfloat16), w2_ref[...],
                preferred_element_type=jnp.float32)
    o_ref[...] = (q + b2_ref[...]).astype(o_ref.dtype)


def fc_fused_pallas(x, w1, b1, w2, b2, *, tm_max=256):
    M, K = x.shape
    H = w1.shape[1]
    N = w2.shape[1]
    if M <= tm_max:
        tm, m_pad = M, M                     # single step, block == full extent
    else:
        tm = tm_max                          # row-tile only for large batches
        m_pad = _round_up(M, tm)
        if m_pad != M:
            x = jnp.pad(x, ((0, m_pad - M), (0, 0)))
    out = pl.pallas_call(
        _fc_kernel,
        out_shape=jax.ShapeDtypeStruct((m_pad, N), jnp.float32),
        grid=(m_pad // tm,),
        in_specs=[
            pl.BlockSpec((tm, K), lambda i: (i, 0)),
            pl.BlockSpec((K, H), lambda i: (0, 0)),
            pl.BlockSpec((1, H), lambda i: (0, 0)),
            pl.BlockSpec((H, N), lambda i: (0, 0)),
            pl.BlockSpec((1, N), lambda i: (0, 0)),
        ],
        out_specs=pl.BlockSpec((tm, N), lambda i: (i, 0)),
        compiler_params=pltpu.CompilerParams(
            dimension_semantics=("parallel",),
            vmem_limit_bytes=_VMEM_LIMIT,
        ),
    )(x, w1, b1, w2, b2)
    return out  # caller slices [:batch, :4]


# ---------------------------------------------------------------------------
# im2col glue (plain XLA: strided slices + stack + reshape on bf16 NHWC data)
# ---------------------------------------------------------------------------
def _im2col(x, kh, kw, stride):
    """x: (N, H, W, C) -> (N, oh*ow, kh*kw*C), patch-feature order (kh, kw, C)."""
    n, h, w, c = x.shape
    oh = (h - kh) // stride + 1
    ow = (w - kw) // stride + 1
    patches = []
    for i in range(kh):
        for j in range(kw):
            patches.append(
                jax.lax.slice(
                    x,
                    (0, i, j, 0),
                    (n, i + (oh - 1) * stride + 1, j + (ow - 1) * stride + 1, c),
                    (1, stride, stride, 1),
                )
            )
    cols = jnp.stack(patches, axis=3)               # (N, oh, ow, kh*kw, C)
    return cols.reshape(n, oh * ow, kh * kw * c), oh, ow


# ---------------------------------------------------------------------------
# Parameter init (torch layout, f32) + one-time prep into kernel layout (bf16)
# ---------------------------------------------------------------------------
def init_params(key):
    ks = jax.random.split(key, 10)

    def norm(k, shape, fan_in):
        return jax.random.normal(k, shape, jnp.float32) / jnp.sqrt(float(fan_in))

    p = {}
    p["w1_oihw"] = norm(ks[0], (32, 4, 8, 8), 4 * 8 * 8)
    p["b1"] = norm(ks[1], (32,), 4 * 8 * 8)
    p["w2_oihw"] = norm(ks[2], (64, 32, 4, 4), 32 * 4 * 4)
    p["b2"] = norm(ks[3], (64,), 32 * 4 * 4)
    p["w3_oihw"] = norm(ks[4], (64, 64, 3, 3), 64 * 3 * 3)
    p["b3"] = norm(ks[5], (64,), 64 * 3 * 3)
    p["wfc1"] = norm(ks[6], (3136, 512), 3136)       # stored (in, out) = torch W.T
    p["bfc1"] = norm(ks[7], (512,), 3136)
    p["wfc2"] = norm(ks[8], (512, 4), 512)
    p["bfc2"] = norm(ks[9], (4,), 512)
    return p


def prepare_params(p):
    bf = jnp.bfloat16
    pp = {}
    # conv1 / conv2: OIHW -> (kh*kw*ic, oc) matmul matrices (im2col order kh,kw,C).
    for wname, bname in (("w1", "b1"), ("w2", "b2")):
        w = p[wname + "_oihw"]
        oc, ic, kh, kw = w.shape
        pp[wname] = (jnp.transpose(w, (2, 3, 1, 0))
                     .reshape(kh * kw * ic, oc).astype(bf))
        pp[bname] = p[bname].reshape(1, oc)
    # conv3: kept per-offset (9, ic, oc) for the in-kernel 3x3 accumulation.
    pp["w3"] = (jnp.transpose(p["w3_oihw"], (2, 3, 1, 0))
                .reshape(9, 64, 64).astype(bf))
    pp["b3"] = p["b3"].reshape(1, 64)
    # FC1: torch flattens NCHW (c*49 + p); our activation flattens NHWC (p*64 + c)
    # -> permute weight rows once.
    w_fc1 = p["wfc1"].reshape(64, 7, 7, 512)
    pp["wfc1"] = (jnp.transpose(w_fc1, (1, 2, 0, 3))
                  .reshape(3136, 512).astype(bf))
    pp["bfc1"] = p["bfc1"].reshape(1, 512)
    # FC2: zero-pad 4 -> 128 output columns for a lane-dense store.
    pp["wfc2"] = jnp.pad(p["wfc2"], ((0, 0), (0, 124))).astype(bf)
    pp["bfc2"] = jnp.pad(p["bfc2"], (0, 124)).reshape(1, 128)
    return pp


# ---------------------------------------------------------------------------
# Qnet forward (Pallas hot path): 3 pallas_calls, no pad/slice glue.
# ---------------------------------------------------------------------------
def qnet_forward_pallas(x_nchw, p):
    n = x_nchw.shape[0]
    x = jnp.transpose(x_nchw, (0, 2, 3, 1)).astype(jnp.bfloat16)   # NCHW -> NHWC

    cols1, oh, ow = _im2col(x, 8, 8, 4)                  # (n, 400, 256)
    x1 = conv1_pallas(cols1, p["w1"], p["b1"])           # (n, 400, 32) bf16
    x1 = x1.reshape(n, oh, ow, 32)                       # (n, 20, 20, 32)

    cols2, _, _ = _im2col(x1, 4, 4, 2)                   # (n, 81, 512)
    x3 = conv23_pallas(cols2, p["w2"], p["b2"], p["w3"], p["b3"])   # (n, 49, 64)

    x3 = x3.reshape(n, 49 * 64)                          # NHWC flatten (p*64 + c)
    q = fc_fused_pallas(x3, p["wfc1"], p["bfc1"], p["wfc2"], p["bfc2"])
    return q[:n, :4]


# ---------------------------------------------------------------------------
# Reference with identical numerics (bf16 operands, f32 accumulation)
# ---------------------------------------------------------------------------
def qnet_forward_reference(x_nchw, p):
    bf = jnp.bfloat16

    def conv(x, w, b, stride):
        y = jax.lax.conv_general_dilated(
            x.astype(bf), w.astype(bf), (stride, stride), "VALID",
            dimension_numbers=("NCHW", "OIHW", "NCHW"),
            preferred_element_type=jnp.float32,
        )
        return jax.nn.relu(y + b[None, :, None, None]).astype(bf)

    x = conv(x_nchw, p["w1_oihw"], p["b1"], 4)
    x = conv(x, p["w2_oihw"], p["b2"], 2)
    x = conv(x, p["w3_oihw"], p["b3"], 1)
    x = x.reshape(-1, 3136)                              # torch NCHW flatten
    h = jax.nn.relu(jnp.dot(x, p["wfc1"].astype(bf),
                            preferred_element_type=jnp.float32) + p["bfc1"])
    return jnp.dot(h.astype(bf), p["wfc2"].astype(bf),
                   preferred_element_type=jnp.float32) + p["bfc2"]


if __name__ == "__main__":
    key = jax.random.PRNGKey(0)
    k_param, k_x = jax.random.split(key)
    params = init_params(k_param)
    prepped = prepare_params(params)

    # batch=2, NCHW input; 84x84 is required by the architecture (3136 flatten).
    x = jax.random.normal(k_x, (2, 4, 84, 84), jnp.float32)

    fwd = jax.jit(qnet_forward_pallas)
    out = jax.block_until_ready(fwd(x, prepped))
    assert out.shape == (2, 4), out.shape

    ref = jax.block_until_ready(qnet_forward_reference(x, params))
    ref = jnp.asarray(ref, jnp.float32)
    assert jnp.all(jnp.isfinite(out))
    assert jnp.allclose(out, ref, rtol=1e-2, atol=1e-2), (out, ref)

    print("KERNEL_OK")
</pallas_src>

<mosaic_0001>
module attributes {stable_mosaic.version = 11 : i64} {
  func.func @_conv1_kernel(%arg0: i32, %arg1: memref<1x400x256xbf16, #tpu.memory_space<vmem>>, %arg2: memref<256x32xbf16, #tpu.memory_space<vmem>>, %arg3: memref<1x32xf32, #tpu.memory_space<vmem>>, %arg4: memref<1x400x32xbf16, #tpu.memory_space<vmem>>) attributes {dimension_semantics = [#tpu.dimension_semantics<parallel>], iteration_bounds = array<i64: 2>, scalar_prefetch = 0 : i64, scratch_operands = 0 : i64, tpu.core_type = #tpu.core_type<tc>, window_params = [{transform_indices = @transform_0, window_bounds = array<i64: 1, 400, 256>}, {pipeline_mode = #tpu.pipeline_mode<synchronous>, transform_indices = @transform_1, window_bounds = array<i64: 256, 32>}, {pipeline_mode = #tpu.pipeline_mode<synchronous>, transform_indices = @transform_2, window_bounds = array<i64: 1, 32>}, {transform_indices = @transform_3, window_bounds = array<i64: 1, 400, 32>}]} {
    %c0 = arith.constant 0 : index
    %c0_0 = arith.constant 0 : index
    %c0_1 = arith.constant 0 : index
    %0 = vector.load %arg1[%c0, %c0_0, %c0_1] : memref<1x400x256xbf16, #tpu.memory_space<vmem>>, vector<1x400x256xbf16>
    %1 = vector.shape_cast %0 : vector<1x400x256xbf16> to vector<400x256xbf16>
    %c0_2 = arith.constant 0 : index
    %c0_3 = arith.constant 0 : index
    %2 = vector.load %arg2[%c0_2, %c0_3] : memref<256x32xbf16, #tpu.memory_space<vmem>>, vector<256x32xbf16>
    %cst = arith.constant dense<0.000000e+00> : vector<400x32xf32>
    %3 = tpu.matmul %1, %2, %cst {dimension_numbers = #tpu.dot_dimension_numbers<[1], [0], [0], [1], [0, 0, 1, 1], [], []>} : vector<400x256xbf16>, vector<256x32xbf16>, vector<400x32xf32> -> vector<400x32xf32>
    %c0_4 = arith.constant 0 : index
    %c0_5 = arith.constant 0 : index
    %4 = vector.load %arg3[%c0_4, %c0_5] : memref<1x32xf32, #tpu.memory_space<vmem>>, vector<1x32xf32>
    %5 = vector.broadcast %4 : vector<1x32xf32> to vector<400x32xf32>
    %6 = arith.addf %3, %5 : vector<400x32xf32>
    %cst_6 = arith.constant 0.000000e+00 : f32
    %7 = vector.broadcast %cst_6 : f32 to vector<400x32xf32>
    %8 = arith.maximumf %6, %7 : vector<400x32xf32>
    %9 = arith.truncf %8 : vector<400x32xf32> to vector<400x32xbf16>
    %c0_7 = arith.constant 0 : index
    %c0_8 = arith.constant 0 : index
    %c0_9 = arith.constant 0 : index
    %10 = vector.load %arg4[%c0_7, %c0_8, %c0_9] : memref<1x400x32xbf16, #tpu.memory_space<vmem>>, vector<1x400x32xbf16>
    %11 = vector.shape_cast %10 : vector<1x400x32xbf16> to vector<400x32xbf16>
    %12 = vector.shape_cast %9 : vector<400x32xbf16> to vector<1x400x32xbf16>
    tpu.vector_store %arg4[%c0_7, %c0_8, %c0_9], %12 {strides = array<i32>} : memref<1x400x32xbf16, #tpu.memory_space<vmem>>, vector<1x400x32xbf16>,
    return
  }
  func.func @transform_0(%arg0: i32) -> (i32, i32, i32) {
    %c0_i32 = arith.constant 0 : i32
    %c0_i32_0 = arith.constant 0 : i32
    %c0_i32_1 = arith.constant 0 : i32
    return %arg0, %c0_i32, %c0_i32_0 : i32, i32, i32
  }
  func.func @transform_1(%arg0: i32) -> (i32, i32) {
    %c0_i32 = arith.constant 0 : i32
    %c0_i32_0 = arith.constant 0 : i32
    %c0_i32_1 = arith.constant 0 : i32
    return %c0_i32, %c0_i32_0 : i32, i32
  }
  func.func @transform_2(%arg0: i32) -> (i32, i32) {
    %c0_i32 = arith.constant 0 : i32
    %c0_i32_0 = arith.constant 0 : i32
    %c0_i32_1 = arith.constant 0 : i32
    return %c0_i32, %c0_i32_0 : i32, i32
  }
  func.func @transform_3(%arg0: i32) -> (i32, i32, i32) {
    %c0_i32 = arith.constant 0 : i32
    %c0_i32_0 = arith.constant 0 : i32
    %c0_i32_1 = arith.constant 0 : i32
    return %arg0, %c0_i32, %c0_i32_0 : i32, i32, i32
  }
}

module attributes {stable_mosaic.version = 11 : i64} {
  func.func @_conv23_kernel(%arg0: i32, %arg1: memref<1x81x512xbf16, #tpu.memory_space<vmem>>, %arg2: memref<512x64xbf16, #tpu.memory_space<vmem>>, %arg3: memref<1x64xf32, #tpu.memory_space<vmem>>, %arg4: memref<9x64x64xbf16, #tpu.memory_space<vmem>>, %arg5: memref<1x64xf32, #tpu.memory_space<vmem>>, %arg6: memref<1x49x64xbf16, #tpu.memory_space<vmem>>) attributes {dimension_semantics = [#tpu.dimension_semantics<parallel>], iteration_bounds = array<i64: 2>, scalar_prefetch = 0 : i64, scratch_operands = 0 : i64, tpu.core_type = #tpu.core_type<tc>, window_params = [{transform_indices = @transform_0, window_bounds = array<i64: 1, 81, 512>}, {pipeline_mode = #tpu.pipeline_mode<synchronous>, transform_indices = @transform_1, window_bounds = array<i64: 512, 64>}, {pipeline_mode = #tpu.pipeline_mode<synchronous>, transform_indices = @transform_2, window_bounds = array<i64: 1, 64>}, {pipeline_mode = #tpu.pipeline_mode<synchronous>, transform_indices = @transform_3, window_bounds = array<i64: 9, 64, 64>}, {pipeline_mode = #tpu.pipeline_mode<synchronous>, transform_indices = @transform_4, window_bounds = array<i64: 1, 64>}, {transform_indices = @transform_5, window_bounds = array<i64: 1, 49, 64>}]} {
    %c0 = arith.constant 0 : index
    %c0_0 = arith.constant 0 : index
    %c0_1 = arith.constant 0 : index
    %0 = vector.load %arg1[%c0, %c0_0, %c0_1] : memref<1x81x512xbf16, #tpu.memory_space<vmem>>, vector<1x81x512xbf16>
    %1 = vector.shape_cast %0 : vector<1x81x512xbf16> to vector<81x512xbf16>
    %c0_2 = arith.constant 0 : index
    %c0_3 = arith.constant 0 : index
    %2 = vector.load %arg2[%c0_2, %c0_3] : memref<512x64xbf16, #tpu.memory_space<vmem>>, vector<512x64xbf16>
    %cst = arith.constant dense<0.000000e+00> : vector<81x64xf32>
    %3 = tpu.matmul %1, %2, %cst {dimension_numbers = #tpu.dot_dimension_numbers<[1], [0], [0], [1], [0, 0, 1, 1], [], []>} : vector<81x512xbf16>, vector<512x64xbf16>, vector<81x64xf32> -> vector<81x64xf32>
    %c0_4 = arith.constant 0 : index
    %c0_5 = arith.constant 0 : index
    %4 = vector.load %arg3[%c0_4, %c0_5] : memref<1x64xf32, #tpu.memory_space<vmem>>, vector<1x64xf32>
    %5 = vector.broadcast %4 : vector<1x64xf32> to vector<81x64xf32>
    %6 = arith.addf %3, %5 : vector<81x64xf32>
    %cst_6 = arith.constant 0.000000e+00 : f32
    %7 = vector.broadcast %cst_6 : f32 to vector<81x64xf32>
    %8 = arith.maximumf %6, %7 : vector<81x64xf32>
    %9 = arith.truncf %8 : vector<81x64xf32> to vector<81x64xbf16>
    %cst_7 = arith.constant 0.000000e+00 : f32
    %10 = vector.broadcast %cst_7 : f32 to vector<61x64xf32>
    %11 = vector.extract_strided_slice %9 {offsets = [0, 0], sizes = [61, 64], strides = [1, 1]} : vector<81x64xbf16> to vector<61x64xbf16>
    %c0_8 = arith.constant 0 : index
    %c0_9 = arith.constant 0 : index
    %c0_10 = arith.constant 0 : index
    %12 = vector.load %arg4[%c0_8, %c0_9, %c0_10] : memref<9x64x64xbf16, #tpu.memory_space<vmem>>, vector<1x64x64xbf16>
    %13 = vector.shape_cast %12 : vector<1x64x64xbf16> to vector<64x64xbf16>
    %cst_11 = arith.constant dense<0.000000e+00> : vector<61x64xf32>
    %14 = tpu.matmul %11, %13, %cst_11 {dimension_numbers = #tpu.dot_dimension_numbers<[1], [0], [0], [1], [0, 0, 1, 1], [], []>} : vector<61x64xbf16>, vector<64x64xbf16>, vector<61x64xf32> -> vector<61x64xf32>
    %15 = arith.addf %10, %14 : vector<61x64xf32>
    %16 = vector.extract_strided_slice %9 {offsets = [1, 0], sizes = [61, 64], strides = [1, 1]} : vector<81x64xbf16> to vector<61x64xbf16>
    %c1 = arith.constant 1 : index
    %c0_12 = arith.constant 0 : index
    %c0_13 = arith.constant 0 : index
    %17 = vector.load %arg4[%c1, %c0_12, %c0_13] : memref<9x64x64xbf16, #tpu.memory_space<vmem>>, vector<1x64x64xbf16>
    %18 = vector.shape_cast %17 : vector<1x64x64xbf16> to vector<64x64xbf16>
    %cst_14 = arith.constant dense<0.000000e+00> : vector<61x64xf32>
    %19 = tpu.matmul %16, %18, %cst_14 {dimension_numbers = #tpu.dot_dimension_numbers<[1], [0], [0], [1], [0, 0, 1, 1], [], []>} : vector<61x64xbf16>, vector<64x64xbf16>, vector<61x64xf32> -> vector<61x64xf32>
    %20 = arith.addf %15, %19 : vector<61x64xf32>
    %21 = vector.extract_strided_slice %9 {offsets = [2, 0], sizes = [61, 64], strides = [1, 1]} : vector<81x64xbf16> to vector<61x64xbf16>
    %c2 = arith.constant 2 : index
    %c0_15 = arith.constant 0 : index
    %c0_16 = arith.constant 0 : index
    %22 = vector.load %arg4[%c2, %c0_15, %c0_16] : memref<9x64x64xbf16, #tpu.memory_space<vmem>>, vector<1x64x64xbf16>
    %23 = vector.shape_cast %22 : vector<1x64x64xbf16> to vector<64x64xbf16>
    %cst_17 = arith.constant dense<0.000000e+00> : vector<61x64xf32>
    %24 = tpu.matmul %21, %23, %cst_17 {dimension_numbers = #tpu.dot_dimension_numbers<[1], [0], [0], [1], [0, 0, 1, 1], [], []>} : vector<61x64xbf16>, vector<64x64xbf16>, vector<61x64xf32> -> vector<61x64xf32>
    %25 = arith.addf %20, %24 : vector<61x64xf32>
    %26 = vector.extract_strided_slice %9 {offsets = [9, 0], sizes = [61, 64], strides = [1, 1]} : vector<81x64xbf16> to vector<61x64xbf16>
    %c3 = arith.constant 3 : index
    %c0_18 = arith.constant 0 : index
    %c0_19 = arith.constant 0 : index
    %27 = vector.load %arg4[%c3, %c0_18, %c0_19] : memref<9x64x64xbf16, #tpu.memory_space<vmem>>, vector<1x64x64xbf16>
    %28 = vector.shape_cast %27 : vector<1x64x64xbf16> to vector<64x64xbf16>
    %cst_20 = arith.constant dense<0.000000e+00> : vector<61x64xf32>
    %29 = tpu.matmul %26, %28, %cst_20 {dimension_numbers = #tpu.dot_dimension_numbers<[1], [0], [0], [1], [0, 0, 1, 1], [], []>} : vector<61x64xbf16>, vector<64x64xbf16>, vector<61x64xf32> -> vector<61x64xf32>
    %30 = arith.addf %25, %29 : vector<61x64xf32>
    %31 = vector.extract_strided_slice %9 {offsets = [10, 0], sizes = [61, 64], strides = [1, 1]} : vector<81x64xbf16> to vector<61x64xbf16>
    %c4 = arith.constant 4 : index
    %c0_21 = arith.constant 0 : index
    %c0_22 = arith.constant 0 : index
    %32 = vector.load %arg4[%c4, %c0_21, %c0_22] : memref<9x64x64xbf16, #tpu.memory_space<vmem>>, vector<1x64x64xbf16>
    %33 = vector.shape_cast %32 : vector<1x64x64xbf16> to vector<64x64xbf16>
    %cst_23 = arith.constant dense<0.000000e+00> : vector<61x64xf32>
    %34 = tpu.matmul %31, %33, %cst_23 {dimension_numbers = #tpu.dot_dimension_numbers<[1], [0], [0], [1], [0, 0, 1, 1], [], []>} : vector<61x64xbf16>, vector<64x64xbf16>, vector<61x64xf32> -> vector<61x64xf32>
    %35 = arith.addf %30, %34 : vector<61x64xf32>
    %36 = vector.extract_strided_slice %9 {offsets = [11, 0], sizes = [61, 64], strides = [1, 1]} : vector<81x64xbf16> to vector<61x64xbf16>
    %c5 = arith.constant 5 : index
    %c0_24 = arith.constant 0 : index
    %c0_25 = arith.constant 0 : index
    %37 = vector.load %arg4[%c5, %c0_24, %c0_25] : memref<9x64x64xbf16, #tpu.memory_space<vmem>>, vector<1x64x64xbf16>
    %38 = vector.shape_cast %37 : vector<1x64x64xbf16> to vector<64x64xbf16>
    %cst_26 = arith.constant dense<0.000000e+00> : vector<61x64xf32>
    %39 = tpu.matmul %36, %38, %cst_26 {dimension_numbers = #tpu.dot_dimension_numbers<[1], [0], [0], [1], [0, 0, 1, 1], [], []>} : vector<61x64xbf16>, vector<64x64xbf16>, vector<61x64xf32> -> vector<61x64xf32>
    %40 = arith.addf %35, %39 : vector<61x64xf32>
    %41 = vector.extract_strided_slice %9 {offsets = [18, 0], sizes = [61, 64], strides = [1, 1]} : vector<81x64xbf16> to vector<61x64xbf16>
    %c6 = arith.constant 6 : index
    %c0_27 = arith.constant 0 : index
    %c0_28 = arith.constant 0 : index
    %42 = vector.load %arg4[%c6, %c0_27, %c0_28] : memref<9x64x64xbf16, #tpu.memory_space<vmem>>, vector<1x64x64xbf16>
    %43 = vector.shape_cast %42 : vector<1x64x64xbf16> to vector<64x64xbf16>
    %cst_29 = arith.constant dense<0.000000e+00> : vector<61x64xf32>
    %44 = tpu.matmul %41, %43, %cst_29 {dimension_numbers = #tpu.dot_dimension_numbers<[1], [0], [0], [1], [0, 0, 1, 1], [], []>} : vector<61x64xbf16>, vector<64x64xbf16>, vector<61x64xf32> -> vector<61x64xf32>
    %45 = arith.addf %40, %44 : vector<61x64xf32>
    %46 = vector.extract_strided_slice %9 {offsets = [19, 0], sizes = [61, 64], strides = [1, 1]} : vector<81x64xbf16> to vector<61x64xbf16>
    %c7 = arith.constant 7 : index
    %c0_30 = arith.constant 0 : index
    %c0_31 = arith.constant 0 : index
    %47 = vector.load %arg4[%c7, %c0_30, %c0_31] : memref<9x64x64xbf16, #tpu.memory_space<vmem>>, vector<1x64x64xbf16>
    %48 = vector.shape_cast %47 : vector<1x64x64xbf16> to vector<64x64xbf16>
    %cst_32 = arith.constant dense<0.000000e+00> : vector<61x64xf32>
    %49 = tpu.matmul %46, %48, %cst_32 {dimension_numbers = #tpu.dot_dimension_numbers<[1], [0], [0], [1], [0, 0, 1, 1], [], []>} : vector<61x64xbf16>, vector<64x64xbf16>, vector<61x64xf32> -> vector<61x64xf32>
    %50 = arith.addf %45, %49 : vector<61x64xf32>
    %51 = vector.extract_strided_slice %9 {offsets = [20, 0], sizes = [61, 64], strides = [1, 1]} : vector<81x64xbf16> to vector<61x64xbf16>
    %c8 = arith.constant 8 : index
    %c0_33 = arith.constant 0 : index
    %c0_34 = arith.constant 0 : index
    %52 = vector.load %arg4[%c8, %c0_33, %c0_34] : memref<9x64x64xbf16, #tpu.memory_space<vmem>>, vector<1x64x64xbf16>
    %53 = vector.shape_cast %52 : vector<1x64x64xbf16> to vector<64x64xbf16>
    %cst_35 = arith.constant dense<0.000000e+00> : vector<61x64xf32>
    %54 = tpu.matmul %51, %53, %cst_35 {dimension_numbers = #tpu.dot_dimension_numbers<[1], [0], [0], [1], [0, 0, 1, 1], [], []>} : vector<61x64xbf16>, vector<64x64xbf16>, vector<61x64xf32> -> vector<61x64xf32>
    %55 = arith.addf %50, %54 : vector<61x64xf32>
    %c0_36 = arith.constant 0 : index
    %c0_37 = arith.constant 0 : index
    %56 = vector.load %arg5[%c0_36, %c0_37] : memref<1x64xf32, #tpu.memory_space<vmem>>, vector<1x64xf32>
    %57 = vector.broadcast %56 : vector<1x64xf32> to vector<61x64xf32>
    %58 = arith.addf %55, %57 : vector<61x64xf32>
    %cst_38 = arith.constant 0.000000e+00 : f32
    %59 = vector.broadcast %cst_38 : f32 to vector<61x64xf32>
    %60 = arith.maximumf %58, %59 : vector<61x64xf32>
    %61 = arith.truncf %60 : vector<61x64xf32> to vector<61x64xbf16>
    %62 = vector.extract_strided_slice %61 {offsets = [0, 0], sizes = [7, 64], strides = [1, 1]} : vector<61x64xbf16> to vector<7x64xbf16>
    %c0_39 = arith.constant 0 : index
    %c0_40 = arith.constant 0 : index
    %c0_41 = arith.constant 0 : index
    %63 = vector.load %arg6[%c0_39, %c0_40, %c0_41] : memref<1x49x64xbf16, #tpu.memory_space<vmem>>, vector<1x7x64xbf16>
    %64 = vector.shape_cast %63 : vector<1x7x64xbf16> to vector<7x64xbf16>
    %65 = vector.shape_cast %62 : vector<7x64xbf16> to vector<1x7x64xbf16>
    tpu.vector_store %arg6[%c0_39, %c0_40, %c0_41], %65 {strides = array<i32>} : memref<1x49x64xbf16, #tpu.memory_space<vmem>>, vector<1x7x64xbf16>,
    %66 = vector.extract_strided_slice %61 {offsets = [9, 0], sizes = [7, 64], strides = [1, 1]} : vector<61x64xbf16> to vector<7x64xbf16>
    %c0_42 = arith.constant 0 : index
    %c7_43 = arith.constant 7 : index
    %c0_44 = arith.constant 0 : index
    %67 = vector.load %arg6[%c0_42, %c7_43, %c0_44] : memref<1x49x64xbf16, #tpu.memory_space<vmem>>, vector<1x7x64xbf16>
    %68 = vector.shape_cast %67 : vector<1x7x64xbf16> to vector<7x64xbf16>
    %69 = vector.shape_cast %66 : vector<7x64xbf16> to vector<1x7x64xbf16>
    tpu.vector_store %arg6[%c0_42, %c7_43, %c0_44], %69 {strides = array<i32>} : memref<1x49x64xbf16, #tpu.memory_space<vmem>>, vector<1x7x64xbf16>,
    %70 = vector.extract_strided_slice %61 {offsets = [18, 0], sizes = [7, 64], strides = [1, 1]} : vector<61x64xbf16> to vector<7x64xbf16>
    %c0_45 = arith.constant 0 : index
    %c14 = arith.constant 14 : index
    %c0_46 = arith.constant 0 : index
    %71 = vector.load %arg6[%c0_45, %c14, %c0_46] : memref<1x49x64xbf16, #tpu.memory_space<vmem>>, vector<1x7x64xbf16>
    %72 = vector.shape_cast %71 : vector<1x7x64xbf16> to vector<7x64xbf16>
    %73 = vector.shape_cast %70 : vector<7x64xbf16> to vector<1x7x64xbf16>
    tpu.vector_store %arg6[%c0_45, %c14, %c0_46], %73 {strides = array<i32>} : memref<1x49x64xbf16, #tpu.memory_space<vmem>>, vector<1x7x64xbf16>,
    %74 = vector.extract_strided_slice %61 {offsets = [27, 0], sizes = [7, 64], strides = [1, 1]} : vector<61x64xbf16> to vector<7x64xbf16>
    %c0_47 = arith.constant 0 : index
    %c21 = arith.constant 21 : index
    %c0_48 = arith.constant 0 : index
    %75 = vector.load %arg6[%c0_47, %c21, %c0_48] : memref<1x49x64xbf16, #tpu.memory_space<vmem>>, vector<1x7x64xbf16>
    %76 = vector.shape_cast %75 : vector<1x7x64xbf16> to vector<7x64xbf16>
    %77 = vector.shape_cast %74 : vector<7x64xbf16> to vector<1x7x64xbf16>
    tpu.vector_store %arg6[%c0_47, %c21, %c0_48], %77 {strides = array<i32>} : memref<1x49x64xbf16, #tpu.memory_space<vmem>>, vector<1x7x64xbf16>,
    %78 = vector.extract_strided_slice %61 {offsets = [36, 0], sizes = [7, 64], strides = [1, 1]} : vector<61x64xbf16> to vector<7x64xbf16>
    %c0_49 = arith.constant 0 : index
    %c28 = arith.constant 28 : index
    %c0_50 = arith.constant 0 : index
    %79 = vector.load %arg6[%c0_49, %c28, %c0_50] : memref<1x49x64xbf16, #tpu.memory_space<vmem>>, vector<1x7x64xbf16>
    %80 = vector.shape_cast %79 : vector<1x7x64xbf16> to vector<7x64xbf16>
    %81 = vector.shape_cast %78 : vector<7x64xbf16> to vector<1x7x64xbf16>
    tpu.vector_store %arg6[%c0_49, %c28, %c0_50], %81 {strides = array<i32>} : memref<1x49x64xbf16, #tpu.memory_space<vmem>>, vector<1x7x64xbf16>,
    %82 = vector.extract_strided_slice %61 {offsets = [45, 0], sizes = [7, 64], strides = [1, 1]} : vector<61x64xbf16> to vector<7x64xbf16>
    %c0_51 = arith.constant 0 : index
    %c35 = arith.constant 35 : index
    %c0_52 = arith.constant 0 : index
    %83 = vector.load %arg6[%c0_51, %c35, %c0_52] : memref<1x49x64xbf16, #tpu.memory_space<vmem>>, vector<1x7x64xbf16>
    %84 = vector.shape_cast %83 : vector<1x7x64xbf16> to vector<7x64xbf16>
    %85 = vector.shape_cast %82 : vector<7x64xbf16> to vector<1x7x64xbf16>
    tpu.vector_store %arg6[%c0_51, %c35, %c0_52], %85 {strides = array<i32>} : memref<1x49x64xbf16, #tpu.memory_space<vmem>>, vector<1x7x64xbf16>,
    %86 = vector.extract_strided_slice %61 {offsets = [54, 0], sizes = [7, 64], strides = [1, 1]} : vector<61x64xbf16> to vector<7x64xbf16>
    %c0_53 = arith.constant 0 : index
    %c42 = arith.constant 42 : index
    %c0_54 = arith.constant 0 : index
    %87 = vector.load %arg6[%c0_53, %c42, %c0_54] : memref<1x49x64xbf16, #tpu.memory_space<vmem>>, vector<1x7x64xbf16>
    %88 = vector.shape_cast %87 : vector<1x7x64xbf16> to vector<7x64xbf16>
    %89 = vector.shape_cast %86 : vector<7x64xbf16> to vector<1x7x64xbf16>
    tpu.vector_store %arg6[%c0_53, %c42, %c0_54], %89 {strides = array<i32>} : memref<1x49x64xbf16, #tpu.memory_space<vmem>>, vector<1x7x64xbf16>,
    return
  }
  func.func @transform_0(%arg0: i32) -> (i32, i32, i32) {
    %c0_i32 = arith.constant 0 : i32
    %c0_i32_0 = arith.constant 0 : i32
    %c0_i32_1 = arith.constant 0 : i32
    return %arg0, %c0_i32, %c0_i32_0 : i32, i32, i32
  }
  func.func @transform_1(%arg0: i32) -> (i32, i32) {
    %c0_i32 = arith.constant 0 : i32
    %c0_i32_0 = arith.constant 0 : i32
    %c0_i32_1 = arith.constant 0 : i32
    return %c0_i32, %c0_i32_0 : i32, i32
  }
  func.func @transform_2(%arg0: i32) -> (i32, i32) {
    %c0_i32 = arith.constant 0 : i32
    %c0_i32_0 = arith.constant 0 : i32
    %c0_i32_1 = arith.constant 0 : i32
    return %c0_i32, %c0_i32_0 : i32, i32
  }
  func.func @transform_3(%arg0: i32) -> (i32, i32, i32) {
    %c0_i32 = arith.constant 0 : i32
    %c0_i32_0 = arith.constant 0 : i32
    %c0_i32_1 = arith.constant 0 : i32
    %c0_i32_2 = arith.constant 0 : i32
    return %c0_i32, %c0_i32_0, %c0_i32_1 : i32, i32, i32
  }
  func.func @transform_4(%arg0: i32) -> (i32, i32) {
    %c0_i32 = arith.constant 0 : i32
    %c0_i32_0 = arith.constant 0 : i32
    %c0_i32_1 = arith.constant 0 : i32
    return %c0_i32, %c0_i32_0 : i32, i32
  }
  func.func @transform_5(%arg0: i32) -> (i32, i32, i32) {
    %c0_i32 = arith.constant 0 : i32
    %c0_i32_0 = arith.constant 0 : i32
    %c0_i32_1 = arith.constant 0 : i32
    return %arg0, %c0_i32, %c0_i32_0 : i32, i32, i32
  }
}

module attributes {stable_mosaic.version = 11 : i64} {
  func.func @_fc_kernel(%arg0: i32, %arg1: memref<2x3136xbf16, #tpu.memory_space<vmem>>, %arg2: memref<3136x512xbf16, #tpu.memory_space<vmem>>, %arg3: memref<1x512xf32, #tpu.memory_space<vmem>>, %arg4: memref<512x128xbf16, #tpu.memory_space<vmem>>, %arg5: memref<1x128xf32, #tpu.memory_space<vmem>>, %arg6: memref<2x128xf32, #tpu.memory_space<vmem>>) attributes {dimension_semantics = [#tpu.dimension_semantics<parallel>], iteration_bounds = array<i64: 1>, scalar_prefetch = 0 : i64, scratch_operands = 0 : i64, tpu.core_type = #tpu.core_type<tc>, window_params = [{transform_indices = @transform_0, window_bounds = array<i64: 2, 3136>}, {pipeline_mode = #tpu.pipeline_mode<synchronous>, transform_indices = @transform_1, window_bounds = array<i64: 3136, 512>}, {pipeline_mode = #tpu.pipeline_mode<synchronous>, transform_indices = @transform_2, window_bounds = array<i64: 1, 512>}, {pipeline_mode = #tpu.pipeline_mode<synchronous>, transform_indices = @transform_3, window_bounds = array<i64: 512, 128>}, {pipeline_mode = #tpu.pipeline_mode<synchronous>, transform_indices = @transform_4, window_bounds = array<i64: 1, 128>}, {transform_indices = @transform_5, window_bounds = array<i64: 2, 128>}]} {
    %c0 = arith.constant 0 : index
    %c0_0 = arith.constant 0 : index
    %0 = vector.load %arg1[%c0, %c0_0] : memref<2x3136xbf16, #tpu.memory_space<vmem>>, vector<2x3136xbf16>
    %c0_1 = arith.constant 0 : index
    %c0_2 = arith.constant 0 : index
    %1 = vector.load %arg2[%c0_1, %c0_2] : memref<3136x512xbf16, #tpu.memory_space<vmem>>, vector<3136x512xbf16>
    %cst = arith.constant dense<0.000000e+00> : vector<2x512xf32>
    %2 = tpu.matmul %0, %1, %cst {dimension_numbers = #tpu.dot_dimension_numbers<[1], [0], [0], [1], [0, 0, 1, 1], [], []>} : vector<2x3136xbf16>, vector<3136x512xbf16>, vector<2x512xf32> -> vector<2x512xf32>
    %c0_3 = arith.constant 0 : index
    %c0_4 = arith.constant 0 : index
    %3 = vector.load %arg3[%c0_3, %c0_4] : memref<1x512xf32, #tpu.memory_space<vmem>>, vector<1x512xf32>
    %4 = vector.broadcast %3 : vector<1x512xf32> to vector<2x512xf32>
    %5 = arith.addf %2, %4 : vector<2x512xf32>
    %cst_5 = arith.constant 0.000000e+00 : f32
    %6 = vector.broadcast %cst_5 : f32 to vector<2x512xf32>
    %7 = arith.maximumf %5, %6 : vector<2x512xf32>
    %8 = arith.truncf %7 : vector<2x512xf32> to vector<2x512xbf16>
    %c0_6 = arith.constant 0 : index
    %c0_7 = arith.constant 0 : index
    %9 = vector.load %arg4[%c0_6, %c0_7] : memref<512x128xbf16, #tpu.memory_space<vmem>>, vector<512x128xbf16>
    %cst_8 = arith.constant dense<0.000000e+00> : vector<2x128xf32>
    %10 = tpu.matmul %8, %9, %cst_8 {dimension_numbers = #tpu.dot_dimension_numbers<[1], [0], [0], [1], [0, 0, 1, 1], [], []>} : vector<2x512xbf16>, vector<512x128xbf16>, vector<2x128xf32> -> vector<2x128xf32>
    %c0_9 = arith.constant 0 : index
    %c0_10 = arith.constant 0 : index
    %11 = vector.load %arg5[%c0_9, %c0_10] : memref<1x128xf32, #tpu.memory_space<vmem>>, vector<1x128xf32>
    %12 = vector.broadcast %11 : vector<1x128xf32> to vector<2x128xf32>
    %13 = arith.addf %10, %12 : vector<2x128xf32>
    %c0_11 = arith.constant 0 : index
    %c0_12 = arith.constant 0 : index
    %14 = vector.load %arg6[%c0_11, %c0_12] : memref<2x128xf32, #tpu.memory_space<vmem>>, vector<2x128xf32>
    tpu.vector_store %arg6[%c0_11, %c0_12], %13 {strides = array<i32>} : memref<2x128xf32, #tpu.memory_space<vmem>>, vector<2x128xf32>,
    return
  }
  func.func @transform_0(%arg0: i32) -> (i32, i32) {
    %c0_i32 = arith.constant 0 : i32
    %c0_i32_0 = arith.constant 0 : i32
    return %arg0, %c0_i32 : i32, i32
  }
  func.func @transform_1(%arg0: i32) -> (i32, i32) {
    %c0_i32 = arith.constant 0 : i32
    %c0_i32_0 = arith.constant 0 : i32
    %c0_i32_1 = arith.constant 0 : i32
    return %c0_i32, %c0_i32_0 : i32, i32
  }
  func.func @transform_2(%arg0: i32) -> (i32, i32) {
    %c0_i32 = arith.constant 0 : i32
    %c0_i32_0 = arith.constant 0 : i32
    %c0_i32_1 = arith.constant 0 : i32
    return %c0_i32, %c0_i32_0 : i32, i32
  }
  func.func @transform_3(%arg0: i32) -> (i32, i32) {
    %c0_i32 = arith.constant 0 : i32
    %c0_i32_0 = arith.constant 0 : i32
    %c0_i32_1 = arith.constant 0 : i32
    return %c0_i32, %c0_i32_0 : i32, i32
  }
  func.func @transform_4(%arg0: i32) -> (i32, i32) {
    %c0_i32 = arith.constant 0 : i32
    %c0_i32_0 = arith.constant 0 : i32
    %c0_i32_1 = arith.constant 0 : i32
    return %c0_i32, %c0_i32_0 : i32, i32
  }
  func.func @transform_5(%arg0: i32) -> (i32, i32) {
    %c0_i32 = arith.constant 0 : i32
    %c0_i32_0 = arith.constant 0 : i32
    return %arg0, %c0_i32 : i32, i32
  }
}

</mosaic_0001>

<bundles_post_ra>
// kernel: qnet_forward_pallas.3
= control target key start
LH: loop header
LB: loop body
LE: loop exit
PB: predicated region body
PF: predicated region fallthrough
CT: control target
= control target key end

     0   :  { %s1471_s12 = smov 0   ;;  %s1805_s0 = inlined_call_operand.vmem [shape: bf16[2,400,256], index: 0, kind: input, shape index: {}]   ;;  %s1806_s1 = inlined_call_operand.vmem [shape: bf16[256,32], index: 1, kind: input, shape index: {}]   ;;  %s1807_s2 = inlined_call_operand.vmem [shape: f32[1,32], index: 2, kind: input, shape index: {}]   ;;  %s1808_s3 = inlined_call_operand.vmem [shape: bf16[2,400,32], index: 3, kind: output, shape index: {}]  }
   0x1 LB: > { %s1077_s13 = sadd.s32 4294967295, %s1449_s12   ;;  %p1081_p0 = scmp.ge.s32.totalorder %s1449_s12, 1  ;;  %s1449_s12 = sphi %s1471_s12, %s13_s12  }
   0x2   : > { %p137_p1 = scmp.lt.s32.totalorder %s1449_s12, 3 }
   0x4   : > { %p138_p2 = pnand %p1081_p0, %p137_p1 }
   0x5   : > { %p161_p3 = scmp.lt.s32.totalorder (!%p138_p2), %s1077_s13, 1 }
   0x6   : > { %141 = sbr.rel (%p138_p2) target bundleno = 384 (0x180), region = 32 }
   0xb   : > { %v1407_v0 = vld [vmem:[%s1806_s1 + $0x38] sm:$0xff]  ;;  %v1406_v2 = vld [vmem:[%s1806_s1 + $0x30] sm:$0xff]  ;;  %v1405_v4 = vld [vmem:[%s1806_s1 + $0x28] sm:$0xff]  ;;  %s1810_s13 = smov (!%p161_p3, %s1077_s13), 1  ;;  %vm971_vm0 = vcmask 257024  }
   0xc   : > { %v1415_v1 = vld [vmem:[%s1806_s1 + $0x78] sm:$0xff]  ;;  %603 = vmatpush.bf16.msra.mxu0 %v1407_v0  ;;  %1416 = vmatpush.bf16.msra.mxu2 %v1407_v0  ;;  %v1414_v3 = vld [vmem:[%s1806_s1 + $0x70] sm:$0xff]  ;;  %v1413_v5 = vld [vmem:[%s1806_s1 + $0x68] sm:$0xff]  ;;  %s1432_s9 = smul.u32 400, %s1810_s13 }
   0xd   : > { %737 = vmatpush.bf16.msra.mxu1 %v1415_v1  ;;  %1424 = vmatpush.bf16.msra.mxu3 %v1415_v1  ;;  %v1404_v6 = vld [vmem:[%s1806_s1 + $0x20] sm:$0xff]  ;;  %v1403_v8 = vld [vmem:[%s1806_s1 + $0x18] sm:$0xff]  ;;  %v1402_v10 = vld [vmem:[%s1806_s1 + $0x10] sm:$0xff]  ;;  %s1433_s27 = smul.u32 200, %s1810_s13 }
   0xe   : > { %v1412_v7 = vld [vmem:[%s1806_s1 + $0x60] sm:$0xff]  ;;  %v1411_v9 = vld [vmem:[%s1806_s1 + $0x58] sm:$0xff]  ;;  %v1410_v11 = vld [vmem:[%s1806_s1 + $0x50] sm:$0xff]  ;;  %s1524_s18 = scalar_lea.vmem %s1805_s0, %s1432_s9 }
   0xf   : > { %v1401_v12 = vld [vmem:[%s1806_s1 + $0x8] sm:$0xff]  ;;  %v1400_v14 = vld [vmem:[%s1806_s1] sm:$0xff]  ;;  %v1376_v22 = vld [vmem:[%s1524_s18 + $0xd4] sm:$0xf]  ;;  %s1617_s30 = scalar_lea.vmem %s1808_s3, %s1433_s27 }
  0x10   : > { %604 = vmatpush.bf16.msra.mxu0 %v1406_v2  ;;  %1417 = vmatpush.bf16.msra.mxu2 %v1406_v2  ;;  %v1409_v13 = vld [vmem:[%s1806_s1 + $0x48] sm:$0xff]  ;;  %v1408_v15 = vld [vmem:[%s1806_s1 + $0x40] sm:$0xff]  ;;  %v1192_v23 = vld [vmem:[%s1524_s18 + $0xd8] sm:$0xf0] }
  0x11   : > { %738 = vmatpush.bf16.msra.mxu1 %v1414_v3  ;;  %1425 = vmatpush.bf16.msra.mxu3 %v1414_v3  ;;  %v1086_v16 = vld [vmem:[%s1524_s18] sm:$0xf]  ;;  %v1351_v17 = vld [vmem:[%s1524_s18 + $0x4] sm:$0xf0]  ;;  %v1350_v20 = vld [vmem:[%s1524_s18 + $0x4] sm:$0xf]  ;;  %v1195_v27 = vor.u32 %v1376_v22, %v1192_v23 }
  0x12   : > { %v1182_v18 = vld [vmem:[%s1524_s18 + $0xc0] sm:$0xf]  ;;  %v1375_v19 = vld [vmem:[%s1524_s18 + $0xc4] sm:$0xf0]  ;;  %v1088_v21 = vld [vmem:[%s1524_s18 + $0x8] sm:$0xf0]  ;;  %v1087_v24 = vor.u32 %v1351_v17, %v1086_v16 }
  0x13   : > { %v1183_v25 = vor.u32 %v1375_v19, %v1182_v18  ;;  %v1091_v26 = vor.u32 %v1350_v20, %v1088_v21  ;;  %v1094_v28 = vld [vmem:[%s1524_s18 + $0x10] sm:$0xf]  ;;  %v1353_v29 = vld [vmem:[%s1524_s18 + $0x14] sm:$0xf0]  ;;  %v1352_v32 = vld [vmem:[%s1524_s18 + $0x14] sm:$0xf] }
  0x14   : > { %605 = vmatpush.bf16.msra.mxu0 %v1405_v4  ;;  %1418 = vmatpush.bf16.msra.mxu2 %v1405_v4  ;;  %v1190_v30 = vld [vmem:[%s1524_s18 + $0xd0] sm:$0xf]  ;;  %v1377_v31 = vld [vmem:[%s1524_s18 + $0xd4] sm:$0xf0]  ;;  %v1096_v33 = vld [vmem:[%s1524_s18 + $0x18] sm:$0xf0]  ;;  %v1095_v36 = vor.u32 %v1353_v29, %v1094_v28 }
  0x15   : > { %739 = vmatpush.bf16.msra.mxu1 %v1413_v5  ;;  %1426 = vmatpush.bf16.msra.mxu3 %v1413_v5  ;;  %v1378_v34 = vld [vmem:[%s1524_s18 + $0xe4] sm:$0xf]  ;;  %v1200_v35 = vld [vmem:[%s1524_s18 + $0xe8] sm:$0xf0]  ;;  %v1191_v37 = vor.u32 %v1377_v31, %v1190_v30  ;;  %v1099_v38 = vor.u32 %v1352_v32, %v1096_v33  ;;  %v1102_v40 = vld [vmem:[%s1524_s18 + $0x20] sm:$0xf] }
  0x16   : > { %v1203_v39 = vor.u32 %v1378_v34, %v1200_v35  ;;  %v1355_v41 = vld [vmem:[%s1524_s18 + $0x24] sm:$0xf0]  ;;  %v1198_v42 = vld [vmem:[%s1524_s18 + $0xe0] sm:$0xf]  ;;  %v1354_v44 = vld [vmem:[%s1524_s18 + $0x24] sm:$0xf] }
  0x17   : > { %v1379_v43 = vld [vmem:[%s1524_s18 + $0xe4] sm:$0xf0]  ;;  %v1104_v45 = vld [vmem:[%s1524_s18 + $0x28] sm:$0xf0]  ;;  %v1380_v46 = vld [vmem:[%s1524_s18 + $0xf4] sm:$0xf]  ;;  %v1103_v48 = vor.u32 %v1355_v41, %v1102_v40 }
  0x18   : > { %606 = vmatpush.bf16.msra.mxu0 %v1404_v6  ;;  %1419 = vmatpush.bf16.msra.mxu2 %v1404_v6  ;;  %v1208_v47 = vld [vmem:[%s1524_s18 + $0xf8] sm:$0xf0]  ;;  %v1199_v49 = vor.u32 %v1379_v43, %v1198_v42  ;;  %v1107_v50 = vor.u32 %v1354_v44, %v1104_v45  ;;  %v1110_v52 = vld [vmem:[%s1524_s18 + $0x30] sm:$0xf]  ;;  %v1357_v53 = vld [vmem:[%s1524_s18 + $0x34] sm:$0xf0] }
  0x19   : > { %740 = vmatpush.bf16.msra.mxu1 %v1412_v7  ;;  %1427 = vmatpush.bf16.msra.mxu3 %v1412_v7  ;;  %v1211_v51 = vor.u32 %v1380_v46, %v1208_v47  ;;  %v1206_v54 = vld [vmem:[%s1524_s18 + $0xf0] sm:$0xf]  ;;  %v1381_v55 = vld [vmem:[%s1524_s18 + $0xf4] sm:$0xf0]  ;;  %v1356_v56 = vld [vmem:[%s1524_s18 + $0x34] sm:$0xf]  ;;  %v1111_v60 = vor.u32 %v1357_v53, %v1110_v52 }
  0x1a   : > { %v1112_v57 = vld [vmem:[%s1524_s18 + $0x38] sm:$0xf0]  ;;  %v1382_v58 = vld [vmem:[%s1524_s18 + $0x104] sm:$0xf]  ;;  %v1216_v59 = vld [vmem:[%s1524_s18 + $0x108] sm:$0xf0]  ;;  %v1207_v61 = vor.u32 %v1381_v55, %v1206_v54 }
  0x1b   : > { %v1115_v62 = vor.u32 %v1356_v56, %v1112_v57  ;;  %v1219_v63 = vor.u32 %v1382_v58, %v1216_v59  ;;  %v1118_v0 = vld [vmem:[%s1524_s18 + $0x40] sm:$0xf]  ;;  %v1359_v1 = vld [vmem:[%s1524_s18 + $0x44] sm:$0xf0]  ;;  %v1358_v4 = vld [vmem:[%s1524_s18 + $0x44] sm:$0xf] }
  0x1c   : > { %607 = vmatpush.bf16.msra.mxu0 %v1403_v8  ;;  %1420 = vmatpush.bf16.msra.mxu2 %v1403_v8  ;;  %v1214_v2 = vld [vmem:[%s1524_s18 + $0x100] sm:$0xf]  ;;  %v1383_v3 = vld [vmem:[%s1524_s18 + $0x104] sm:$0xf0]  ;;  %v1120_v5 = vld [vmem:[%s1524_s18 + $0x48] sm:$0xf0]  ;;  %v1119_v8 = vor.u32 %v1359_v1, %v1118_v0 }
  0x1d   : > { %741 = vmatpush.bf16.msra.mxu1 %v1411_v9  ;;  %1428 = vmatpush.bf16.msra.mxu3 %v1411_v9  ;;  %v1384_v6 = vld [vmem:[%s1524_s18 + $0x114] sm:$0xf]  ;;  %v1224_v7 = vld [vmem:[%s1524_s18 + $0x118] sm:$0xf0]  ;;  %v1215_v9 = vor.u32 %v1383_v3, %v1214_v2  ;;  %v1386_v18 = vld [vmem:[%s1524_s18 + $0x124] sm:$0xf] }
  0x1e   : > { %v1360_v16 = vld [vmem:[%s1524_s18 + $0x54] sm:$0xf]  ;;  %v1128_v17 = vld [vmem:[%s1524_s18 + $0x58] sm:$0xf0]  ;;  %v1232_v19 = vld [vmem:[%s1524_s18 + $0x128] sm:$0xf0] }
  0x1f   : > { %v1131_v22 = vor.u32 %v1360_v16, %v1128_v17  ;;  %v1235_v23 = vor.u32 %v1386_v18, %v1232_v19  ;;  %v1362_v28 = vld [vmem:[%s1524_s18 + $0x64] sm:$0xf]  ;;  %v1136_v29 = vld [vmem:[%s1524_s18 + $0x68] sm:$0xf0]  ;;  %v1388_v30 = vld [vmem:[%s1524_s18 + $0x134] sm:$0xf] }
  0x20   : > { %608 = vmatpush.bf16.msra.mxu0 %v1402_v10  ;;  %1421 = vmatpush.bf16.msra.mxu2 %v1402_v10  ;;  %v1123_v10 = vor.u32 %v1358_v4, %v1120_v5  ;;  %v1240_v31 = vld [vmem:[%s1524_s18 + $0x138] sm:$0xf0]  ;;  %v1139_v34 = vor.u32 %v1362_v28, %v1136_v29  ;;  %v1364_v40 = vld [vmem:[%s1524_s18 + $0x74] sm:$0xf]  ;;  %v1390_v42 = vld [vmem:[%s1524_s18 + $0x144] sm:$0xf] }
  0x21   : > { %742 = vmatpush.bf16.msra.mxu1 %v1410_v11  ;;  %1429 = vmatpush.bf16.msra.mxu3 %v1410_v11  ;;  %v1227_v11 = vor.u32 %v1384_v6, %v1224_v7  ;;  %v1243_v35 = vor.u32 %v1388_v30, %v1240_v31  ;;  %v1144_v41 = vld [vmem:[%s1524_s18 + $0x78] sm:$0xf0]  ;;  %v1248_v43 = vld [vmem:[%s1524_s18 + $0x148] sm:$0xf0]  ;;  %v1391_v52 = vld [vmem:[%s1524_s18 + $0x144] sm:$0xf0] }
  0x22   : > { %v1147_v46 = vor.u32 %v1364_v40, %v1144_v41  ;;  %v1251_v47 = vor.u32 %v1390_v42, %v1248_v43  ;;  %v1366_v53 = vld [vmem:[%s1524_s18 + $0x84] sm:$0xf]  ;;  %v1152_v54 = vld [vmem:[%s1524_s18 + $0x88] sm:$0xf0]  ;;  %v1392_v55 = vld [vmem:[%s1524_s18 + $0x154] sm:$0xf] }
  0x23   : > { %v1256_v56 = vld [vmem:[%s1524_s18 + $0x158] sm:$0xf0]  ;;  %v1394_v16 = vld [vmem:[%s1524_s18 + $0x164] sm:$0xf]  ;;  %v1264_v17 = vld [vmem:[%s1524_s18 + $0x168] sm:$0xf0] }
  0x24   : > { %609 = vmatpush.bf16.msra.mxu0 %v1401_v12  ;;  %1422 = vmatpush.bf16.msra.mxu2 %v1401_v12  ;;  %v1126_v12 = vld [vmem:[%s1524_s18 + $0x50] sm:$0xf]  ;;  %v1371_v41 = vld [vmem:[%s1524_s18 + $0xa4] sm:$0xf0]  ;;  %v1262_v42 = vld [vmem:[%s1524_s18 + $0x160] sm:$0xf] }
  0x25   : > { %743 = vmatpush.bf16.msra.mxu1 %v1409_v13  ;;  %1430 = vmatpush.bf16.msra.mxu3 %v1409_v13  ;;  %v1361_v13 = vld [vmem:[%s1524_s18 + $0x54] sm:$0xf0]  ;;  %v1395_v43 = vld [vmem:[%s1524_s18 + $0x164] sm:$0xf0] }
  0x26   : > { %v1127_v20 = vor.u32 %v1361_v13, %v1126_v12  ;;  %v1393_v12 = vld [vmem:[%s1524_s18 + $0x154] sm:$0xf0]  ;;  %v1368_v13 = vld [vmem:[%s1524_s18 + $0x94] sm:$0xf] }
  0x28   : > { %610 = vmatpush.bf16.msra.mxu0 %v1400_v14  ;;  %1423 = vmatpush.bf16.msra.mxu2 %v1400_v14  ;;  %v1222_v14 = vld [vmem:[%s1524_s18 + $0x110] sm:$0xf] }
  0x29   : > { %744 = vmatpush.bf16.msra.mxu1 %v1408_v15  ;;  %1431 = vmatpush.bf16.msra.mxu3 %v1408_v15  ;;  %v1385_v15 = vld [vmem:[%s1524_s18 + $0x114] sm:$0xf0] }
  0x2a   : > { %v1223_v21 = vor.u32 %v1385_v15, %v1222_v14  ;;  %v1160_v14 = vld [vmem:[%s1524_s18 + $0x98] sm:$0xf0] }
  0x2b   : > { %611 = vmatmul.bf16.vlgmr.msra.gmra.mxu0 %v1087_v24  ;;  %671 = vmatmul.bf16.vlgmr.msra.gmra.mxu2 %v1183_v25  ;;  %v1134_v24 = vld [vmem:[%s1524_s18 + $0x60] sm:$0xf]  ;;  %v1363_v25 = vld [vmem:[%s1524_s18 + $0x64] sm:$0xf0] }
  0x2c   : > { %745 = vmatmul.bf16.vlgmr.msra.gmra.mxu1 %v1091_v26  ;;  %810 = vmatmul.bf16.vlgmr.msra.gmra.mxu3 %v1195_v27  ;;  %v1230_v26 = vld [vmem:[%s1524_s18 + $0x120] sm:$0xf]  ;;  %v1387_v27 = vld [vmem:[%s1524_s18 + $0x124] sm:$0xf0]  ;;  %v1135_v32 = vor.u32 %v1363_v25, %v1134_v24  ;;  %v1163_v24 = vor.u32 %v1368_v13, %v1160_v14  ;;  %v1267_v25 = vor.u32 %v1394_v16, %v1264_v17  ;;  %v1270_v16 = vld [vmem:[%s1524_s18 + $0x170] sm:$0xf] }
  0x2d   : > { %v1231_v33 = vor.u32 %v1387_v27, %v1230_v26  ;;  %v1397_v17 = vld [vmem:[%s1524_s18 + $0x174] sm:$0xf0] }
  0x3b   : > { %616 = vmatmul.bf16.gmra.mxu0 %v1095_v36  ;;  %676 = vmatmul.bf16.gmra.mxu2 %v1191_v37  ;;  %v1142_v36 = vld [vmem:[%s1524_s18 + $0x70] sm:$0xf]  ;;  %v1365_v37 = vld [vmem:[%s1524_s18 + $0x74] sm:$0xf0] }
  0x3c   : > { %750 = vmatmul.bf16.gmra.mxu1 %v1099_v38  ;;  %815 = vmatmul.bf16.gmra.mxu3 %v1203_v39  ;;  %v1238_v38 = vld [vmem:[%s1524_s18 + $0x130] sm:$0xf]  ;;  %v1389_v39 = vld [vmem:[%s1524_s18 + $0x134] sm:$0xf0]  ;;  %v1143_v44 = vor.u32 %v1365_v37, %v1142_v36 }
  0x3d   : > { %v1239_v45 = vor.u32 %v1389_v39, %v1238_v38  ;;  %v1166_v38 = vld [vmem:[%s1524_s18 + $0xa0] sm:$0xf] }
  0x4b   : > { %621 = vmatmul.bf16.gmra.mxu0 %v1103_v48  ;;  %681 = vmatmul.bf16.gmra.mxu2 %v1199_v49  ;;  %v1602_v48 = vld [vmem:[%s1807_s2] ss:$0 sm:$0xff] }
  0x4c   : > { %755 = vmatmul.bf16.gmra.mxu1 %v1107_v50  ;;  %820 = vmatmul.bf16.gmra.mxu3 %v1211_v51  ;;  %v1150_v49 = vld [vmem:[%s1524_s18 + $0x80] sm:$0xf]  ;;  %v1367_v50 = vld [vmem:[%s1524_s18 + $0x84] sm:$0xf0] }
  0x4d   : > { %v1246_v51 = vld [vmem:[%s1524_s18 + $0x140] sm:$0xf]  ;;  %v1151_v57 = vor.u32 %v1367_v50, %v1150_v49  ;;  %v1396_v49 = vld [vmem:[%s1524_s18 + $0x174] sm:$0xf]  ;;  %v1272_v50 = vld [vmem:[%s1524_s18 + $0x178] sm:$0xf0] }
  0x4e   : > { %v1247_v58 = vor.u32 %v1391_v52, %v1246_v51 }
  0x5b   : > { %626 = vmatmul.bf16.gmra.mxu0 %v1111_v60  ;;  %686 = vmatmul.bf16.gmra.mxu2 %v1207_v61  ;;  %v1155_v60 = vor.u32 %v1366_v53, %v1152_v54  ;;  %v1259_v61 = vor.u32 %v1392_v55, %v1256_v56  ;;  %v1167_v54 = vor.u32 %v1371_v41, %v1166_v38 }
  0x5c   : > { %760 = vmatmul.bf16.gmra.mxu1 %v1115_v62  ;;  %825 = vmatmul.bf16.gmra.mxu3 %v1219_v63  ;;  %v1263_v55 = vor.u32 %v1395_v43, %v1262_v42 }
  0x6b   : > { %631 = vmatmul.bf16.gmra.mxu0 %v1119_v8  ;;  %691 = vmatmul.bf16.gmra.mxu2 %v1215_v9  ;;  %v1158_v9 = vld [vmem:[%s1524_s18 + $0x90] sm:$0xf] }
  0x6c   : > { %765 = vmatmul.bf16.gmra.mxu1 %v1123_v10  ;;  %830 = vmatmul.bf16.gmra.mxu3 %v1227_v11  ;;  %v1369_v10 = vld [vmem:[%s1524_s18 + $0x94] sm:$0xf0]  ;;  %v1254_v11 = vld [vmem:[%s1524_s18 + $0x150] sm:$0xf] }
  0x7b   : > { %636 = vmatmul.bf16.gmra.mxu0 %v1127_v20  ;;  %696 = vmatmul.bf16.gmra.mxu2 %v1223_v21  ;;  %v1159_v20 = vor.u32 %v1369_v10, %v1158_v9  ;;  %v1255_v21 = vor.u32 %v1393_v12, %v1254_v11  ;;  %v1174_v12 = vld [vmem:[%s1524_s18 + $0xb0] sm:$0xf] }
  0x7c   : > { %770 = vmatmul.bf16.gmra.mxu1 %v1131_v22  ;;  %835 = vmatmul.bf16.gmra.mxu3 %v1235_v23 }
  0x8b   : > { %641 = vmatmul.bf16.gmra.mxu0 %v1135_v32  ;;  %701 = vmatmul.bf16.gmra.mxu2 %v1231_v33 }
  0x8c   : > { %775 = vmatmul.bf16.gmra.mxu1 %v1139_v34  ;;  %840 = vmatmul.bf16.gmra.mxu3 %v1243_v35 }
  0x9b   : > { %646 = vmatmul.bf16.gmra.mxu0 %v1143_v44  ;;  %706 = vmatmul.bf16.gmra.mxu2 %v1239_v45  ;;  %v1370_v44 = vld [vmem:[%s1524_s18 + $0xa4] sm:$0xf]  ;;  %v1168_v45 = vld [vmem:[%s1524_s18 + $0xa8] sm:$0xf0] }
  0x9c   : > { %780 = vmatmul.bf16.gmra.mxu1 %v1147_v46  ;;  %845 = vmatmul.bf16.gmra.mxu3 %v1251_v47 }
  0xa8   : > { %v612_v59 = vpop.f32.mrf.mxu0 }
  0xa9   : > { %v613_v62 = vadd.f32 %v1602_v48, %v612_v59  ;;  %v746_v63 = vpop.f32.mrf.mxu1  ;;  %v1275_v59 = vor.u32 %v1396_v49, %v1272_v50 }
  0xab   : > { %v747_v0 = vadd.f32 %v746_v63, %v613_v62  ;;  %651 = vmatmul.bf16.gmra.mxu0 %v1151_v57  ;;  %711 = vmatmul.bf16.gmra.mxu2 %v1247_v58  ;;  %v1171_v58 = vor.u32 %v1370_v44, %v1168_v45 }
  0xac   : > { %785 = vmatmul.bf16.gmra.mxu1 %v1155_v60  ;;  %850 = vmatmul.bf16.gmra.mxu3 %v1259_v61 }
  0xad   : > { %v871_v1 = vmax.f32 %v747_v0, 0.0 }
  0xae   : > { %v1619_v2 = vpop.f32.mrf.mxu2 }
  0xaf   : > { %v921_v3 = vpack.c.bf16 %v871_v1, %v871_v1  ;;  %v811_v4 = vpop.f32.mrf.mxu3 }
  0xb0   : > { %v614_v5 = vpop.f32.mrf.mxu0 }
  0xb1   : > { %972 = vst.msk [vmem:[%s1617_s30] sm:$0xf] %vm971_vm0, %v921_v3  ;;  %v615_v6 = vadd.f32 %v1602_v48, %v614_v5  ;;  %v748_v7 = vpop.f32.mrf.mxu1 }
  0xb3   : > { %v749_v8 = vadd.f32 %v748_v7, %v615_v6 }
  0xb5   : > { %v872_v15 = vmax.f32 %v749_v8, 0.0 }
  0xb6   : > { %v1632_v18 = vpop.f32.mrf.mxu2 }
  0xb7   : > { %v922_v19 = vpack.c.bf16 %v872_v15, %v872_v15  ;;  %v813_v22 = vpop.f32.mrf.mxu3  ;;  %v1373_v15 = vld [vmem:[%s1524_s18 + $0xb4] sm:$0xf0] }
  0xb8   : > { %v617_v23 = vpop.f32.mrf.mxu0 }
  0xb9   : > { %973 = vst.msk [vmem:[%s1617_s30 + $0x4] sm:$0xf] %vm971_vm0, %v922_v19  ;;  %v618_v26 = vadd.f32 %v1602_v48, %v617_v23  ;;  %v751_v27 = vpop.f32.mrf.mxu1  ;;  %v1372_v19 = vld [vmem:[%s1524_s18 + $0xb4] sm:$0xf]  ;;  %v1398_v23 = vld [vmem:[%s1524_s18 + $0x184] sm:$0xf] }
  0xbb   : > { %v752_v28 = vadd.f32 %v751_v27, %v618_v26  ;;  %656 = vmatmul.bf16.gmra.mxu0 %v1159_v20  ;;  %716 = vmatmul.bf16.gmra.mxu2 %v1255_v21  ;;  %v1176_v20 = vld [vmem:[%s1524_s18 + $0xb8] sm:$0xf0] }
  0xbc   : > { %790 = vmatmul.bf16.gmra.mxu1 %v1163_v24  ;;  %855 = vmatmul.bf16.gmra.mxu3 %v1267_v25  ;;  %v1280_v24 = vld [vmem:[%s1524_s18 + $0x188] sm:$0xf0] }
  0xbd   : > { %v873_v29 = vmax.f32 %v752_v28, 0.0  ;;  %v1175_v28 = vor.u32 %v1373_v15, %v1174_v12 }
  0xbe   : > { %v677_v30 = vpop.f32.mrf.mxu2 }
  0xbf   : > { %v923_v31 = vpack.c.bf16 %v873_v29, %v873_v29  ;;  %v678_v32 = vadd.f32 %v1602_v48, %v677_v30  ;;  %v816_v33 = vpop.f32.mrf.mxu3  ;;  %v1271_v29 = vor.u32 %v1397_v17, %v1270_v16 }
  0xc0   : > { %v619_v34 = vpop.f32.mrf.mxu0 }
  0xc1   : > { %974 = vst.msk [vmem:[%s1617_s30 + $0x8] sm:$0xf] %vm971_vm0, %v923_v31  ;;  %v812_v35 = vadd.f32 %v811_v4, %v678_v32  ;;  %v620_v36 = vadd.f32 %v1602_v48, %v619_v34  ;;  %v753_v37 = vpop.f32.mrf.mxu1  ;;  %v1179_v32 = vor.u32 %v1372_v19, %v1176_v20 }
  0xc3   : > { %v897_v39 = vmax.f32 %v812_v35, 0.0  ;;  %v754_v40 = vadd.f32 %v753_v37, %v620_v36 }
  0xc5   : > { %v947_v46 = vpack.c.bf16 %v897_v39, %v897_v39  ;;  %v874_v47 = vmax.f32 %v754_v40, 0.0 }
  0xc6   : > { %v679_v51 = vpop.f32.mrf.mxu2 }
  0xc7   : > { %998 = vst.msk [vmem:[%s1617_s30 + $0x68] sm:$0xf] %vm971_vm0, %v947_v46  ;;  %v924_v52 = vpack.c.bf16 %v874_v47, %v874_v47  ;;  %v680_v53 = vadd.f32 %v1602_v48, %v679_v51  ;;  %v818_v56 = vpop.f32.mrf.mxu3 }
  0xc8   : > { %v622_v57 = vpop.f32.mrf.mxu0 }
  0xc9   : > { %975 = vst.msk [vmem:[%s1617_s30 + $0xc] sm:$0xf] %vm971_vm0, %v924_v52  ;;  %v814_v60 = vadd.f32 %v813_v22, %v680_v53  ;;  %v623_v61 = vadd.f32 %v1602_v48, %v622_v57  ;;  %v756_v62 = vpop.f32.mrf.mxu1  ;;  %v1278_v52 = vld [vmem:[%s1524_s18 + $0x180] sm:$0xf]  ;;  %v1399_v53 = vld [vmem:[%s1524_s18 + $0x184] sm:$0xf0] }
  0xca   : > { %v1184_v57 = vld [vmem:[%s1524_s18 + $0xc8] sm:$0xf0] }
  0xcb   : > { %v898_v63 = vmax.f32 %v814_v60, 0.0  ;;  %v757_v0 = vadd.f32 %v756_v62, %v623_v61  ;;  %661 = vmatmul.bf16.gmra.mxu0 %v1167_v54  ;;  %721 = vmatmul.bf16.gmra.mxu2 %v1263_v55  ;;  %v1279_v61 = vor.u32 %v1399_v53, %v1278_v52 }
  0xcc   : > { %795 = vmatmul.bf16.gmra.mxu1 %v1171_v58  ;;  %860 = vmatmul.bf16.gmra.mxu3 %v1275_v59 }
  0xcd   : > { %v948_v1 = vpack.c.bf16 %v898_v63, %v898_v63  ;;  %v875_v3 = vmax.f32 %v757_v0, 0.0 }
  0xce   : > { %v682_v4 = vpop.f32.mrf.mxu2 }
  0xcf   : > { %999 = vst.msk [vmem:[%s1617_s30 + $0x6c] sm:$0xf] %vm971_vm0, %v948_v1  ;;  %v925_v5 = vpack.c.bf16 %v875_v3, %v875_v3  ;;  %v683_v6 = vadd.f32 %v1602_v48, %v682_v4  ;;  %v821_v7 = vpop.f32.mrf.mxu3 }
  0xd0   : > { %v624_v8 = vpop.f32.mrf.mxu0 }
  0xd1   : > { %976 = vst.msk [vmem:[%s1617_s30 + $0x10] sm:$0xf] %vm971_vm0, %v925_v5  ;;  %v817_v9 = vadd.f32 %v816_v33, %v683_v6  ;;  %v625_v10 = vadd.f32 %v1602_v48, %v624_v8  ;;  %v758_v11 = vpop.f32.mrf.mxu1  ;;  %v1283_v33 = vor.u32 %v1398_v23, %v1280_v24 }
  0xd3   : > { %v899_v13 = vmax.f32 %v817_v9, 0.0  ;;  %v759_v14 = vadd.f32 %v758_v11, %v625_v10 }
  0xd5   : > { %v949_v21 = vpack.c.bf16 %v899_v13, %v899_v13  ;;  %v876_v22 = vmax.f32 %v759_v14, 0.0 }
  0xd6   : > { %v684_v25 = vpop.f32.mrf.mxu2 }
  0xd7   : > { %1000 = vst.msk [vmem:[%s1617_s30 + $0x70] sm:$0xf] %vm971_vm0, %v949_v21  ;;  %v926_v26 = vpack.c.bf16 %v876_v22, %v876_v22  ;;  %v685_v27 = vadd.f32 %v1602_v48, %v684_v25  ;;  %v823_v30 = vpop.f32.mrf.mxu3 }
  0xd8   : > { %v627_v31 = vpop.f32.mrf.mxu0 }
  0xd9   : > { %977 = vst.msk [vmem:[%s1617_s30 + $0x14] sm:$0xf] %vm971_vm0, %v926_v26  ;;  %v819_v34 = vadd.f32 %v818_v56, %v685_v27  ;;  %v628_v35 = vadd.f32 %v1602_v48, %v627_v31  ;;  %v761_v36 = vpop.f32.mrf.mxu1  ;;  %v1374_v56 = vld [vmem:[%s1524_s18 + $0xc4] sm:$0xf] }
  0xda   : > { %v1187_v0 = vor.u32 %v1374_v56, %v1184_v57 }
  0xdb   : > { %v900_v37 = vmax.f32 %v819_v34, 0.0  ;;  %v762_v38 = vadd.f32 %v761_v36, %v628_v35  ;;  %666 = vmatmul.bf16.gmra.mxu0 %v1175_v28  ;;  %726 = vmatmul.bf16.gmra.mxu2 %v1271_v29 }
  0xdc   : > { %800 = vmatmul.bf16.gmra.mxu1 %v1179_v32  ;;  %865 = vmatmul.bf16.gmra.mxu3 %v1283_v33 }
  0xdd   : > { %v950_v39 = vpack.c.bf16 %v900_v37, %v900_v37  ;;  %v877_v40 = vmax.f32 %v762_v38, 0.0 }
  0xde   : > { %v687_v41 = vpop.f32.mrf.mxu2 }
  0xdf   : > { %1001 = vst.msk [vmem:[%s1617_s30 + $0x74] sm:$0xf] %vm971_vm0, %v950_v39  ;;  %v927_v42 = vpack.c.bf16 %v877_v40, %v877_v40  ;;  %v688_v43 = vadd.f32 %v1602_v48, %v687_v41  ;;  %v826_v44 = vpop.f32.mrf.mxu3 }
  0xe0   : > { %v629_v45 = vpop.f32.mrf.mxu0 }
  0xe1   : > { %978 = vst.msk [vmem:[%s1617_s30 + $0x18] sm:$0xf] %vm971_vm0, %v927_v42  ;;  %v822_v46 = vadd.f32 %v821_v7, %v688_v43  ;;  %v630_v47 = vadd.f32 %v1602_v48, %v629_v45  ;;  %v763_v49 = vpop.f32.mrf.mxu1 }
  0xe3   : > { %v901_v50 = vmax.f32 %v822_v46, 0.0  ;;  %v764_v51 = vadd.f32 %v763_v49, %v630_v47 }
  0xe5   : > { %v951_v54 = vpack.c.bf16 %v901_v50, %v901_v50  ;;  %v878_v55 = vmax.f32 %v764_v51, 0.0 }
  0xe6   : > { %v689_v58 = vpop.f32.mrf.mxu2 }
  0xe7   : > { %1002 = vst.msk [vmem:[%s1617_s30 + $0x78] sm:$0xf] %vm971_vm0, %v951_v54  ;;  %v928_v59 = vpack.c.bf16 %v878_v55, %v878_v55  ;;  %v690_v60 = vadd.f32 %v1602_v48, %v689_v58  ;;  %v828_v62 = vpop.f32.mrf.mxu3 }
  0xe8   : > { %v632_v63 = vpop.f32.mrf.mxu0 }
  0xe9   : > { %979 = vst.msk [vmem:[%s1617_s30 + $0x1c] sm:$0xf] %vm971_vm0, %v928_v59  ;;  %v824_v1 = vadd.f32 %v823_v30, %v690_v60  ;;  %v633_v3 = vadd.f32 %v1602_v48, %v632_v63  ;;  %v766_v4 = vpop.f32.mrf.mxu1 }
  0xeb   : > { %v902_v5 = vmax.f32 %v824_v1, 0.0  ;;  %v767_v6 = vadd.f32 %v766_v4, %v633_v3  ;;  %731 = vmatmul.bf16.gmra.mxu2 %v1279_v61 }
  0xec   : > { %805 = vmatmul.bf16.gmra.mxu1 %v1187_v0 }
  0xed   : > { %v952_v7 = vpack.c.bf16 %v902_v5, %v902_v5  ;;  %v879_v8 = vmax.f32 %v767_v6, 0.0 }
  0xee   : > { %v692_v9 = vpop.f32.mrf.mxu2 }
  0xef   : > { %1003 = vst.msk [vmem:[%s1617_s30 + $0x7c] sm:$0xf] %vm971_vm0, %v952_v7  ;;  %v929_v10 = vpack.c.bf16 %v879_v8, %v879_v8  ;;  %v693_v11 = vadd.f32 %v1602_v48, %v692_v9  ;;  %v831_v12 = vpop.f32.mrf.mxu3 }
  0xf0   : > { %v634_v13 = vpop.f32.mrf.mxu0 }
  0xf1   : > { %980 = vst.msk [vmem:[%s1617_s30 + $0x20] sm:$0xf] %vm971_vm0, %v929_v10  ;;  %v827_v14 = vadd.f32 %v826_v44, %v693_v11  ;;  %v635_v15 = vadd.f32 %v1602_v48, %v634_v13  ;;  %v768_v16 = vpop.f32.mrf.mxu1 }
  0xf3   : > { %v903_v17 = vmax.f32 %v827_v14, 0.0  ;;  %v769_v19 = vadd.f32 %v768_v16, %v635_v15 }
  0xf5   : > { %v953_v20 = vpack.c.bf16 %v903_v17, %v903_v17  ;;  %v880_v21 = vmax.f32 %v769_v19, 0.0 }
  0xf6   : > { %v694_v22 = vpop.f32.mrf.mxu2 }
  0xf7   : > { %1004 = vst.msk [vmem:[%s1617_s30 + $0x80] sm:$0xf] %vm971_vm0, %v953_v20  ;;  %v930_v23 = vpack.c.bf16 %v880_v21, %v880_v21  ;;  %v695_v24 = vadd.f32 %v1602_v48, %v694_v22  ;;  %v833_v25 = vpop.f32.mrf.mxu3 }
  0xf8   : > { %v637_v26 = vpop.f32.mrf.mxu0 }
  0xf9   : > { %981 = vst.msk [vmem:[%s1617_s30 + $0x24] sm:$0xf] %vm971_vm0, %v930_v23  ;;  %v829_v27 = vadd.f32 %v828_v62, %v695_v24  ;;  %v638_v28 = vadd.f32 %v1602_v48, %v637_v26  ;;  %v771_v29 = vpop.f32.mrf.mxu1 }
  0xfb   : > { %v904_v30 = vmax.f32 %v829_v27, 0.0  ;;  %v772_v31 = vadd.f32 %v771_v29, %v638_v28 }
  0xfd   : > { %v954_v32 = vpack.c.bf16 %v904_v30, %v904_v30  ;;  %v881_v33 = vmax.f32 %v772_v31, 0.0 }
  0xfe   : > { %v697_v34 = vpop.f32.mrf.mxu2 }
  0xff   : > { %1005 = vst.msk [vmem:[%s1617_s30 + $0x84] sm:$0xf] %vm971_vm0, %v954_v32  ;;  %v931_v35 = vpack.c.bf16 %v881_v33, %v881_v33  ;;  %v698_v36 = vadd.f32 %v1602_v48, %v697_v34  ;;  %v836_v37 = vpop.f32.mrf.mxu3 }
 0x100   : > { %v639_v38 = vpop.f32.mrf.mxu0 }
 0x101   : > { %982 = vst.msk [vmem:[%s1617_s30 + $0x28] sm:$0xf] %vm971_vm0, %v931_v35  ;;  %v832_v39 = vadd.f32 %v831_v12, %v698_v36  ;;  %v640_v40 = vadd.f32 %v1602_v48, %v639_v38  ;;  %v773_v41 = vpop.f32.mrf.mxu1 }
 0x103   : > { %v905_v42 = vmax.f32 %v832_v39, 0.0  ;;  %v774_v43 = vadd.f32 %v773_v41, %v640_v40 }
 0x105   : > { %v955_v44 = vpack.c.bf16 %v905_v42, %v905_v42  ;;  %v882_v45 = vmax.f32 %v774_v43, 0.0 }
 0x106   : > { %v699_v46 = vpop.f32.mrf.mxu2 }
 0x107   : > { %1006 = vst.msk [vmem:[%s1617_s30 + $0x88] sm:$0xf] %vm971_vm0, %v955_v44  ;;  %v932_v47 = vpack.c.bf16 %v882_v45, %v882_v45  ;;  %v700_v49 = vadd.f32 %v1602_v48, %v699_v46  ;;  %v838_v50 = vpop.f32.mrf.mxu3 }
 0x108   : > { %v642_v51 = vpop.f32.mrf.mxu0 }
 0x109   : > { %983 = vst.msk [vmem:[%s1617_s30 + $0x2c] sm:$0xf] %vm971_vm0, %v932_v47  ;;  %v834_v52 = vadd.f32 %v833_v25, %v700_v49  ;;  %v643_v53 = vadd.f32 %v1602_v48, %v642_v51  ;;  %v776_v54 = vpop.f32.mrf.mxu1 }
 0x10b   : > { %v906_v55 = vmax.f32 %v834_v52, 0.0  ;;  %v777_v56 = vadd.f32 %v776_v54, %v643_v53 }
 0x10d   : > { %v956_v57 = vpack.c.bf16 %v906_v55, %v906_v55  ;;  %v883_v58 = vmax.f32 %v777_v56, 0.0 }
 0x10e   : > { %v702_v59 = vpop.f32.mrf.mxu2 }
 0x10f   : > { %1007 = vst.msk [vmem:[%s1617_s30 + $0x8c] sm:$0xf] %vm971_vm0, %v956_v57  ;;  %v933_v60 = vpack.c.bf16 %v883_v58, %v883_v58  ;;  %v703_v61 = vadd.f32 %v1602_v48, %v702_v59  ;;  %v841_v62 = vpop.f32.mrf.mxu3 }
 0x110   : > { %v644_v63 = vpop.f32.mrf.mxu0 }
 0x111   : > { %984 = vst.msk [vmem:[%s1617_s30 + $0x30] sm:$0xf] %vm971_vm0, %v933_v60  ;;  %v837_v0 = vadd.f32 %v836_v37, %v703_v61  ;;  %v645_v1 = vadd.f32 %v1602_v48, %v644_v63  ;;  %v778_v3 = vpop.f32.mrf.mxu1 }
 0x113   : > { %v907_v4 = vmax.f32 %v837_v0, 0.0  ;;  %v779_v5 = vadd.f32 %v778_v3, %v645_v1 }
 0x115   : > { %v957_v6 = vpack.c.bf16 %v907_v4, %v907_v4  ;;  %v884_v7 = vmax.f32 %v779_v5, 0.0 }
 0x116   : > { %v704_v8 = vpop.f32.mrf.mxu2 }
 0x117   : > { %1008 = vst.msk [vmem:[%s1617_s30 + $0x90] sm:$0xf] %vm971_vm0, %v957_v6  ;;  %v934_v9 = vpack.c.bf16 %v884_v7, %v884_v7  ;;  %v705_v10 = vadd.f32 %v1602_v48, %v704_v8  ;;  %v843_v11 = vpop.f32.mrf.mxu3 }
 0x118   : > { %v647_v12 = vpop.f32.mrf.mxu0 }
 0x119   : > { %985 = vst.msk [vmem:[%s1617_s30 + $0x34] sm:$0xf] %vm971_vm0, %v934_v9  ;;  %v839_v13 = vadd.f32 %v838_v50, %v705_v10  ;;  %v648_v14 = vadd.f32 %v1602_v48, %v647_v12  ;;  %v781_v15 = vpop.f32.mrf.mxu1 }
 0x11b   : > { %v908_v16 = vmax.f32 %v839_v13, 0.0  ;;  %v782_v17 = vadd.f32 %v781_v15, %v648_v14 }
 0x11d   : > { %v958_v19 = vpack.c.bf16 %v908_v16, %v908_v16  ;;  %v885_v20 = vmax.f32 %v782_v17, 0.0 }
 0x11e   : > { %v707_v21 = vpop.f32.mrf.mxu2 }
 0x11f   : > { %1009 = vst.msk [vmem:[%s1617_s30 + $0x94] sm:$0xf] %vm971_vm0, %v958_v19  ;;  %v935_v22 = vpack.c.bf16 %v885_v20, %v885_v20  ;;  %v708_v23 = vadd.f32 %v1602_v48, %v707_v21  ;;  %v846_v24 = vpop.f32.mrf.mxu3 }
 0x120   : > { %v649_v25 = vpop.f32.mrf.mxu0 }
 0x121   : > { %986 = vst.msk [vmem:[%s1617_s30 + $0x38] sm:$0xf] %vm971_vm0, %v935_v22  ;;  %v842_v26 = vadd.f32 %v841_v62, %v708_v23  ;;  %v650_v27 = vadd.f32 %v1602_v48, %v649_v25  ;;  %v783_v28 = vpop.f32.mrf.mxu1 }
 0x123   : > { %v909_v29 = vmax.f32 %v842_v26, 0.0  ;;  %v784_v30 = vadd.f32 %v783_v28, %v650_v27 }
 0x125   : > { %v959_v31 = vpack.c.bf16 %v909_v29, %v909_v29  ;;  %v886_v32 = vmax.f32 %v784_v30, 0.0 }
 0x126   : > { %v709_v33 = vpop.f32.mrf.mxu2 }
 0x127   : > { %1010 = vst.msk [vmem:[%s1617_s30 + $0x98] sm:$0xf] %vm971_vm0, %v959_v31  ;;  %v936_v34 = vpack.c.bf16 %v886_v32, %v886_v32  ;;  %v710_v35 = vadd.f32 %v1602_v48, %v709_v33  ;;  %v848_v37 = vpop.f32.mrf.mxu3 }
 0x128   : > { %v652_v36 = vpop.f32.mrf.mxu0 }
 0x129   : > { %987 = vst.msk [vmem:[%s1617_s30 + $0x3c] sm:$0xf] %vm971_vm0, %v936_v34  ;;  %v844_v38 = vadd.f32 %v843_v11, %v710_v35  ;;  %v653_v39 = vadd.f32 %v1602_v48, %v652_v36  ;;  %v786_v40 = vpop.f32.mrf.mxu1 }
 0x12b   : > { %v910_v41 = vmax.f32 %v844_v38, 0.0  ;;  %v787_v42 = vadd.f32 %v786_v40, %v653_v39 }
 0x12d   : > { %v960_v43 = vpack.c.bf16 %v910_v41, %v910_v41  ;;  %v887_v44 = vmax.f32 %v787_v42, 0.0 }
 0x12e   : > { %v712_v45 = vpop.f32.mrf.mxu2 }
 0x12f   : > { %1011 = vst.msk [vmem:[%s1617_s30 + $0x9c] sm:$0xf] %vm971_vm0, %v960_v43  ;;  %v937_v46 = vpack.c.bf16 %v887_v44, %v887_v44  ;;  %v713_v47 = vadd.f32 %v1602_v48, %v712_v45  ;;  %v851_v53 = vpop.f32.mrf.mxu3 }
 0x130   : > { %v654_v49 = vpop.f32.mrf.mxu0 }
 0x131   : > { %988 = vst.msk [vmem:[%s1617_s30 + $0x40] sm:$0xf] %vm971_vm0, %v937_v46  ;;  %v847_v50 = vadd.f32 %v846_v24, %v713_v47  ;;  %v655_v51 = vadd.f32 %v1602_v48, %v654_v49  ;;  %v788_v52 = vpop.f32.mrf.mxu1 }
 0x133   : > { %v911_v54 = vmax.f32 %v847_v50, 0.0  ;;  %v789_v55 = vadd.f32 %v788_v52, %v655_v51 }
 0x135   : > { %v961_v56 = vpack.c.bf16 %v911_v54, %v911_v54  ;;  %v888_v57 = vmax.f32 %v789_v55, 0.0 }
 0x136   : > { %v714_v58 = vpop.f32.mrf.mxu2 }
 0x137   : > { %1012 = vst.msk [vmem:[%s1617_s30 + $0xa0] sm:$0xf] %vm971_vm0, %v961_v56  ;;  %v938_v59 = vpack.c.bf16 %v888_v57, %v888_v57  ;;  %v715_v60 = vadd.f32 %v1602_v48, %v714_v58  ;;  %v853_v4 = vpop.f32.mrf.mxu3 }
 0x138   : > { %v657_v61 = vpop.f32.mrf.mxu0 }
 0x139   : > { %989 = vst.msk [vmem:[%s1617_s30 + $0x44] sm:$0xf] %vm971_vm0, %v938_v59  ;;  %v849_v62 = vadd.f32 %v848_v37, %v715_v60  ;;  %v658_v63 = vadd.f32 %v1602_v48, %v657_v61  ;;  %v791_v0 = vpop.f32.mrf.mxu1 }
 0x13b   : > { %v912_v1 = vmax.f32 %v849_v62, 0.0  ;;  %v792_v3 = vadd.f32 %v791_v0, %v658_v63 }
 0x13d   : > { %v962_v5 = vpack.c.bf16 %v912_v1, %v912_v1  ;;  %v889_v6 = vmax.f32 %v792_v3, 0.0 }
 0x13e   : > { %v717_v7 = vpop.f32.mrf.mxu2 }
 0x13f   : > { %1013 = vst.msk [vmem:[%s1617_s30 + $0xa4] sm:$0xf] %vm971_vm0, %v962_v5  ;;  %v939_v8 = vpack.c.bf16 %v889_v6, %v889_v6  ;;  %v718_v9 = vadd.f32 %v1602_v48, %v717_v7  ;;  %v856_v20 = vpop.f32.mrf.mxu3 }
 0x140   : > { %v659_v10 = vpop.f32.mrf.mxu0 }
 0x141   : > { %990 = vst.msk [vmem:[%s1617_s30 + $0x48] sm:$0xf] %vm971_vm0, %v939_v8  ;;  %v852_v11 = vadd.f32 %v851_v53, %v718_v9  ;;  %v660_v12 = vadd.f32 %v1602_v48, %v659_v10  ;;  %v793_v13 = vpop.f32.mrf.mxu1  ;;  %v673_v8 = vadd.f32 %v1602_v48, %v1619_v2  ;;  %v675_v2 = vadd.f32 %v1602_v48, %v1632_v18 }
 0x143   : > { %v913_v14 = vmax.f32 %v852_v11, 0.0  ;;  %v794_v15 = vadd.f32 %v793_v13, %v660_v12 }
 0x145   : > { %v963_v16 = vpack.c.bf16 %v913_v14, %v913_v14  ;;  %v890_v17 = vmax.f32 %v794_v15, 0.0 }
 0x146   : > { %v719_v19 = vpop.f32.mrf.mxu2 }
 0x147   : > { %1014 = vst.msk [vmem:[%s1617_s30 + $0xa8] sm:$0xf] %vm971_vm0, %v963_v16  ;;  %v940_v21 = vpack.c.bf16 %v890_v17, %v890_v17  ;;  %v720_v22 = vadd.f32 %v1602_v48, %v719_v19  ;;  %v858_v35 = vpop.f32.mrf.mxu3 }
 0x148   : > { %v662_v23 = vpop.f32.mrf.mxu0 }
 0x149   : > { %991 = vst.msk [vmem:[%s1617_s30 + $0x4c] sm:$0xf] %vm971_vm0, %v940_v21  ;;  %v854_v24 = vadd.f32 %v853_v4, %v720_v22  ;;  %v663_v25 = vadd.f32 %v1602_v48, %v662_v23  ;;  %v796_v26 = vpop.f32.mrf.mxu1 }
 0x14b   : > { %v914_v27 = vmax.f32 %v854_v24, 0.0  ;;  %v797_v28 = vadd.f32 %v796_v26, %v663_v25 }
 0x14d   : > { %v964_v29 = vpack.c.bf16 %v914_v27, %v914_v27  ;;  %v891_v30 = vmax.f32 %v797_v28, 0.0 }
 0x14e   : > { %v722_v31 = vpop.f32.mrf.mxu2 }
 0x14f   : > { %1015 = vst.msk [vmem:[%s1617_s30 + $0xac] sm:$0xf] %vm971_vm0, %v964_v29  ;;  %v941_v32 = vpack.c.bf16 %v891_v30, %v891_v30  ;;  %v723_v33 = vadd.f32 %v1602_v48, %v722_v31  ;;  %v861_v51 = vpop.f32.mrf.mxu3 }
 0x150   : > { %v664_v34 = vpop.f32.mrf.mxu0 }
 0x151   : > { %992 = vst.msk [vmem:[%s1617_s30 + $0x50] sm:$0xf] %vm971_vm0, %v941_v32  ;;  %v857_v36 = vadd.f32 %v856_v20, %v723_v33  ;;  %v665_v37 = vadd.f32 %v1602_v48, %v664_v34  ;;  %v798_v38 = vpop.f32.mrf.mxu1 }
 0x153   : > { %v915_v39 = vmax.f32 %v857_v36, 0.0  ;;  %v799_v40 = vadd.f32 %v798_v38, %v665_v37 }
 0x155   : > { %v965_v41 = vpack.c.bf16 %v915_v39, %v915_v39  ;;  %v892_v42 = vmax.f32 %v799_v40, 0.0 }
 0x156   : > { %v724_v43 = vpop.f32.mrf.mxu2 }
 0x157   : > { %1016 = vst.msk [vmem:[%s1617_s30 + $0xb0] sm:$0xf] %vm971_vm0, %v965_v41  ;;  %v942_v44 = vpack.c.bf16 %v892_v42, %v892_v42  ;;  %v725_v45 = vadd.f32 %v1602_v48, %v724_v43  ;;  %v863_v1 = vpop.f32.mrf.mxu3 }
 0x158   : > { %v667_v46 = vpop.f32.mrf.mxu0 }
 0x159   : > { %993 = vst.msk [vmem:[%s1617_s30 + $0x54] sm:$0xf] %vm971_vm0, %v942_v44  ;;  %v859_v47 = vadd.f32 %v858_v35, %v725_v45  ;;  %v668_v49 = vadd.f32 %v1602_v48, %v667_v46  ;;  %v801_v50 = vpop.f32.mrf.mxu1 }
 0x15b   : > { %v916_v52 = vmax.f32 %v859_v47, 0.0  ;;  %v802_v53 = vadd.f32 %v801_v50, %v668_v49 }
 0x15d   : > { %v966_v54 = vpack.c.bf16 %v916_v52, %v916_v52  ;;  %v893_v55 = vmax.f32 %v802_v53, 0.0 }
 0x15e   : > { %v727_v56 = vpop.f32.mrf.mxu2 }
 0x15f   : > { %1017 = vst.msk [vmem:[%s1617_s30 + $0xb4] sm:$0xf] %vm971_vm0, %v966_v54  ;;  %v943_v57 = vpack.c.bf16 %v893_v55, %v893_v55  ;;  %v728_v58 = vadd.f32 %v1602_v48, %v727_v56  ;;  %v866_v16 = vpop.f32.mrf.mxu3 }
 0x160   : > { %v669_v59 = vpop.f32.mrf.mxu0 }
 0x161   : > { %994 = vst.msk [vmem:[%s1617_s30 + $0x58] sm:$0xf] %vm971_vm0, %v943_v57  ;;  %v862_v60 = vadd.f32 %v861_v51, %v728_v58  ;;  %v670_v61 = vadd.f32 %v1602_v48, %v669_v59  ;;  %v803_v62 = vpop.f32.mrf.mxu1 }
 0x163   : > { %v917_v63 = vmax.f32 %v862_v60, 0.0  ;;  %v804_v0 = vadd.f32 %v803_v62, %v670_v61 }
 0x165   : > { %v967_v3 = vpack.c.bf16 %v917_v63, %v917_v63  ;;  %v894_v4 = vmax.f32 %v804_v0, 0.0 }
 0x166   : > { %v729_v5 = vpop.f32.mrf.mxu2 }
 0x167   : > { %1018 = vst.msk [vmem:[%s1617_s30 + $0xb8] sm:$0xf] %vm971_vm0, %v967_v3  ;;  %v944_v6 = vpack.c.bf16 %v894_v4, %v894_v4  ;;  %v730_v7 = vadd.f32 %v1602_v48, %v729_v5  ;;  %v868_v29 = vpop.f32.mrf.mxu3 }
 0x169   : > { %995 = vst.msk [vmem:[%s1617_s30 + $0x5c] sm:$0xf] %vm971_vm0, %v944_v6  ;;  %v864_v9 = vadd.f32 %v863_v1, %v730_v7  ;;  %v806_v10 = vpop.f32.mrf.mxu1 }
 0x16a   : > { %v807_v11 = vadd.f32 %v806_v10, %v673_v8 }
 0x16b   : > { %v918_v12 = vmax.f32 %v864_v9, 0.0 }
 0x16c   : > { %v895_v13 = vmax.f32 %v807_v11, 0.0 }
 0x16d   : > { %v968_v14 = vpack.c.bf16 %v918_v12, %v918_v12 }
 0x16e   : > { %v945_v15 = vpack.c.bf16 %v895_v13, %v895_v13  ;;  %v732_v17 = vpop.f32.mrf.mxu2 }
 0x16f   : > { %1019 = vst.msk [vmem:[%s1617_s30 + $0xbc] sm:$0xf] %vm971_vm0, %v968_v14  ;;  %v733_v19 = vadd.f32 %v1602_v48, %v732_v17 }
 0x170   : > { %996 = vst.msk [vmem:[%s1617_s30 + $0x60] sm:$0xf] %vm971_vm0, %v945_v15 }
 0x171   : > { %v867_v20 = vadd.f32 %v866_v16, %v733_v19  ;;  %v808_v21 = vpop.f32.mrf.mxu1 }
 0x172   : > { %v809_v22 = vadd.f32 %v808_v21, %v675_v2 }
 0x173   : > { %v919_v23 = vmax.f32 %v867_v20, 0.0 }
 0x174   : > { %v896_v24 = vmax.f32 %v809_v22, 0.0 }
 0x175   : > { %v969_v25 = vpack.c.bf16 %v919_v23, %v919_v23 }
 0x176   : > { %v946_v26 = vpack.c.bf16 %v896_v24, %v896_v24  ;;  %v734_v27 = vpop.f32.mrf.mxu2 }
 0x177   : > { %1020 = vst.msk [vmem:[%s1617_s30 + $0xc0] sm:$0xf] %vm971_vm0, %v969_v25  ;;  %v735_v28 = vadd.f32 %v1602_v48, %v734_v27 }
 0x178   : > { %997 = vst.msk [vmem:[%s1617_s30 + $0x64] sm:$0xf] %vm971_vm0, %v946_v26 }
 0x179   : > { %v869_v30 = vadd.f32 %v868_v29, %v735_v28 }
 0x17b   : > { %v920_v18 = vmax.f32 %v869_v30, 0.0 }
 0x17d   : > { %v970_v31 = vpack.c.bf16 %v920_v18, %v920_v18 }
 0x17f   : > { %1021 = vst.msk [vmem:[%s1617_s30 + $0xc4] sm:$0xf] %vm971_vm0, %v970_v31 }
 0x180 PF: > { %s13_s12 = sadd.s32 1, %s1449_s12  }
 0x181   : > { %p10_p4 = scmp.ge.s32.totalorder %s13_s12, 4  }
 0x183   :  { %12 = sbr.rel (!%p10_p4) target bundleno = 1 (0x1), region = 62 }

// kernel: qnet_forward_pallas.4
= control target key start
LH: loop header
LB: loop body
LE: loop exit
PB: predicated region body
PF: predicated region fallthrough
CT: control target
= control target key end

     0   :  { %s2466_s18 = smov 0   ;;  %s3093_s0 = inlined_call_operand.vmem [shape: bf16[2,81,512], index: 0, kind: input, shape index: {}]   ;;  %s3094_s1 = inlined_call_operand.vmem [shape: bf16[512,64], index: 1, kind: input, shape index: {}]   ;;  %s3095_s2 = inlined_call_operand.vmem [shape: f32[1,64], index: 2, kind: input, shape index: {}]   ;;  %s3096_s3 = inlined_call_operand.vmem [shape: bf16[9,64,64], index: 3, kind: input, shape index: {}]   ;;  %s3097_s4 = inlined_call_operand.vmem [shape: f32[1,64], index: 4, kind: input, shape index: {}]   ;;  %s3098_s5 = inlined_call_operand.vmem [shape: bf16[2,49,64], index: 5, kind: output, shape index: {}]  }
   0x1 LB: > { %s1849_s19 = sadd.s32 4294967295, %s2434_s18   ;;  %p1853_p0 = scmp.ge.s32.totalorder %s2434_s18, 1  ;;  %s2434_s18 = sphi %s2466_s18, %s15_s18  }
   0x2   : > { %p187_p1 = scmp.lt.s32.totalorder %s2434_s18, 3 }
   0x4   : > { %p188_p2 = pnand %p1853_p0, %p187_p1 }
   0x5   : > { %p215_p3 = scmp.lt.s32.totalorder (!%p188_p2), %s1849_s19, 1 }
   0x6   : > { %191 = sbr.rel (%p188_p2) target bundleno = 572 (0x23c), region = 40 }
   0xb   : > { %v2339_v0 = vld [vmem:[%s3094_s1 + $0x38] sm:$0xff]  ;;  %v2338_v1 = vld [vmem:[%s3094_s1 + $0x30] sm:$0xff]  ;;  %v2337_v4 = vld [vmem:[%s3094_s1 + $0x28] sm:$0xff]  ;;  %s3102_s19 = smov (!%p215_p3, %s1849_s19), 1  ;;  %vm889_vm0 = vcmask 523264   ;;  %vm1001_vm1 = vcmask 1046528  }
   0xc   : > { %2400 = vmatpush.bf16.msra.mxu1 %v2339_v0  ;;  %2401 = vmatpush.bf16.msra.mxu2 %v2339_v0  ;;  %v2363_v2 = vld [vmem:[%s3094_s1 + $0xf8] sm:$0xff]  ;;  %v2362_v3 = vld [vmem:[%s3094_s1 + $0xf0] sm:$0xff]  ;;  %v2361_v5 = vld [vmem:[%s3094_s1 + $0xe8] sm:$0xff]  ;;  %s2416_s15 = smul.u32 176, %s3102_s19  ;;  %vm833_vm2 = vsmask.f32 7424 }
   0xd   : > { %622 = vmatpush.bf16.msra.mxu0 %v2339_v0  ;;  %736 = vmatpush.bf16.msra.mxu3 %v2363_v2  ;;  %v2336_v6 = vld [vmem:[%s3094_s1 + $0x20] sm:$0xff]  ;;  %v2335_v8 = vld [vmem:[%s3094_s1 + $0x18] sm:$0xff]  ;;  %v2334_v10 = vld [vmem:[%s3094_s1 + $0x10] sm:$0xff]  ;;  %vm1583_vm3 = vcmask 1045504   ;;  %vm1299_vm4 = vsmask.f32 6400 }
   0xe   : > { %v2360_v7 = vld [vmem:[%s3094_s1 + $0xe0] sm:$0xff]  ;;  %v2359_v9 = vld [vmem:[%s3094_s1 + $0xd8] sm:$0xff]  ;;  %v2358_v11 = vld [vmem:[%s3094_s1 + $0xd0] sm:$0xff]  ;;  %s2516_s24 = scalar_lea.vmem %s3093_s0, %s2416_s15  ;;  %s2417_s25 = smul.u32 28, %s3102_s19  ;;  %vm1694_vm5 = vcmask 519168   ;;  %vm1705_vm8 = vcmask 519171  }
   0xf   : > { %v2333_v12 = vld [vmem:[%s3094_s1 + $0x8] sm:$0xff]  ;;  %v2522_v13 = vld [vmem:[%s2516_s24 + $0xa0] sm:$0x11]  ;;  %v2326_v18 = vld [vmem:[%s2516_s24 + $0x6c] sm:$0xf0]  ;;  %vm1711_vm11 = vcmask 518144  }
  0x10   : > { %2402 = vmatpush.bf16.msra.mxu1 %v2338_v1  ;;  %2403 = vmatpush.bf16.msra.mxu2 %v2338_v1  ;;  %v2357_v14 = vld [vmem:[%s3094_s1 + $0xc8] sm:$0xff]  ;;  %v378_v15 = vunpack.c.l.b16 %v2522_v13  ;;  %v2332_v16 = vld [vmem:[%s3094_s1] sm:$0xff]  ;;  %v2355_v19 = vld [vmem:[%s3094_s1 + $0xb8] sm:$0xff]  ;;  %s3021_s30 = scalar_lea.vmem %s3098_s5, %s2417_s25  ;;  %vm1695_vm6 = vsmask.f32 3328  ;;  %vm1715_vm12 = vcmask 1041408  }
  0x11   : > { %623 = vmatpush.bf16.msra.mxu0 %v2338_v1  ;;  %737 = vmatpush.bf16.msra.mxu3 %v2362_v3  ;;  %v1906_v17 = vld [vmem:[%s2516_s24 + $0x60] sm:$0xf]  ;;  %v2347_v20 = vld [vmem:[%s3094_s1 + $0x78] sm:$0xff]  ;;  %v2314_v25 = vld [vmem:[%s2516_s24 + $0xc] sm:$0xf0]  ;;  %vm1716_vm13 = vcmask 1045508  }
  0x12   : > { %v2356_v21 = vld [vmem:[%s3094_s1 + $0xc0] sm:$0xff]  ;;  %v1907_v23 = vor.u32 %v2326_v18, %v1906_v17  ;;  %v402_v24 = vpack.c.b16 %v378_v15, %v378_v15  ;;  %v2313_v26 = vld [vmem:[%s2516_s24 + $0xc] sm:$0xf]  ;;  %v1868_v27 = vld [vmem:[%s2516_s24 + $0x18] sm:$0xf0] }
  0x13   : > { %v1858_v22 = vld [vmem:[%s2516_s24] sm:$0xf]  ;;  %v2354_v28 = vld [vmem:[%s3094_s1 + $0xb0] sm:$0xff]  ;;  %v1871_v31 = vor.u32 %v2313_v26, %v1868_v27  ;;  %v2353_v32 = vld [vmem:[%s3094_s1 + $0xa8] sm:$0xff]  ;;  %vm1706_vm9 = vsmask.f32 7950 }
  0x14   : > { %2404 = vmatpush.bf16.msra.mxu1 %v2337_v4  ;;  %2405 = vmatpush.bf16.msra.mxu2 %v2337_v4  ;;  %v2346_v29 = vld [vmem:[%s3094_s1 + $0x70] sm:$0xff]  ;;  %v1859_v30 = vor.u32 %v2314_v25, %v1858_v22  ;;  %v2345_v33 = vld [vmem:[%s3094_s1 + $0x68] sm:$0xff]  ;;  %v2352_v34 = vld [vmem:[%s3094_s1 + $0xa0] sm:$0xff]  ;;  %vm1727_vm14 = vsmask.f32 2304 }
  0x15   : > { %624 = vmatpush.bf16.msra.mxu0 %v2337_v4  ;;  %738 = vmatpush.bf16.msra.mxu3 %v2361_v5  ;;  %v2344_v35 = vld [vmem:[%s3094_s1 + $0x60] sm:$0xff]  ;;  %v2330_v37 = vld [vmem:[%s2516_s24 + $0x8c] sm:$0xf0]  ;;  %v2351_v38 = vld [vmem:[%s3094_s1 + $0x98] sm:$0xff] }
  0x16   : > { %v1922_v36 = vld [vmem:[%s2516_s24 + $0x80] sm:$0xf]  ;;  %v2343_v39 = vld [vmem:[%s3094_s1 + $0x58] sm:$0xff]  ;;  %v2318_v42 = vld [vmem:[%s2516_s24 + $0x2c] sm:$0xf0] }
  0x17   : > { %v1874_v40 = vld [vmem:[%s2516_s24 + $0x20] sm:$0xf]  ;;  %v1923_v41 = vor.u32 %v2330_v37, %v1922_v36  ;;  %v2317_v43 = vld [vmem:[%s2516_s24 + $0x2c] sm:$0xf]  ;;  %v1884_v44 = vld [vmem:[%s2516_s24 + $0x38] sm:$0xf0]  ;;  %v379_v36 = vunpack.c.h.b16 %v2522_v13 }
  0x18   : > { %2406 = vmatpush.bf16.msra.mxu1 %v2336_v6  ;;  %2407 = vmatpush.bf16.msra.mxu2 %v2336_v6  ;;  %v2350_v45 = vld [vmem:[%s3094_s1 + $0x90] sm:$0xff]  ;;  %v1875_v47 = vor.u32 %v2318_v42, %v1874_v40  ;;  %v1887_v48 = vor.u32 %v2317_v43, %v1884_v44  ;;  %v2349_v49 = vld [vmem:[%s3094_s1 + $0x88] sm:$0xff]  ;;  %v2348_v51 = vld [vmem:[%s3094_s1 + $0x80] sm:$0xff] }
  0x19   : > { %625 = vmatpush.bf16.msra.mxu0 %v2336_v6  ;;  %739 = vmatpush.bf16.msra.mxu3 %v2360_v7  ;;  %v2342_v46 = vld [vmem:[%s3094_s1 + $0x50] sm:$0xff]  ;;  %v2341_v50 = vld [vmem:[%s3094_s1 + $0x48] sm:$0xff]  ;;  %v2340_v52 = vld [vmem:[%s3094_s1 + $0x40] sm:$0xff] }
  0x1a   : > { %v1866_v53 = vld [vmem:[%s2516_s24 + $0x8] sm:$0xf]  ;;  %v2315_v54 = vld [vmem:[%s2516_s24 + $0x14] sm:$0xf0]  ;;  %v2312_v56 = vld [vmem:[%s2516_s24 + $0x4] sm:$0xf] }
  0x1b   : > { %v1867_v55 = vor.u32 %v2315_v54, %v1866_v53  ;;  %v1860_v57 = vld [vmem:[%s2516_s24 + $0x10] sm:$0xf0]  ;;  %v1890_v58 = vld [vmem:[%s2516_s24 + $0x40] sm:$0xf]  ;;  %v2322_v60 = vld [vmem:[%s2516_s24 + $0x4c] sm:$0xf0] }
  0x1c   : > { %2408 = vmatpush.bf16.msra.mxu1 %v2335_v8  ;;  %2409 = vmatpush.bf16.msra.mxu2 %v2335_v8  ;;  %v1863_v59 = vor.u32 %v2312_v56, %v1860_v57  ;;  %v2321_v61 = vld [vmem:[%s2516_s24 + $0x4c] sm:$0xf]  ;;  %v1900_v62 = vld [vmem:[%s2516_s24 + $0x58] sm:$0xf0]  ;;  %v1891_v63 = vor.u32 %v2322_v60, %v1890_v58  ;;  %v1882_v1 = vld [vmem:[%s2516_s24 + $0x28] sm:$0xf] }
  0x1d   : > { %626 = vmatpush.bf16.msra.mxu0 %v2335_v8  ;;  %740 = vmatpush.bf16.msra.mxu3 %v2359_v9  ;;  %v1903_v0 = vor.u32 %v2321_v61, %v1900_v62  ;;  %v2319_v2 = vld [vmem:[%s2516_s24 + $0x34] sm:$0xf0]  ;;  %v2316_v4 = vld [vmem:[%s2516_s24 + $0x24] sm:$0xf]  ;;  %v1876_v5 = vld [vmem:[%s2516_s24 + $0x30] sm:$0xf0] }
  0x1e   : > { %v1883_v3 = vor.u32 %v2319_v2, %v1882_v1  ;;  %v1879_v6 = vor.u32 %v2316_v4, %v1876_v5  ;;  %v2325_v7 = vld [vmem:[%s2516_s24 + $0x6c] sm:$0xf]  ;;  %v1916_v8 = vld [vmem:[%s2516_s24 + $0x78] sm:$0xf0]  ;;  %v1892_v15 = vld [vmem:[%s2516_s24 + $0x50] sm:$0xf0] }
  0x1f   : > { %v1919_v9 = vor.u32 %v2325_v7, %v1916_v8  ;;  %v2329_v17 = vld [vmem:[%s2516_s24 + $0x8c] sm:$0xf]  ;;  %v1932_v18 = vld [vmem:[%s2516_s24 + $0x98] sm:$0xf0]  ;;  %v2374_v60 = vld [vmem:[%s3096_s3 + $0x50] sm:$0xff] }
  0x20   : > { %2410 = vmatpush.bf16.msra.mxu1 %v2334_v10  ;;  %2411 = vmatpush.bf16.msra.mxu2 %v2334_v10  ;;  %v247_v25 = vld [vmem:[%s2516_s24 + $0xa8] sm:$0x11]  ;;  %v2367_v13 = vld [vmem:[%s3096_s3 + $0x18] sm:$0xff]  ;;  %v2378_v5 = vld [vmem:[%s3096_s3 + $0x70] sm:$0xff] }
  0x21   : > { %627 = vmatpush.bf16.msra.mxu0 %v2334_v10  ;;  %741 = vmatpush.bf16.msra.mxu3 %v2358_v11  ;;  %v1898_v10 = vld [vmem:[%s2516_s24 + $0x48] sm:$0xf]  ;;  %v2323_v11 = vld [vmem:[%s2516_s24 + $0x54] sm:$0xf0]  ;;  %v381_v26 = vunpack.c.h.b16 %v247_v25  ;;  %v2372_v7 = vld [vmem:[%s3096_s3 + $0x40] sm:$0xff] }
  0x22   : > { %v2373_v1 = vld [vmem:[%s3096_s3 + $0x48] sm:$0xff]  ;;  %vm1696_vm7 = vmand %vm1694_vm5, %vm1695_vm6  ;;  %vm1748_vm6 = vcmask 517120  }
  0x23   : > { %vm1707_vm10 = vmand %vm1705_vm8, %vm1706_vm9 }
  0x24   : > { %2412 = vmatpush.bf16.msra.mxu1 %v2333_v12  ;;  %2413 = vmatpush.bf16.msra.mxu2 %v2333_v12  ;;  %vm3052_vm15 = vmor %vm1715_vm12, %vm1716_vm13  ;;  %vm1770_vm12 = vcmask 519169   ;;  %vm1771_vm13 = vsmask.f32 7942 }
  0x25   : > { %628 = vmatpush.bf16.msra.mxu0 %v2333_v12  ;;  %742 = vmatpush.bf16.msra.mxu3 %v2357_v14  ;;  %v1899_v12 = vor.u32 %v2323_v11, %v1898_v10  ;;  %v2320_v14 = vld [vmem:[%s2516_s24 + $0x44] sm:$0xf] }
  0x28   : > { %2414 = vmatpush.bf16.msra.mxu1 %v2332_v16  ;;  %2415 = vmatpush.bf16.msra.mxu2 %v2332_v16 }
  0x29   : > { %629 = vmatpush.bf16.msra.mxu0 %v2332_v16  ;;  %743 = vmatpush.bf16.msra.mxu3 %v2356_v21  ;;  %v1895_v16 = vor.u32 %v2320_v14, %v1892_v15  ;;  %v2327_v21 = vld [vmem:[%s2516_s24 + $0x74] sm:$0xf0] }
  0x2b   : > { %645 = vmatmul.bf16.vlgmr.msra.gmra.mxu1 %v1907_v23  ;;  %655 = vmatmul.bf16.vlgmr.msra.gmra.mxu2 %v402_v24  ;;  %v2324_v23 = vld [vmem:[%s2516_s24 + $0x64] sm:$0xf]  ;;  %v1908_v24 = vld [vmem:[%s2516_s24 + $0x70] sm:$0xf0] }
  0x2c   : > { %698 = vmatpush.bf16.msrb.mxu2 %v2355_v19  ;;  %660 = vmatpush.bf16.msrb.mxu1 %v2347_v20  ;;  %v1935_v19 = vor.u32 %v2329_v17, %v1932_v18  ;;  %v1914_v20 = vld [vmem:[%s2516_s24 + $0x68] sm:$0xf]  ;;  %v1911_v27 = vor.u32 %v2324_v23, %v1908_v24  ;;  %v2376_v24 = vld [vmem:[%s3096_s3 + $0x60] sm:$0xff] }
  0x2d   : > { %630 = vmatmul.bf16.vlgmr.msra.gmra.mxu0 %v1859_v30  ;;  %744 = vmatmul.bf16.vlgmr.msra.gmra.mxu3 %v1871_v31  ;;  %v1915_v22 = vor.u32 %v2327_v21, %v1914_v20  ;;  %v2331_v30 = vld [vmem:[%s2516_s24 + $0x94] sm:$0xf0]  ;;  %v2377_v17 = vld [vmem:[%s3096_s3 + $0x68] sm:$0xff] }
  0x30   : > { %699 = vmatpush.bf16.msrb.mxu2 %v2354_v28  ;;  %661 = vmatpush.bf16.msrb.mxu1 %v2346_v29  ;;  %v405_v28 = vpack.c.b16 %v381_v26, %v381_v26  ;;  %v1930_v29 = vld [vmem:[%s2516_s24 + $0x88] sm:$0xf] }
  0x31   : > { %v1931_v31 = vor.u32 %v2331_v30, %v1930_v29 }
  0x34   : > { %700 = vmatpush.bf16.msrb.mxu2 %v2353_v32  ;;  %662 = vmatpush.bf16.msrb.mxu1 %v2345_v33  ;;  %v2328_v32 = vld [vmem:[%s2516_s24 + $0x84] sm:$0xf]  ;;  %v1924_v33 = vld [vmem:[%s2516_s24 + $0x90] sm:$0xf0] }
  0x38   : > { %701 = vmatpush.bf16.msrb.mxu2 %v2352_v34  ;;  %663 = vmatpush.bf16.msrb.mxu1 %v2344_v35  ;;  %v1927_v34 = vor.u32 %v2328_v32, %v1924_v33  ;;  %v380_v35 = vunpack.c.l.b16 %v247_v25 }
  0x3a   : > { %v404_v37 = vpack.c.b16 %v380_v35, %v380_v35 }
  0x3b   : > { %650 = vmatmul.bf16.gmra.mxu1 %v1923_v41  ;;  %v2632_v41 = vld [vmem:[%s3095_s2] ss:$0 sm:$0xff] }
  0x3c   : > { %702 = vmatpush.bf16.msrb.mxu2 %v2351_v38  ;;  %664 = vmatpush.bf16.msrb.mxu1 %v2343_v39  ;;  %v403_v38 = vpack.c.b16 %v379_v36, %v379_v36  ;;  %v2371_v39 = vld [vmem:[%s3096_s3 + $0x38] sm:$0xff] }
  0x3d   : > { %635 = vmatmul.bf16.gmra.mxu0 %v1875_v47  ;;  %749 = vmatmul.bf16.gmra.mxu3 %v1887_v48  ;;  %v2375_v47 = vld [vmem:[%s3096_s3 + $0x58] sm:$0xff] }
  0x3e   : > { %906 = vmatpush.bf16.msrb.mxu0 %v2371_v39  ;;  %v2379_v48 = vld [vmem:[%s3096_s3 + $0x78] sm:$0xff] }
  0x3f   : > { %1168 = vmatpush.bf16.msrb.mxu3 %v2379_v48 }
  0x40   : > { %703 = vmatpush.bf16.msrb.mxu2 %v2350_v45  ;;  %665 = vmatpush.bf16.msrb.mxu1 %v2342_v46  ;;  %v2366_v46 = vld [vmem:[%s3096_s3 + $0x10] sm:$0xff] }
  0x43   : > { %1169 = vmatpush.bf16.msrb.mxu3 %v2378_v5 }
  0x44   : > { %704 = vmatpush.bf16.msrb.mxu2 %v2349_v49  ;;  %666 = vmatpush.bf16.msrb.mxu1 %v2341_v50  ;;  %v2370_v49 = vld [vmem:[%s3096_s3 + $0x30] sm:$0xff] }
  0x45   : > { %907 = vmatpush.bf16.msrb.mxu0 %v2370_v49 }
  0x47   : > { %1170 = vmatpush.bf16.msrb.mxu3 %v2377_v17 }
  0x48   : > { %705 = vmatpush.bf16.msrb.mxu2 %v2348_v51  ;;  %667 = vmatpush.bf16.msrb.mxu1 %v2340_v52  ;;  %v2365_v51 = vld [vmem:[%s3096_s3 + $0x8] sm:$0xff] }
  0x4b   : > { %706 = vmatmul.bf16.vlgmr.msrb.gmra.mxu2 %v1867_v55  ;;  %668 = vmatmul.bf16.vlgmr.msrb.gmra.mxu1 %v1863_v59  ;;  %v2364_v55 = vld [vmem:[%s3096_s3] sm:$0xff] }
  0x4c   : > { %967 = vmatpush.bf16.msra.mxu1 %v2367_v13  ;;  %1049 = vmatpush.bf16.msra.mxu2 %v2375_v47 }
  0x4d   : > { %640 = vmatmul.bf16.gmra.mxu0 %v1891_v63  ;;  %754 = vmatmul.bf16.gmra.mxu3 %v1903_v0  ;;  %v2369_v0 = vld [vmem:[%s3096_s3 + $0x28] sm:$0xff] }
  0x4e   : > { %908 = vmatpush.bf16.msrb.mxu0 %v2369_v0  ;;  %1171 = vmatpush.bf16.msrb.mxu3 %v2376_v24 }
  0x50   : > { %968 = vmatpush.bf16.msra.mxu1 %v2366_v46  ;;  %1050 = vmatpush.bf16.msra.mxu2 %v2374_v60 }
  0x54   : > { %969 = vmatpush.bf16.msra.mxu1 %v2365_v51  ;;  %1051 = vmatpush.bf16.msra.mxu2 %v2373_v1 }
  0x58   : > { %970 = vmatpush.bf16.msra.mxu1 %v2364_v55  ;;  %1052 = vmatpush.bf16.msra.mxu2 %v2372_v7 }
  0x5b   : > { %711 = vmatmul.bf16.gmra.mxu2 %v1883_v3  ;;  %673 = vmatmul.bf16.gmra.mxu1 %v1879_v6  ;;  %v2368_v6 = vld [vmem:[%s3096_s3 + $0x20] sm:$0xff] }
  0x5c   : > { %909 = vmatpush.bf16.msrb.mxu0 %v2368_v6 }
  0x5d   : > { %759 = vmatmul.bf16.gmra.mxu3 %v1919_v9 }
  0x6b   : > { %716 = vmatmul.bf16.gmra.mxu2 %v1899_v12  ;;  %678 = vmatmul.bf16.gmra.mxu1 %v1895_v16 }
  0x6d   : > { %764 = vmatmul.bf16.gmra.mxu3 %v1935_v19 }
  0x7b   : > { %721 = vmatmul.bf16.gmra.mxu2 %v1915_v22  ;;  %683 = vmatmul.bf16.gmra.mxu1 %v1911_v27 }
  0x7d   : > { %769 = vmatmul.bf16.gmra.mxu3 %v405_v28 }
  0x8b   : > { %726 = vmatmul.bf16.gmra.mxu2 %v1931_v31  ;;  %688 = vmatmul.bf16.gmra.mxu1 %v1927_v34  ;;  %v2383_v34 = vld [vmem:[%s3096_s3 + $0x98] sm:$0xff] }
  0x8c   : > { %1257 = vmatpush.bf16.msra.mxu0 %v2383_v34 }
  0x9b   : > { %731 = vmatmul.bf16.gmra.mxu2 %v404_v37  ;;  %693 = vmatmul.bf16.gmra.mxu1 %v403_v38 }
  0xa8   : > { %v2627_v40 = vpop.f32.mrf.mxu1 }
  0xaa   : > { %v631_v54 = vpop.f32.mrf.mxu0 }
  0xab   : > { %v632_v59 = vadd.f32 %v2632_v41, %v631_v54 }
  0xae   : > { %v656_v42 = vpop.f32.mrf.mxu2 }
  0xaf   : > { %v2635_v43 = vadd.f32 %v2632_v41, %v656_v42 }
  0xb0   : > { %v2640_v44 = vpop.f32.mrf.mxu1  ;;  %v745_v45 = vpop.f32.mrf.mxu3 }
  0xb2   : > { %v633_v58 = vpop.f32.mrf.mxu0 }
  0xb3   : > { %v634_v8 = vadd.f32 %v2632_v41, %v633_v58 }
  0xb6   : > { %v658_v50 = vpop.f32.mrf.mxu2 }
  0xb8   : > { %v2657_v52 = vpop.f32.mrf.mxu1  ;;  %v747_v53 = vpop.f32.mrf.mxu3 }
  0xba   : > { %v636_v4 = vpop.f32.mrf.mxu0 }
  0xbb   : > { %v637_v18 = vadd.f32 %v2632_v41, %v636_v4 }
  0xc0   : > { %v2662_v56 = vpop.f32.mrf.mxu1  ;;  %v750_v57 = vpop.f32.mrf.mxu3 }
  0xc2   : > { %v638_v22 = vpop.f32.mrf.mxu0 }
  0xc3   : > { %v639_v35 = vadd.f32 %v2632_v41, %v638_v22 }
  0xc8   : > { %v669_v61 = vpop.f32.mrf.mxu1  ;;  %v752_v63 = vpop.f32.mrf.mxu3 }
  0xc9   : > { %v670_v62 = vadd.f32 %v669_v61, %v632_v59 }
  0xca   : > { %v641_v42 = vpop.f32.mrf.mxu0 }
  0xcb   : > { %v642_v46 = vadd.f32 %v2632_v41, %v641_v42 }
  0xce   : > { %v707_v2 = vpop.f32.mrf.mxu2 }
  0xcf   : > { %v708_v3 = vadd.f32 %v707_v2, %v670_v62 }
  0xd0   : > { %v671_v10 = vpop.f32.mrf.mxu1  ;;  %v755_v12 = vpop.f32.mrf.mxu3 }
  0xd1   : > { %v746_v9 = vadd.f32 %v745_v45, %v708_v3  ;;  %v672_v11 = vadd.f32 %v671_v10, %v634_v8  ;;  %v2387_v10 = vld [vmem:[%s3096_s3 + $0xb8] sm:$0xff] }
  0xd2   : > { %v643_v60 = vpop.f32.mrf.mxu0  ;;  %1355 = vmatpush.bf16.msrb.mxu1 %v2387_v10 }
  0xd3   : > { %v774_v15 = vmax.f32 %v746_v9, 0.0  ;;  %v644_v3 = vadd.f32 %v2632_v41, %v643_v60 }
  0xd5   : > { %v785_v20 = vpack.c.bf16 %v774_v15, %v774_v15 }
  0xd6   : > { %v709_v14 = vpop.f32.mrf.mxu2 }
  0xd7   : > { %v710_v16 = vadd.f32 %v709_v14, %v672_v11  ;;  %v821_v29 = vunpack.c.l.b16 %v785_v20 }
  0xd8   : > { %v674_v23 = vpop.f32.mrf.mxu1  ;;  %v2691_v26 = vpop.f32.mrf.mxu3 }
  0xd9   : > { %v748_v19 = vadd.f32 %v747_v53, %v710_v16  ;;  %v675_v25 = vadd.f32 %v674_v23, %v637_v18  ;;  %v2386_v23 = vld [vmem:[%s3096_s3 + $0xb0] sm:$0xff] }
  0xda   : > { %1356 = vmatpush.bf16.msrb.mxu1 %v2386_v23 }
  0xdb   : > { %v775_v21 = vmax.f32 %v748_v19, 0.0 }
  0xdd   : > { %v786_v27 = vpack.c.bf16 %v775_v21, %v775_v21 }
  0xde   : > { %v712_v28 = vpop.f32.mrf.mxu2 }
  0xdf   : > { %v822_v30 = vunpack.c.l.b16 %v786_v27  ;;  %v713_v31 = vadd.f32 %v712_v28, %v675_v25  ;;  %v647_v28 = vadd.f32 %v2632_v41, %v2627_v40 }
  0xe0   : > { %v676_v36 = vpop.f32.mrf.mxu1  ;;  %v2698_v38 = vpop.f32.mrf.mxu3 }
  0xe1   : > { %v829_v32 = vpack.c.b16 %v822_v30, %v821_v29  ;;  %v751_v33 = vadd.f32 %v750_v57, %v713_v31  ;;  %v677_v37 = vadd.f32 %v676_v36, %v639_v35 }
  0xe3   : > { %2108 = vmatmul.msk.bf16.vlgmr.msra.gmra.mxu1 %vm889_vm0, %v829_v32  ;;  %v776_v39 = vmax.f32 %v751_v33, 0.0  ;;  %v837_v53 = vshll.u32 %v829_v32, 16  ;;  %v835_v4 = vshrl.u32 %v829_v32, 16  ;;  %v1002_v7 = vrot.slane %v829_v32, 1  ;;  %v2385_v33 = vld [vmem:[%s3096_s3 + $0xa8] sm:$0xff] }
  0xe4   : > { %1357 = vmatpush.bf16.msrb.mxu1 %v2385_v33 }
  0xe5   : > { %v787_v47 = vpack.c.bf16 %v776_v39, %v776_v39  ;;  %v839_v62 = vrot.slane %v837_v53, 1 }
  0xe6   : > { %v714_v13 = vpop.f32.mrf.mxu2 }
  0xe7   : > { %v715_v45 = vadd.f32 %v714_v13, %v677_v37  ;;  %v823_v55 = vunpack.c.l.b16 %v787_v47 }
  0xe8   : > { %v679_v50 = vpop.f32.mrf.mxu1  ;;  %v2701_v54 = vpop.f32.mrf.mxu3 }
  0xe9   : > { %v753_v48 = vadd.f32 %v752_v63, %v715_v45  ;;  %v680_v51 = vadd.f32 %v679_v50, %v642_v46  ;;  %v2703_v0 = vpack.c.b16 %v823_v55, %v822_v30  ;;  %v2382_v63 = vld [vmem:[%s3096_s3 + $0x90] sm:$0xff]  ;;  %v2384_v45 = vld [vmem:[%s3096_s3 + $0xa0] sm:$0xff] }
  0xea   : > { %1258 = vmatpush.bf16.msra.mxu0 %v2382_v63  ;;  %1358 = vmatpush.bf16.msrb.mxu1 %v2384_v45 }
  0xeb   : > { %v777_v49 = vmax.f32 %v753_v48, 0.0  ;;  %v1100_v15 = vshll.u32 %v2703_v0, 16  ;;  %v1098_v31 = vshrl.u32 %v2703_v0, 16  ;;  %v2381_v48 = vld [vmem:[%s3096_s3 + $0x88] sm:$0xff] }
  0xed   : > { %v788_v57 = vpack.c.bf16 %v777_v49, %v777_v49  ;;  %v1102_v27 = vrot.slane %v1100_v15, 1  ;;  %v649_v49 = vadd.f32 %v2632_v41, %v2640_v44 }
  0xee   : > { %v717_v58 = vpop.f32.mrf.mxu2  ;;  %1259 = vmatpush.bf16.msra.mxu0 %v2381_v48 }
  0xef   : > { %v824_v59 = vunpack.c.l.b16 %v788_v57  ;;  %v718_v61 = vadd.f32 %v717_v58, %v680_v51  ;;  %v1103_v36 = vor.u32 %v1102_v27, %v1098_v31 }
  0xf0   : > { %v681_v6 = vpop.f32.mrf.mxu1  ;;  %v2718_v14 = vpop.f32.mrf.mxu3 }
  0xf1   : > { %v2705_v1 = vpack.c.b16 %v824_v59, %v823_v55  ;;  %v756_v2 = vadd.f32 %v755_v12, %v718_v61  ;;  %v682_v11 = vadd.f32 %v681_v6, %v644_v3  ;;  %v840_v12 = vor.u32 %v839_v62, %v835_v4  ;;  %v2391_v3 = vld [vmem:[%s3096_s3 + $0xd8] sm:$0xff] }
  0xf2   : > { %1436 = vmatpush.bf16.msrb.mxu2 %v2391_v3 }
  0xf3   : > { %v778_v5 = vmax.f32 %v756_v2, 0.0  ;;  %2109 = vmatmul.msk.bf16.gmra.mxu1 %vm889_vm0, %v2705_v1  ;;  %v1003_v8 = vrot.slane %v2705_v1, 1  ;;  %v842_v9 = vshll.u32 %v2705_v1, 16  ;;  %v846_v55 = vshrl.u32 %v2705_v1, 16 }
  0xf5   : > { %v789_v16 = vpack.c.bf16 %v778_v5, %v778_v5  ;;  %v1004_v17 = vsel %vm1001_vm1, %v1002_v7, %v1003_v8  ;;  %v844_v18 = vrot.slane %v842_v9, 1 }
  0xf6   : > { %v719_v19 = vpop.f32.mrf.mxu2  ;;  %2136 = vmatmul.msk.bf16.vlgmr.msra.gmra.mxu2 %vm889_vm0, %v1004_v17 }
  0xf7   : > { %v825_v20 = vunpack.c.l.b16 %v789_v16  ;;  %v720_v21 = vadd.f32 %v719_v19, %v682_v11  ;;  %v845_v22 = vsel %vm833_vm2, %v840_v12, %v844_v18  ;;  %v848_v62 = vor.u32 %v846_v55, %v844_v18  ;;  %v2390_v12 = vld [vmem:[%s3096_s3 + $0xd0] sm:$0xff] }
  0xf8   : > { %2088 = vmatmul.msk.bf16.vlgmr.msrb.gmra.mxu0 %vm889_vm0, %v845_v22  ;;  %v684_v30 = vpop.f32.mrf.mxu1  ;;  %v2742_v35 = vpop.f32.mrf.mxu3  ;;  %v652_v11 = vadd.f32 %v2632_v41, %v2657_v52  ;;  %1437 = vmatpush.bf16.msrb.mxu2 %v2390_v12  ;;  %v2389_v52 = vld [vmem:[%s3096_s3 + $0xc8] sm:$0xff] }
  0xf9   : > { %v2730_v24 = vpack.c.b16 %v825_v20, %v824_v59  ;;  %v758_v25 = vadd.f32 %v2691_v26, %v720_v21  ;;  %v685_v34 = vadd.f32 %v684_v30, %v647_v28  ;;  %v1584_v59 = vrot.slane %v2705_v1, 2  ;;  %v2396_v1 = vld [vmem:[%s3096_s3 + $0x100] sm:$0xff] }
  0xfb   : > { %v779_v29 = vmax.f32 %v758_v25, 0.0  ;;  %v1105_v32 = vshll.u32 %v2730_v24, 16  ;;  %v1109_v18 = vshrl.u32 %v2730_v24, 16  ;;  %v1211_v22 = vrot.slane %v2730_v24, 1 }
  0xfc   : > { %1438 = vmatpush.bf16.msrb.mxu2 %v2389_v52 }
  0xfd   : > { %v790_v26 = vpack.c.bf16 %v779_v29, %v779_v29  ;;  %v1107_v40 = vrot.slane %v1105_v32, 1  ;;  %v1304_v12 = vrot.slane %v1105_v32, 2 }
  0xfe   : > { %v722_v37 = vpop.f32.mrf.mxu2 }
  0xff   : > { %v826_v39 = vunpack.c.l.b16 %v790_v26  ;;  %v723_v42 = vadd.f32 %v722_v37, %v685_v34  ;;  %v1108_v13 = vsel %vm833_vm2, %v1103_v36, %v1107_v40  ;;  %v1111_v27 = vor.u32 %v1109_v18, %v1107_v40  ;;  %v2395_v36 = vld [vmem:[%s3096_s3 + $0xf8] sm:$0xff] }
 0x100   : > { %2164 = vmatmul.msk.bf16.vlgmr.msrb.gmra.mxu3 %vm889_vm0, %v1108_v13  ;;  %v686_v51 = vpop.f32.mrf.mxu1  ;;  %v2766_v58 = vpop.f32.mrf.mxu3 }
 0x101   : > { %v2753_v46 = vpack.c.b16 %v826_v39, %v825_v20  ;;  %v761_v47 = vadd.f32 %v2698_v38, %v723_v42  ;;  %v687_v57 = vadd.f32 %v686_v51, %v649_v49  ;;  %v2380_v20 = vld [vmem:[%s3096_s3 + $0x80] sm:$0xff]  ;;  %1538 = vmatpush.bf16.msra.mxu3 %v2395_v36 }
 0x102   : > { %1260 = vmatpush.bf16.msra.mxu0 %v2380_v20  ;;  %v2388_v42 = vld [vmem:[%s3096_s3 + $0xc0] sm:$0xff] }
 0x103   : > { %v780_v50 = vmax.f32 %v761_v47, 0.0  ;;  %2110 = vmatmul.msk.bf16.gmra.mxu1 %vm889_vm0, %v2753_v46  ;;  %v1005_v53 = vrot.slane %v2753_v46, 1  ;;  %v850_v38 = vshll.u32 %v2753_v46, 16  ;;  %v1585_v44 = vrot.slane %v2753_v46, 2  ;;  %1439 = vmatpush.bf16.msrb.mxu2 %v2388_v42 }
 0x104   : > { %v854_v48 = vshrl.u32 %v2753_v46, 16 }
 0x105   : > { %v791_v60 = vpack.c.bf16 %v780_v50, %v780_v50  ;;  %v2773_v61 = vsel %vm1001_vm1, %v1003_v8, %v1005_v53  ;;  %v852_v2 = vrot.slane %v850_v38, 1  ;;  %v2787_v4 = vsel %vm1583_vm3, %v1584_v59, %v1585_v44 }
 0x106   : > { %v724_v63 = vpop.f32.mrf.mxu2  ;;  %2137 = vmatmul.msk.bf16.gmra.mxu2 %vm889_vm0, %v2773_v61 }
 0x107   : > { %v827_v5 = vunpack.c.l.b16 %v791_v60  ;;  %v725_v6 = vadd.f32 %v724_v63, %v687_v57  ;;  %v853_v7 = vsel %vm833_vm2, %v848_v62, %v852_v2  ;;  %v856_v57 = vor.u32 %v854_v48, %v852_v2 }
 0x108   : > { %2089 = vmatmul.msk.bf16.gmra.mxu0 %vm889_vm0, %v853_v7  ;;  %v689_v17 = vpop.f32.mrf.mxu1  ;;  %v772_v23 = vpop.f32.mrf.mxu3 }
 0x109   : > { %v2791_v8 = vpack.c.b16 %v827_v5, %v826_v39  ;;  %v763_v10 = vadd.f32 %v2701_v54, %v725_v6  ;;  %v690_v54 = vadd.f32 %v689_v17, %v652_v11  ;;  %v654_v39 = vadd.f32 %v2632_v41, %v2662_v56  ;;  %v2394_v41 = vld [vmem:[%s3096_s3 + $0xf0] sm:$0xff]  ;;  %v2393_v6 = vld [vmem:[%s3096_s3 + $0xe8] sm:$0xff]  ;;  %v2392_v17 = vld [vmem:[%s3096_s3 + $0xe0] sm:$0xff] }
 0x10a   : > { %1539 = vmatpush.bf16.msra.mxu3 %v2394_v41  ;;  %v1300_v11 = vrot.slane %v1098_v31, 1 }
 0x10b   : > { %v781_v16 = vmax.f32 %v763_v10, 0.0  ;;  %v1113_v19 = vshll.u32 %v2791_v8, 16  ;;  %v1213_v21 = vrot.slane %v2791_v8, 1  ;;  %v1117_v2 = vshrl.u32 %v2791_v8, 16 }
 0x10c   : > { %v1301_v10 = vrot.slane %v1100_v15, 2 }
 0x10d   : > { %v792_v25 = vpack.c.bf16 %v781_v16, %v781_v16  ;;  %v1115_v28 = vrot.slane %v1113_v19, 1  ;;  %v2816_v30 = vsel %vm1001_vm1, %v1211_v22, %v1213_v21  ;;  %v1303_v16 = vrot.slane %v1109_v18, 1 }
 0x10e   : > { %v727_v29 = vpop.f32.mrf.mxu2  ;;  %1540 = vmatpush.bf16.msra.mxu3 %v2393_v6  ;;  %v1308_v32 = vrot.slane %v1113_v19, 2 }
 0x10f   : > { %v828_v33 = vunpack.c.l.b16 %v792_v25  ;;  %v728_v34 = vadd.f32 %v727_v29, %v690_v54  ;;  %v1116_v26 = vsel %vm833_vm2, %v1111_v27, %v1115_v28  ;;  %v1119_v23 = vor.u32 %v1117_v2, %v1115_v28 }
 0x110   : > { %2165 = vmatmul.msk.bf16.gmra.mxu3 %vm889_vm0, %v1116_v26  ;;  %v691_v45 = vpop.f32.mrf.mxu1  ;;  %v1307_v25 = vrot.slane %v1117_v2, 1 }
 0x111   : > { %v2823_v40 = vpack.c.b16 %v828_v33, %v827_v5  ;;  %v766_v37 = vadd.f32 %v2718_v14, %v728_v34  ;;  %v692_v56 = vadd.f32 %v691_v45, %v654_v39  ;;  %v2399_v5 = vld [vmem:[%s3096_s3 + $0x118] sm:$0xff]  ;;  %v1305_v34 = vor.u32 %v1304_v12, %v1303_v16 }
 0x112   : > { %1633 = vmatpush.bf16.msrb.mxu0 %v2399_v5  ;;  %1541 = vmatpush.bf16.msra.mxu3 %v2392_v17  ;;  %v1302_v39 = vor.u32 %v1301_v10, %v1300_v11  ;;  %v1309_v42 = vor.u32 %v1308_v32, %v1307_v25  ;;  %v1481_v25 = vrot.slane %v854_v48, 1  ;;  %v2397_v32 = vld [vmem:[%s3096_s3 + $0x108] sm:$0xff] }
 0x113   : > { %v782_v13 = vmax.f32 %v766_v37, 0.0  ;;  %2111 = vmatmul.msk.bf16.gmra.mxu1 %vm889_vm0, %v2823_v40  ;;  %v2834_v47 = vrot.slane %v2823_v40, 1  ;;  %v858_v14 = vshll.u32 %v2823_v40, 16  ;;  %v1587_v49 = vrot.slane %v2823_v40, 2 }
 0x114   : > { %v862_v36 = vshrl.u32 %v2823_v40, 16  ;;  %v1310_v40 = vsel %vm1299_vm4, %v1305_v34, %v1309_v42 }
 0x115   : > { %v793_v50 = vpack.c.bf16 %v782_v13, %v782_v13  ;;  %v2846_v51 = vsel %vm1001_vm1, %v1005_v53, %v2834_v47  ;;  %v2850_v59 = vrot.slane %v858_v14, 1  ;;  %v2859_v62 = vsel %vm1583_vm3, %v1585_v44, %v1587_v49 }
 0x116   : > { %v729_v60 = vpop.f32.mrf.mxu2  ;;  %2138 = vmatmul.msk.bf16.gmra.mxu2 %vm889_vm0, %v2846_v51 }
 0x117   : > { %v1092_v63 = vunpack.c.l.b16 %v793_v50  ;;  %v730_v53 = vadd.f32 %v729_v60, %v692_v56  ;;  %v861_v3 = vsel %vm833_vm2, %v856_v57, %v2850_v59  ;;  %v1306_v56 = vsel %vm1299_vm4, %v1302_v39, %v1305_v34 }
 0x118   : > { %2090 = vmatmul.msk.bf16.gmra.mxu0 %vm889_vm0, %v861_v3  ;;  %v694_v54 = vpop.f32.mrf.mxu1  ;;  %v1485_v50 = vrot.slane %v862_v36, 1  ;;  %v864_v10 = vor.u32 %v862_v36, %v2850_v59 }
 0x119   : > { %v2871_v7 = vpack.c.b16 %v1092_v63, %v828_v33  ;;  %v768_v44 = vadd.f32 %v2742_v35, %v730_v53  ;;  %v695_v31 = vadd.f32 %v694_v54, %v2635_v43 }
 0x11b   : > { %v783_v20 = vmax.f32 %v768_v44, 0.0  ;;  %v1121_v35 = vshll.u32 %v2871_v7, 16  ;;  %v1125_v52 = vshrl.u32 %v2871_v7, 16  ;;  %v1215_v15 = vrot.slane %v2871_v7, 1 }
 0x11d   : > { %v794_v18 = vpack.c.bf16 %v783_v20, %v783_v20  ;;  %v1123_v27 = vrot.slane %v1121_v35, 1  ;;  %v1311_v29 = vrot.slane %v1125_v52, 1  ;;  %v1312_v33 = vrot.slane %v1121_v35, 2  ;;  %v2398_v20 = vld [vmem:[%s3096_s3 + $0x110] sm:$0xff] }
 0x11e   : > { %v732_v26 = vpop.f32.mrf.mxu2  ;;  %v2895_v43 = vsel %vm1001_vm1, %v1213_v21, %v1215_v15  ;;  %v1486_v21 = vrot.slane %v858_v14, 2  ;;  %1634 = vmatpush.bf16.msrb.mxu0 %v2398_v20 }
 0x11f   : > { %v1398_v28 = vunpack.c.l.b16 %v794_v18  ;;  %v733_v37 = vadd.f32 %v732_v26, %v695_v31  ;;  %v1124_v19 = vsel %vm833_vm2, %v1119_v23, %v1123_v27  ;;  %v1313_v13 = vor.u32 %v1312_v33, %v1311_v29 }
 0x120   : > { %2166 = vmatmul.msk.bf16.gmra.mxu3 %vm889_vm0, %v1124_v19  ;;  %v696_v53 = vpop.f32.mrf.mxu1  ;;  %v1487_v16 = vor.u32 %v1486_v21, %v1485_v50  ;;  %v1127_v31 = vor.u32 %v1125_v52, %v1123_v27  ;;  %v1482_v23 = vrot.slane %v850_v38, 2  ;;  %vm1734_vm2 = vcmask 1044484  }
 0x121   : > { %v1399_v45 = vpack.c.b16 %v1398_v28, %v1092_v63  ;;  %v771_v41 = vadd.f32 %v2766_v58, %v733_v37  ;;  %v1314_v8 = vsel %vm1299_vm4, %v1309_v42, %v1313_v13 }
 0x122   : > { %1635 = vmatpush.bf16.msrb.mxu0 %v2397_v32  ;;  %v1483_v38 = vor.u32 %v1482_v23, %v1481_v25 }
 0x123   : > { %v784_v57 = vmax.f32 %v771_v41, 0.0  ;;  %2220 = vmatmul.msk.bf16.vlgmr.msrb.gmra.mxu1 %vm889_vm0, %v1306_v56  ;;  %v1400_v60 = vrot.slane %v1399_v45, 1  ;;  %v1490_v3 = vshrl.u32 %v1399_v45, 16  ;;  %v1493_v2 = vshll.u32 %v1399_v45, 16 }
 0x124   : > { %v1589_v5 = vrot.slane %v1399_v45, 2 }
 0x125   : > { %v795_v6 = vpack.c.bf16 %v784_v57, %v784_v57  ;;  %v1401_v63 = vsel %vm1001_vm1, %v2834_v47, %v1400_v60  ;;  %v1492_v44 = vrot.slane %v1490_v3, 1  ;;  %v1495_v58 = vrot.slane %v1493_v2, 2 }
 0x126   : > { %2139 = vmatmul.msk.bf16.gmra.mxu2 %vm889_vm0, %v2834_v47  ;;  %v734_v14 = vpop.f32.mrf.mxu2  ;;  %v1590_v11 = vsel %vm1583_vm3, %v1587_v49, %v1589_v5  ;;  %v1210_v49 = vrot.slane %v2703_v0, 1  ;;  %v1479_v0 = vrot.slane %v842_v9, 2  ;;  %1636 = vmatpush.bf16.msrb.mxu0 %v2396_v1  ;;  %v1488_v9 = vsel %vm1299_vm4, %v1483_v38, %v1487_v16 }
 0x127   : > { %v1581_v12 = vunpack.c.l.b16 %v795_v6  ;;  %v1496_v17 = vor.u32 %v1495_v58, %v1492_v44 }
 0x128   : > { %2091 = vmatmul.msk.bf16.gmra.mxu0 %vm889_vm0, %v864_v10  ;;  %v1212_v52 = vsel %vm1001_vm1, %v1210_v49, %v1211_v22  ;;  %vm1733_vm1 = vcmask 1040384  }
 0x129   : > { %v1582_v54 = vpack.c.b16 %v1581_v12, %v1581_v12  ;;  %v1497_v35 = vsel %vm1299_vm4, %v1487_v16, %v1496_v17  ;;  %vm1735_vm5 = vmor %vm1733_vm1, %vm1734_vm2  ;;  %vm1776_vm1 = vcmask 516096   ;;  %vm1789_vm2 = vsmask.f32 256 }
 0x12b   : > { %v1591_v47 = vrot.slane %v1582_v54, 2 }
 0x12d   : > { %v1592_v59 = vsel %vm1583_vm3, %v1589_v5, %v1591_v47  ;;  %vm1742_vm3 = vcmask 519170  }
 0x130   : > { %2167 = vmatmul.msk.bf16.gmra.mxu3 %vm889_vm0, %v1127_v31 }
 0x133   : > { %2221 = vmatmul.msk.bf16.gmra.mxu1 %vm889_vm0, %v1310_v40 }
 0x136   : > { %2248 = vmatmul.msk.bf16.vlgmr.msrb.gmra.mxu2 %vm889_vm0, %v2773_v61  ;;  %v1478_v61 = vrot.slane %v846_v55, 1 }
 0x138   : > { %2192 = vmatmul.msk.bf16.vlgmr.msra.gmra.mxu0 %vm889_vm0, %v1212_v52  ;;  %v1480_v46 = vor.u32 %v1479_v0, %v1478_v61 }
 0x13a   : > { %v1484_v48 = vsel %vm1299_vm4, %v1480_v46, %v1483_v38  ;;  %v3016_v38 = vld [vmem:[%s3097_s4] ss:$0 sm:$0xff]  ;;  %vm1743_vm4 = vsmask.f32 7946 }
 0x140   : > { %2276 = vmatmul.msk.bf16.vlgmr.msra.gmra.mxu3 %vm889_vm0, %v1484_v48 }
 0x143   : > { %2222 = vmatmul.msk.bf16.gmra.mxu1 %vm889_vm0, %v1314_v8 }
 0x146   : > { %2249 = vmatmul.msk.bf16.gmra.mxu2 %vm889_vm0, %v2846_v51 }
 0x148   : > { %2193 = vmatmul.msk.bf16.gmra.mxu0 %vm889_vm0, %v2816_v30 }
 0x150   : > { %2277 = vmatmul.msk.bf16.gmra.mxu3 %vm889_vm0, %v1488_v9 }
 0x153   : > { %2223 = vmatmul.msk.bf16.gmra.mxu1 %vm889_vm0, %v1313_v13 }
 0x156   : > { %2250 = vmatmul.msk.bf16.gmra.mxu2 %vm889_vm0, %v1401_v63 }
 0x158   : > { %2194 = vmatmul.msk.bf16.gmra.mxu0 %vm889_vm0, %v2895_v43 }
 0x160   : > { %2278 = vmatmul.msk.bf16.gmra.mxu3 %vm889_vm0, %v1497_v35  ;;  %v972_v51 = vpop.f32.mrf.mxu1 }
 0x166   : > { %2251 = vmatmul.msk.bf16.gmra.mxu2 %vm889_vm0, %v1400_v60 }
 0x168   : > { %2195 = vmatmul.msk.bf16.gmra.mxu0 %vm889_vm0, %v1215_v15  ;;  %v974_v7 = vpop.f32.mrf.mxu1 }
 0x170   : > { %2279 = vmatmul.msk.bf16.gmra.mxu3 %vm889_vm0, %v1496_v17 }
 0x175   : > { %v911_v24 = vpop.f32.mrf.mxu0 }
 0x178   : > { %2304 = vmatmul.msk.bf16.vlgmr.msrb.gmra.mxu0 %vm889_vm0, %v2787_v4  ;;  %v977_v4 = vpop.f32.mrf.mxu1 }
 0x179   : > { %v1054_v18 = vpop.f32.mrf.mxu2 }
 0x17d   : > { %v913_v55 = vpop.f32.mrf.mxu0 }
 0x17e   : > { %v975_v47 = vadd.f32 %v974_v7, %v913_v55 }
 0x181   : > { %v1056_v15 = vpop.f32.mrf.mxu2 }
 0x182   : > { %v1075_v40 = vadd.f32 %v1056_v15, %v975_v47  ;;  %v1697_v15 = vld [vmem:[%s3021_s30] sm:$0xf] }
 0x183   : > { %v1173_v27 = vpop.f32.mrf.mxu3 }
 0x185   : > { %v916_v22 = vpop.f32.mrf.mxu0 }
 0x186   : > { %v978_v32 = vadd.f32 %v977_v4, %v916_v22 }
 0x188   : > { %2305 = vmatmul.msk.bf16.gmra.mxu0 %vm889_vm0, %v2859_v62  ;;  %v979_v62 = vpop.f32.mrf.mxu1 }
 0x189   : > { %v1059_v26 = vpop.f32.mrf.mxu2 }
 0x18a   : > { %v1076_v46 = vadd.f32 %v1059_v26, %v978_v32 }
 0x18b   : > { %v1175_v33 = vpop.f32.mrf.mxu3 }
 0x18c   : > { %v1194_v23 = vadd.f32 %v1175_v33, %v1075_v40 }
 0x18d   : > { %v2964_v30 = vpop.f32.mrf.mxu0 }
 0x18e   : > { %v980_v33 = vadd.f32 %v979_v62, %v2964_v30 }
 0x190   : > { %v2980_v42 = vpop.f32.mrf.mxu1 }
 0x191   : > { %v2976_v37 = vpop.f32.mrf.mxu2 }
 0x193   : > { %v1178_v43 = vpop.f32.mrf.mxu3 }
 0x194   : > { %v1195_v55 = vadd.f32 %v1178_v43, %v1076_v46 }
 0x195   : > { %v2966_v29 = vpop.f32.mrf.mxu0 }
 0x196   : > { %v983_v62 = vadd.f32 %v2980_v42, %v2966_v29 }
 0x198   : > { %2306 = vmatmul.msk.bf16.gmra.mxu0 %vm889_vm0, %v1590_v11  ;;  %v2986_v56 = vpop.f32.mrf.mxu1  ;;  %v973_v11 = vadd.f32 %v972_v51, %v911_v24 }
 0x199   : > { %v2982_v13 = vpop.f32.mrf.mxu2 }
 0x19a   : > { %v1074_v16 = vadd.f32 %v1054_v18, %v973_v11 }
 0x19b   : > { %v2978_v19 = vpop.f32.mrf.mxu3 }
 0x19c   : > { %v1193_v17 = vadd.f32 %v1173_v27, %v1074_v16 }
 0x19d   : > { %v2969_v34 = vpop.f32.mrf.mxu0 }
 0x19e   : > { %v985_v46 = vadd.f32 %v2986_v56, %v2969_v34 }
 0x1a0   : > { %v2992_v57 = vpop.f32.mrf.mxu1 }
 0x1a1   : > { %v2988_v50 = vpop.f32.mrf.mxu2 }
 0x1a3   : > { %v2984_v45 = vpop.f32.mrf.mxu3 }
 0x1a5   : > { %v2971_v36 = vpop.f32.mrf.mxu0 }
 0x1a6   : > { %v988_v56 = vadd.f32 %v2992_v57, %v2971_v36 }
 0x1a8   : > { %2307 = vmatmul.msk.bf16.gmra.mxu0 %vm889_vm0, %v1592_v59  ;;  %v2998_v2 = vpop.f32.mrf.mxu1  ;;  %vm1728_vm0 = vmand %vm1711_vm11, %vm1727_vm14 }
 0x1a9   : > { %v2994_v60 = vpop.f32.mrf.mxu2 }
 0x1ab   : > { %v2990_v8 = vpop.f32.mrf.mxu3 }
 0x1ad   : > { %v2974_v28 = vpop.f32.mrf.mxu0 }
 0x1b0   : > { %v1360_v58 = vpop.f32.mrf.mxu1 }
 0x1b1   : > { %v3002_v6 = vpop.f32.mrf.mxu2 }
 0x1b3   : > { %v2996_v3 = vpop.f32.mrf.mxu3 }
 0x1b5   : > { %v1262_v39 = vpop.f32.mrf.mxu0 }
 0x1b6   : > { %v1282_v54 = vadd.f32 %v1262_v39, %v1193_v17 }
 0x1b8   : > { %v1362_v20 = vpop.f32.mrf.mxu1  ;;  %v1380_v49 = vadd.f32 %v1360_v58, %v1282_v54  ;;  %v1077_v58 = vadd.f32 %v2976_v37, %v980_v33 }
 0x1b9   : > { %v1441_v10 = vpop.f32.mrf.mxu2 }
 0x1ba   : > { %v1461_v25 = vadd.f32 %v1441_v10, %v1380_v49  ;;  %v1196_v16 = vadd.f32 %v2978_v19, %v1077_v58  ;;  %v1078_v19 = vadd.f32 %v2982_v13, %v983_v62 }
 0x1bb   : > { %v3004_v63 = vpop.f32.mrf.mxu3 }
 0x1bd   : > { %v1264_v41 = vpop.f32.mrf.mxu0 }
 0x1be   : > { %v1283_v52 = vadd.f32 %v1264_v41, %v1194_v23 }
 0x1c0   : > { %v1365_v0 = vpop.f32.mrf.mxu1  ;;  %v1381_v9 = vadd.f32 %v1362_v20, %v1283_v52 }
 0x1c1   : > { %v1443_v35 = vpop.f32.mrf.mxu2 }
 0x1c2   : > { %v1462_v27 = vadd.f32 %v1443_v35, %v1381_v9 }
 0x1c3   : > { %v1543_v14 = vpop.f32.mrf.mxu3 }
 0x1c4   : > { %v1563_v61 = vadd.f32 %v1543_v14, %v1461_v25  ;;  %v1197_v25 = vadd.f32 %v2984_v45, %v1078_v19  ;;  %v1079_v45 = vadd.f32 %v2988_v50, %v985_v46 }
 0x1c5   : > { %v1267_v21 = vpop.f32.mrf.mxu0 }
 0x1c6   : > { %v1284_v18 = vadd.f32 %v1267_v21, %v1195_v55 }
 0x1c8   : > { %v1367_v43 = vpop.f32.mrf.mxu1  ;;  %v1382_v39 = vadd.f32 %v1365_v0, %v1284_v18  ;;  %v1198_v18 = vadd.f32 %v2990_v8, %v1079_v45  ;;  %v1080_v8 = vadd.f32 %v2994_v60, %v988_v56 }
 0x1c9   : > { %v1446_v48 = vpop.f32.mrf.mxu2 }
 0x1ca   : > { %v1463_v17 = vadd.f32 %v1446_v48, %v1382_v39  ;;  %v1199_v57 = vadd.f32 %v2996_v3, %v1080_v8 }
 0x1cb   : > { %v1545_v59 = vpop.f32.mrf.mxu3 }
 0x1cc   : > { %v1564_v4 = vadd.f32 %v1545_v59, %v1462_v27 }
 0x1cd   : > { %v1269_v53 = vpop.f32.mrf.mxu0 }
 0x1ce   : > { %v1285_v54 = vadd.f32 %v1269_v53, %v1196_v16 }
 0x1d0   : > { %v1383_v59 = vadd.f32 %v1367_v43, %v1285_v54  ;;  %v1370_v53 = vpop.f32.mrf.mxu1  ;;  %v990_v54 = vadd.f32 %v2998_v2, %v2974_v28 }
 0x1d1   : > { %v1448_v11 = vpop.f32.mrf.mxu2 }
 0x1d2   : > { %v1464_v0 = vadd.f32 %v1448_v11, %v1383_v59 }
 0x1d3   : > { %v1548_v51 = vpop.f32.mrf.mxu3 }
 0x1d4   : > { %v1565_v35 = vadd.f32 %v1548_v51, %v1463_v17 }
 0x1d5   : > { %v3000_v5 = vpop.f32.mrf.mxu0 }
 0x1d8   : > { %v1372_v27 = vpop.f32.mrf.mxu1 }
 0x1d9   : > { %v1451_v42 = vpop.f32.mrf.mxu2 }
 0x1db   : > { %v1550_v20 = vpop.f32.mrf.mxu3 }
 0x1dd   : > { %v3006_v44 = vpop.f32.mrf.mxu0 }
 0x1e1   : > { %v1453_v50 = vpop.f32.mrf.mxu2 }
 0x1e3   : > { %v1553_v48 = vpop.f32.mrf.mxu3 }
 0x1e5   : > { %v3008_v12 = vpop.f32.mrf.mxu0 }
 0x1e6   : > { %v1288_v16 = vadd.f32 %v3008_v12, %v1199_v57 }
 0x1e9   : > { %v1456_v12 = vpop.f32.mrf.mxu2 }
 0x1eb   : > { %v1555_v43 = vpop.f32.mrf.mxu3 }
 0x1ed   : > { %v3010_v31 = vpop.f32.mrf.mxu0 }
 0x1f3   : > { %v1558_v28 = vpop.f32.mrf.mxu3 }
 0x1f5   : > { %v1638_v1 = vpop.f32.mrf.mxu0 }
 0x1f6   : > { %v1658_v24 = vadd.f32 %v1638_v1, %v1563_v61  ;;  %v1286_v61 = vadd.f32 %v3000_v5, %v1197_v25  ;;  %v1566_v1 = vadd.f32 %v1550_v20, %v1464_v0 }
 0x1f8   : > { %v1670_v22 = vadd.f32 %v3016_v38, %v1658_v24  ;;  %v1384_v55 = vadd.f32 %v1370_v53, %v1286_v61 }
 0x1fa   : > { %v1678_v7 = vmax.f32 %v1670_v22, 0.0 }
 0x1fb   : > { %v1560_v45 = vpop.f32.mrf.mxu3 }
 0x1fc   : > { %v1686_v26 = vpack.c.bf16 %v1678_v7, %v1678_v7  ;;  %v1287_v7 = vadd.f32 %v3006_v44, %v1198_v18 }
 0x1fd   : > { %v1640_v41 = vpop.f32.mrf.mxu0 }
 0x1fe   : > { %v1698_v10 = vsel %vm1696_vm7, %v1686_v26, %v1697_v15  ;;  %v1659_v14 = vadd.f32 %v1640_v41, %v1564_v4  ;;  %v1465_v15 = vadd.f32 %v1451_v42, %v1384_v55  ;;  %v1385_v26 = vadd.f32 %v1372_v27, %v1287_v7  ;;  %vm1744_vm7 = vmand %vm1742_vm3, %vm1743_vm4 }
 0x1ff   : > { %1699 = vst [vmem:[%s3021_s30] sm:$0xf] %v1698_v10  ;;  %v1729_v10 = vld [vmem:[%s3021_s30 + $0x8] sm:$0x7] }
 0x200   : > { %v1671_v21 = vadd.f32 %v3016_v38, %v1659_v14  ;;  %v1567_v33 = vadd.f32 %v1553_v48, %v1465_v15  ;;  %v1466_v11 = vadd.f32 %v1453_v50, %v1385_v26 }
 0x202   : > { %v1679_v30 = vmax.f32 %v1671_v21, 0.0  ;;  %v1568_v3 = vadd.f32 %v1555_v43, %v1466_v11  ;;  %v1791_v43 = vld [vmem:[%s3021_s30 + $0x18] sm:$0x1] }
 0x204   : > { %v1687_v37 = vpack.c.bf16 %v1679_v30, %v1679_v30  ;;  %v1375_v30 = vpop.f32.mrf.mxu1 }
 0x205   : > { %v1643_v47 = vpop.f32.mrf.mxu0 }
 0x206   : > { %v1701_v40 = vrot.slane %v1687_v37, 5  ;;  %v1708_v49 = vld [vmem:[%s3021_s30] sm:$0x8]  ;;  %v1660_v23 = vadd.f32 %v1643_v47, %v1565_v35  ;;  %v1081_v35 = vadd.f32 %v3002_v6, %v990_v54  ;;  %v1386_v37 = vadd.f32 %v1375_v30, %v1288_v16 }
 0x208   : > { %v1702_v52 = vrot.slane %v1701_v40, 4  ;;  %v1709_v32 = vsel %vm1707_vm10, %v1701_v40, %v1708_v49  ;;  %v1672_v29 = vadd.f32 %v3016_v38, %v1660_v23  ;;  %v1200_v2 = vadd.f32 %v3004_v63, %v1081_v35 }
 0x209   : > { %1710 = vst [vmem:[%s3021_s30] sm:$0x8] %v1709_v32  ;;  %v1467_v53 = vadd.f32 %v1456_v12, %v1386_v37  ;;  %vm1760_vm10 = vcmask 1042432  }
 0x20a   : > { %1712 = vst.msk [vmem:[%s3021_s30 + $0x4] sm:$0x7] %vm1711_vm11, %v1702_v52  ;;  %v1680_v13 = vmax.f32 %v1672_v29, 0.0  ;;  %v1289_v25 = vadd.f32 %v3010_v31, %v1200_v2  ;;  %v1755_v29 = vld [vmem:[%s3021_s30 + $0x10] sm:$0x3]  ;;  %vm1761_vm11 = vcmask 1046532  }
 0x20b   : > { %v1569_v42 = vadd.f32 %v1558_v28, %v1467_v53  ;;  %vm1762_vm14 = vmor %vm1760_vm10, %vm1761_vm11 }
 0x20c   : > { %v1688_v9 = vpack.c.bf16 %v1680_v13, %v1680_v13  ;;  %v1377_v61 = vpop.f32.mrf.mxu1 }
 0x20d   : > { %v1645_v24 = vpop.f32.mrf.mxu0  ;;  %v1387_v63 = vadd.f32 %v1377_v61, %v1289_v25 }
 0x20e   : > { %v1718_v51 = vrot.slane %v1688_v9, 6  ;;  %v1661_v22 = vadd.f32 %v1645_v24, %v1566_v1  ;;  %v1458_v1 = vpop.f32.mrf.mxu2 }
 0x20f   : > { %v1468_v24 = vadd.f32 %v1458_v1, %v1387_v63 }
 0x210   : > { %1725 = vst.msk [vmem:[%s3021_s30 + $0x4] sm:$0x8] %vm1705_vm8, %v1718_v51  ;;  %v1673_v5 = vadd.f32 %v3016_v38, %v1661_v22  ;;  %v1719_v41 = vrot.slane %v1718_v51, 4  ;;  %vm1753_vm8 = vsmask.f32 1280 }
 0x211   : > { %vm1754_vm9 = vmand %vm1748_vm6, %vm1753_vm8  ;;  %v1570_v55 = vadd.f32 %v1560_v45, %v1468_v24 }
 0x212   : > { %v1681_v34 = vmax.f32 %v1673_v5, 0.0 }
 0x214   : > { %v1689_v4 = vpack.c.bf16 %v1681_v34, %v1681_v34 }
 0x215   : > { %v1648_v44 = vpop.f32.mrf.mxu0 }
 0x216   : > { %v1720_v58 = vrot.slane %v1689_v4, 6  ;;  %v1662_v36 = vadd.f32 %v1648_v44, %v1567_v33  ;;  %v1736_v17 = vrot.slane %v1689_v4, 7 }
 0x218   : > { %v1721_v14 = vsel %vm3052_vm15, %v1719_v41, %v1720_v58  ;;  %v1674_v60 = vadd.f32 %v3016_v38, %v1662_v36  ;;  %v1737_v19 = vrot.slane %v1736_v17, 4 }
 0x219   : > { %v1730_v21 = vsel %vm1728_vm0, %v1721_v14, %v1729_v10  ;;  %vm1772_vm0 = vmand %vm1770_vm12, %vm1771_vm13 }
 0x21a   : > { %1731 = vst [vmem:[%s3021_s30 + $0x8] sm:$0x7] %v1730_v21  ;;  %v1682_v20 = vmax.f32 %v1674_v60, 0.0 }
 0x21c   : > { %v1690_v62 = vpack.c.bf16 %v1682_v20, %v1682_v20 }
 0x21d   : > { %v1650_v47 = vpop.f32.mrf.mxu0 }
 0x21e   : > { %v1738_v59 = vrot.slane %v1690_v62, 7  ;;  %1751 = vst.msk [vmem:[%s3021_s30 + $0xc] sm:$0xc] %vm1742_vm3, %v1690_v62  ;;  %v1663_v40 = vadd.f32 %v1650_v47, %v1568_v3  ;;  %vm1790_vm3 = vmand %vm1776_vm1, %vm1789_vm2 }
 0x220   : > { %v1739_v6 = vsel %vm1735_vm5, %v1737_v19, %v1738_v59  ;;  %v1675_v49 = vadd.f32 %v3016_v38, %v1663_v40 }
 0x221   : > { %v1745_v23 = vld [vmem:[%s3021_s30 + $0x8] sm:$0xc]  ;;  %1749 = vst.msk [vmem:[%s3021_s30 + $0xc] sm:$0x3] %vm1748_vm6, %v1739_v6 }
 0x222   : > { %v1746_v52 = vsel %vm1744_vm7, %v1736_v17, %v1745_v23  ;;  %v1683_v32 = vmax.f32 %v1675_v49, 0.0 }
 0x223   : > { %1747 = vst [vmem:[%s3021_s30 + $0x8] sm:$0xc] %v1746_v52 }
 0x224   : > { %v1691_v0 = vpack.c.bf16 %v1683_v32, %v1683_v32 }
 0x225   : > { %v1653_v13 = vpop.f32.mrf.mxu0 }
 0x226   : > { %v1756_v46 = vsel %vm1754_vm9, %v1691_v0, %v1755_v29  ;;  %v1664_v48 = vadd.f32 %v1653_v13, %v1569_v42  ;;  %v2308_v18 = vrot.slane %v1691_v0, 9 }
 0x227   : > { %1757 = vst [vmem:[%s3021_s30 + $0x10] sm:$0x3] %v1756_v46 }
 0x228   : > { %v1676_v9 = vadd.f32 %v3016_v38, %v1664_v48 }
 0x22a   : > { %v1684_v31 = vmax.f32 %v1676_v9, 0.0 }
 0x22c   : > { %v1692_v51 = vpack.c.bf16 %v1684_v31, %v1684_v31 }
 0x22d   : > { %v1655_v22 = vpop.f32.mrf.mxu0 }
 0x22e   : > { %v1765_v5 = vrot.slane %v1692_v51, 5  ;;  %v1665_v27 = vadd.f32 %v1655_v22, %v1570_v55  ;;  %v1773_v34 = vld [vmem:[%s3021_s30 + $0x10] sm:$0xe]  ;;  %v2309_v8 = vrot.slane %v1692_v51, 10 }
 0x230   : > { %v1766_v7 = vsel %vm1762_vm14, %v2308_v18, %v1765_v5  ;;  %v1767_v15 = vrot.slane %v1765_v5, 4  ;;  %v1677_v56 = vadd.f32 %v3016_v38, %v1665_v27 }
 0x231   : > { %v1774_v50 = vsel %vm1772_vm0, %v1766_v7, %v1773_v34 }
 0x232   : > { %1775 = vst [vmem:[%s3021_s30 + $0x10] sm:$0xe] %v1774_v50  ;;  %v1685_v33 = vmax.f32 %v1677_v56, 0.0 }
 0x233   : > { %1777 = vst.msk [vmem:[%s3021_s30 + $0x14] sm:$0x1] %vm1776_vm1, %v1767_v15 }
 0x234   : > { %v1693_v4 = vpack.c.bf16 %v1685_v33, %v1685_v33 }
 0x236   : > { %v1781_v26 = vrot.slane %v1693_v4, 6 }
 0x238   : > { %v1782_v44 = vsel %vm3052_vm15, %v2309_v8, %v1781_v26  ;;  %v1783_v41 = vrot.slane %v1781_v26, 4 }
 0x239   : > { %1787 = vst.msk [vmem:[%s3021_s30 + $0x14] sm:$0xe] %vm1770_vm12, %v1782_v44 }
 0x23a   : > { %v1792_v58 = vsel %vm1790_vm3, %v1783_v41, %v1791_v43 }
 0x23b   : > { %1793 = vst [vmem:[%s3021_s30 + $0x18] sm:$0x1] %v1792_v58 }
 0x23c PF: > { %s15_s18 = sadd.s32 1, %s2434_s18  }
 0x23d   : > { %p12_p4 = scmp.ge.s32.totalorder %s15_s18, 4  }
 0x23f   :  { %14 = sbr.rel (!%p12_p4) target bundleno = 1 (0x1), region = 78 }

// kernel: qnet_forward_pallas.5
= control target key start
LH: loop header
LB: loop body
LE: loop exit
PB: predicated region body
PF: predicated region fallthrough
CT: control target
= control target key end

     0   :  { %s15618_s0 = inlined_call_operand.vmem [shape: bf16[2,3136], index: 0, kind: input, shape index: {}]   ;;  %s15619_s1 = inlined_call_operand.vmem [shape: bf16[3136,512], index: 1, kind: input, shape index: {}]   ;;  %s15620_s2 = inlined_call_operand.vmem [shape: f32[1,512], index: 2, kind: input, shape index: {}]   ;;  %s15621_s3 = inlined_call_operand.vmem [shape: bf16[512,128], index: 3, kind: input, shape index: {}]   ;;  %s15622_s4 = inlined_call_operand.vmem [shape: f32[1,128], index: 4, kind: input, shape index: {}]   ;;  %s15623_s5 = inlined_call_operand.hbm [shape: f32[2,128], index: 5, kind: output, shape index: {}]  }
   0x1   :  { %v6551_v0 = vld [vmem:[%s15619_s1 + $0xe0] sm:$0xf]  ;;  %v9735_v1 = vld [vmem:[%s15619_s1 + $0xec] sm:$0xf0] }
   0x2   :  { %v6679_v2 = vld [vmem:[%s15619_s1 + $0x1e0] sm:$0xf]  ;;  %v6552_v3 = vor.u32 %v9735_v1, %v6551_v0  ;;  %v9767_v4 = vld [vmem:[%s15619_s1 + $0x1ec] sm:$0xf0] }
   0x3   :  { %v6807_v5 = vld [vmem:[%s15619_s1 + $0x2e0] sm:$0xf]  ;;  %v9799_v6 = vld [vmem:[%s15619_s1 + $0x2ec] sm:$0xf0]  ;;  %v6680_v7 = vor.u32 %v9767_v4, %v6679_v2 }
   0x4   :  { %v6808_v8 = vor.u32 %v9799_v6, %v6807_v5  ;;  %v6935_v9 = vld [vmem:[%s15619_s1 + $0x3e0] sm:$0xf]  ;;  %v9831_v10 = vld [vmem:[%s15619_s1 + $0x3ec] sm:$0xf0]  ;;  %4800 = vmatpush.bf16.msra.mxu0 %v6552_v3 }
   0x5   :  { %v6535_v11 = vld [vmem:[%s15619_s1 + $0xc0] sm:$0xf]  ;;  %v6936_v12 = vor.u32 %v9831_v10, %v6935_v9  ;;  %v9731_v13 = vld [vmem:[%s15619_s1 + $0xcc] sm:$0xf0]  ;;  %4813 = vmatpush.bf16.msra.mxu1 %v6680_v7 }
   0x6   :  { %v6663_v14 = vld [vmem:[%s15619_s1 + $0x1c0] sm:$0xf]  ;;  %v9763_v15 = vld [vmem:[%s15619_s1 + $0x1cc] sm:$0xf0]  ;;  %4826 = vmatpush.bf16.msra.mxu2 %v6808_v8  ;;  %v6536_v16 = vor.u32 %v9731_v13, %v6535_v11 }
   0x7   :  { %v6664_v17 = vor.u32 %v9763_v15, %v6663_v14  ;;  %v6791_v18 = vld [vmem:[%s15619_s1 + $0x2c0] sm:$0xf]  ;;  %v9795_v19 = vld [vmem:[%s15619_s1 + $0x2cc] sm:$0xf0]  ;;  %4839 = vmatpush.bf16.msra.mxu3 %v6936_v12 }
   0x8   :  { %v6919_v20 = vld [vmem:[%s15619_s1 + $0x3c0] sm:$0xf]  ;;  %v6792_v21 = vor.u32 %v9795_v19, %v6791_v18  ;;  %v9827_v22 = vld [vmem:[%s15619_s1 + $0x3cc] sm:$0xf0]  ;;  %4801 = vmatpush.bf16.msra.mxu0 %v6536_v16 }
   0x9   :  { %v6519_v23 = vld [vmem:[%s15619_s1 + $0xa0] sm:$0xf]  ;;  %v9727_v24 = vld [vmem:[%s15619_s1 + $0xac] sm:$0xf0]  ;;  %v6920_v25 = vor.u32 %v9827_v22, %v6919_v20  ;;  %4814 = vmatpush.bf16.msra.mxu1 %v6664_v17 }
   0xa   :  { %v6647_v26 = vld [vmem:[%s15619_s1 + $0x1a0] sm:$0xf]  ;;  %v9759_v27 = vld [vmem:[%s15619_s1 + $0x1ac] sm:$0xf0]  ;;  %v6520_v29 = vor.u32 %v9727_v24, %v6519_v23  ;;  %4827 = vmatpush.bf16.msra.mxu2 %v6792_v21 }
   0xb   :  { %v6775_v28 = vld [vmem:[%s15619_s1 + $0x2a0] sm:$0xf]  ;;  %v9791_v30 = vld [vmem:[%s15619_s1 + $0x2ac] sm:$0xf0]  ;;  %v6648_v33 = vor.u32 %v9759_v27, %v6647_v26  ;;  %4840 = vmatpush.bf16.msra.mxu3 %v6920_v25 }
   0xc   :  { %v6903_v31 = vld [vmem:[%s15619_s1 + $0x3a0] sm:$0xf]  ;;  %v9823_v32 = vld [vmem:[%s15619_s1 + $0x3ac] sm:$0xf0]  ;;  %v6776_v34 = vor.u32 %v9791_v30, %v6775_v28  ;;  %4802 = vmatpush.bf16.msra.mxu0 %v6520_v29 }
   0xd   :  { %v6503_v35 = vld [vmem:[%s15619_s1 + $0x80] sm:$0xf]  ;;  %v9723_v36 = vld [vmem:[%s15619_s1 + $0x8c] sm:$0xf0]  ;;  %v6904_v38 = vor.u32 %v9823_v32, %v6903_v31  ;;  %4815 = vmatpush.bf16.msra.mxu1 %v6648_v33 }
   0xe   :  { %v6631_v37 = vld [vmem:[%s15619_s1 + $0x180] sm:$0xf]  ;;  %v9755_v39 = vld [vmem:[%s15619_s1 + $0x18c] sm:$0xf0]  ;;  %v6504_v44 = vor.u32 %v9723_v36, %v6503_v35  ;;  %4828 = vmatpush.bf16.msra.mxu2 %v6776_v34 }
   0xf   :  { %v6759_v40 = vld [vmem:[%s15619_s1 + $0x280] sm:$0xf]  ;;  %v9787_v41 = vld [vmem:[%s15619_s1 + $0x28c] sm:$0xf0]  ;;  %v6632_v45 = vor.u32 %v9755_v39, %v6631_v37  ;;  %4841 = vmatpush.bf16.msra.mxu3 %v6904_v38 }
  0x10   :  { %v6887_v42 = vld [vmem:[%s15619_s1 + $0x380] sm:$0xf]  ;;  %v9819_v43 = vld [vmem:[%s15619_s1 + $0x38c] sm:$0xf0]  ;;  %v6760_v46 = vor.u32 %v9787_v41, %v6759_v40  ;;  %4803 = vmatpush.bf16.msra.mxu0 %v6504_v44 }
  0x11   :  { %v6487_v47 = vld [vmem:[%s15619_s1 + $0x60] sm:$0xf]  ;;  %v9719_v48 = vld [vmem:[%s15619_s1 + $0x6c] sm:$0xf0]  ;;  %v6888_v50 = vor.u32 %v9819_v43, %v6887_v42  ;;  %4816 = vmatpush.bf16.msra.mxu1 %v6632_v45 }
  0x12   :  { %v6615_v49 = vld [vmem:[%s15619_s1 + $0x160] sm:$0xf]  ;;  %v9751_v51 = vld [vmem:[%s15619_s1 + $0x16c] sm:$0xf0]  ;;  %v6488_v56 = vor.u32 %v9719_v48, %v6487_v47  ;;  %4829 = vmatpush.bf16.msra.mxu2 %v6760_v46 }
  0x13   :  { %v6743_v52 = vld [vmem:[%s15619_s1 + $0x260] sm:$0xf]  ;;  %v9783_v53 = vld [vmem:[%s15619_s1 + $0x26c] sm:$0xf0]  ;;  %v6616_v57 = vor.u32 %v9751_v51, %v6615_v49  ;;  %4842 = vmatpush.bf16.msra.mxu3 %v6888_v50 }
  0x14   :  { %v6871_v54 = vld [vmem:[%s15619_s1 + $0x360] sm:$0xf]  ;;  %v9815_v55 = vld [vmem:[%s15619_s1 + $0x36c] sm:$0xf0]  ;;  %v6744_v58 = vor.u32 %v9783_v53, %v6743_v52  ;;  %4804 = vmatpush.bf16.msra.mxu0 %v6488_v56 }
  0x15   :  { %v6471_v59 = vld [vmem:[%s15619_s1 + $0x40] sm:$0xf]  ;;  %v9715_v60 = vld [vmem:[%s15619_s1 + $0x4c] sm:$0xf0]  ;;  %v6872_v62 = vor.u32 %v9815_v55, %v6871_v54  ;;  %4817 = vmatpush.bf16.msra.mxu1 %v6616_v57 }
  0x16   :  { %v6599_v61 = vld [vmem:[%s15619_s1 + $0x140] sm:$0xf]  ;;  %v9747_v63 = vld [vmem:[%s15619_s1 + $0x14c] sm:$0xf0]  ;;  %v6472_v4 = vor.u32 %v9715_v60, %v6471_v59  ;;  %4830 = vmatpush.bf16.msra.mxu2 %v6744_v58 }
  0x17   :  { %v6727_v0 = vld [vmem:[%s15619_s1 + $0x240] sm:$0xf]  ;;  %v9779_v1 = vld [vmem:[%s15619_s1 + $0x24c] sm:$0xf0]  ;;  %v6600_v5 = vor.u32 %v9747_v63, %v6599_v61  ;;  %4843 = vmatpush.bf16.msra.mxu3 %v6872_v62 }
  0x18   :  { %v6855_v2 = vld [vmem:[%s15619_s1 + $0x340] sm:$0xf]  ;;  %v9811_v3 = vld [vmem:[%s15619_s1 + $0x34c] sm:$0xf0]  ;;  %v6728_v6 = vor.u32 %v9779_v1, %v6727_v0  ;;  %4805 = vmatpush.bf16.msra.mxu0 %v6472_v4 }
  0x19   :  { %v6455_v7 = vld [vmem:[%s15619_s1 + $0x20] sm:$0xf]  ;;  %v9711_v8 = vld [vmem:[%s15619_s1 + $0x2c] sm:$0xf0]  ;;  %v6856_v10 = vor.u32 %v9811_v3, %v6855_v2  ;;  %4818 = vmatpush.bf16.msra.mxu1 %v6600_v5 }
  0x1a   :  { %v6583_v9 = vld [vmem:[%s15619_s1 + $0x120] sm:$0xf]  ;;  %v9743_v11 = vld [vmem:[%s15619_s1 + $0x12c] sm:$0xf0]  ;;  %v6456_v16 = vor.u32 %v9711_v8, %v6455_v7  ;;  %4831 = vmatpush.bf16.msra.mxu2 %v6728_v6 }
  0x1b   :  { %v6711_v12 = vld [vmem:[%s15619_s1 + $0x220] sm:$0xf]  ;;  %v9775_v13 = vld [vmem:[%s15619_s1 + $0x22c] sm:$0xf0]  ;;  %v6584_v19 = vor.u32 %v9743_v11, %v6583_v9  ;;  %4844 = vmatpush.bf16.msra.mxu3 %v6856_v10 }
  0x1c   :  { %v6839_v14 = vld [vmem:[%s15619_s1 + $0x320] sm:$0xf]  ;;  %v9807_v15 = vld [vmem:[%s15619_s1 + $0x32c] sm:$0xf0]  ;;  %v6712_v20 = vor.u32 %v9775_v13, %v6711_v12  ;;  %4806 = vmatpush.bf16.msra.mxu0 %v6456_v16 }
  0x1d   :  { %v6439_v17 = vld [vmem:[%s15619_s1] sm:$0xf]  ;;  %v9707_v18 = vld [vmem:[%s15619_s1 + $0xc] sm:$0xf0]  ;;  %v6840_v24 = vor.u32 %v9807_v15, %v6839_v14  ;;  %4819 = vmatpush.bf16.msra.mxu1 %v6584_v19 }
  0x1e   :  { %v6567_v21 = vld [vmem:[%s15619_s1 + $0x100] sm:$0xf]  ;;  %v9739_v22 = vld [vmem:[%s15619_s1 + $0x10c] sm:$0xf0]  ;;  %v6440_v31 = vor.u32 %v9707_v18, %v6439_v17  ;;  %4832 = vmatpush.bf16.msra.mxu2 %v6712_v20 }
  0x1f   :  { %v6695_v23 = vld [vmem:[%s15619_s1 + $0x200] sm:$0xf]  ;;  %v9771_v25 = vld [vmem:[%s15619_s1 + $0x20c] sm:$0xf0]  ;;  %v6568_v35 = vor.u32 %v9739_v22, %v6567_v21  ;;  %4845 = vmatpush.bf16.msra.mxu3 %v6840_v24 }
  0x20   :  { %v6823_v26 = vld [vmem:[%s15619_s1 + $0x300] sm:$0xf]  ;;  %v9803_v27 = vld [vmem:[%s15619_s1 + $0x30c] sm:$0xf0]  ;;  %v6696_v36 = vor.u32 %v9771_v25, %v6695_v23  ;;  %4807 = vmatpush.bf16.msra.mxu0 %v6440_v31 }
  0x21   :  { %v7063_v28 = vld [vmem:[%s15619_s1 + $0x4e0] sm:$0xf]  ;;  %v9863_v29 = vld [vmem:[%s15619_s1 + $0x4ec] sm:$0xf0]  ;;  %v6824_v39 = vor.u32 %v9803_v27, %v6823_v26  ;;  %4820 = vmatpush.bf16.msra.mxu1 %v6568_v35 }
  0x22   :  { %v7191_v30 = vld [vmem:[%s15619_s1 + $0x5e0] sm:$0xf]  ;;  %v9895_v32 = vld [vmem:[%s15619_s1 + $0x5ec] sm:$0xf0]  ;;  %v7064_v40 = vor.u32 %v9863_v29, %v7063_v28  ;;  %4833 = vmatpush.bf16.msra.mxu2 %v6696_v36 }
  0x23   :  { %v7319_v33 = vld [vmem:[%s15619_s1 + $0x6e0] sm:$0xf]  ;;  %v9927_v34 = vld [vmem:[%s15619_s1 + $0x6ec] sm:$0xf0]  ;;  %v7192_v41 = vor.u32 %v9895_v32, %v7191_v30  ;;  %4846 = vmatpush.bf16.msra.mxu3 %v6824_v39 }
  0x24   :  { %v7447_v37 = vld [vmem:[%s15619_s1 + $0x7e0] sm:$0xf]  ;;  %v9959_v38 = vld [vmem:[%s15619_s1 + $0x7ec] sm:$0xf0]  ;;  %v7320_v42 = vor.u32 %v9927_v34, %v7319_v33  ;;  %4852 = vmatpush.bf16.msrb.mxu0 %v7064_v40 }
  0x25   :  { %v7047_v43 = vld [vmem:[%s15619_s1 + $0x4c0] sm:$0xf]  ;;  %v9859_v44 = vld [vmem:[%s15619_s1 + $0x4cc] sm:$0xf0]  ;;  %v7448_v46 = vor.u32 %v9959_v38, %v7447_v37  ;;  %4865 = vmatpush.bf16.msrb.mxu1 %v7192_v41 }
  0x26   :  { %v7175_v45 = vld [vmem:[%s15619_s1 + $0x5c0] sm:$0xf]  ;;  %v9891_v47 = vld [vmem:[%s15619_s1 + $0x5cc] sm:$0xf0]  ;;  %v7048_v52 = vor.u32 %v9859_v44, %v7047_v43  ;;  %4878 = vmatpush.bf16.msrb.mxu2 %v7320_v42 }
  0x27   :  { %v7303_v48 = vld [vmem:[%s15619_s1 + $0x6c0] sm:$0xf]  ;;  %v9923_v49 = vld [vmem:[%s15619_s1 + $0x6cc] sm:$0xf0]  ;;  %v7176_v55 = vor.u32 %v9891_v47, %v7175_v45  ;;  %4891 = vmatpush.bf16.msrb.mxu3 %v7448_v46 }
  0x28   :  { %v7431_v50 = vld [vmem:[%s15619_s1 + $0x7c0] sm:$0xf]  ;;  %v9955_v51 = vld [vmem:[%s15619_s1 + $0x7cc] sm:$0xf0]  ;;  %v7304_v56 = vor.u32 %v9923_v49, %v7303_v48  ;;  %4853 = vmatpush.bf16.msrb.mxu0 %v7048_v52 }
  0x29   :  { %v7031_v53 = vld [vmem:[%s15619_s1 + $0x4a0] sm:$0xf]  ;;  %v9855_v54 = vld [vmem:[%s15619_s1 + $0x4ac] sm:$0xf0]  ;;  %v7432_v60 = vor.u32 %v9955_v51, %v7431_v50  ;;  %4866 = vmatpush.bf16.msrb.mxu1 %v7176_v55 }
  0x2a   :  { %v7159_v57 = vld [vmem:[%s15619_s1 + $0x5a0] sm:$0xf]  ;;  %v9887_v58 = vld [vmem:[%s15619_s1 + $0x5ac] sm:$0xf0]  ;;  %v7032_v1 = vor.u32 %v9855_v54, %v7031_v53  ;;  %4879 = vmatpush.bf16.msrb.mxu2 %v7304_v56 }
  0x2b   :  { %v22_v59 = vld [vmem:[%s15618_s0] sm:$0xff]  ;;  %v9919_v62 = vld [vmem:[%s15619_s1 + $0x6ac] sm:$0xf0]  ;;  %v7160_v2 = vor.u32 %v9887_v58, %v7159_v57  ;;  %4892 = vmatpush.bf16.msrb.mxu3 %v7432_v60 }
  0x2c   :  { %v7287_v61 = vld [vmem:[%s15619_s1 + $0x6a0] sm:$0xf]  ;;  %821 = vst [vmem:[#allocation1] ss:$9 sm:$0xff] %v22_v59  ;;  %v9951_v0 = vld [vmem:[%s15619_s1 + $0x7ac] sm:$0xf0]  ;;  %4854 = vmatpush.bf16.msrb.mxu0 %v7032_v1 }
  0x2d   :  { %v7415_v63 = vld [vmem:[%s15619_s1 + $0x7a0] sm:$0xf]  ;;  %v7288_v3 = vor.u32 %v9919_v62, %v7287_v61  ;;  %v9851_v5 = vld [vmem:[%s15619_s1 + $0x48c] sm:$0xf0]  ;;  %4867 = vmatpush.bf16.msrb.mxu1 %v7160_v2  ;;  %v23_v61 = vld [vmem:[%s15618_s0 + $0x8] sm:$0xff] }
  0x2e   :  { %v7015_v4 = vld [vmem:[%s15619_s1 + $0x480] sm:$0xf]  ;;  %v7416_v7 = vor.u32 %v9951_v0, %v7415_v63  ;;  %v9883_v8 = vld [vmem:[%s15619_s1 + $0x58c] sm:$0xf0] }
  0x2f   :  { %v7143_v6 = vld [vmem:[%s15619_s1 + $0x580] sm:$0xf]  ;;  %v9915_v10 = vld [vmem:[%s15619_s1 + $0x68c] sm:$0xf0]  ;;  %v7016_v14 = vor.u32 %v9851_v5, %v7015_v4  ;;  %4880 = vmatpush.bf16.msrb.mxu2 %v7288_v3 }
  0x30   :  { %v7271_v9 = vld [vmem:[%s15619_s1 + $0x680] sm:$0xf]  ;;  %v9947_v12 = vld [vmem:[%s15619_s1 + $0x78c] sm:$0xf0]  ;;  %v7144_v18 = vor.u32 %v9883_v8, %v7143_v6  ;;  %4893 = vmatpush.bf16.msrb.mxu3 %v7416_v7 }
  0x31   :  { %v7399_v11 = vld [vmem:[%s15619_s1 + $0x780] sm:$0xf]  ;;  %v9847_v15 = vld [vmem:[%s15619_s1 + $0x46c] sm:$0xf0]  ;;  %v7272_v19 = vor.u32 %v9915_v10, %v7271_v9  ;;  %4855 = vmatpush.bf16.msrb.mxu0 %v7016_v14 }
  0x32   :  { %v6999_v13 = vld [vmem:[%s15619_s1 + $0x460] sm:$0xf]  ;;  %v9879_v17 = vld [vmem:[%s15619_s1 + $0x56c] sm:$0xf0]  ;;  %v7400_v23 = vor.u32 %v9947_v12, %v7399_v11  ;;  %4868 = vmatpush.bf16.msrb.mxu1 %v7144_v18 }
  0x33   :  { %v7127_v16 = vld [vmem:[%s15619_s1 + $0x560] sm:$0xf]  ;;  %v10889_v20 = vld [vmem:[#allocation1 + $0x12] sm:$0xff]  ;;  %v10902_v26 = vld [vmem:[#allocation1 + $0x9] sm:$0xff]  ;;  %v7000_v29 = vor.u32 %v9847_v15, %v6999_v13  ;;  %4881 = vmatpush.bf16.msrb.mxu2 %v7272_v19 }
  0x34   :  { %v10891_v21 = vld [vmem:[#allocation1] sm:$0xff]  ;;  %v9911_v25 = vld [vmem:[%s15619_s1 + $0x66c] sm:$0xf0]  ;;  %4834 = vmatmul.bf16.vlgmr.msra.gmra.mxu2 %v10889_v20  ;;  %4821 = vmatmul.bf16.vlgmr.msra.gmra.mxu1 %v10902_v26  ;;  %v7128_v30 = vor.u32 %v9879_v17, %v7127_v16  ;;  %v10979_v60 = vld [vmem:[#allocation1 + $0x36] sm:$0xff] }
  0x35   :  { %v10893_v22 = vld [vmem:[#allocation1 + $0x1b] sm:$0xff]  ;;  %v9943_v28 = vld [vmem:[%s15619_s1 + $0x76c] sm:$0xf0]  ;;  %4808 = vmatmul.bf16.vlgmr.msra.gmra.mxu0 %v10891_v21  ;;  %4894 = vmatpush.bf16.msrb.mxu3 %v7400_v23  ;;  %v10984_v0 = vld [vmem:[#allocation1 + $0x24] sm:$0xff] }
  0x36   :  { %v7255_v24 = vld [vmem:[%s15619_s1 + $0x660] sm:$0xf]  ;;  %4847 = vmatmul.bf16.vlgmr.msra.gmra.mxu3 %v10893_v22  ;;  %v9843_v33 = vld [vmem:[%s15619_s1 + $0x44c] sm:$0xf0]  ;;  %4856 = vmatpush.bf16.msrb.mxu0 %v7000_v29 }
  0x37   :  { %v7383_v27 = vld [vmem:[%s15619_s1 + $0x760] sm:$0xf]  ;;  %v7256_v31 = vor.u32 %v9911_v25, %v7255_v24  ;;  %v9875_v36 = vld [vmem:[%s15619_s1 + $0x54c] sm:$0xf0]  ;;  %4869 = vmatpush.bf16.msrb.mxu1 %v7128_v30 }
  0x38   :  { %v6983_v32 = vld [vmem:[%s15619_s1 + $0x440] sm:$0xf]  ;;  %v7384_v35 = vor.u32 %v9943_v28, %v7383_v27  ;;  %v9907_v38 = vld [vmem:[%s15619_s1 + $0x64c] sm:$0xf0] }
  0x39   :  { %v7111_v34 = vld [vmem:[%s15619_s1 + $0x540] sm:$0xf]  ;;  %v9939_v40 = vld [vmem:[%s15619_s1 + $0x74c] sm:$0xf0]  ;;  %v6984_v41 = vor.u32 %v9843_v33, %v6983_v32  ;;  %4882 = vmatpush.bf16.msrb.mxu2 %v7256_v31 }
  0x3a   :  { %v7239_v37 = vld [vmem:[%s15619_s1 + $0x640] sm:$0xf]  ;;  %v7112_v43 = vor.u32 %v9875_v36, %v7111_v34  ;;  %v9839_v45 = vld [vmem:[%s15619_s1 + $0x42c] sm:$0xf0]  ;;  %4895 = vmatpush.bf16.msrb.mxu3 %v7384_v35 }
  0x3b   :  { %v7367_v39 = vld [vmem:[%s15619_s1 + $0x740] sm:$0xf]  ;;  %v7240_v44 = vor.u32 %v9907_v38, %v7239_v37  ;;  %v9871_v47 = vld [vmem:[%s15619_s1 + $0x52c] sm:$0xf0]  ;;  %4857 = vmatpush.bf16.msrb.mxu0 %v6984_v41 }
  0x3c   :  { %v6967_v42 = vld [vmem:[%s15619_s1 + $0x420] sm:$0xf]  ;;  %v7368_v48 = vor.u32 %v9939_v40, %v7367_v39  ;;  %v9903_v50 = vld [vmem:[%s15619_s1 + $0x62c] sm:$0xf0]  ;;  %4870 = vmatpush.bf16.msrb.mxu1 %v7112_v43 }
  0x3d   :  { %v7095_v46 = vld [vmem:[%s15619_s1 + $0x520] sm:$0xf]  ;;  %v9935_v52 = vld [vmem:[%s15619_s1 + $0x72c] sm:$0xf0]  ;;  %v6968_v55 = vor.u32 %v9839_v45, %v6967_v42  ;;  %4883 = vmatpush.bf16.msrb.mxu2 %v7240_v44 }
  0x3e   :  { %v7223_v49 = vld [vmem:[%s15619_s1 + $0x620] sm:$0xf]  ;;  %v9835_v54 = vld [vmem:[%s15619_s1 + $0x40c] sm:$0xf0]  ;;  %v7096_v62 = vor.u32 %v9871_v47, %v7095_v46  ;;  %4896 = vmatpush.bf16.msrb.mxu3 %v7368_v48 }
  0x3f   :  { %v7351_v51 = vld [vmem:[%s15619_s1 + $0x720] sm:$0xf]  ;;  %v9867_v57 = vld [vmem:[%s15619_s1 + $0x50c] sm:$0xf0]  ;;  %v7224_v63 = vor.u32 %v9903_v50, %v7223_v49  ;;  %4858 = vmatpush.bf16.msrb.mxu0 %v6968_v55 }
  0x40   :  { %v6951_v53 = vld [vmem:[%s15619_s1 + $0x400] sm:$0xf]  ;;  %v9899_v59 = vld [vmem:[%s15619_s1 + $0x60c] sm:$0xf0]  ;;  %v7352_v3 = vor.u32 %v9935_v52, %v7351_v51  ;;  %4871 = vmatpush.bf16.msrb.mxu1 %v7096_v62 }
  0x41   :  { %v7079_v56 = vld [vmem:[%s15619_s1 + $0x500] sm:$0xf]  ;;  %v10988_v2 = vld [vmem:[#allocation1 + $0x2d] sm:$0xff]  ;;  %v6952_v9 = vor.u32 %v9835_v54, %v6951_v53  ;;  %4884 = vmatpush.bf16.msrb.mxu2 %v7224_v63 }
  0x42   :  { %v7207_v58 = vld [vmem:[%s15619_s1 + $0x600] sm:$0xf]  ;;  %v9931_v5 = vld [vmem:[%s15619_s1 + $0x70c] sm:$0xf0]  ;;  %v7080_v13 = vor.u32 %v9867_v57, %v7079_v56  ;;  %4897 = vmatpush.bf16.msrb.mxu3 %v7352_v3 }
  0x43   :  { %v10986_v1 = vld [vmem:[#allocation1 + $0x3f] sm:$0xff]  ;;  %v9991_v7 = vld [vmem:[%s15619_s1 + $0x8ec] sm:$0xf0]  ;;  %v7208_v14 = vor.u32 %v9899_v59, %v7207_v58  ;;  %4859 = vmatpush.bf16.msrb.mxu0 %v6952_v9 }
  0x44   :  { %v7335_v4 = vld [vmem:[%s15619_s1 + $0x700] sm:$0xf]  ;;  %831 = vst [vmem:[#allocation1] ss:$9 sm:$0xff] %v23_v61  ;;  %v10023_v10 = vld [vmem:[%s15619_s1 + $0x9ec] sm:$0xf0]  ;;  %4872 = vmatpush.bf16.msrb.mxu1 %v7080_v13 }
  0x45   :  { %v7575_v6 = vld [vmem:[%s15619_s1 + $0x8e0] sm:$0xf]  ;;  %v10055_v12 = vld [vmem:[%s15619_s1 + $0xaec] sm:$0xf0]  ;;  %v7336_v17 = vor.u32 %v9931_v5, %v7335_v4  ;;  %4885 = vmatpush.bf16.msrb.mxu2 %v7208_v14 }
  0x46   :  { %v7703_v8 = vld [vmem:[%s15619_s1 + $0x9e0] sm:$0xf]  ;;  %v10087_v16 = vld [vmem:[%s15619_s1 + $0xbec] sm:$0xf0]  ;;  %v7576_v18 = vor.u32 %v9991_v7, %v7575_v6  ;;  %4860 = vmatmul.bf16.vlgmr.msrb.gmra.mxu0 %v10984_v0 }
  0x47   :  { %v7831_v11 = vld [vmem:[%s15619_s1 + $0xae0] sm:$0xf]  ;;  %v7704_v19 = vor.u32 %v10023_v10, %v7703_v8  ;;  %v9987_v25 = vld [vmem:[%s15619_s1 + $0x8cc] sm:$0xf0]  ;;  %4898 = vmatpush.bf16.msrb.mxu3 %v7336_v17  ;;  %4873 = vmatmul.bf16.vlgmr.msrb.gmra.mxu1 %v10988_v2 }
  0x48   :  { %v7959_v15 = vld [vmem:[%s15619_s1 + $0xbe0] sm:$0xf]  ;;  %v7832_v23 = vor.u32 %v10055_v12, %v7831_v11  ;;  %v10019_v29 = vld [vmem:[%s15619_s1 + $0x9cc] sm:$0xf0]  ;;  %4904 = vmatpush.bf16.msra.mxu0 %v7576_v18  ;;  %4886 = vmatmul.bf16.vlgmr.msrb.gmra.mxu2 %v10979_v60 }
  0x49   :  { %v7559_v24 = vld [vmem:[%s15619_s1 + $0x8c0] sm:$0xf]  ;;  %v7960_v28 = vor.u32 %v10087_v16, %v7959_v15  ;;  %v10051_v31 = vld [vmem:[%s15619_s1 + $0xacc] sm:$0xf0]  ;;  %4917 = vmatpush.bf16.msra.mxu1 %v7704_v19 }
  0x4a   :  { %v7687_v27 = vld [vmem:[%s15619_s1 + $0x9c0] sm:$0xf]  ;;  %v10083_v33 = vld [vmem:[%s15619_s1 + $0xbcc] sm:$0xf0]  ;;  %v7560_v34 = vor.u32 %v9987_v25, %v7559_v24  ;;  %4930 = vmatpush.bf16.msra.mxu2 %v7832_v23  ;;  %4899 = vmatmul.bf16.vlgmr.msrb.gmra.mxu3 %v10986_v1 }
  0x4b   :  { %v7815_v30 = vld [vmem:[%s15619_s1 + $0xac0] sm:$0xf]  ;;  %v7688_v35 = vor.u32 %v10019_v29, %v7687_v27  ;;  %v9983_v38 = vld [vmem:[%s15619_s1 + $0x8ac] sm:$0xf0]  ;;  %4943 = vmatpush.bf16.msra.mxu3 %v7960_v28 }
  0x4c   :  { %v7943_v32 = vld [vmem:[%s15619_s1 + $0xbc0] sm:$0xf]  ;;  %v7816_v36 = vor.u32 %v10051_v31, %v7815_v30  ;;  %v10015_v41 = vld [vmem:[%s15619_s1 + $0x9ac] sm:$0xf0]  ;;  %4905 = vmatpush.bf16.msra.mxu0 %v7560_v34 }
  0x4d   :  { %v7543_v37 = vld [vmem:[%s15619_s1 + $0x8a0] sm:$0xf]  ;;  %v7944_v40 = vor.u32 %v10083_v33, %v7943_v32  ;;  %v10047_v43 = vld [vmem:[%s15619_s1 + $0xaac] sm:$0xf0]  ;;  %4918 = vmatpush.bf16.msra.mxu1 %v7688_v35 }
  0x4e   :  { %v7671_v39 = vld [vmem:[%s15619_s1 + $0x9a0] sm:$0xf]  ;;  %v10079_v45 = vld [vmem:[%s15619_s1 + $0xbac] sm:$0xf0]  ;;  %v7544_v46 = vor.u32 %v9983_v38, %v7543_v37  ;;  %4931 = vmatpush.bf16.msra.mxu2 %v7816_v36 }
  0x4f   :  { %v7799_v42 = vld [vmem:[%s15619_s1 + $0xaa0] sm:$0xf]  ;;  %v7672_v47 = vor.u32 %v10015_v41, %v7671_v39  ;;  %v9979_v50 = vld [vmem:[%s15619_s1 + $0x88c] sm:$0xf0]  ;;  %4944 = vmatpush.bf16.msra.mxu3 %v7944_v40 }
  0x50   :  { %v7927_v44 = vld [vmem:[%s15619_s1 + $0xba0] sm:$0xf]  ;;  %v7800_v48 = vor.u32 %v10047_v43, %v7799_v42  ;;  %v10011_v53 = vld [vmem:[%s15619_s1 + $0x98c] sm:$0xf0]  ;;  %4906 = vmatpush.bf16.msra.mxu0 %v7544_v46 }
  0x51   :  { %v7527_v49 = vld [vmem:[%s15619_s1 + $0x880] sm:$0xf]  ;;  %v7928_v52 = vor.u32 %v10079_v45, %v7927_v44  ;;  %v10043_v55 = vld [vmem:[%s15619_s1 + $0xa8c] sm:$0xf0]  ;;  %4919 = vmatpush.bf16.msra.mxu1 %v7672_v47 }
  0x52   :  { %v7655_v51 = vld [vmem:[%s15619_s1 + $0x980] sm:$0xf]  ;;  %v10075_v57 = vld [vmem:[%s15619_s1 + $0xb8c] sm:$0xf0]  ;;  %v7528_v58 = vor.u32 %v9979_v50, %v7527_v49  ;;  %4932 = vmatpush.bf16.msra.mxu2 %v7800_v48 }
  0x53   :  { %v7783_v54 = vld [vmem:[%s15619_s1 + $0xa80] sm:$0xf]  ;;  %v7656_v59 = vor.u32 %v10011_v53, %v7655_v51  ;;  %v9975_v63 = vld [vmem:[%s15619_s1 + $0x86c] sm:$0xf0]  ;;  %4945 = vmatpush.bf16.msra.mxu3 %v7928_v52 }
  0x54   :  { %v7911_v56 = vld [vmem:[%s15619_s1 + $0xb80] sm:$0xf]  ;;  %v7784_v61 = vor.u32 %v10043_v55, %v7783_v54  ;;  %v10007_v5 = vld [vmem:[%s15619_s1 + $0x96c] sm:$0xf0]  ;;  %4907 = vmatpush.bf16.msra.mxu0 %v7528_v58 }
  0x55   :  { %v7511_v62 = vld [vmem:[%s15619_s1 + $0x860] sm:$0xf]  ;;  %v7912_v4 = vor.u32 %v10075_v57, %v7911_v56  ;;  %v10039_v7 = vld [vmem:[%s15619_s1 + $0xa6c] sm:$0xf0]  ;;  %4920 = vmatpush.bf16.msra.mxu1 %v7656_v59 }
  0x56   :  { %v7639_v3 = vld [vmem:[%s15619_s1 + $0x960] sm:$0xf]  ;;  %v10071_v9 = vld [vmem:[%s15619_s1 + $0xb6c] sm:$0xf0]  ;;  %v7512_v10 = vor.u32 %v9975_v63, %v7511_v62  ;;  %4933 = vmatpush.bf16.msra.mxu2 %v7784_v61 }
  0x57   :  { %v7767_v6 = vld [vmem:[%s15619_s1 + $0xa60] sm:$0xf]  ;;  %v7640_v11 = vor.u32 %v10007_v5, %v7639_v3  ;;  %v9971_v14 = vld [vmem:[%s15619_s1 + $0x84c] sm:$0xf0]  ;;  %4946 = vmatpush.bf16.msra.mxu3 %v7912_v4 }
  0x58   :  { %v7895_v8 = vld [vmem:[%s15619_s1 + $0xb60] sm:$0xf]  ;;  %v7768_v12 = vor.u32 %v10039_v7, %v7767_v6  ;;  %v10003_v17 = vld [vmem:[%s15619_s1 + $0x94c] sm:$0xf0]  ;;  %4908 = vmatpush.bf16.msra.mxu0 %v7512_v10 }
  0x59   :  { %v7495_v13 = vld [vmem:[%s15619_s1 + $0x840] sm:$0xf]  ;;  %v7896_v16 = vor.u32 %v10071_v9, %v7895_v8  ;;  %v10035_v19 = vld [vmem:[%s15619_s1 + $0xa4c] sm:$0xf0]  ;;  %4921 = vmatpush.bf16.msra.mxu1 %v7640_v11 }
  0x5a   :  { %v7623_v15 = vld [vmem:[%s15619_s1 + $0x940] sm:$0xf]  ;;  %v10067_v24 = vld [vmem:[%s15619_s1 + $0xb4c] sm:$0xf0]  ;;  %v7496_v25 = vor.u32 %v9971_v14, %v7495_v13  ;;  %4934 = vmatpush.bf16.msra.mxu2 %v7768_v12 }
  0x5b   :  { %v7751_v18 = vld [vmem:[%s15619_s1 + $0xa40] sm:$0xf]  ;;  %v7624_v27 = vor.u32 %v10003_v17, %v7623_v15  ;;  %v9967_v30 = vld [vmem:[%s15619_s1 + $0x82c] sm:$0xf0]  ;;  %4947 = vmatpush.bf16.msra.mxu3 %v7896_v16 }
  0x5c   :  { %v7879_v23 = vld [vmem:[%s15619_s1 + $0xb40] sm:$0xf]  ;;  %v7752_v28 = vor.u32 %v10035_v19, %v7751_v18  ;;  %v9999_v33 = vld [vmem:[%s15619_s1 + $0x92c] sm:$0xf0]  ;;  %4909 = vmatpush.bf16.msra.mxu0 %v7496_v25 }
  0x5d   :  { %v7479_v29 = vld [vmem:[%s15619_s1 + $0x820] sm:$0xf]  ;;  %v7880_v32 = vor.u32 %v10067_v24, %v7879_v23  ;;  %v10031_v35 = vld [vmem:[%s15619_s1 + $0xa2c] sm:$0xf0]  ;;  %4922 = vmatpush.bf16.msra.mxu1 %v7624_v27 }
  0x5e   :  { %v7607_v31 = vld [vmem:[%s15619_s1 + $0x920] sm:$0xf]  ;;  %v10063_v37 = vld [vmem:[%s15619_s1 + $0xb2c] sm:$0xf0]  ;;  %v7480_v38 = vor.u32 %v9967_v30, %v7479_v29  ;;  %4935 = vmatpush.bf16.msra.mxu2 %v7752_v28 }
  0x5f   :  { %v7735_v34 = vld [vmem:[%s15619_s1 + $0xa20] sm:$0xf]  ;;  %v9963_v40 = vld [vmem:[%s15619_s1 + $0x80c] sm:$0xf0]  ;;  %v7608_v41 = vor.u32 %v9999_v33, %v7607_v31  ;;  %4948 = vmatpush.bf16.msra.mxu3 %v7880_v32 }
  0x60   :  { %v7863_v36 = vld [vmem:[%s15619_s1 + $0xb20] sm:$0xf]  ;;  %v7736_v42 = vor.u32 %v10031_v35, %v7735_v34  ;;  %v9995_v44 = vld [vmem:[%s15619_s1 + $0x90c] sm:$0xf0]  ;;  %4910 = vmatpush.bf16.msra.mxu0 %v7480_v38 }
  0x61   :  { %v7463_v39 = vld [vmem:[%s15619_s1 + $0x800] sm:$0xf]  ;;  %v7864_v46 = vor.u32 %v10063_v37, %v7863_v36  ;;  %v10027_v47 = vld [vmem:[%s15619_s1 + $0xa0c] sm:$0xf0]  ;;  %4923 = vmatpush.bf16.msra.mxu1 %v7608_v41 }
  0x62   :  { %v7591_v43 = vld [vmem:[%s15619_s1 + $0x900] sm:$0xf]  ;;  %v10059_v49 = vld [vmem:[%s15619_s1 + $0xb0c] sm:$0xf0]  ;;  %v7464_v53 = vor.u32 %v9963_v40, %v7463_v39  ;;  %4936 = vmatpush.bf16.msra.mxu2 %v7736_v42 }
  0x63   :  { %v7719_v45 = vld [vmem:[%s15619_s1 + $0xa00] sm:$0xf]  ;;  %v10119_v51 = vld [vmem:[%s15619_s1 + $0xcec] sm:$0xf0]  ;;  %v7592_v57 = vor.u32 %v9995_v44, %v7591_v43  ;;  %4949 = vmatpush.bf16.msra.mxu3 %v7864_v46 }
  0x64   :  { %v7847_v48 = vld [vmem:[%s15619_s1 + $0xb00] sm:$0xf]  ;;  %v10151_v54 = vld [vmem:[%s15619_s1 + $0xdec] sm:$0xf0]  ;;  %v7720_v58 = vor.u32 %v10027_v47, %v7719_v45  ;;  %4911 = vmatpush.bf16.msra.mxu0 %v7464_v53 }
  0x65   :  { %v8087_v50 = vld [vmem:[%s15619_s1 + $0xce0] sm:$0xf]  ;;  %v10183_v56 = vld [vmem:[%s15619_s1 + $0xeec] sm:$0xf0]  ;;  %v7848_v62 = vor.u32 %v10059_v49, %v7847_v48  ;;  %4924 = vmatpush.bf16.msra.mxu1 %v7592_v57 }
  0x66   :  { %v8215_v52 = vld [vmem:[%s15619_s1 + $0xde0] sm:$0xf]  ;;  %v10215_v61 = vld [vmem:[%s15619_s1 + $0xfec] sm:$0xf0]  ;;  %v8088_v63 = vor.u32 %v10119_v51, %v8087_v50  ;;  %4937 = vmatpush.bf16.msra.mxu2 %v7720_v58 }
  0x67   :  { %v8343_v55 = vld [vmem:[%s15619_s1 + $0xee0] sm:$0xf]  ;;  %v8216_v3 = vor.u32 %v10151_v54, %v8215_v52  ;;  %v10115_v6 = vld [vmem:[%s15619_s1 + $0xccc] sm:$0xf0]  ;;  %4950 = vmatpush.bf16.msra.mxu3 %v7848_v62 }
  0x68   :  { %v8471_v59 = vld [vmem:[%s15619_s1 + $0xfe0] sm:$0xf]  ;;  %v8344_v4 = vor.u32 %v10183_v56, %v8343_v55  ;;  %v10147_v9 = vld [vmem:[%s15619_s1 + $0xdcc] sm:$0xf0]  ;;  %4956 = vmatpush.bf16.msrb.mxu0 %v8088_v63 }
  0x69   :  { %v8071_v5 = vld [vmem:[%s15619_s1 + $0xcc0] sm:$0xf]  ;;  %v8472_v8 = vor.u32 %v10215_v61, %v8471_v59  ;;  %v10179_v11 = vld [vmem:[%s15619_s1 + $0xecc] sm:$0xf0]  ;;  %4969 = vmatpush.bf16.msrb.mxu1 %v8216_v3 }
  0x6a   :  { %v8199_v7 = vld [vmem:[%s15619_s1 + $0xdc0] sm:$0xf]  ;;  %v10211_v14 = vld [vmem:[%s15619_s1 + $0xfcc] sm:$0xf0]  ;;  %v8072_v18 = vor.u32 %v10115_v6, %v8071_v5  ;;  %4982 = vmatpush.bf16.msrb.mxu2 %v8344_v4 }
  0x6b   :  { %v8327_v10 = vld [vmem:[%s15619_s1 + $0xec0] sm:$0xf]  ;;  %v11242_v15 = vld [vmem:[#allocation1 + $0x12] sm:$0xff]  ;;  %v11244_v16 = vld [vmem:[#allocation1 + $0x9] sm:$0xff]  ;;  %v8200_v19 = vor.u32 %v10147_v9, %v8199_v7  ;;  %4995 = vmatpush.bf16.msrb.mxu3 %v8472_v8 }
  0x6c   :  { %v11234_v12 = vld [vmem:[#allocation1] sm:$0xff]  ;;  %v8328_v23 = vor.u32 %v10179_v11, %v8327_v10  ;;  %v10111_v25 = vld [vmem:[%s15619_s1 + $0xcac] sm:$0xf0]  ;;  %4938 = vmatmul.bf16.vlgmr.msra.gmra.mxu2 %v11242_v15  ;;  %4925 = vmatmul.bf16.vlgmr.msra.gmra.mxu1 %v11244_v16 }
  0x6d   :  { %v8455_v13 = vld [vmem:[%s15619_s1 + $0xfc0] sm:$0xf]  ;;  %4912 = vmatmul.bf16.vlgmr.msra.gmra.mxu0 %v11234_v12  ;;  %v10143_v29 = vld [vmem:[%s15619_s1 + $0xdac] sm:$0xf0]  ;;  %4970 = vmatpush.bf16.msrb.mxu1 %v8200_v19 }
  0x6e   :  { %v11246_v17 = vld [vmem:[#allocation1 + $0x1b] sm:$0xff]  ;;  %v8456_v28 = vor.u32 %v10211_v14, %v8455_v13  ;;  %v10175_v31 = vld [vmem:[%s15619_s1 + $0xeac] sm:$0xf0]  ;;  %4957 = vmatpush.bf16.msrb.mxu0 %v8072_v18  ;;  %4983 = vmatpush.bf16.msrb.mxu2 %v8328_v23 }
  0x6f   :  { %v8055_v24 = vld [vmem:[%s15619_s1 + $0xca0] sm:$0xf]  ;;  %v10207_v33 = vld [vmem:[%s15619_s1 + $0xfac] sm:$0xf0]  ;;  %4951 = vmatmul.bf16.vlgmr.msra.gmra.mxu3 %v11246_v17 }
  0x70   :  { %v8183_v27 = vld [vmem:[%s15619_s1 + $0xda0] sm:$0xf]  ;;  %v8056_v34 = vor.u32 %v10111_v25, %v8055_v24  ;;  %v10107_v38 = vld [vmem:[%s15619_s1 + $0xc8c] sm:$0xf0]  ;;  %4996 = vmatpush.bf16.msrb.mxu3 %v8456_v28 }
  0x71   :  { %v8311_v30 = vld [vmem:[%s15619_s1 + $0xea0] sm:$0xf]  ;;  %v8184_v36 = vor.u32 %v10143_v29, %v8183_v27  ;;  %v10139_v40 = vld [vmem:[%s15619_s1 + $0xd8c] sm:$0xf0] }
  0x72   :  { %v8439_v32 = vld [vmem:[%s15619_s1 + $0xfa0] sm:$0xf]  ;;  %v8312_v37 = vor.u32 %v10175_v31, %v8311_v30  ;;  %v10171_v43 = vld [vmem:[%s15619_s1 + $0xe8c] sm:$0xf0] }
  0x73   :  { %v8039_v35 = vld [vmem:[%s15619_s1 + $0xc80] sm:$0xf]  ;;  %v8440_v41 = vor.u32 %v10207_v33, %v8439_v32  ;;  %v10203_v45 = vld [vmem:[%s15619_s1 + $0xf8c] sm:$0xf0] }
  0x74   :  { %v8167_v39 = vld [vmem:[%s15619_s1 + $0xd80] sm:$0xf] }
  0x75   :  { %v8295_v42 = vld [vmem:[%s15619_s1 + $0xe80] sm:$0xf] }
  0x76   :  { %v8423_v44 = vld [vmem:[%s15619_s1 + $0xf80] sm:$0xf] }
  0x77   :  { %10 = vsyncpa [#allocation3], 0  ;;  %4958 = vmatpush.bf16.msrb.mxu0 %v8056_v34  ;;  %v8040_v46 = vor.u32 %v10107_v38, %v8039_v35  ;;  %4971 = vmatpush.bf16.msrb.mxu1 %v8184_v36  ;;  %v8168_v47 = vor.u32 %v10139_v40, %v8167_v39  ;;  %v8296_v48 = vor.u32 %v10171_v43, %v8295_v42  ;;  %v8023_v49 = vld [vmem:[%s15619_s1 + $0xc60] sm:$0xf]  ;;  %v10103_v50 = vld [vmem:[%s15619_s1 + $0xc6c] sm:$0xf0] }
  0x78   :  { %4984 = vmatpush.bf16.msrb.mxu2 %v8312_v37  ;;  %v8151_v51 = vld [vmem:[%s15619_s1 + $0xd60] sm:$0xf]  ;;  %4997 = vmatpush.bf16.msrb.mxu3 %v8440_v41  ;;  %v8424_v52 = vor.u32 %v10203_v45, %v8423_v44  ;;  %v10135_v53 = vld [vmem:[%s15619_s1 + $0xd6c] sm:$0xf0]  ;;  %v8024_v58 = vor.u32 %v10103_v50, %v8023_v49  ;;  %vm4797_vm0 = vcmask 523264   ;;  %s10555_s30 = smov [#allocation2]  }
  0x79   :  { %v8279_v54 = vld [vmem:[%s15619_s1 + $0xe60] sm:$0xf]  ;;  %v10167_v55 = vld [vmem:[%s15619_s1 + $0xe6c] sm:$0xf0]  ;;  %v8152_v59 = vor.u32 %v10135_v53, %v8151_v51  ;;  %s6426_s6 = sshll.u32 %s10555_s30, 4  ;;  %s6428_s9 = sshll.u32 %s15623_s5, 4  ;;  %s6427_s6 = int_to_ptr.vmem [resolvable:$true] %s6426_s6  ;;  %s6429_s9 = int_to_ptr.hbm [resolvable:$true] %s6428_s9 }
  0x7a   :  { %v8407_v56 = vld [vmem:[%s15619_s1 + $0xf60] sm:$0xf]  ;;  %v10199_v57 = vld [vmem:[%s15619_s1 + $0xf6c] sm:$0xf0]  ;;  %v8280_v61 = vor.u32 %v10167_v55, %v8279_v54 }
  0x7b   :  { %4959 = vmatpush.bf16.msrb.mxu0 %v8040_v46  ;;  %4972 = vmatpush.bf16.msrb.mxu1 %v8168_v47  ;;  %v8007_v62 = vld [vmem:[%s15619_s1 + $0xc40] sm:$0xf]  ;;  %v10099_v63 = vld [vmem:[%s15619_s1 + $0xc4c] sm:$0xf0]  ;;  %v8408_v4 = vor.u32 %v10199_v57, %v8407_v56  ;;  %v11408_v46 = vld [vmem:[#allocation1 + $0x24] sm:$0xff] }
  0x7c   :  { %4985 = vmatpush.bf16.msrb.mxu2 %v8296_v48  ;;  %v8135_v3 = vld [vmem:[%s15619_s1 + $0xd40] sm:$0xf]  ;;  %4998 = vmatpush.bf16.msrb.mxu3 %v8424_v52  ;;  %v10131_v5 = vld [vmem:[%s15619_s1 + $0xd4c] sm:$0xf0]  ;;  %v8008_v10 = vor.u32 %v10099_v63, %v8007_v62  ;;  %v11410_v47 = vld [vmem:[#allocation1 + $0x36] sm:$0xff] }
  0x7d   :  { %v8263_v6 = vld [vmem:[%s15619_s1 + $0xe40] sm:$0xf]  ;;  %v10163_v7 = vld [vmem:[%s15619_s1 + $0xe4c] sm:$0xf0]  ;;  %v8136_v13 = vor.u32 %v10131_v5, %v8135_v3 }
  0x7e   :  { %v8391_v8 = vld [vmem:[%s15619_s1 + $0xf40] sm:$0xf]  ;;  %v10195_v9 = vld [vmem:[%s15619_s1 + $0xf4c] sm:$0xf0]  ;;  %v8264_v14 = vor.u32 %v10163_v7, %v8263_v6 }
  0x7f   :  { %4960 = vmatpush.bf16.msrb.mxu0 %v8024_v58  ;;  %v7991_v11 = vld [vmem:[%s15619_s1 + $0xc20] sm:$0xf]  ;;  %4973 = vmatpush.bf16.msrb.mxu1 %v8152_v59  ;;  %v10095_v18 = vld [vmem:[%s15619_s1 + $0xc2c] sm:$0xf0]  ;;  %v8392_v24 = vor.u32 %v10195_v9, %v8391_v8 }
  0x80   :  { %4986 = vmatpush.bf16.msrb.mxu2 %v8280_v61  ;;  %v8119_v19 = vld [vmem:[%s15619_s1 + $0xd20] sm:$0xf]  ;;  %v10127_v23 = vld [vmem:[%s15619_s1 + $0xd2c] sm:$0xf0]  ;;  %4999 = vmatpush.bf16.msrb.mxu3 %v8408_v4  ;;  %v7992_v32 = vor.u32 %v10095_v18, %v7991_v11 }
  0x81   :  { %v8247_v25 = vld [vmem:[%s15619_s1 + $0xe20] sm:$0xf]  ;;  %v10159_v27 = vld [vmem:[%s15619_s1 + $0xe2c] sm:$0xf0]  ;;  %v8120_v37 = vor.u32 %v10127_v23, %v8119_v19 }
  0x82   :  { %v8375_v28 = vld [vmem:[%s15619_s1 + $0xf20] sm:$0xf]  ;;  %v10191_v29 = vld [vmem:[%s15619_s1 + $0xf2c] sm:$0xf0]  ;;  %v8248_v38 = vor.u32 %v10159_v27, %v8247_v25 }
  0x83   :  { %v7975_v30 = vld [vmem:[%s15619_s1 + $0xc00] sm:$0xf]  ;;  %v10091_v31 = vld [vmem:[%s15619_s1 + $0xc0c] sm:$0xf0]  ;;  %4961 = vmatpush.bf16.msrb.mxu0 %v8008_v10  ;;  %4974 = vmatpush.bf16.msrb.mxu1 %v8136_v13  ;;  %v8376_v43 = vor.u32 %v10191_v29, %v8375_v28 }
  0x84   :  { %v8103_v33 = vld [vmem:[%s15619_s1 + $0xd00] sm:$0xf]  ;;  %v10123_v34 = vld [vmem:[%s15619_s1 + $0xd0c] sm:$0xf0]  ;;  %4987 = vmatpush.bf16.msrb.mxu2 %v8264_v14  ;;  %5000 = vmatpush.bf16.msrb.mxu3 %v8392_v24  ;;  %v7976_v51 = vor.u32 %v10091_v31, %v7975_v30 }
  0x85   :  { %v8231_v35 = vld [vmem:[%s15619_s1 + $0xe00] sm:$0xf]  ;;  %v10155_v36 = vld [vmem:[%s15619_s1 + $0xe0c] sm:$0xf0]  ;;  %v8104_v54 = vor.u32 %v10123_v34, %v8103_v33 }
  0x86   :  { %v8359_v39 = vld [vmem:[%s15619_s1 + $0xf00] sm:$0xf]  ;;  %v10187_v40 = vld [vmem:[%s15619_s1 + $0xf0c] sm:$0xf0]  ;;  %v8232_v55 = vor.u32 %v10155_v36, %v8231_v35 }
  0x87   :  { %v8599_v41 = vld [vmem:[%s15619_s1 + $0x10e0] sm:$0xf]  ;;  %v10247_v42 = vld [vmem:[%s15619_s1 + $0x10ec] sm:$0xf0]  ;;  %4962 = vmatpush.bf16.msrb.mxu0 %v7992_v32  ;;  %4975 = vmatpush.bf16.msrb.mxu1 %v8120_v37  ;;  %v8360_v58 = vor.u32 %v10187_v40, %v8359_v39 }
  0x88   :  { %v8727_v44 = vld [vmem:[%s15619_s1 + $0x11e0] sm:$0xf]  ;;  %v10279_v45 = vld [vmem:[%s15619_s1 + $0x11ec] sm:$0xf0]  ;;  %4988 = vmatpush.bf16.msrb.mxu2 %v8248_v38  ;;  %5001 = vmatpush.bf16.msrb.mxu3 %v8376_v43  ;;  %v8600_v59 = vor.u32 %v10247_v42, %v8599_v41 }
  0x89   :  { %v11412_v48 = vld [vmem:[#allocation1 + $0x2d] sm:$0xff]  ;;  %v11414_v49 = vld [vmem:[#allocation1 + $0x3f] sm:$0xff]  ;;  %v8728_v61 = vor.u32 %v10279_v45, %v8727_v44 }
  0x8a   :  { %v24_v50 = vld [vmem:[%s15618_s0 + $0x10] sm:$0xff]  ;;  %v8855_v52 = vld [vmem:[%s15619_s1 + $0x12e0] sm:$0xf] }
  0x8b   :  { %v10311_v53 = vld [vmem:[%s15619_s1 + $0x12ec] sm:$0xf0]  ;;  %841 = vst [vmem:[#allocation1] ss:$9 sm:$0xff] %v24_v50  ;;  %v8983_v56 = vld [vmem:[%s15619_s1 + $0x13e0] sm:$0xf]  ;;  %4963 = vmatpush.bf16.msrb.mxu0 %v7976_v51  ;;  %4976 = vmatpush.bf16.msrb.mxu1 %v8104_v54 }
  0x8c   :  { %v10343_v57 = vld [vmem:[%s15619_s1 + $0x13ec] sm:$0xf0]  ;;  %v8856_v62 = vor.u32 %v10311_v53, %v8855_v52  ;;  %v8583_v63 = vld [vmem:[%s15619_s1 + $0x10c0] sm:$0xf]  ;;  %4989 = vmatpush.bf16.msrb.mxu2 %v8232_v55  ;;  %5002 = vmatpush.bf16.msrb.mxu3 %v8360_v58 }
  0x8d   :  { %v10243_v3 = vld [vmem:[%s15619_s1 + $0x10cc] sm:$0xf0]  ;;  %v8711_v4 = vld [vmem:[%s15619_s1 + $0x11c0] sm:$0xf]  ;;  %v8984_v5 = vor.u32 %v10343_v57, %v8983_v56 }
  0x8e   :  { %v10275_v6 = vld [vmem:[%s15619_s1 + $0x11cc] sm:$0xf0]  ;;  %v8839_v7 = vld [vmem:[%s15619_s1 + $0x12c0] sm:$0xf]  ;;  %v8584_v11 = vor.u32 %v10243_v3, %v8583_v63  ;;  %4964 = vmatmul.bf16.vlgmr.msrb.gmra.mxu0 %v11408_v46  ;;  %4977 = vmatmul.bf16.vlgmr.msrb.gmra.mxu1 %v11412_v48 }
  0x8f   :  { %v10307_v8 = vld [vmem:[%s15619_s1 + $0x12cc] sm:$0xf0]  ;;  %v8967_v9 = vld [vmem:[%s15619_s1 + $0x13c0] sm:$0xf]  ;;  %5008 = vmatpush.bf16.msra.mxu0 %v8600_v59  ;;  %5021 = vmatpush.bf16.msra.mxu1 %v8728_v61  ;;  %v8712_v13 = vor.u32 %v10275_v6, %v8711_v4 }
  0x90   :  { %v10339_v10 = vld [vmem:[%s15619_s1 + $0x13cc] sm:$0xf0]  ;;  %5034 = vmatpush.bf16.msra.mxu2 %v8856_v62  ;;  %v8840_v14 = vor.u32 %v10307_v8, %v8839_v7  ;;  %v8567_v18 = vld [vmem:[%s15619_s1 + $0x10a0] sm:$0xf]  ;;  %5047 = vmatpush.bf16.msra.mxu3 %v8984_v5 }
  0x91   :  { %v10239_v19 = vld [vmem:[%s15619_s1 + $0x10ac] sm:$0xf0]  ;;  %v8695_v23 = vld [vmem:[%s15619_s1 + $0x11a0] sm:$0xf]  ;;  %v8968_v24 = vor.u32 %v10339_v10, %v8967_v9  ;;  %4990 = vmatmul.bf16.vlgmr.msrb.gmra.mxu2 %v11410_v47  ;;  %5003 = vmatmul.bf16.vlgmr.msrb.gmra.mxu3 %v11414_v49 }
  0x92   :  { %v10271_v25 = vld [vmem:[%s15619_s1 + $0x11ac] sm:$0xf0]  ;;  %v8823_v27 = vld [vmem:[%s15619_s1 + $0x12a0] sm:$0xf]  ;;  %v8568_v31 = vor.u32 %v10239_v19, %v8567_v18 }
  0x93   :  { %v10303_v28 = vld [vmem:[%s15619_s1 + $0x12ac] sm:$0xf0]  ;;  %v8951_v29 = vld [vmem:[%s15619_s1 + $0x13a0] sm:$0xf]  ;;  %5009 = vmatpush.bf16.msra.mxu0 %v8584_v11  ;;  %5022 = vmatpush.bf16.msra.mxu1 %v8712_v13  ;;  %v8696_v32 = vor.u32 %v10271_v25, %v8695_v23 }
  0x94   :  { %v10335_v30 = vld [vmem:[%s15619_s1 + $0x13ac] sm:$0xf0]  ;;  %5035 = vmatpush.bf16.msra.mxu2 %v8840_v14  ;;  %v8824_v33 = vor.u32 %v10303_v28, %v8823_v27  ;;  %v8551_v34 = vld [vmem:[%s15619_s1 + $0x1080] sm:$0xf]  ;;  %5048 = vmatpush.bf16.msra.mxu3 %v8968_v24 }
  0x95   :  { %v10235_v35 = vld [vmem:[%s15619_s1 + $0x108c] sm:$0xf0]  ;;  %v8679_v36 = vld [vmem:[%s15619_s1 + $0x1180] sm:$0xf]  ;;  %v8952_v37 = vor.u32 %v10335_v30, %v8951_v29 }
  0x96   :  { %v10267_v38 = vld [vmem:[%s15619_s1 + $0x118c] sm:$0xf0]  ;;  %v8807_v39 = vld [vmem:[%s15619_s1 + $0x1280] sm:$0xf]  ;;  %v8552_v43 = vor.u32 %v10235_v35, %v8551_v34 }
  0x97   :  { %v10299_v40 = vld [vmem:[%s15619_s1 + $0x128c] sm:$0xf0]  ;;  %v8935_v41 = vld [vmem:[%s15619_s1 + $0x1380] sm:$0xf]  ;;  %5010 = vmatpush.bf16.msra.mxu0 %v8568_v31  ;;  %5023 = vmatpush.bf16.msra.mxu1 %v8696_v32  ;;  %v8680_v44 = vor.u32 %v10267_v38, %v8679_v36 }
  0x98   :  { %v10331_v42 = vld [vmem:[%s15619_s1 + $0x138c] sm:$0xf0]  ;;  %5036 = vmatpush.bf16.msra.mxu2 %v8824_v33  ;;  %v8808_v45 = vor.u32 %v10299_v40, %v8807_v39  ;;  %v8535_v50 = vld [vmem:[%s15619_s1 + $0x1060] sm:$0xf]  ;;  %5049 = vmatpush.bf16.msra.mxu3 %v8952_v37 }
  0x99   :  { %v10231_v51 = vld [vmem:[%s15619_s1 + $0x106c] sm:$0xf0]  ;;  %v8663_v52 = vld [vmem:[%s15619_s1 + $0x1160] sm:$0xf]  ;;  %v8936_v53 = vor.u32 %v10331_v42, %v8935_v41 }
  0x9a   :  { %v10263_v54 = vld [vmem:[%s15619_s1 + $0x116c] sm:$0xf0]  ;;  %v8791_v55 = vld [vmem:[%s15619_s1 + $0x1260] sm:$0xf]  ;;  %v8536_v59 = vor.u32 %v10231_v51, %v8535_v50 }
  0x9b   :  { %v10295_v56 = vld [vmem:[%s15619_s1 + $0x126c] sm:$0xf0]  ;;  %v8919_v57 = vld [vmem:[%s15619_s1 + $0x1360] sm:$0xf]  ;;  %5011 = vmatpush.bf16.msra.mxu0 %v8552_v43  ;;  %5024 = vmatpush.bf16.msra.mxu1 %v8680_v44  ;;  %v8664_v61 = vor.u32 %v10263_v54, %v8663_v52 }
  0x9c   :  { %v10327_v58 = vld [vmem:[%s15619_s1 + $0x136c] sm:$0xf0]  ;;  %5037 = vmatpush.bf16.msra.mxu2 %v8808_v45  ;;  %v8792_v62 = vor.u32 %v10295_v56, %v8791_v55  ;;  %v8519_v63 = vld [vmem:[%s15619_s1 + $0x1040] sm:$0xf]  ;;  %5050 = vmatpush.bf16.msra.mxu3 %v8936_v53 }
  0x9d   :  { %v10227_v3 = vld [vmem:[%s15619_s1 + $0x104c] sm:$0xf0]  ;;  %v8647_v4 = vld [vmem:[%s15619_s1 + $0x1140] sm:$0xf]  ;;  %v8920_v5 = vor.u32 %v10327_v58, %v8919_v57 }
  0x9e   :  { %v10259_v6 = vld [vmem:[%s15619_s1 + $0x114c] sm:$0xf0]  ;;  %v8775_v7 = vld [vmem:[%s15619_s1 + $0x1240] sm:$0xf]  ;;  %v8520_v11 = vor.u32 %v10227_v3, %v8519_v63 }
  0x9f   :  { %v10291_v8 = vld [vmem:[%s15619_s1 + $0x124c] sm:$0xf0]  ;;  %v8903_v9 = vld [vmem:[%s15619_s1 + $0x1340] sm:$0xf]  ;;  %5012 = vmatpush.bf16.msra.mxu0 %v8536_v59  ;;  %5025 = vmatpush.bf16.msra.mxu1 %v8664_v61  ;;  %v8648_v13 = vor.u32 %v10259_v6, %v8647_v4 }
  0xa0   :  { %v10323_v10 = vld [vmem:[%s15619_s1 + $0x134c] sm:$0xf0]  ;;  %5038 = vmatpush.bf16.msra.mxu2 %v8792_v62  ;;  %v8776_v14 = vor.u32 %v10291_v8, %v8775_v7  ;;  %v8503_v18 = vld [vmem:[%s15619_s1 + $0x1020] sm:$0xf]  ;;  %5051 = vmatpush.bf16.msra.mxu3 %v8920_v5 }
  0xa1   :  { %v10223_v19 = vld [vmem:[%s15619_s1 + $0x102c] sm:$0xf0]  ;;  %v8631_v23 = vld [vmem:[%s15619_s1 + $0x1120] sm:$0xf]  ;;  %v8904_v24 = vor.u32 %v10323_v10, %v8903_v9 }
  0xa2   :  { %v10255_v25 = vld [vmem:[%s15619_s1 + $0x112c] sm:$0xf0]  ;;  %v8759_v27 = vld [vmem:[%s15619_s1 + $0x1220] sm:$0xf]  ;;  %v8504_v31 = vor.u32 %v10223_v19, %v8503_v18 }
  0xa3   :  { %v10287_v28 = vld [vmem:[%s15619_s1 + $0x122c] sm:$0xf0]  ;;  %v8887_v29 = vld [vmem:[%s15619_s1 + $0x1320] sm:$0xf]  ;;  %5013 = vmatpush.bf16.msra.mxu0 %v8520_v11  ;;  %5026 = vmatpush.bf16.msra.mxu1 %v8648_v13  ;;  %v8632_v34 = vor.u32 %v10255_v25, %v8631_v23 }
  0xa4   :  { %v10319_v30 = vld [vmem:[%s15619_s1 + $0x132c] sm:$0xf0]  ;;  %v8487_v32 = vld [vmem:[%s15619_s1 + $0x1000] sm:$0xf]  ;;  %5039 = vmatpush.bf16.msra.mxu2 %v8776_v14  ;;  %v8760_v35 = vor.u32 %v10287_v28, %v8759_v27  ;;  %5052 = vmatpush.bf16.msra.mxu3 %v8904_v24 }
  0xa5   :  { %v10219_v33 = vld [vmem:[%s15619_s1 + $0x100c] sm:$0xf0]  ;;  %v8615_v36 = vld [vmem:[%s15619_s1 + $0x1100] sm:$0xf]  ;;  %v8888_v39 = vor.u32 %v10319_v30, %v8887_v29 }
  0xa6   :  { %v10251_v37 = vld [vmem:[%s15619_s1 + $0x110c] sm:$0xf0]  ;;  %v8743_v38 = vld [vmem:[%s15619_s1 + $0x1200] sm:$0xf]  ;;  %v8488_v50 = vor.u32 %v10219_v33, %v8487_v32 }
  0xa7   :  { %v10283_v40 = vld [vmem:[%s15619_s1 + $0x120c] sm:$0xf0]  ;;  %v8871_v41 = vld [vmem:[%s15619_s1 + $0x1300] sm:$0xf]  ;;  %5014 = vmatpush.bf16.msra.mxu0 %v8504_v31  ;;  %5027 = vmatpush.bf16.msra.mxu1 %v8632_v34  ;;  %v8616_v54 = vor.u32 %v10251_v37, %v8615_v36 }
  0xa8   :  { %v10315_v42 = vld [vmem:[%s15619_s1 + $0x130c] sm:$0xf0]  ;;  %v9111_v43 = vld [vmem:[%s15619_s1 + $0x14e0] sm:$0xf]  ;;  %5040 = vmatpush.bf16.msra.mxu2 %v8760_v35  ;;  %v8744_v55 = vor.u32 %v10283_v40, %v8743_v38  ;;  %5053 = vmatpush.bf16.msra.mxu3 %v8888_v39 }
  0xa9   :  { %v10375_v44 = vld [vmem:[%s15619_s1 + $0x14ec] sm:$0xf0]  ;;  %v9239_v45 = vld [vmem:[%s15619_s1 + $0x15e0] sm:$0xf]  ;;  %v8872_v58 = vor.u32 %v10315_v42, %v8871_v41 }
  0xaa   :  { %v10407_v51 = vld [vmem:[%s15619_s1 + $0x15ec] sm:$0xf0]  ;;  %v9367_v52 = vld [vmem:[%s15619_s1 + $0x16e0] sm:$0xf]  ;;  %v9112_v59 = vor.u32 %v10375_v44, %v9111_v43 }
  0xab   :  { %v10439_v53 = vld [vmem:[%s15619_s1 + $0x16ec] sm:$0xf0]  ;;  %v9495_v56 = vld [vmem:[%s15619_s1 + $0x17e0] sm:$0xf]  ;;  %v9240_v61 = vor.u32 %v10407_v51, %v9239_v45  ;;  %5015 = vmatpush.bf16.msra.mxu0 %v8488_v50  ;;  %5028 = vmatpush.bf16.msra.mxu1 %v8616_v54 }
  0xac   :  { %v10471_v57 = vld [vmem:[%s15619_s1 + $0x17ec] sm:$0xf0]  ;;  %v9368_v62 = vor.u32 %v10439_v53, %v9367_v52  ;;  %v9095_v63 = vld [vmem:[%s15619_s1 + $0x14c0] sm:$0xf]  ;;  %5041 = vmatpush.bf16.msra.mxu2 %v8744_v55  ;;  %5054 = vmatpush.bf16.msra.mxu3 %v8872_v58 }
  0xad   :  { %v10371_v3 = vld [vmem:[%s15619_s1 + $0x14cc] sm:$0xf0]  ;;  %v9223_v4 = vld [vmem:[%s15619_s1 + $0x15c0] sm:$0xf]  ;;  %v9496_v5 = vor.u32 %v10471_v57, %v9495_v56 }
  0xae   :  { %v10403_v6 = vld [vmem:[%s15619_s1 + $0x15cc] sm:$0xf0]  ;;  %v9351_v7 = vld [vmem:[%s15619_s1 + $0x16c0] sm:$0xf]  ;;  %v9096_v19 = vor.u32 %v10371_v3, %v9095_v63 }
  0xaf   :  { %v10435_v8 = vld [vmem:[%s15619_s1 + $0x16cc] sm:$0xf0]  ;;  %v11645_v9 = vld [vmem:[#allocation1] sm:$0xff]  ;;  %5060 = vmatpush.bf16.msrb.mxu0 %v9112_v59  ;;  %5073 = vmatpush.bf16.msrb.mxu1 %v9240_v61  ;;  %v9224_v23 = vor.u32 %v10403_v6, %v9223_v4 }
  0xb0   :  { %v9479_v10 = vld [vmem:[%s15619_s1 + $0x17c0] sm:$0xf]  ;;  %v10467_v11 = vld [vmem:[%s15619_s1 + $0x17cc] sm:$0xf0]  ;;  %5086 = vmatpush.bf16.msrb.mxu2 %v9368_v62  ;;  %v9352_v24 = vor.u32 %v10435_v8, %v9351_v7  ;;  %5099 = vmatpush.bf16.msrb.mxu3 %v9496_v5  ;;  %v11738_v4 = vld [vmem:[#allocation1 + $0x24] sm:$0xff] }
  0xb1   :  { %v11653_v13 = vld [vmem:[#allocation1 + $0x12] sm:$0xff]  ;;  %v11655_v14 = vld [vmem:[#allocation1 + $0x9] sm:$0xff]  ;;  %v11657_v18 = vld [vmem:[#allocation1 + $0x1b] sm:$0xff]  ;;  %5016 = vmatmul.bf16.vlgmr.msra.gmra.mxu0 %v11645_v9  ;;  %v9480_v29 = vor.u32 %v10467_v11, %v9479_v10 }
  0xb2   :  { %v9079_v25 = vld [vmem:[%s15619_s1 + $0x14a0] sm:$0xf]  ;;  %v10367_v27 = vld [vmem:[%s15619_s1 + $0x14ac] sm:$0xf0]  ;;  %5042 = vmatmul.bf16.vlgmr.msra.gmra.mxu2 %v11653_v13  ;;  %5029 = vmatmul.bf16.vlgmr.msra.gmra.mxu1 %v11655_v14  ;;  %v11740_v5 = vld [vmem:[#allocation1 + $0x36] sm:$0xff] }
  0xb3   :  { %v9207_v28 = vld [vmem:[%s15619_s1 + $0x15a0] sm:$0xf]  ;;  %v10399_v30 = vld [vmem:[%s15619_s1 + $0x15ac] sm:$0xf0]  ;;  %5055 = vmatmul.bf16.vlgmr.msra.gmra.mxu3 %v11657_v18  ;;  %5061 = vmatpush.bf16.msrb.mxu0 %v9096_v19  ;;  %v9080_v35 = vor.u32 %v10367_v27, %v9079_v25  ;;  %v25_v8 = vld [vmem:[%s15618_s0 + $0x18] sm:$0x1] }
  0xb4   :  { %v9335_v31 = vld [vmem:[%s15619_s1 + $0x16a0] sm:$0xf]  ;;  %v10431_v32 = vld [vmem:[%s15619_s1 + $0x16ac] sm:$0xf0]  ;;  %5074 = vmatpush.bf16.msrb.mxu1 %v9224_v23  ;;  %5087 = vmatpush.bf16.msrb.mxu2 %v9352_v24  ;;  %v9208_v37 = vor.u32 %v10399_v30, %v9207_v28 }
  0xb5   :  { %v9463_v33 = vld [vmem:[%s15619_s1 + $0x17a0] sm:$0xf]  ;;  %v10463_v34 = vld [vmem:[%s15619_s1 + $0x17ac] sm:$0xf0]  ;;  %v9336_v38 = vor.u32 %v10431_v32, %v9335_v31  ;;  %5100 = vmatpush.bf16.msrb.mxu3 %v9480_v29 }
  0xb6   :  { %v9063_v36 = vld [vmem:[%s15619_s1 + $0x1480] sm:$0xf]  ;;  %v10363_v39 = vld [vmem:[%s15619_s1 + $0x148c] sm:$0xf0]  ;;  %v9464_v42 = vor.u32 %v10463_v34, %v9463_v33 }
  0xb7   :  { %v9191_v40 = vld [vmem:[%s15619_s1 + $0x1580] sm:$0xf]  ;;  %v10395_v41 = vld [vmem:[%s15619_s1 + $0x158c] sm:$0xf0]  ;;  %5062 = vmatpush.bf16.msrb.mxu0 %v9080_v35  ;;  %v9064_v53 = vor.u32 %v10363_v39, %v9063_v36  ;;  %v4809_v35 = vpop.f32.mrf.mxu0 }
  0xb8   :  { %v9319_v43 = vld [vmem:[%s15619_s1 + $0x1680] sm:$0xf]  ;;  %v10427_v44 = vld [vmem:[%s15619_s1 + $0x168c] sm:$0xf0]  ;;  %5075 = vmatpush.bf16.msrb.mxu1 %v9208_v37  ;;  %5088 = vmatpush.bf16.msrb.mxu2 %v9336_v38  ;;  %v9192_v57 = vor.u32 %v10395_v41, %v9191_v40 }
  0xb9   :  { %v9447_v45 = vld [vmem:[%s15619_s1 + $0x1780] sm:$0xf]  ;;  %v10459_v50 = vld [vmem:[%s15619_s1 + $0x178c] sm:$0xf0]  ;;  %v9320_v58 = vor.u32 %v10427_v44, %v9319_v43  ;;  %5101 = vmatpush.bf16.msrb.mxu3 %v9464_v42  ;;  %v4822_v42 = vpop.f32.mrf.mxu1 }
  0xba   :  { %v9047_v51 = vld [vmem:[%s15619_s1 + $0x1460] sm:$0xf]  ;;  %v10359_v52 = vld [vmem:[%s15619_s1 + $0x146c] sm:$0xf0]  ;;  %v9448_v63 = vor.u32 %v10459_v50, %v9447_v45 }
  0xbb   :  { %v9175_v54 = vld [vmem:[%s15619_s1 + $0x1560] sm:$0xf]  ;;  %v10391_v55 = vld [vmem:[%s15619_s1 + $0x156c] sm:$0xf0]  ;;  %5063 = vmatpush.bf16.msrb.mxu0 %v9064_v53  ;;  %v9048_v10 = vor.u32 %v10359_v52, %v9047_v51 }
  0xbc   :  { %v9303_v56 = vld [vmem:[%s15619_s1 + $0x1660] sm:$0xf]  ;;  %v10423_v59 = vld [vmem:[%s15619_s1 + $0x166c] sm:$0xf0]  ;;  %5076 = vmatpush.bf16.msrb.mxu1 %v9192_v57  ;;  %5089 = vmatpush.bf16.msrb.mxu2 %v9320_v58  ;;  %v9176_v19 = vor.u32 %v10391_v55, %v9175_v54 }
  0xbd   :  { %v9431_v61 = vld [vmem:[%s15619_s1 + $0x1760] sm:$0xf]  ;;  %v10455_v62 = vld [vmem:[%s15619_s1 + $0x176c] sm:$0xf0]  ;;  %v9304_v23 = vor.u32 %v10423_v59, %v9303_v56  ;;  %5102 = vmatpush.bf16.msrb.mxu3 %v9448_v63  ;;  %v4835_v63 = vpop.f32.mrf.mxu2 }
  0xbe   :  { %v810_v3 = vld [vmem:[%s15620_s2] sm:$0xf]  ;;  %v11742_v6 = vld [vmem:[#allocation1 + $0x2d] sm:$0xff]  ;;  %v9432_v28 = vor.u32 %v10455_v62, %v9431_v61 }
  0xbf   :  { %v11744_v7 = vld [vmem:[#allocation1 + $0x3f] sm:$0xff]  ;;  %v10355_v24 = vld [vmem:[%s15619_s1 + $0x144c] sm:$0xf0]  ;;  %v812_v27 = vperm.slane %v810_v3, 0  ;;  %5064 = vmatpush.bf16.msrb.mxu0 %v9048_v10 }
  0xc0   :  { %v9031_v11 = vld [vmem:[%s15619_s1 + $0x1440] sm:$0xf]  ;;  %851 = vst [vmem:[#allocation1] ss:$9 sm:$0xff] %v25_v8  ;;  %v10387_v29 = vld [vmem:[%s15619_s1 + $0x154c] sm:$0xf0]  ;;  %5077 = vmatpush.bf16.msrb.mxu1 %v9176_v19  ;;  %5090 = vmatpush.bf16.msrb.mxu2 %v9304_v23  ;;  %v4848_v23 = vpop.f32.mrf.mxu3 }
  0xc1   :  { %v9159_v25 = vld [vmem:[%s15619_s1 + $0x1540] sm:$0xf]  ;;  %v10419_v31 = vld [vmem:[%s15619_s1 + $0x164c] sm:$0xf0]  ;;  %v9032_v34 = vor.u32 %v10355_v24, %v9031_v11  ;;  %v4810_v41 = vadd.f32 %v4809_v35, %v812_v27  ;;  %5103 = vmatpush.bf16.msrb.mxu3 %v9432_v28  ;;  %v9733_v27 = vld [vmem:[%s15619_s1 + $0xe4] sm:$0xf] }
  0xc2   :  { %v9287_v30 = vld [vmem:[%s15619_s1 + $0x1640] sm:$0xf]  ;;  %v10451_v33 = vld [vmem:[%s15619_s1 + $0x174c] sm:$0xf0]  ;;  %v9160_v36 = vor.u32 %v10387_v29, %v9159_v25  ;;  %v6553_v29 = vld [vmem:[%s15619_s1 + $0xf0] sm:$0xf0] }
  0xc3   :  { %v9415_v32 = vld [vmem:[%s15619_s1 + $0x1740] sm:$0xf]  ;;  %v9288_v37 = vor.u32 %v10419_v31, %v9287_v30  ;;  %v10351_v39 = vld [vmem:[%s15619_s1 + $0x142c] sm:$0xf0]  ;;  %v4823_v53 = vadd.f32 %v4822_v42, %v4810_v41  ;;  %5065 = vmatpush.bf16.msrb.mxu0 %v9032_v34  ;;  %v9765_v30 = vld [vmem:[%s15619_s1 + $0x1e4] sm:$0xf]  ;;  %v6556_v41 = vor.u32 %v9733_v27, %v6553_v29 }
  0xc4   :  { %v9015_v38 = vld [vmem:[%s15619_s1 + $0x1420] sm:$0xf]  ;;  %v9416_v43 = vor.u32 %v10451_v33, %v9415_v32  ;;  %v10383_v44 = vld [vmem:[%s15619_s1 + $0x152c] sm:$0xf0]  ;;  %5078 = vmatpush.bf16.msrb.mxu1 %v9160_v36  ;;  %v6681_v31 = vld [vmem:[%s15619_s1 + $0x1f0] sm:$0xf0]  ;;  %v4811_v33 = vpop.f32.mrf.mxu0 }
  0xc5   :  { %v9143_v40 = vld [vmem:[%s15619_s1 + $0x1520] sm:$0xf]  ;;  %v10415_v50 = vld [vmem:[%s15619_s1 + $0x162c] sm:$0xf0]  ;;  %v9016_v54 = vor.u32 %v10351_v39, %v9015_v38  ;;  %5091 = vmatpush.bf16.msrb.mxu2 %v9288_v37  ;;  %v4836_v19 = vadd.f32 %v4835_v63, %v4823_v53  ;;  %v9797_v36 = vld [vmem:[%s15619_s1 + $0x2e4] sm:$0xf]  ;;  %v4824_v38 = vpop.f32.mrf.mxu1  ;;  %v6684_v42 = vor.u32 %v9765_v30, %v6681_v31 }
  0xc6   :  { %v9271_v45 = vld [vmem:[%s15619_s1 + $0x1620] sm:$0xf]  ;;  %v10447_v52 = vld [vmem:[%s15619_s1 + $0x172c] sm:$0xf0]  ;;  %v9144_v57 = vor.u32 %v10383_v44, %v9143_v40  ;;  %5104 = vmatpush.bf16.msrb.mxu3 %v9416_v43  ;;  %v6809_v37 = vld [vmem:[%s15619_s1 + $0x2f0] sm:$0xf0] }
  0xc7   :  { %v9399_v51 = vld [vmem:[%s15619_s1 + $0x1720] sm:$0xf]  ;;  %v10347_v56 = vld [vmem:[%s15619_s1 + $0x140c] sm:$0xf0]  ;;  %v9272_v58 = vor.u32 %v10415_v50, %v9271_v45  ;;  %5066 = vmatpush.bf16.msrb.mxu0 %v9016_v54  ;;  %v11839_v32 = vadd.f32 %v4848_v23, %v4836_v19  ;;  %v9729_v45 = vld [vmem:[%s15619_s1 + $0xc4] sm:$0xf]  ;;  %v6812_v50 = vor.u32 %v9797_v36, %v6809_v37 }
  0xc8   :  { %v8999_v55 = vld [vmem:[%s15619_s1 + $0x1400] sm:$0xf]  ;;  %v10379_v61 = vld [vmem:[%s15619_s1 + $0x150c] sm:$0xf0]  ;;  %v9400_v3 = vor.u32 %v10447_v52, %v9399_v51  ;;  %5079 = vmatpush.bf16.msrb.mxu1 %v9144_v57  ;;  %v6537_v51 = vld [vmem:[%s15619_s1 + $0xd0] sm:$0xf0] }
  0xc9   :  { %v9127_v59 = vld [vmem:[%s15619_s1 + $0x1500] sm:$0xf]  ;;  %v10411_v8 = vld [vmem:[%s15619_s1 + $0x160c] sm:$0xf0]  ;;  %v9000_v28 = vor.u32 %v10347_v56, %v8999_v55  ;;  %5092 = vmatpush.bf16.msrb.mxu2 %v9272_v58  ;;  %v9761_v52 = vld [vmem:[%s15619_s1 + $0x1c4] sm:$0xf]  ;;  %v4837_v56 = vpop.f32.mrf.mxu2  ;;  %v4850_v58 = vpop.f32.mrf.mxu3 }
  0xca   :  { %v9255_v62 = vld [vmem:[%s15619_s1 + $0x1600] sm:$0xf]  ;;  %v10443_v11 = vld [vmem:[%s15619_s1 + $0x170c] sm:$0xf0]  ;;  %v9128_v34 = vor.u32 %v10379_v61, %v9127_v59  ;;  %5105 = vmatpush.bf16.msrb.mxu3 %v9400_v3  ;;  %v6665_v53 = vld [vmem:[%s15619_s1 + $0x1d0] sm:$0xf0]  ;;  %v6540_v59 = vor.u32 %v9729_v45, %v6537_v51 }
  0xcb   :  { %v9383_v10 = vld [vmem:[%s15619_s1 + $0x1700] sm:$0xf]  ;;  %v10487_v25 = vld [vmem:[%s15619_s1 + $0x186c] sm:$0xf0]  ;;  %v9256_v35 = vor.u32 %v10411_v8, %v9255_v62  ;;  %5067 = vmatpush.bf16.msrb.mxu0 %v9000_v28  ;;  %v9793_v54 = vld [vmem:[%s15619_s1 + $0x2c4] sm:$0xf]  ;;  %v6668_v61 = vor.u32 %v9761_v52, %v6665_v53 }
  0xcc   :  { %v9559_v24 = vld [vmem:[%s15619_s1 + $0x1860] sm:$0xf]  ;;  %v9384_v39 = vor.u32 %v10443_v11, %v9383_v10  ;;  %v10483_v44 = vld [vmem:[%s15619_s1 + $0x184c] sm:$0xf0]  ;;  %5080 = vmatpush.bf16.msrb.mxu1 %v9128_v34  ;;  %v6793_v55 = vld [vmem:[%s15619_s1 + $0x2d0] sm:$0xf0] }
  0xcd   :  { %v9560_v40 = vor.u32 %v10487_v25, %v9559_v24  ;;  %v9543_v43 = vld [vmem:[%s15619_s1 + $0x1840] sm:$0xf]  ;;  %5093 = vmatpush.bf16.msrb.mxu2 %v9256_v35  ;;  %v10479_v63 = vld [vmem:[%s15619_s1 + $0x182c] sm:$0xf0]  ;;  %v9725_v3 = vld [vmem:[%s15619_s1 + $0xa4] sm:$0xf]  ;;  %v6796_v8 = vor.u32 %v9793_v54, %v6793_v55  ;;  %v4874_v52 = vpop.f32.mrf.mxu1 }
  0xce   :  { %5106 = vmatpush.bf16.msrb.mxu3 %v9384_v39  ;;  %v9544_v57 = vor.u32 %v10483_v44, %v9543_v43  ;;  %v9527_v62 = vld [vmem:[%s15619_s1 + $0x1820] sm:$0xf]  ;;  %5068 = vmatmul.bf16.vlgmr.msrb.gmra.mxu0 %v11738_v4  ;;  %v6521_v10 = vld [vmem:[%s15619_s1 + $0xb0] sm:$0xf0]  ;;  %v9757_v11 = vld [vmem:[%s15619_s1 + $0x1a4] sm:$0xf] }
  0xcf   :  { %5116 = vmatpush.bf16.msra.mxu0 %v9560_v40  ;;  %v6649_v19 = vld [vmem:[%s15619_s1 + $0x1b0] sm:$0xf0]  ;;  %5081 = vmatmul.bf16.vlgmr.msrb.gmra.mxu1 %v11742_v6  ;;  %v9789_v23 = vld [vmem:[%s15619_s1 + $0x2a4] sm:$0xf]  ;;  %v9528_v25 = vor.u32 %v10479_v63, %v9527_v62  ;;  %v9511_v27 = vld [vmem:[%s15619_s1 + $0x1800] sm:$0xf]  ;;  %v6524_v28 = vor.u32 %v9725_v3, %v6521_v10 }
  0xd0   :  { %5125 = vmatpush.bf16.msra.mxu1 %v6556_v41  ;;  %5094 = vmatmul.bf16.vlgmr.msrb.gmra.mxu2 %v11740_v5  ;;  %v6777_v24 = vld [vmem:[%s15619_s1 + $0x2b0] sm:$0xf0]  ;;  %v6652_v29 = vor.u32 %v9757_v11, %v6649_v19  ;;  %v10475_v30 = vld [vmem:[%s15619_s1 + $0x180c] sm:$0xf0]  ;;  %v9721_v31 = vld [vmem:[%s15619_s1 + $0x84] sm:$0xf] }
  0xd1   :  { %5138 = vmatpush.bf16.msra.mxu2 %v6684_v42  ;;  %5107 = vmatmul.bf16.vlgmr.msrb.gmra.mxu3 %v11744_v7  ;;  %v6505_v33 = vld [vmem:[%s15619_s1 + $0x90] sm:$0xf0]  ;;  %v6780_v34 = vor.u32 %v9789_v23, %v6777_v24  ;;  %v9753_v35 = vld [vmem:[%s15619_s1 + $0x184] sm:$0xf]  ;;  %v9512_v41 = vor.u32 %v10475_v30, %v9511_v27  ;;  %v4861_v42 = vpop.f32.mrf.mxu0  ;;  %v4887_v10 = vpop.f32.mrf.mxu2 }
  0xd2   :  { %5151 = vmatpush.bf16.msra.mxu3 %v6812_v50  ;;  %v6633_v36 = vld [vmem:[%s15619_s1 + $0x190] sm:$0xf0]  ;;  %v9785_v37 = vld [vmem:[%s15619_s1 + $0x284] sm:$0xf]  ;;  %v6508_v43 = vor.u32 %v9721_v31, %v6505_v33  ;;  %v4862_v51 = vadd.f32 %v4861_v42, %v11839_v32 }
  0xd3   :  { %5117 = vmatpush.bf16.msra.mxu0 %v9544_v57  ;;  %v6761_v38 = vld [vmem:[%s15619_s1 + $0x290] sm:$0xf0]  ;;  %v9829_v39 = vld [vmem:[%s15619_s1 + $0x3e4] sm:$0xf]  ;;  %v6636_v44 = vor.u32 %v9753_v35, %v6633_v36 }
  0xd4   :  { %5126 = vmatpush.bf16.msra.mxu1 %v6540_v59  ;;  %v6937_v40 = vld [vmem:[%s15619_s1 + $0x3f0] sm:$0xf0]  ;;  %v9717_v45 = vld [vmem:[%s15619_s1 + $0x64] sm:$0xf]  ;;  %v6764_v53 = vor.u32 %v9785_v37, %v6761_v38 }
  0xd5   :  { %5139 = vmatpush.bf16.msra.mxu2 %v6668_v61  ;;  %v6489_v50 = vld [vmem:[%s15619_s1 + $0x70] sm:$0xf0]  ;;  %v6940_v54 = vor.u32 %v9829_v39, %v6937_v40  ;;  %v9749_v55 = vld [vmem:[%s15619_s1 + $0x164] sm:$0xf]  ;;  %v4875_v61 = vadd.f32 %v4874_v52, %v4862_v51  ;;  %v4876_v40 = vpop.f32.mrf.mxu1 }
  0xd6   :  { %5152 = vmatpush.bf16.msra.mxu3 %v6796_v8  ;;  %v6617_v56 = vld [vmem:[%s15619_s1 + $0x170] sm:$0xf0]  ;;  %v9781_v57 = vld [vmem:[%s15619_s1 + $0x264] sm:$0xf]  ;;  %v6492_v62 = vor.u32 %v9717_v45, %v6489_v50 }
  0xd7   :  { %5118 = vmatpush.bf16.msra.mxu0 %v9528_v25  ;;  %v6745_v32 = vld [vmem:[%s15619_s1 + $0x270] sm:$0xf0]  ;;  %v9825_v58 = vld [vmem:[%s15619_s1 + $0x3c4] sm:$0xf]  ;;  %v6620_v63 = vor.u32 %v9749_v55, %v6617_v56  ;;  %v4888_v27 = vadd.f32 %v4887_v10, %v4875_v61 }
  0xd8   :  { %5127 = vmatpush.bf16.msra.mxu1 %v6524_v28  ;;  %v6921_v59 = vld [vmem:[%s15619_s1 + $0x3d0] sm:$0xf0]  ;;  %v9713_v3 = vld [vmem:[%s15619_s1 + $0x44] sm:$0xf]  ;;  %v6748_v11 = vor.u32 %v9781_v57, %v6745_v32  ;;  %v4900_v28 = vpop.f32.mrf.mxu3 }
  0xd9   :  { %5140 = vmatpush.bf16.msra.mxu2 %v6652_v29  ;;  %v6473_v8 = vld [vmem:[%s15619_s1 + $0x50] sm:$0xf0]  ;;  %v6924_v19 = vor.u32 %v9825_v58, %v6921_v59  ;;  %v9745_v23 = vld [vmem:[%s15619_s1 + $0x144] sm:$0xf]  ;;  %v4863_v35 = vpop.f32.mrf.mxu0  ;;  %v4889_v32 = vpop.f32.mrf.mxu2 }
  0xda   :  { %5153 = vmatpush.bf16.msra.mxu3 %v6780_v34  ;;  %v6601_v24 = vld [vmem:[%s15619_s1 + $0x150] sm:$0xf0]  ;;  %v9777_v25 = vld [vmem:[%s15619_s1 + $0x244] sm:$0xf]  ;;  %v11978_v34 = vadd.f32 %v4900_v28, %v4888_v27  ;;  %v6476_v36 = vor.u32 %v9713_v3, %v6473_v8 }
  0xdb   :  { %5119 = vmatpush.bf16.msra.mxu0 %v9512_v41  ;;  %v6729_v29 = vld [vmem:[%s15619_s1 + $0x250] sm:$0xf0]  ;;  %v9821_v30 = vld [vmem:[%s15619_s1 + $0x3a4] sm:$0xf]  ;;  %v6604_v37 = vor.u32 %v9745_v23, %v6601_v24 }
  0xdc   :  { %5128 = vmatpush.bf16.msra.mxu1 %v6508_v43  ;;  %v6905_v31 = vld [vmem:[%s15619_s1 + $0x3b0] sm:$0xf0]  ;;  %v852_v33 = vld [vmem:[#allocation1] sm:$0xff]  ;;  %v6732_v41 = vor.u32 %v9777_v25, %v6729_v29 }
  0xdd   :  { %5141 = vmatpush.bf16.msra.mxu2 %v6636_v44  ;;  %v9709_v38 = vld [vmem:[%s15619_s1 + $0x24] sm:$0xf]  ;;  %v6457_v39 = vld [vmem:[%s15619_s1 + $0x30] sm:$0xf0]  ;;  %v6908_v42 = vor.u32 %v9821_v30, %v6905_v31 }
  0xde   :  { %5154 = vmatpush.bf16.msra.mxu3 %v6764_v53  ;;  %v9741_v43 = vld [vmem:[%s15619_s1 + $0x124] sm:$0xf]  ;;  %v6585_v44 = vld [vmem:[%s15619_s1 + $0x130] sm:$0xf0]  ;;  %9573 = vmatmul.msk.bf16.vlgmr.msra.gmra.mxu0 %vm4797_vm0, %v852_v33  ;;  %v6460_v53 = vor.u32 %v9709_v38, %v6457_v39 }
  0xdf   :  { %5164 = vmatpush.bf16.msrb.mxu0 %v6940_v54  ;;  %v9773_v45 = vld [vmem:[%s15619_s1 + $0x224] sm:$0xf]  ;;  %v6713_v50 = vld [vmem:[%s15619_s1 + $0x230] sm:$0xf0]  ;;  %v6588_v54 = vor.u32 %v9741_v43, %v6585_v44 }
  0xe0   :  { %5129 = vmatpush.bf16.msra.mxu1 %v6492_v62  ;;  %v9817_v51 = vld [vmem:[%s15619_s1 + $0x384] sm:$0xf]  ;;  %v6889_v52 = vld [vmem:[%s15619_s1 + $0x390] sm:$0xf0]  ;;  %v6716_v58 = vor.u32 %v9773_v45, %v6713_v50  ;;  %v4902_v3 = vpop.f32.mrf.mxu3 }
  0xe1   :  { %5142 = vmatpush.bf16.msra.mxu2 %v6620_v63  ;;  %v9705_v55 = vld [vmem:[%s15619_s1 + $0x4] sm:$0xf]  ;;  %v6441_v56 = vld [vmem:[%s15619_s1 + $0x10] sm:$0xf0]  ;;  %v6892_v59 = vor.u32 %v9817_v51, %v6889_v52 }
  0xe2   :  { %5155 = vmatpush.bf16.msra.mxu3 %v6748_v11  ;;  %v9737_v57 = vld [vmem:[%s15619_s1 + $0x104] sm:$0xf]  ;;  %v6569_v61 = vld [vmem:[%s15619_s1 + $0x110] sm:$0xf0]  ;;  %v6444_v25 = vor.u32 %v9705_v55, %v6441_v56 }
  0xe3   :  { %5165 = vmatpush.bf16.msrb.mxu0 %v6924_v19  ;;  %v9769_v62 = vld [vmem:[%s15619_s1 + $0x204] sm:$0xf]  ;;  %v6697_v63 = vld [vmem:[%s15619_s1 + $0x210] sm:$0xf0]  ;;  %v6572_v27 = vor.u32 %v9737_v57, %v6569_v61 }
  0xe4   :  { %5130 = vmatpush.bf16.msra.mxu1 %v6476_v36  ;;  %v9813_v8 = vld [vmem:[%s15619_s1 + $0x364] sm:$0xf]  ;;  %v6873_v10 = vld [vmem:[%s15619_s1 + $0x370] sm:$0xf0]  ;;  %v6700_v30 = vor.u32 %v9769_v62, %v6697_v63 }
  0xe5   :  { %5143 = vmatpush.bf16.msra.mxu2 %v6604_v37  ;;  %v9861_v11 = vld [vmem:[%s15619_s1 + $0x4e4] sm:$0xf]  ;;  %v7065_v19 = vld [vmem:[%s15619_s1 + $0x4f0] sm:$0xf0]  ;;  %v6876_v31 = vor.u32 %v9813_v8, %v6873_v10 }
  0xe6   :  { %5156 = vmatpush.bf16.msra.mxu3 %v6732_v41  ;;  %v9893_v23 = vld [vmem:[%s15619_s1 + $0x5e4] sm:$0xf]  ;;  %v7193_v24 = vld [vmem:[%s15619_s1 + $0x5f0] sm:$0xf0]  ;;  %v7068_v33 = vor.u32 %v9861_v11, %v7065_v19 }
  0xe7   :  { %5166 = vmatpush.bf16.msrb.mxu0 %v6908_v42  ;;  %v9925_v28 = vld [vmem:[%s15619_s1 + $0x6e4] sm:$0xf]  ;;  %v7321_v29 = vld [vmem:[%s15619_s1 + $0x6f0] sm:$0xf0]  ;;  %v7196_v35 = vor.u32 %v9893_v23, %v7193_v24 }
  0xe8   :  { %5131 = vmatpush.bf16.msra.mxu1 %v6460_v53  ;;  %v9809_v36 = vld [vmem:[%s15619_s1 + $0x344] sm:$0xf]  ;;  %v6857_v37 = vld [vmem:[%s15619_s1 + $0x350] sm:$0xf0]  ;;  %v7324_v39 = vor.u32 %v9925_v28, %v7321_v29 }
  0xe9   :  { %5144 = vmatpush.bf16.msra.mxu2 %v6588_v54  ;;  %v9857_v38 = vld [vmem:[%s15619_s1 + $0x4c4] sm:$0xf]  ;;  %v7049_v40 = vld [vmem:[%s15619_s1 + $0x4d0] sm:$0xf0]  ;;  %v6860_v45 = vor.u32 %v9809_v36, %v6857_v37 }
  0xea   :  { %5157 = vmatpush.bf16.msra.mxu3 %v6716_v58  ;;  %v9889_v41 = vld [vmem:[%s15619_s1 + $0x5c4] sm:$0xf]  ;;  %v7177_v42 = vld [vmem:[%s15619_s1 + $0x5d0] sm:$0xf0]  ;;  %v7052_v50 = vor.u32 %v9857_v38, %v7049_v40 }
  0xeb   :  { %5167 = vmatpush.bf16.msrb.mxu0 %v6892_v59  ;;  %v9921_v43 = vld [vmem:[%s15619_s1 + $0x6c4] sm:$0xf]  ;;  %v7305_v44 = vld [vmem:[%s15619_s1 + $0x6d0] sm:$0xf0]  ;;  %v7180_v51 = vor.u32 %v9889_v41, %v7177_v42 }
  0xec   :  { %5132 = vmatpush.bf16.msra.mxu1 %v6444_v25  ;;  %v9805_v52 = vld [vmem:[%s15619_s1 + $0x324] sm:$0xf]  ;;  %v6841_v53 = vld [vmem:[%s15619_s1 + $0x330] sm:$0xf0]  ;;  %v7308_v55 = vor.u32 %v9921_v43, %v7305_v44 }
  0xed   :  { %5145 = vmatpush.bf16.msra.mxu2 %v6572_v27  ;;  %v9853_v54 = vld [vmem:[%s15619_s1 + $0x4a4] sm:$0xf]  ;;  %v7033_v56 = vld [vmem:[%s15619_s1 + $0x4b0] sm:$0xf0]  ;;  %v6844_v61 = vor.u32 %v9805_v52, %v6841_v53  ;;  %v4913_v27 = vpop.f32.mrf.mxu0 }
  0xee   :  { %5158 = vmatpush.bf16.msra.mxu3 %v6700_v30  ;;  %v9885_v57 = vld [vmem:[%s15619_s1 + $0x5a4] sm:$0xf]  ;;  %v7161_v32 = vld [vmem:[%s15619_s1 + $0x5b0] sm:$0xf0]  ;;  %v7036_v63 = vor.u32 %v9853_v54, %v7033_v56 }
  0xef   :  { %5168 = vmatpush.bf16.msrb.mxu0 %v6876_v31  ;;  %v9917_v58 = vld [vmem:[%s15619_s1 + $0x6a4] sm:$0xf]  ;;  %v7289_v59 = vld [vmem:[%s15619_s1 + $0x6b0] sm:$0xf0]  ;;  %5133 = vmatmul.bf16.vlgmr.msra.gmra.mxu1 %v10891_v21  ;;  %v7164_v3 = vor.u32 %v9885_v57, %v7161_v32  ;;  %v4914_v31 = vadd.f32 %v4913_v27, %v11978_v34  ;;  %v4939_v57 = vpop.f32.mrf.mxu2 }
  0xf0   :  { %5177 = vmatpush.bf16.msrb.mxu1 %v7068_v33  ;;  %5146 = vmatmul.bf16.vlgmr.msra.gmra.mxu2 %v10902_v26  ;;  %v9801_v62 = vld [vmem:[%s15619_s1 + $0x304] sm:$0xf]  ;;  %v6825_v8 = vld [vmem:[%s15619_s1 + $0x310] sm:$0xf0]  ;;  %v7292_v19 = vor.u32 %v9917_v58, %v7289_v59 }
  0xf1   :  { %5190 = vmatpush.bf16.msrb.mxu2 %v7196_v35  ;;  %5159 = vmatmul.bf16.vlgmr.msra.gmra.mxu3 %v10889_v20  ;;  %v9849_v10 = vld [vmem:[%s15619_s1 + $0x484] sm:$0xf]  ;;  %v7017_v11 = vld [vmem:[%s15619_s1 + $0x490] sm:$0xf0]  ;;  %v6828_v33 = vor.u32 %v9801_v62, %v6825_v8  ;;  %v4926_v35 = vpop.f32.mrf.mxu1 }
  0xf2   :  { %5203 = vmatpush.bf16.msrb.mxu3 %v7324_v39  ;;  %v9881_v23 = vld [vmem:[%s15619_s1 + $0x584] sm:$0xf]  ;;  %v7145_v24 = vld [vmem:[%s15619_s1 + $0x590] sm:$0xf0]  ;;  %v7020_v36 = vor.u32 %v9849_v10, %v7017_v11  ;;  %v4927_v41 = vadd.f32 %v4926_v35, %v4914_v31 }
  0xf3   :  { %5169 = vmatpush.bf16.msrb.mxu0 %v6860_v45  ;;  %v9913_v25 = vld [vmem:[%s15619_s1 + $0x684] sm:$0xf]  ;;  %v7273_v28 = vld [vmem:[%s15619_s1 + $0x690] sm:$0xf0]  ;;  %v7148_v37 = vor.u32 %v9881_v23, %v7145_v24 }
  0xf4   :  { %5178 = vmatpush.bf16.msrb.mxu1 %v7052_v50  ;;  %v9957_v29 = vld [vmem:[%s15619_s1 + $0x7e4] sm:$0xf]  ;;  %v7449_v30 = vld [vmem:[%s15619_s1 + $0x7f0] sm:$0xf0]  ;;  %v7276_v40 = vor.u32 %v9913_v25, %v7273_v28  ;;  %v4940_v62 = vadd.f32 %v4939_v57, %v4927_v41 }
  0xf5   :  { %5191 = vmatpush.bf16.msrb.mxu2 %v7180_v51  ;;  %v9845_v38 = vld [vmem:[%s15619_s1 + $0x464] sm:$0xf]  ;;  %v7001_v39 = vld [vmem:[%s15619_s1 + $0x470] sm:$0xf0]  ;;  %v7452_v42 = vor.u32 %v9957_v29, %v7449_v30  ;;  %v4915_v11 = vpop.f32.mrf.mxu0 }
  0xf6   :  { %5204 = vmatpush.bf16.msrb.mxu3 %v7308_v55  ;;  %v9877_v34 = vld [vmem:[%s15619_s1 + $0x564] sm:$0xf]  ;;  %v7129_v43 = vld [vmem:[%s15619_s1 + $0x570] sm:$0xf0]  ;;  %v7004_v52 = vor.u32 %v9845_v38, %v7001_v39 }
  0xf7   :  { %5170 = vmatpush.bf16.msrb.mxu0 %v6844_v61  ;;  %v9909_v44 = vld [vmem:[%s15619_s1 + $0x664] sm:$0xf]  ;;  %v7257_v45 = vld [vmem:[%s15619_s1 + $0x670] sm:$0xf0]  ;;  %v7132_v53 = vor.u32 %v9877_v34, %v7129_v43 }
  0xf8   :  { %5179 = vmatpush.bf16.msrb.mxu1 %v7036_v63  ;;  %v9953_v50 = vld [vmem:[%s15619_s1 + $0x7c4] sm:$0xf]  ;;  %v7433_v51 = vld [vmem:[%s15619_s1 + $0x7d0] sm:$0xf0]  ;;  %v7260_v56 = vor.u32 %v9909_v44, %v7257_v45  ;;  %v4952_v63 = vpop.f32.mrf.mxu3 }
  0xf9   :  { %5192 = vmatpush.bf16.msrb.mxu2 %v7164_v3  ;;  %v9841_v54 = vld [vmem:[%s15619_s1 + $0x444] sm:$0xf]  ;;  %v6985_v55 = vld [vmem:[%s15619_s1 + $0x450] sm:$0xf0]  ;;  %v7436_v32 = vor.u32 %v9953_v50, %v7433_v51  ;;  %v12178_v23 = vadd.f32 %v4952_v63, %v4940_v62 }
  0xfa   :  { %5205 = vmatpush.bf16.msrb.mxu3 %v7292_v19  ;;  %v9873_v58 = vld [vmem:[%s15619_s1 + $0x544] sm:$0xf]  ;;  %v7113_v59 = vld [vmem:[%s15619_s1 + $0x550] sm:$0xf0]  ;;  %v4928_v19 = vpop.f32.mrf.mxu1  ;;  %v6988_v24 = vor.u32 %v9841_v54, %v6985_v55 }
  0xfb   :  { %5171 = vmatpush.bf16.msrb.mxu0 %v6828_v33  ;;  %v9905_v61 = vld [vmem:[%s15619_s1 + $0x644] sm:$0xf]  ;;  %v7241_v3 = vld [vmem:[%s15619_s1 + $0x650] sm:$0xf0]  ;;  %v7116_v25 = vor.u32 %v9873_v58, %v7113_v59 }
  0xfc   :  { %5180 = vmatpush.bf16.msrb.mxu1 %v7020_v36  ;;  %v9949_v8 = vld [vmem:[%s15619_s1 + $0x7a4] sm:$0xf]  ;;  %v7417_v10 = vld [vmem:[%s15619_s1 + $0x7b0] sm:$0xf0]  ;;  %v7244_v29 = vor.u32 %v9905_v61, %v7241_v3 }
  0xfd   :  { %5193 = vmatpush.bf16.msrb.mxu2 %v7148_v37  ;;  %v9837_v27 = vld [vmem:[%s15619_s1 + $0x424] sm:$0xf]  ;;  %v6969_v28 = vld [vmem:[%s15619_s1 + $0x430] sm:$0xf0]  ;;  %v7420_v30 = vor.u32 %v9949_v8, %v7417_v10 }
  0xfe   :  { %5206 = vmatpush.bf16.msrb.mxu3 %v7276_v40  ;;  %5172 = vmatmul.bf16.vlgmr.msrb.gmra.mxu0 %v10893_v22  ;;  %v9869_v31 = vld [vmem:[%s15619_s1 + $0x524] sm:$0xf]  ;;  %v7097_v33 = vld [vmem:[%s15619_s1 + $0x530] sm:$0xf0]  ;;  %v6972_v39 = vor.u32 %v9837_v27, %v6969_v28 }
  0xff   :  { %5216 = vmatpush.bf16.msra.mxu0 %v7452_v42  ;;  %v9901_v35 = vld [vmem:[%s15619_s1 + $0x624] sm:$0xf]  ;;  %v7225_v36 = vld [vmem:[%s15619_s1 + $0x630] sm:$0xf0]  ;;  %v7100_v40 = vor.u32 %v9869_v31, %v7097_v33 }
 0x100   :  { %5181 = vmatpush.bf16.msrb.mxu1 %v7004_v52  ;;  %v9945_v37 = vld [vmem:[%s15619_s1 + $0x784] sm:$0xf]  ;;  %v7401_v38 = vld [vmem:[%s15619_s1 + $0x790] sm:$0xf0]  ;;  %v7228_v43 = vor.u32 %v9901_v35, %v7225_v36  ;;  %v4941_v52 = vpop.f32.mrf.mxu2 }
 0x101   :  { %5194 = vmatpush.bf16.msrb.mxu2 %v7132_v53  ;;  %v9833_v41 = vld [vmem:[%s15619_s1 + $0x404] sm:$0xf]  ;;  %v6953_v42 = vld [vmem:[%s15619_s1 + $0x410] sm:$0xf0]  ;;  %v7404_v44 = vor.u32 %v9945_v37, %v7401_v38 }
 0x102   :  { %5207 = vmatpush.bf16.msrb.mxu3 %v7260_v56  ;;  %v9865_v34 = vld [vmem:[%s15619_s1 + $0x504] sm:$0xf]  ;;  %v7081_v45 = vld [vmem:[%s15619_s1 + $0x510] sm:$0xf0]  ;;  %v4954_v56 = vpop.f32.mrf.mxu3  ;;  %v6956_v59 = vor.u32 %v9833_v41, %v6953_v42 }
 0x103   :  { %5217 = vmatpush.bf16.msra.mxu0 %v7436_v32  ;;  %v9897_v50 = vld [vmem:[%s15619_s1 + $0x604] sm:$0xf]  ;;  %v7209_v51 = vld [vmem:[%s15619_s1 + $0x610] sm:$0xf0]  ;;  %v7084_v61 = vor.u32 %v9865_v34, %v7081_v45 }
 0x104   :  { %5182 = vmatpush.bf16.msrb.mxu1 %v6988_v24  ;;  %v9941_v53 = vld [vmem:[%s15619_s1 + $0x764] sm:$0xf]  ;;  %v7385_v54 = vld [vmem:[%s15619_s1 + $0x770] sm:$0xf0]  ;;  %v7212_v3 = vor.u32 %v9897_v50, %v7209_v51 }
 0x105   :  { %5195 = vmatpush.bf16.msrb.mxu2 %v7116_v25  ;;  %v9989_v55 = vld [vmem:[%s15619_s1 + $0x8e4] sm:$0xf]  ;;  %v7577_v57 = vld [vmem:[%s15619_s1 + $0x8f0] sm:$0xf0]  ;;  %v7388_v8 = vor.u32 %v9941_v53, %v7385_v54 }
 0x106   :  { %5208 = vmatpush.bf16.msrb.mxu3 %v7244_v29  ;;  %v10021_v32 = vld [vmem:[%s15619_s1 + $0x9e4] sm:$0xf]  ;;  %v7705_v58 = vld [vmem:[%s15619_s1 + $0x9f0] sm:$0xf0]  ;;  %v7580_v10 = vor.u32 %v9989_v55, %v7577_v57 }
 0x107   :  { %5218 = vmatpush.bf16.msra.mxu0 %v7420_v30  ;;  %v10053_v62 = vld [vmem:[%s15619_s1 + $0xae4] sm:$0xf]  ;;  %v7833_v63 = vld [vmem:[%s15619_s1 + $0xaf0] sm:$0xf0]  ;;  %v7708_v11 = vor.u32 %v10021_v32, %v7705_v58 }
 0x108   :  { %5183 = vmatpush.bf16.msrb.mxu1 %v6972_v39  ;;  %v9937_v19 = vld [vmem:[%s15619_s1 + $0x744] sm:$0xf]  ;;  %v7369_v24 = vld [vmem:[%s15619_s1 + $0x750] sm:$0xf0]  ;;  %v7836_v27 = vor.u32 %v10053_v62, %v7833_v63 }
 0x109   :  { %5196 = vmatpush.bf16.msrb.mxu2 %v7100_v40  ;;  %v9985_v25 = vld [vmem:[%s15619_s1 + $0x8c4] sm:$0xf]  ;;  %v7561_v28 = vld [vmem:[%s15619_s1 + $0x8d0] sm:$0xf0]  ;;  %v7372_v35 = vor.u32 %v9937_v19, %v7369_v24 }
 0x10a   :  { %5209 = vmatpush.bf16.msrb.mxu3 %v7228_v43  ;;  %v10017_v29 = vld [vmem:[%s15619_s1 + $0x9c4] sm:$0xf]  ;;  %v7689_v30 = vld [vmem:[%s15619_s1 + $0x9d0] sm:$0xf0]  ;;  %v7564_v36 = vor.u32 %v9985_v25, %v7561_v28 }
 0x10b   :  { %5219 = vmatpush.bf16.msra.mxu0 %v7404_v44  ;;  %v10049_v31 = vld [vmem:[%s15619_s1 + $0xac4] sm:$0xf]  ;;  %v7817_v33 = vld [vmem:[%s15619_s1 + $0xad0] sm:$0xf0]  ;;  %v7692_v37 = vor.u32 %v10017_v29, %v7689_v30 }
 0x10c   :  { %5184 = vmatpush.bf16.msrb.mxu1 %v6956_v59  ;;  %v9933_v38 = vld [vmem:[%s15619_s1 + $0x724] sm:$0xf]  ;;  %v7353_v39 = vld [vmem:[%s15619_s1 + $0x730] sm:$0xf0]  ;;  %v7820_v41 = vor.u32 %v10049_v31, %v7817_v33 }
 0x10d   :  { %5197 = vmatpush.bf16.msrb.mxu2 %v7084_v61  ;;  %v9981_v40 = vld [vmem:[%s15619_s1 + $0x8a4] sm:$0xf]  ;;  %v7545_v42 = vld [vmem:[%s15619_s1 + $0x8b0] sm:$0xf0]  ;;  %v7356_v50 = vor.u32 %v9933_v38, %v7353_v39  ;;  %v4965_v61 = vpop.f32.mrf.mxu0 }
 0x10e   :  { %5210 = vmatpush.bf16.msrb.mxu3 %v7212_v3  ;;  %v10013_v34 = vld [vmem:[%s15619_s1 + $0x9a4] sm:$0xf]  ;;  %v7673_v43 = vld [vmem:[%s15619_s1 + $0x9b0] sm:$0xf0]  ;;  %v7548_v52 = vor.u32 %v9981_v40, %v7545_v42 }
 0x10f   :  { %5220 = vmatpush.bf16.msra.mxu0 %v7388_v8  ;;  %v10045_v44 = vld [vmem:[%s15619_s1 + $0xaa4] sm:$0xf]  ;;  %v7801_v45 = vld [vmem:[%s15619_s1 + $0xab0] sm:$0xf0]  ;;  %5185 = vmatmul.bf16.vlgmr.msrb.gmra.mxu1 %v10984_v0  ;;  %v7676_v53 = vor.u32 %v10013_v34, %v7673_v43  ;;  %v4966_v8 = vadd.f32 %v4965_v61, %v12178_v23 }
 0x110   :  { %5229 = vmatpush.bf16.msra.mxu1 %v7580_v10  ;;  %5198 = vmatmul.bf16.vlgmr.msrb.gmra.mxu2 %v10988_v2  ;;  %v9929_v51 = vld [vmem:[%s15619_s1 + $0x704] sm:$0xf]  ;;  %v7337_v54 = vld [vmem:[%s15619_s1 + $0x710] sm:$0xf0]  ;;  %v7804_v57 = vor.u32 %v10045_v44, %v7801_v45 }
 0x111   :  { %5242 = vmatpush.bf16.msra.mxu2 %v7708_v11  ;;  %5211 = vmatmul.bf16.vlgmr.msrb.gmra.mxu3 %v10979_v60  ;;  %v9977_v55 = vld [vmem:[%s15619_s1 + $0x884] sm:$0xf]  ;;  %v7529_v56 = vld [vmem:[%s15619_s1 + $0x890] sm:$0xf0]  ;;  %v7340_v10 = vor.u32 %v9929_v51, %v7337_v54  ;;  %v4978_v11 = vpop.f32.mrf.mxu1 }
 0x112   :  { %5255 = vmatpush.bf16.msra.mxu3 %v7836_v27  ;;  %v10009_v32 = vld [vmem:[%s15619_s1 + $0x984] sm:$0xf]  ;;  %v7657_v58 = vld [vmem:[%s15619_s1 + $0x990] sm:$0xf0]  ;;  %v7532_v19 = vor.u32 %v9977_v55, %v7529_v56  ;;  %v4979_v29 = vadd.f32 %v4978_v11, %v4966_v8 }
 0x113   :  { %5221 = vmatpush.bf16.msra.mxu0 %v7372_v35  ;;  %v10041_v59 = vld [vmem:[%s15619_s1 + $0xa84] sm:$0xf]  ;;  %v7785_v62 = vld [vmem:[%s15619_s1 + $0xa90] sm:$0xf0]  ;;  %v7660_v24 = vor.u32 %v10009_v32, %v7657_v58 }
 0x114   :  { %5230 = vmatpush.bf16.msra.mxu1 %v7564_v36  ;;  %v10085_v63 = vld [vmem:[%s15619_s1 + $0xbe4] sm:$0xf]  ;;  %v7961_v3 = vld [vmem:[%s15619_s1 + $0xbf0] sm:$0xf0]  ;;  %v7788_v28 = vor.u32 %v10041_v59, %v7785_v62  ;;  %v4991_v34 = vpop.f32.mrf.mxu2 }
 0x115   :  { %5243 = vmatpush.bf16.msra.mxu2 %v7692_v37  ;;  %v9973_v25 = vld [vmem:[%s15619_s1 + $0x864] sm:$0xf]  ;;  %v7513_v27 = vld [vmem:[%s15619_s1 + $0x870] sm:$0xf0]  ;;  %v7964_v30 = vor.u32 %v10085_v63, %v7961_v3  ;;  %v4992_v51 = vadd.f32 %v4991_v34, %v4979_v29  ;;  %v4967_v56 = vpop.f32.mrf.mxu0 }
 0x116   :  { %5256 = vmatpush.bf16.msra.mxu3 %v7820_v41  ;;  %v10005_v23 = vld [vmem:[%s15619_s1 + $0x964] sm:$0xf]  ;;  %v7641_v31 = vld [vmem:[%s15619_s1 + $0x970] sm:$0xf0]  ;;  %v7516_v38 = vor.u32 %v9973_v25, %v7513_v27 }
 0x117   :  { %5222 = vmatpush.bf16.msra.mxu0 %v7356_v50  ;;  %v10037_v33 = vld [vmem:[%s15619_s1 + $0xa64] sm:$0xf]  ;;  %v7769_v35 = vld [vmem:[%s15619_s1 + $0xa70] sm:$0xf0]  ;;  %v7644_v39 = vor.u32 %v10005_v23, %v7641_v31 }
 0x118   :  { %5231 = vmatpush.bf16.msra.mxu1 %v7548_v52  ;;  %v10081_v36 = vld [vmem:[%s15619_s1 + $0xbc4] sm:$0xf]  ;;  %v7945_v37 = vld [vmem:[%s15619_s1 + $0xbd0] sm:$0xf0]  ;;  %v7772_v42 = vor.u32 %v10037_v33, %v7769_v35  ;;  %v5004_v52 = vpop.f32.mrf.mxu3 }
 0x119   :  { %5244 = vmatpush.bf16.msra.mxu2 %v7676_v53  ;;  %v9969_v40 = vld [vmem:[%s15619_s1 + $0x844] sm:$0xf]  ;;  %v7497_v41 = vld [vmem:[%s15619_s1 + $0x850] sm:$0xf0]  ;;  %v7948_v43 = vor.u32 %v10081_v36, %v7945_v37  ;;  %v12377_v32 = vadd.f32 %v5004_v52, %v4992_v51 }
 0x11a   :  { %5257 = vmatpush.bf16.msra.mxu3 %v7804_v57  ;;  %v10001_v44 = vld [vmem:[%s15619_s1 + $0x944] sm:$0xf]  ;;  %v7625_v45 = vld [vmem:[%s15619_s1 + $0x950] sm:$0xf0]  ;;  %v4980_v57 = vpop.f32.mrf.mxu1  ;;  %v7500_v58 = vor.u32 %v9969_v40, %v7497_v41 }
 0x11b   :  { %5223 = vmatpush.bf16.msra.mxu0 %v7340_v10  ;;  %v10033_v50 = vld [vmem:[%s15619_s1 + $0xa44] sm:$0xf]  ;;  %v7753_v53 = vld [vmem:[%s15619_s1 + $0xa50] sm:$0xf0]  ;;  %v7628_v59 = vor.u32 %v10001_v44, %v7625_v45 }
 0x11c   :  { %5232 = vmatpush.bf16.msra.mxu1 %v7532_v19  ;;  %v10077_v54 = vld [vmem:[%s15619_s1 + $0xba4] sm:$0xf]  ;;  %v7929_v55 = vld [vmem:[%s15619_s1 + $0xbb0] sm:$0xf0]  ;;  %v7756_v63 = vor.u32 %v10033_v50, %v7753_v53 }
 0x11d   :  { %5245 = vmatpush.bf16.msra.mxu2 %v7660_v24  ;;  %v9965_v61 = vld [vmem:[%s15619_s1 + $0x824] sm:$0xf]  ;;  %v7481_v62 = vld [vmem:[%s15619_s1 + $0x830] sm:$0xf0]  ;;  %v7932_v3 = vor.u32 %v10077_v54, %v7929_v55 }
 0x11e   :  { %5258 = vmatpush.bf16.msra.mxu3 %v7788_v28  ;;  %5224 = vmatmul.bf16.vlgmr.msra.gmra.mxu0 %v10986_v1  ;;  %v9997_v8 = vld [vmem:[%s15619_s1 + $0x924] sm:$0xf]  ;;  %v7609_v10 = vld [vmem:[%s15619_s1 + $0x930] sm:$0xf0]  ;;  %v7484_v27 = vor.u32 %v9965_v61, %v7481_v62 }
 0x11f   :  { %5268 = vmatpush.bf16.msrb.mxu0 %v7964_v30  ;;  %v10029_v11 = vld [vmem:[%s15619_s1 + $0xa24] sm:$0xf]  ;;  %v7737_v19 = vld [vmem:[%s15619_s1 + $0xa30] sm:$0xf0]  ;;  %v7612_v28 = vor.u32 %v9997_v8, %v7609_v10 }
 0x120   :  { %5233 = vmatpush.bf16.msra.mxu1 %v7516_v38  ;;  %v10073_v24 = vld [vmem:[%s15619_s1 + $0xb84] sm:$0xf]  ;;  %v7913_v25 = vld [vmem:[%s15619_s1 + $0xb90] sm:$0xf0]  ;;  %v7740_v31 = vor.u32 %v10029_v11, %v7737_v19  ;;  %v4993_v38 = vpop.f32.mrf.mxu2 }
 0x121   :  { %5246 = vmatpush.bf16.msra.mxu2 %v7644_v39  ;;  %v9961_v29 = vld [vmem:[%s15619_s1 + $0x804] sm:$0xf]  ;;  %v7465_v30 = vld [vmem:[%s15619_s1 + $0x810] sm:$0xf0]  ;;  %v7916_v33 = vor.u32 %v10073_v24, %v7913_v25 }
 0x122   :  { %5259 = vmatpush.bf16.msra.mxu3 %v7772_v42  ;;  %v9993_v23 = vld [vmem:[%s15619_s1 + $0x904] sm:$0xf]  ;;  %v7593_v35 = vld [vmem:[%s15619_s1 + $0x910] sm:$0xf0]  ;;  %v5006_v42 = vpop.f32.mrf.mxu3  ;;  %v7468_v45 = vor.u32 %v9961_v29, %v7465_v30 }
 0x123   :  { %5269 = vmatpush.bf16.msrb.mxu0 %v7948_v43  ;;  %v10025_v36 = vld [vmem:[%s15619_s1 + $0xa04] sm:$0xf]  ;;  %v7721_v37 = vld [vmem:[%s15619_s1 + $0xa10] sm:$0xf0]  ;;  %v7596_v50 = vor.u32 %v9993_v23, %v7593_v35 }
 0x124   :  { %5234 = vmatpush.bf16.msra.mxu1 %v7500_v58  ;;  %v10069_v39 = vld [vmem:[%s15619_s1 + $0xb64] sm:$0xf]  ;;  %v7897_v40 = vld [vmem:[%s15619_s1 + $0xb70] sm:$0xf0]  ;;  %v7724_v53 = vor.u32 %v10025_v36, %v7721_v37 }
 0x125   :  { %5247 = vmatpush.bf16.msra.mxu2 %v7628_v59  ;;  %v10117_v41 = vld [vmem:[%s15619_s1 + $0xce4] sm:$0xf]  ;;  %v8089_v34 = vld [vmem:[%s15619_s1 + $0xcf0] sm:$0xf0]  ;;  %v7900_v54 = vor.u32 %v10069_v39, %v7897_v40 }
 0x126   :  { %5260 = vmatpush.bf16.msra.mxu3 %v7756_v63  ;;  %v10149_v43 = vld [vmem:[%s15619_s1 + $0xde4] sm:$0xf]  ;;  %v8217_v44 = vld [vmem:[%s15619_s1 + $0xdf0] sm:$0xf0]  ;;  %v8092_v55 = vor.u32 %v10117_v41, %v8089_v34 }
 0x127   :  { %5270 = vmatpush.bf16.msrb.mxu0 %v7932_v3  ;;  %v10181_v51 = vld [vmem:[%s15619_s1 + $0xee4] sm:$0xf]  ;;  %v8345_v52 = vld [vmem:[%s15619_s1 + $0xef0] sm:$0xf0]  ;;  %v8220_v56 = vor.u32 %v10149_v43, %v8217_v44 }
 0x128   :  { %5235 = vmatpush.bf16.msra.mxu1 %v7484_v27  ;;  %v10065_v57 = vld [vmem:[%s15619_s1 + $0xb44] sm:$0xf]  ;;  %v7881_v58 = vld [vmem:[%s15619_s1 + $0xb50] sm:$0xf0]  ;;  %v8348_v61 = vor.u32 %v10181_v51, %v8345_v52 }
 0x129   :  { %5248 = vmatpush.bf16.msra.mxu2 %v7612_v28  ;;  %v10113_v59 = vld [vmem:[%s15619_s1 + $0xcc4] sm:$0xf]  ;;  %v8073_v62 = vld [vmem:[%s15619_s1 + $0xcd0] sm:$0xf0]  ;;  %v7884_v11 = vor.u32 %v10065_v57, %v7881_v58 }
 0x12a   :  { %5261 = vmatpush.bf16.msra.mxu3 %v7740_v31  ;;  %v10145_v63 = vld [vmem:[%s15619_s1 + $0xdc4] sm:$0xf]  ;;  %v8201_v3 = vld [vmem:[%s15619_s1 + $0xdd0] sm:$0xf0]  ;;  %v8076_v19 = vor.u32 %v10113_v59, %v8073_v62 }
 0x12b   :  { %5271 = vmatpush.bf16.msrb.mxu0 %v7916_v33  ;;  %v10177_v8 = vld [vmem:[%s15619_s1 + $0xec4] sm:$0xf]  ;;  %v8329_v10 = vld [vmem:[%s15619_s1 + $0xed0] sm:$0xf0]  ;;  %v8204_v24 = vor.u32 %v10145_v63, %v8201_v3 }
 0x12c   :  { %5236 = vmatpush.bf16.msra.mxu1 %v7468_v45  ;;  %v10061_v25 = vld [vmem:[%s15619_s1 + $0xb24] sm:$0xf]  ;;  %v7865_v27 = vld [vmem:[%s15619_s1 + $0xb30] sm:$0xf0]  ;;  %v8332_v29 = vor.u32 %v10177_v8, %v8329_v10 }
 0x12d   :  { %5249 = vmatpush.bf16.msra.mxu2 %v7596_v50  ;;  %v10109_v28 = vld [vmem:[%s15619_s1 + $0xca4] sm:$0xf]  ;;  %v8057_v30 = vld [vmem:[%s15619_s1 + $0xcb0] sm:$0xf0]  ;;  %v7868_v36 = vor.u32 %v10061_v25, %v7865_v27 }
 0x12e   :  { %5262 = vmatpush.bf16.msra.mxu3 %v7724_v53  ;;  %v10141_v23 = vld [vmem:[%s15619_s1 + $0xda4] sm:$0xf]  ;;  %v8185_v31 = vld [vmem:[%s15619_s1 + $0xdb0] sm:$0xf0]  ;;  %v8060_v38 = vor.u32 %v10109_v28, %v8057_v30  ;;  %v5017_v50 = vpop.f32.mrf.mxu0 }
 0x12f   :  { %5272 = vmatpush.bf16.msrb.mxu0 %v7900_v54  ;;  %5237 = vmatmul.bf16.vlgmr.msra.gmra.mxu1 %v11234_v12  ;;  %v10173_v33 = vld [vmem:[%s15619_s1 + $0xea4] sm:$0xf]  ;;  %v8313_v35 = vld [vmem:[%s15619_s1 + $0xeb0] sm:$0xf0]  ;;  %v8188_v39 = vor.u32 %v10141_v23, %v8185_v31  ;;  %v5018_v54 = vadd.f32 %v5017_v50, %v12377_v32 }
 0x130   :  { %5281 = vmatpush.bf16.msrb.mxu1 %v8092_v55  ;;  %5250 = vmatmul.bf16.vlgmr.msra.gmra.mxu2 %v11244_v16  ;;  %v10057_v37 = vld [vmem:[%s15619_s1 + $0xb04] sm:$0xf]  ;;  %v7849_v40 = vld [vmem:[%s15619_s1 + $0xb10] sm:$0xf0]  ;;  %v8316_v34 = vor.u32 %v10173_v33, %v8313_v35 }
 0x131   :  { %5294 = vmatpush.bf16.msrb.mxu2 %v8220_v56  ;;  %5263 = vmatmul.bf16.vlgmr.msra.gmra.mxu3 %v11242_v15  ;;  %v10105_v41 = vld [vmem:[%s15619_s1 + $0xc84] sm:$0xf]  ;;  %v8041_v42 = vld [vmem:[%s15619_s1 + $0xc90] sm:$0xf0]  ;;  %v7852_v55 = vor.u32 %v10057_v37, %v7849_v40  ;;  %v5030_v56 = vpop.f32.mrf.mxu1 }
 0x132   :  { %5307 = vmatpush.bf16.msrb.mxu3 %v8348_v61  ;;  %v10137_v43 = vld [vmem:[%s15619_s1 + $0xd84] sm:$0xf]  ;;  %v8169_v44 = vld [vmem:[%s15619_s1 + $0xd90] sm:$0xf0]  ;;  %v8044_v57 = vor.u32 %v10105_v41, %v8041_v42  ;;  %v5031_v63 = vadd.f32 %v5030_v56, %v5018_v54 }
 0x133   :  { %5273 = vmatpush.bf16.msrb.mxu0 %v7884_v11  ;;  %v10169_v45 = vld [vmem:[%s15619_s1 + $0xe84] sm:$0xf]  ;;  %v8297_v51 = vld [vmem:[%s15619_s1 + $0xe90] sm:$0xf0]  ;;  %v8172_v58 = vor.u32 %v10137_v43, %v8169_v44 }
 0x134   :  { %5282 = vmatpush.bf16.msrb.mxu1 %v8076_v19  ;;  %v10213_v52 = vld [vmem:[%s15619_s1 + $0xfe4] sm:$0xf]  ;;  %v8473_v53 = vld [vmem:[%s15619_s1 + $0xff0] sm:$0xf0]  ;;  %v8300_v62 = vor.u32 %v10169_v45, %v8297_v51 }
 0x135   :  { %5295 = vmatpush.bf16.msrb.mxu2 %v8204_v24  ;;  %v10101_v59 = vld [vmem:[%s15619_s1 + $0xc64] sm:$0xf]  ;;  %v8025_v61 = vld [vmem:[%s15619_s1 + $0xc70] sm:$0xf0]  ;;  %v8476_v3 = vor.u32 %v10213_v52, %v8473_v53  ;;  %v5043_v23 = vpop.f32.mrf.mxu2 }
 0x136   :  { %5308 = vmatpush.bf16.msrb.mxu3 %v8332_v29  ;;  %v10133_v32 = vld [vmem:[%s15619_s1 + $0xd64] sm:$0xf]  ;;  %v8153_v8 = vld [vmem:[%s15619_s1 + $0xd70] sm:$0xf0]  ;;  %v8028_v25 = vor.u32 %v10101_v59, %v8025_v61  ;;  %v5044_v37 = vadd.f32 %v5043_v23, %v5031_v63  ;;  %v5019_v42 = vpop.f32.mrf.mxu0 }
 0x137   :  { %5274 = vmatpush.bf16.msrb.mxu0 %v7868_v36  ;;  %v10165_v10 = vld [vmem:[%s15619_s1 + $0xe64] sm:$0xf]  ;;  %v8281_v11 = vld [vmem:[%s15619_s1 + $0xe70] sm:$0xf0]  ;;  %v8156_v27 = vor.u32 %v10133_v32, %v8153_v8 }
 0x138   :  { %5283 = vmatpush.bf16.msrb.mxu1 %v8060_v38  ;;  %v10209_v19 = vld [vmem:[%s15619_s1 + $0xfc4] sm:$0xf]  ;;  %v8457_v24 = vld [vmem:[%s15619_s1 + $0xfd0] sm:$0xf0]  ;;  %v8284_v30 = vor.u32 %v10165_v10, %v8281_v11  ;;  %v5056_v38 = vpop.f32.mrf.mxu3 }
 0x139   :  { %5296 = vmatpush.bf16.msrb.mxu2 %v8188_v39  ;;  %v10097_v28 = vld [vmem:[%s15619_s1 + $0xc44] sm:$0xf]  ;;  %v8009_v29 = vld [vmem:[%s15619_s1 + $0xc50] sm:$0xf0]  ;;  %v8460_v31 = vor.u32 %v10209_v19, %v8457_v24  ;;  %v12576_v43 = vadd.f32 %v5056_v38, %v5044_v37 }
 0x13a   :  { %5309 = vmatpush.bf16.msrb.mxu3 %v8316_v34  ;;  %v10129_v33 = vld [vmem:[%s15619_s1 + $0xd44] sm:$0xf]  ;;  %v8137_v35 = vld [vmem:[%s15619_s1 + $0xd50] sm:$0xf0]  ;;  %v5032_v34 = vpop.f32.mrf.mxu1  ;;  %v8012_v44 = vor.u32 %v10097_v28, %v8009_v29 }
 0x13b   :  { %5275 = vmatpush.bf16.msrb.mxu0 %v7852_v55  ;;  %v10161_v36 = vld [vmem:[%s15619_s1 + $0xe44] sm:$0xf]  ;;  %v8265_v39 = vld [vmem:[%s15619_s1 + $0xe50] sm:$0xf0]  ;;  %v8140_v45 = vor.u32 %v10129_v33, %v8137_v35 }
 0x13c   :  { %5284 = vmatpush.bf16.msrb.mxu1 %v8044_v57  ;;  %v10205_v40 = vld [vmem:[%s15619_s1 + $0xfa4] sm:$0xf]  ;;  %v8441_v41 = vld [vmem:[%s15619_s1 + $0xfb0] sm:$0xf0]  ;;  %v8268_v52 = vor.u32 %v10161_v36, %v8265_v39 }
 0x13d   :  { %5297 = vmatpush.bf16.msrb.mxu2 %v8172_v58  ;;  %v10093_v50 = vld [vmem:[%s15619_s1 + $0xc24] sm:$0xf]  ;;  %v7993_v51 = vld [vmem:[%s15619_s1 + $0xc30] sm:$0xf0]  ;;  %v8444_v53 = vor.u32 %v10205_v40, %v8441_v41 }
 0x13e   :  { %5310 = vmatpush.bf16.msrb.mxu3 %v8300_v62  ;;  %5276 = vmatmul.bf16.vlgmr.msrb.gmra.mxu0 %v11246_v17  ;;  %v10125_v54 = vld [vmem:[%s15619_s1 + $0xd24] sm:$0xf]  ;;  %v8121_v55 = vld [vmem:[%s15619_s1 + $0xd30] sm:$0xf0]  ;;  %v7996_v61 = vor.u32 %v10093_v50, %v7993_v51 }
 0x13f   :  { %5320 = vmatpush.bf16.msra.mxu0 %v8476_v3  ;;  %v10157_v56 = vld [vmem:[%s15619_s1 + $0xe24] sm:$0xf]  ;;  %v8249_v57 = vld [vmem:[%s15619_s1 + $0xe30] sm:$0xf0]  ;;  %v8124_v62 = vor.u32 %v10125_v54, %v8121_v55 }
 0x140   :  { %5285 = vmatpush.bf16.msrb.mxu1 %v8028_v25  ;;  %v10201_v58 = vld [vmem:[%s15619_s1 + $0xf84] sm:$0xf]  ;;  %v8425_v59 = vld [vmem:[%s15619_s1 + $0xf90] sm:$0xf0]  ;;  %v8252_v8 = vor.u32 %v10157_v56, %v8249_v57  ;;  %v5045_v25 = vpop.f32.mrf.mxu2 }
 0x141   :  { %5298 = vmatpush.bf16.msrb.mxu2 %v8156_v27  ;;  %v10089_v63 = vld [vmem:[%s15619_s1 + $0xc04] sm:$0xf]  ;;  %v7977_v3 = vld [vmem:[%s15619_s1 + $0xc10] sm:$0xf0]  ;;  %v8428_v10 = vor.u32 %v10201_v58, %v8425_v59 }
 0x142   :  { %5311 = vmatpush.bf16.msrb.mxu3 %v8284_v30  ;;  %v10121_v32 = vld [vmem:[%s15619_s1 + $0xd04] sm:$0xf]  ;;  %v8105_v11 = vld [vmem:[%s15619_s1 + $0xd10] sm:$0xf0]  ;;  %v5058_v30 = vpop.f32.mrf.mxu3  ;;  %v7980_v35 = vor.u32 %v10089_v63, %v7977_v3 }
 0x143   :  { %5321 = vmatpush.bf16.msra.mxu0 %v8460_v31  ;;  %v10153_v19 = vld [vmem:[%s15619_s1 + $0xe04] sm:$0xf]  ;;  %v8233_v24 = vld [vmem:[%s15619_s1 + $0xe10] sm:$0xf0]  ;;  %v8108_v36 = vor.u32 %v10121_v32, %v8105_v11 }
 0x144   :  { %5286 = vmatpush.bf16.msrb.mxu1 %v8012_v44  ;;  %v10197_v27 = vld [vmem:[%s15619_s1 + $0xf64] sm:$0xf]  ;;  %v8409_v28 = vld [vmem:[%s15619_s1 + $0xf70] sm:$0xf0]  ;;  %v8236_v39 = vor.u32 %v10153_v19, %v8233_v24 }
 0x145   :  { %5299 = vmatpush.bf16.msrb.mxu2 %v8140_v45  ;;  %v10245_v29 = vld [vmem:[%s15619_s1 + $0x10e4] sm:$0xf]  ;;  %v8601_v23 = vld [vmem:[%s15619_s1 + $0x10f0] sm:$0xf0]  ;;  %v8412_v40 = vor.u32 %v10197_v27, %v8409_v28 }
 0x146   :  { %5312 = vmatpush.bf16.msrb.mxu3 %v8268_v52  ;;  %v10277_v31 = vld [vmem:[%s15619_s1 + $0x11e4] sm:$0xf]  ;;  %v8729_v33 = vld [vmem:[%s15619_s1 + $0x11f0] sm:$0xf0]  ;;  %v8604_v41 = vor.u32 %v10245_v29, %v8601_v23 }
 0x147   :  { %5322 = vmatpush.bf16.msra.mxu0 %v8444_v53  ;;  %v10309_v37 = vld [vmem:[%s15619_s1 + $0x12e4] sm:$0xf]  ;;  %v8857_v38 = vld [vmem:[%s15619_s1 + $0x12f0] sm:$0xf0]  ;;  %v8732_v42 = vor.u32 %v10277_v31, %v8729_v33 }
 0x148   :  { %5287 = vmatpush.bf16.msrb.mxu1 %v7996_v61  ;;  %v10193_v34 = vld [vmem:[%s15619_s1 + $0xf44] sm:$0xf]  ;;  %v8393_v44 = vld [vmem:[%s15619_s1 + $0xf50] sm:$0xf0]  ;;  %v8860_v50 = vor.u32 %v10309_v37, %v8857_v38 }
 0x149   :  { %5300 = vmatpush.bf16.msrb.mxu2 %v8124_v62  ;;  %v10241_v45 = vld [vmem:[%s15619_s1 + $0x10c4] sm:$0xf]  ;;  %v8585_v51 = vld [vmem:[%s15619_s1 + $0x10d0] sm:$0xf0]  ;;  %v8396_v56 = vor.u32 %v10193_v34, %v8393_v44 }
 0x14a   :  { %5313 = vmatpush.bf16.msrb.mxu3 %v8252_v8  ;;  %v10273_v52 = vld [vmem:[%s15619_s1 + $0x11c4] sm:$0xf]  ;;  %v8713_v53 = vld [vmem:[%s15619_s1 + $0x11d0] sm:$0xf0]  ;;  %v8588_v57 = vor.u32 %v10241_v45, %v8585_v51 }
 0x14b   :  { %5323 = vmatpush.bf16.msra.mxu0 %v8428_v10  ;;  %v10305_v54 = vld [vmem:[%s15619_s1 + $0x12c4] sm:$0xf]  ;;  %v8841_v55 = vld [vmem:[%s15619_s1 + $0x12d0] sm:$0xf0]  ;;  %v8716_v58 = vor.u32 %v10273_v52, %v8713_v53 }
 0x14c   :  { %5288 = vmatpush.bf16.msrb.mxu1 %v7980_v35  ;;  %v10189_v59 = vld [vmem:[%s15619_s1 + $0xf24] sm:$0xf]  ;;  %v8377_v61 = vld [vmem:[%s15619_s1 + $0xf30] sm:$0xf0]  ;;  %v8844_v63 = vor.u32 %v10305_v54, %v8841_v55 }
 0x14d   :  { %5301 = vmatpush.bf16.msrb.mxu2 %v8108_v36  ;;  %v10237_v62 = vld [vmem:[%s15619_s1 + $0x10a4] sm:$0xf]  ;;  %v8569_v3 = vld [vmem:[%s15619_s1 + $0x10b0] sm:$0xf0]  ;;  %v8380_v19 = vor.u32 %v10189_v59, %v8377_v61  ;;  %v5069_v36 = vpop.f32.mrf.mxu0 }
 0x14e   :  { %5314 = vmatpush.bf16.msrb.mxu3 %v8236_v39  ;;  %v10269_v32 = vld [vmem:[%s15619_s1 + $0x11a4] sm:$0xf]  ;;  %v8697_v8 = vld [vmem:[%s15619_s1 + $0x11b0] sm:$0xf0]  ;;  %v8572_v25 = vor.u32 %v10237_v62, %v8569_v3 }
 0x14f   :  { %5324 = vmatpush.bf16.msra.mxu0 %v8412_v40  ;;  %5289 = vmatmul.bf16.vlgmr.msrb.gmra.mxu1 %v11408_v46  ;;  %v10301_v10 = vld [vmem:[%s15619_s1 + $0x12a4] sm:$0xf]  ;;  %v8825_v11 = vld [vmem:[%s15619_s1 + $0x12b0] sm:$0xf0]  ;;  %v8700_v27 = vor.u32 %v10269_v32, %v8697_v8  ;;  %v5070_v40 = vadd.f32 %v5069_v36, %v12576_v43 }
 0x150   :  { %5333 = vmatpush.bf16.msra.mxu1 %v8604_v41  ;;  %5302 = vmatmul.bf16.vlgmr.msrb.gmra.mxu2 %v11412_v48  ;;  %v10185_v24 = vld [vmem:[%s15619_s1 + $0xf04] sm:$0xf]  ;;  %v8361_v28 = vld [vmem:[%s15619_s1 + $0xf10] sm:$0xf0]  ;;  %v8828_v23 = vor.u32 %v10301_v10, %v8825_v11 }
 0x151   :  { %5346 = vmatpush.bf16.msra.mxu2 %v8732_v42  ;;  %5315 = vmatmul.bf16.vlgmr.msrb.gmra.mxu3 %v11410_v47  ;;  %v10233_v29 = vld [vmem:[%s15619_s1 + $0x1084] sm:$0xf]  ;;  %v8553_v30 = vld [vmem:[%s15619_s1 + $0x1090] sm:$0xf0]  ;;  %v8364_v41 = vor.u32 %v10185_v24, %v8361_v28  ;;  %v5082_v42 = vpop.f32.mrf.mxu1 }
 0x152   :  { %5359 = vmatpush.bf16.msra.mxu3 %v8860_v50  ;;  %v10265_v31 = vld [vmem:[%s15619_s1 + $0x1184] sm:$0xf]  ;;  %v8681_v33 = vld [vmem:[%s15619_s1 + $0x1190] sm:$0xf0]  ;;  %v8556_v34 = vor.u32 %v10233_v29, %v8553_v30  ;;  %v5083_v52 = vadd.f32 %v5082_v42, %v5070_v40 }
 0x153   :  { %5325 = vmatpush.bf16.msra.mxu0 %v8396_v56  ;;  %v10297_v35 = vld [vmem:[%s15619_s1 + $0x1284] sm:$0xf]  ;;  %v8809_v37 = vld [vmem:[%s15619_s1 + $0x1290] sm:$0xf0]  ;;  %v8684_v44 = vor.u32 %v10265_v31, %v8681_v33  ;;  %v5095_v32 = vpop.f32.mrf.mxu2 }
 0x154   :  { %5334 = vmatpush.bf16.msra.mxu1 %v8588_v57  ;;  %v10341_v38 = vld [vmem:[%s15619_s1 + $0x13e4] sm:$0xf]  ;;  %v8985_v39 = vld [vmem:[%s15619_s1 + $0x13f0] sm:$0xf0]  ;;  %v8812_v51 = vor.u32 %v10297_v35, %v8809_v37  ;;  %v5096_v24 = vadd.f32 %v5095_v32, %v5083_v52 }
 0x155   :  { %5347 = vmatpush.bf16.msra.mxu2 %v8716_v58  ;;  %v10229_v45 = vld [vmem:[%s15619_s1 + $0x1064] sm:$0xf]  ;;  %v8537_v50 = vld [vmem:[%s15619_s1 + $0x1070] sm:$0xf0]  ;;  %v8988_v53 = vor.u32 %v10341_v38, %v8985_v39 }
 0x156   :  { %5360 = vmatpush.bf16.msra.mxu3 %v8844_v63  ;;  %v10261_v43 = vld [vmem:[%s15619_s1 + $0x1164] sm:$0xf]  ;;  %v8665_v54 = vld [vmem:[%s15619_s1 + $0x1170] sm:$0xf0]  ;;  %v8540_v59 = vor.u32 %v10229_v45, %v8537_v50 }
 0x157   :  { %5326 = vmatpush.bf16.msra.mxu0 %v8380_v19  ;;  %v10293_v55 = vld [vmem:[%s15619_s1 + $0x1264] sm:$0xf]  ;;  %v8793_v56 = vld [vmem:[%s15619_s1 + $0x1270] sm:$0xf0]  ;;  %v8668_v61 = vor.u32 %v10261_v43, %v8665_v54 }
 0x158   :  { %5335 = vmatpush.bf16.msra.mxu1 %v8572_v25  ;;  %v10337_v57 = vld [vmem:[%s15619_s1 + $0x13c4] sm:$0xf]  ;;  %v8969_v58 = vld [vmem:[%s15619_s1 + $0x13d0] sm:$0xf0]  ;;  %v8796_v3 = vor.u32 %v10293_v55, %v8793_v56  ;;  %v5071_v25 = vpop.f32.mrf.mxu0 }
 0x159   :  { %5348 = vmatpush.bf16.msra.mxu2 %v8700_v27  ;;  %v10225_v62 = vld [vmem:[%s15619_s1 + $0x1044] sm:$0xf]  ;;  %v8521_v63 = vld [vmem:[%s15619_s1 + $0x1050] sm:$0xf0]  ;;  %v8972_v8 = vor.u32 %v10337_v57, %v8969_v58  ;;  %v5108_v27 = vpop.f32.mrf.mxu3 }
 0x15a   :  { %5361 = vmatpush.bf16.msra.mxu3 %v8828_v23  ;;  %v10257_v10 = vld [vmem:[%s15619_s1 + $0x1144] sm:$0xf]  ;;  %v8649_v11 = vld [vmem:[%s15619_s1 + $0x1150] sm:$0xf0]  ;;  %v5084_v23 = vpop.f32.mrf.mxu1  ;;  %v5109_v31 = vadd.f32 %v5108_v27, %v5096_v24  ;;  %v8524_v33 = vor.u32 %v10225_v62, %v8521_v63 }
 0x15b   :  { %5327 = vmatpush.bf16.msra.mxu0 %v8364_v41  ;;  %v10289_v19 = vld [vmem:[%s15619_s1 + $0x1244] sm:$0xf]  ;;  %v8777_v28 = vld [vmem:[%s15619_s1 + $0x1250] sm:$0xf0]  ;;  %v8652_v35 = vor.u32 %v10257_v10, %v8649_v11 }
 0x15c   :  { %5336 = vmatpush.bf16.msra.mxu1 %v8556_v34  ;;  %v10333_v29 = vld [vmem:[%s15619_s1 + $0x13a4] sm:$0xf]  ;;  %v8953_v30 = vld [vmem:[%s15619_s1 + $0x13b0] sm:$0xf0]  ;;  %v8780_v38 = vor.u32 %v10289_v19, %v8777_v28 }
 0x15d   :  { %5349 = vmatpush.bf16.msra.mxu2 %v8684_v44  ;;  %v10221_v36 = vld [vmem:[%s15619_s1 + $0x1024] sm:$0xf]  ;;  %v8505_v37 = vld [vmem:[%s15619_s1 + $0x1030] sm:$0xf0]  ;;  %v8956_v39 = vor.u32 %v10333_v29, %v8953_v30 }
 0x15e   :  { %5362 = vmatpush.bf16.msra.mxu3 %v8812_v51  ;;  %5328 = vmatmul.bf16.vlgmr.msra.gmra.mxu0 %v11414_v49  ;;  %v10253_v40 = vld [vmem:[%s15619_s1 + $0x1124] sm:$0xf]  ;;  %v8633_v41 = vld [vmem:[%s15619_s1 + $0x1130] sm:$0xf0]  ;;  %v8508_v50 = vor.u32 %v10221_v36, %v8505_v37 }
 0x15f   :  { %5372 = vmatpush.bf16.msrb.mxu0 %v8988_v53  ;;  %v10285_v42 = vld [vmem:[%s15619_s1 + $0x1224] sm:$0xf]  ;;  %v8761_v34 = vld [vmem:[%s15619_s1 + $0x1230] sm:$0xf0]  ;;  %v8636_v51 = vor.u32 %v10253_v40, %v8633_v41 }
 0x160   :  { %5337 = vmatpush.bf16.msra.mxu1 %v8540_v59  ;;  %v10329_v44 = vld [vmem:[%s15619_s1 + $0x1384] sm:$0xf]  ;;  %v8937_v45 = vld [vmem:[%s15619_s1 + $0x1390] sm:$0xf0]  ;;  %v8764_v54 = vor.u32 %v10285_v42, %v8761_v34  ;;  %v5097_v59 = vpop.f32.mrf.mxu2  ;;  %v5121_v32 = vpop.f32.mrf.mxu0 }
 0x161   :  { %5350 = vmatpush.bf16.msra.mxu2 %v8668_v61  ;;  %v10217_v52 = vld [vmem:[%s15619_s1 + $0x1004] sm:$0xf]  ;;  %v8489_v53 = vld [vmem:[%s15619_s1 + $0x1010] sm:$0xf0]  ;;  %v8940_v55 = vor.u32 %v10329_v44, %v8937_v45  ;;  %v12835_v19 = vadd.f32 %v5121_v32, %v5109_v31 }
 0x162   :  { %5363 = vmatpush.bf16.msra.mxu3 %v8796_v3  ;;  %v10249_v43 = vld [vmem:[%s15619_s1 + $0x1104] sm:$0xf]  ;;  %v8617_v56 = vld [vmem:[%s15619_s1 + $0x1110] sm:$0xf0]  ;;  %v5110_v3 = vpop.f32.mrf.mxu3  ;;  %v8492_v24 = vor.u32 %v10217_v52, %v8489_v53 }
 0x163   :  { %5373 = vmatpush.bf16.msrb.mxu0 %v8972_v8  ;;  %v10281_v57 = vld [vmem:[%s15619_s1 + $0x1204] sm:$0xf]  ;;  %v8745_v58 = vld [vmem:[%s15619_s1 + $0x1210] sm:$0xf0]  ;;  %v8620_v25 = vor.u32 %v10249_v43, %v8617_v56 }
 0x164   :  { %5338 = vmatpush.bf16.msra.mxu1 %v8524_v33  ;;  %v10325_v61 = vld [vmem:[%s15619_s1 + $0x1364] sm:$0xf]  ;;  %v8921_v62 = vld [vmem:[%s15619_s1 + $0x1370] sm:$0xf0]  ;;  %v8748_v29 = vor.u32 %v10281_v57, %v8745_v58 }
 0x165   :  { %5351 = vmatpush.bf16.msra.mxu2 %v8652_v35  ;;  %v10373_v63 = vld [vmem:[%s15619_s1 + $0x14e4] sm:$0xf]  ;;  %v9113_v8 = vld [vmem:[%s15619_s1 + $0x14f0] sm:$0xf0]  ;;  %v8924_v30 = vor.u32 %v10325_v61, %v8921_v62 }
 0x166   :  { %5364 = vmatpush.bf16.msra.mxu3 %v8780_v38  ;;  %v10405_v10 = vld [vmem:[%s15619_s1 + $0x15e4] sm:$0xf]  ;;  %v9241_v11 = vld [vmem:[%s15619_s1 + $0x15f0] sm:$0xf0]  ;;  %v9116_v23 = vor.u32 %v10373_v63, %v9113_v8 }
 0x167   :  { %5374 = vmatpush.bf16.msrb.mxu0 %v8956_v39  ;;  %v10437_v27 = vld [vmem:[%s15619_s1 + $0x16e4] sm:$0xf]  ;;  %v9369_v28 = vld [vmem:[%s15619_s1 + $0x16f0] sm:$0xf0]  ;;  %v9244_v33 = vor.u32 %v10405_v10, %v9241_v11 }
 0x168   :  { %5339 = vmatpush.bf16.msra.mxu1 %v8508_v50  ;;  %v10321_v31 = vld [vmem:[%s15619_s1 + $0x1344] sm:$0xf]  ;;  %v8905_v35 = vld [vmem:[%s15619_s1 + $0x1350] sm:$0xf0]  ;;  %v9372_v37 = vor.u32 %v10437_v27, %v9369_v28  ;;  %v5123_v56 = vpop.f32.mrf.mxu0  ;;  %v10523_v27 = vld [vmem:[%s15620_s2] sm:$0xf] }
 0x169   :  { %5352 = vmatpush.bf16.msra.mxu2 %v8636_v51  ;;  %v10369_v36 = vld [vmem:[%s15619_s1 + $0x14c4] sm:$0xf]  ;;  %v9097_v38 = vld [vmem:[%s15619_s1 + $0x14d0] sm:$0xf0]  ;;  %v8908_v34 = vor.u32 %v10321_v31, %v8905_v35  ;;  %v813_v28 = vperm.slane %v10523_v27, 1 }
 0x16a   :  { %5365 = vmatpush.bf16.msra.mxu3 %v8764_v54  ;;  %v10401_v39 = vld [vmem:[%s15619_s1 + $0x15c4] sm:$0xf]  ;;  %v9225_v40 = vld [vmem:[%s15619_s1 + $0x15d0] sm:$0xf0]  ;;  %v9100_v44 = vor.u32 %v10369_v36, %v9097_v38 }
 0x16b   :  { %5375 = vmatpush.bf16.msrb.mxu0 %v8940_v55  ;;  %v10433_v41 = vld [vmem:[%s15619_s1 + $0x16c4] sm:$0xf]  ;;  %v9353_v42 = vld [vmem:[%s15619_s1 + $0x16d0] sm:$0xf0]  ;;  %v9228_v45 = vor.u32 %v10401_v39, %v9225_v40 }
 0x16c   :  { %5340 = vmatpush.bf16.msra.mxu1 %v8492_v24  ;;  %v10317_v50 = vld [vmem:[%s15619_s1 + $0x1324] sm:$0xf]  ;;  %v8889_v51 = vld [vmem:[%s15619_s1 + $0x1330] sm:$0xf0]  ;;  %v9356_v53 = vor.u32 %v10433_v41, %v9353_v42  ;;  %v5134_v31 = vpop.f32.mrf.mxu1 }
 0x16d   :  { %5353 = vmatpush.bf16.msra.mxu2 %v8620_v25  ;;  %v10365_v52 = vld [vmem:[%s15619_s1 + $0x14a4] sm:$0xf]  ;;  %v9081_v43 = vld [vmem:[%s15619_s1 + $0x14b0] sm:$0xf0]  ;;  %v8892_v59 = vor.u32 %v10317_v50, %v8889_v51 }
 0x16e   :  { %5366 = vmatpush.bf16.msra.mxu3 %v8748_v29  ;;  %v10397_v54 = vld [vmem:[%s15619_s1 + $0x15a4] sm:$0xf]  ;;  %v9209_v55 = vld [vmem:[%s15619_s1 + $0x15b0] sm:$0xf0]  ;;  %v9084_v63 = vor.u32 %v10365_v52, %v9081_v43 }
 0x16f   :  { %5376 = vmatpush.bf16.msrb.mxu0 %v8924_v30  ;;  %5341 = vmatmul.bf16.vlgmr.msra.gmra.mxu1 %v11645_v9  ;;  %v10429_v57 = vld [vmem:[%s15619_s1 + $0x16a4] sm:$0xf]  ;;  %v9337_v58 = vld [vmem:[%s15619_s1 + $0x16b0] sm:$0xf0]  ;;  %v9212_v3 = vor.u32 %v10397_v54, %v9209_v55 }
 0x170   :  { %5385 = vmatpush.bf16.msrb.mxu1 %v9116_v23  ;;  %5354 = vmatmul.bf16.vlgmr.msra.gmra.mxu2 %v11655_v14  ;;  %v10313_v61 = vld [vmem:[%s15619_s1 + $0x1304] sm:$0xf]  ;;  %v8873_v62 = vld [vmem:[%s15619_s1 + $0x1310] sm:$0xf0]  ;;  %v9340_v11 = vor.u32 %v10429_v57, %v9337_v58 }
 0x171   :  { %5398 = vmatpush.bf16.msrb.mxu2 %v9244_v33  ;;  %5367 = vmatmul.bf16.vlgmr.msra.gmra.mxu3 %v11653_v13  ;;  %v10361_v32 = vld [vmem:[%s15619_s1 + $0x1484] sm:$0xf]  ;;  %v9065_v8 = vld [vmem:[%s15619_s1 + $0x1490] sm:$0xf0]  ;;  %v8876_v33 = vor.u32 %v10313_v61, %v8873_v62 }
 0x172   :  { %5411 = vmatpush.bf16.msrb.mxu3 %v9372_v37  ;;  %v10393_v10 = vld [vmem:[%s15619_s1 + $0x1584] sm:$0xf]  ;;  %v9193_v24 = vld [vmem:[%s15619_s1 + $0x1590] sm:$0xf0]  ;;  %v9068_v35 = vor.u32 %v10361_v32, %v9065_v8 }
 0x173   :  { %5377 = vmatpush.bf16.msrb.mxu0 %v8908_v34  ;;  %v10425_v25 = vld [vmem:[%s15619_s1 + $0x1684] sm:$0xf]  ;;  %v9321_v29 = vld [vmem:[%s15619_s1 + $0x1690] sm:$0xf0]  ;;  %v9196_v36 = vor.u32 %v10393_v10, %v9193_v24  ;;  %v5147_v55 = vpop.f32.mrf.mxu2 }
 0x174   :  { %5386 = vmatpush.bf16.msrb.mxu1 %v9100_v44  ;;  %v10469_v30 = vld [vmem:[%s15619_s1 + $0x17e4] sm:$0xf]  ;;  %v9497_v23 = vld [vmem:[%s15619_s1 + $0x17f0] sm:$0xf0]  ;;  %v9324_v39 = vor.u32 %v10425_v25, %v9321_v29  ;;  %v5135_v44 = vadd.f32 %v5134_v31, %v813_v28 }
 0x175   :  { %5399 = vmatpush.bf16.msrb.mxu2 %v9228_v45  ;;  %v10357_v37 = vld [vmem:[%s15619_s1 + $0x1464] sm:$0xf]  ;;  %v9049_v38 = vld [vmem:[%s15619_s1 + $0x1470] sm:$0xf0]  ;;  %v9500_v40 = vor.u32 %v10469_v30, %v9497_v23 }
 0x176   :  { %5412 = vmatpush.bf16.msrb.mxu3 %v9356_v53  ;;  %v10389_v41 = vld [vmem:[%s15619_s1 + $0x1564] sm:$0xf]  ;;  %v9177_v42 = vld [vmem:[%s15619_s1 + $0x1570] sm:$0xf0]  ;;  %v9052_v52 = vor.u32 %v10357_v37, %v9049_v38  ;;  %v5148_v62 = vadd.f32 %v5147_v55, %v5135_v44 }
 0x177   :  { %5378 = vmatpush.bf16.msrb.mxu0 %v8892_v59  ;;  %v10421_v34 = vld [vmem:[%s15619_s1 + $0x1664] sm:$0xf]  ;;  %v9305_v45 = vld [vmem:[%s15619_s1 + $0x1670] sm:$0xf0]  ;;  %v9180_v53 = vor.u32 %v10389_v41, %v9177_v42 }
 0x178   :  { %5387 = vmatpush.bf16.msrb.mxu1 %v9084_v63  ;;  %v10465_v50 = vld [vmem:[%s15619_s1 + $0x17c4] sm:$0xf]  ;;  %v9481_v51 = vld [vmem:[%s15619_s1 + $0x17d0] sm:$0xf0]  ;;  %v9308_v56 = vor.u32 %v10421_v34, %v9305_v45  ;;  %v5160_v63 = vpop.f32.mrf.mxu3 }
 0x179   :  { %5400 = vmatpush.bf16.msrb.mxu2 %v9212_v3  ;;  %v10353_v43 = vld [vmem:[%s15619_s1 + $0x1444] sm:$0xf]  ;;  %v9033_v54 = vld [vmem:[%s15619_s1 + $0x1450] sm:$0xf0]  ;;  %v9484_v57 = vor.u32 %v10465_v50, %v9481_v51  ;;  %v5161_v10 = vadd.f32 %v5160_v63, %v5148_v62 }
 0x17a   :  { %5413 = vmatpush.bf16.msrb.mxu3 %v9340_v11  ;;  %v10385_v58 = vld [vmem:[%s15619_s1 + $0x1544] sm:$0xf]  ;;  %v9161_v59 = vld [vmem:[%s15619_s1 + $0x1550] sm:$0xf0]  ;;  %v5136_v11 = vpop.f32.mrf.mxu1  ;;  %v9036_v24 = vor.u32 %v10353_v43, %v9033_v54 }
 0x17b   :  { %5379 = vmatpush.bf16.msrb.mxu0 %v8876_v33  ;;  %v10417_v61 = vld [vmem:[%s15619_s1 + $0x1644] sm:$0xf]  ;;  %v9289_v3 = vld [vmem:[%s15619_s1 + $0x1650] sm:$0xf0]  ;;  %v9164_v25 = vor.u32 %v10385_v58, %v9161_v59  ;;  %v5173_v38 = vpop.f32.mrf.mxu0  ;;  %v5149_v45 = vpop.f32.mrf.mxu2  ;;  %v6559_v59 = vld [vmem:[%s15619_s1 + $0xe8] sm:$0xf] }
 0x17c   :  { %5388 = vmatpush.bf16.msrb.mxu1 %v9068_v35  ;;  %v10461_v32 = vld [vmem:[%s15619_s1 + $0x17a4] sm:$0xf]  ;;  %v9465_v8 = vld [vmem:[%s15619_s1 + $0x17b0] sm:$0xf0]  ;;  %v9292_v29 = vor.u32 %v10417_v61, %v9289_v3  ;;  %v13009_v44 = vadd.f32 %v5173_v38, %v5161_v10  ;;  %v9736_v61 = vld [vmem:[%s15619_s1 + $0xf4] sm:$0xf0] }
 0x17d   :  { %5401 = vmatpush.bf16.msrb.mxu2 %v9196_v36  ;;  %v10349_v27 = vld [vmem:[%s15619_s1 + $0x1424] sm:$0xf]  ;;  %v9017_v28 = vld [vmem:[%s15619_s1 + $0x1430] sm:$0xf0]  ;;  %v9468_v30 = vor.u32 %v10461_v32, %v9465_v8  ;;  %v6687_v3 = vld [vmem:[%s15619_s1 + $0x1e8] sm:$0xf] }
 0x17e   :  { %5414 = vmatpush.bf16.msrb.mxu3 %v9324_v39  ;;  %5380 = vmatmul.bf16.vlgmr.msrb.gmra.mxu0 %v11657_v18  ;;  %v10381_v23 = vld [vmem:[%s15619_s1 + $0x1524] sm:$0xf]  ;;  %v9145_v33 = vld [vmem:[%s15619_s1 + $0x1530] sm:$0xf0]  ;;  %v9020_v39 = vor.u32 %v10349_v27, %v9017_v28  ;;  %v9768_v32 = vld [vmem:[%s15619_s1 + $0x1f4] sm:$0xf0] }
 0x17f   :  { %5424 = vmatpush.bf16.msra.mxu0 %v9500_v40  ;;  %v10413_v31 = vld [vmem:[%s15619_s1 + $0x1624] sm:$0xf]  ;;  %v9273_v35 = vld [vmem:[%s15619_s1 + $0x1630] sm:$0xf0]  ;;  %v9148_v40 = vor.u32 %v10381_v23, %v9145_v33  ;;  %v6543_v23 = vld [vmem:[%s15619_s1 + $0xc8] sm:$0xf] }
 0x180   :  { %5389 = vmatpush.bf16.msrb.mxu1 %v9052_v52  ;;  %v10457_v36 = vld [vmem:[%s15619_s1 + $0x1784] sm:$0xf]  ;;  %v9449_v37 = vld [vmem:[%s15619_s1 + $0x1790] sm:$0xf0]  ;;  %v9276_v50 = vor.u32 %v10413_v31, %v9273_v35  ;;  %v5162_v54 = vpop.f32.mrf.mxu3  ;;  %v9732_v33 = vld [vmem:[%s15619_s1 + $0xd4] sm:$0xf0] }
 0x181   :  { %5402 = vmatpush.bf16.msrb.mxu2 %v9180_v53  ;;  %v10345_v41 = vld [vmem:[%s15619_s1 + $0x1404] sm:$0xf]  ;;  %v9001_v42 = vld [vmem:[%s15619_s1 + $0x1410] sm:$0xf0]  ;;  %v9452_v51 = vor.u32 %v10457_v36, %v9449_v37  ;;  %v6671_v35 = vld [vmem:[%s15619_s1 + $0x1c8] sm:$0xf] }
 0x182   :  { %5415 = vmatpush.bf16.msrb.mxu3 %v9308_v56  ;;  %v10377_v34 = vld [vmem:[%s15619_s1 + $0x1504] sm:$0xf]  ;;  %v9129_v52 = vld [vmem:[%s15619_s1 + $0x1510] sm:$0xf0]  ;;  %v9004_v62 = vor.u32 %v10345_v41, %v9001_v42  ;;  %v9764_v36 = vld [vmem:[%s15619_s1 + $0x1d4] sm:$0xf0] }
 0x183   :  { %5425 = vmatpush.bf16.msra.mxu0 %v9484_v57  ;;  %v10409_v53 = vld [vmem:[%s15619_s1 + $0x1604] sm:$0xf]  ;;  %v9257_v43 = vld [vmem:[%s15619_s1 + $0x1610] sm:$0xf0]  ;;  %v9132_v63 = vor.u32 %v10377_v34, %v9129_v52  ;;  %v5175_v31 = vpop.f32.mrf.mxu0  ;;  %v6672_v34 = vor.u32 %v9764_v36, %v6671_v35  ;;  %v6655_v52 = vld [vmem:[%s15619_s1 + $0x1a8] sm:$0xf] }
 0x184   :  { %5390 = vmatpush.bf16.msrb.mxu1 %v9036_v24  ;;  %v10453_v55 = vld [vmem:[%s15619_s1 + $0x1764] sm:$0xf]  ;;  %v9433_v56 = vld [vmem:[%s15619_s1 + $0x1770] sm:$0xf0]  ;;  %v9260_v8 = vor.u32 %v10409_v53, %v9257_v43  ;;  %v6560_v24 = vor.u32 %v9736_v61, %v6559_v59  ;;  %v9760_v53 = vld [vmem:[%s15619_s1 + $0x1b4] sm:$0xf0] }
 0x185   :  { %5403 = vmatpush.bf16.msrb.mxu2 %v9164_v25  ;;  %v10485_v57 = vld [vmem:[%s15619_s1 + $0x1864] sm:$0xf]  ;;  %v9561_v58 = vld [vmem:[%s15619_s1 + $0x1870] sm:$0xf0]  ;;  %v9436_v10 = vor.u32 %v10453_v55, %v9433_v56  ;;  %v6656_v61 = vor.u32 %v9760_v53, %v6655_v52  ;;  %v6495_v31 = vld [vmem:[%s15619_s1 + $0x68] sm:$0xf] }
 0x186   :  { %5416 = vmatpush.bf16.msrb.mxu3 %v9292_v29  ;;  %v9564_v11 = vor.u32 %v10485_v57, %v9561_v58  ;;  %v10449_v25 = vld [vmem:[%s15619_s1 + $0x1744] sm:$0xf]  ;;  %v9417_v27 = vld [vmem:[%s15619_s1 + $0x1750] sm:$0xf0]  ;;  %v6688_v29 = vor.u32 %v9768_v32, %v6687_v3  ;;  %v6639_v3 = vld [vmem:[%s15619_s1 + $0x188] sm:$0xf] }
 0x187   :  { %5426 = vmatpush.bf16.msra.mxu0 %v9468_v30  ;;  %v10481_v28 = vld [vmem:[%s15619_s1 + $0x1844] sm:$0xf]  ;;  %v9545_v30 = vld [vmem:[%s15619_s1 + $0x1850] sm:$0xf0]  ;;  %v9420_v37 = vor.u32 %v10449_v25, %v9417_v27  ;;  %v9756_v32 = vld [vmem:[%s15619_s1 + $0x194] sm:$0xf0] }
 0x188   :  { %5391 = vmatpush.bf16.msrb.mxu1 %v9020_v39  ;;  %v9548_v38 = vor.u32 %v10481_v28, %v9545_v30  ;;  %v6544_v39 = vor.u32 %v9732_v33, %v6543_v23  ;;  %v9401_v41 = vld [vmem:[%s15619_s1 + $0x1730] sm:$0xf0]  ;;  %v10477_v42 = vld [vmem:[%s15619_s1 + $0x1824] sm:$0xf]  ;;  %v9832_v25 = vld [vmem:[%s15619_s1 + $0x3f4] sm:$0xf0]  ;;  %v6640_v23 = vor.u32 %v9756_v32, %v6639_v3 }
 0x189   :  { %5404 = vmatpush.bf16.msrb.mxu2 %v9148_v40  ;;  %v10445_v40 = vld [vmem:[%s15619_s1 + $0x1724] sm:$0xf]  ;;  %v9529_v45 = vld [vmem:[%s15619_s1 + $0x1830] sm:$0xf0]  ;;  %v9720_v35 = vld [vmem:[%s15619_s1 + $0x74] sm:$0xf0] }
 0x18a   :  { %5417 = vmatpush.bf16.msrb.mxu3 %v9276_v50  ;;  %v6527_v50 = vld [vmem:[%s15619_s1 + $0xa8] sm:$0xf]  ;;  %v9404_v43 = vor.u32 %v10445_v40, %v9401_v41  ;;  %v10441_v54 = vld [vmem:[%s15619_s1 + $0x1704] sm:$0xf]  ;;  %v9532_v55 = vor.u32 %v10477_v42, %v9529_v45  ;;  %v9385_v57 = vld [vmem:[%s15619_s1 + $0x1710] sm:$0xf0]  ;;  %v6496_v42 = vor.u32 %v9720_v35, %v6495_v31 }
 0x18b   :  { %5427 = vmatpush.bf16.msra.mxu0 %v9452_v51  ;;  %v9728_v51 = vld [vmem:[%s15619_s1 + $0xb4] sm:$0xf0]  ;;  %v10473_v58 = vld [vmem:[%s15619_s1 + $0x1804] sm:$0xf]  ;;  %v9513_v59 = vld [vmem:[%s15619_s1 + $0x1810] sm:$0xf0] }
 0x18c   :  { %5392 = vmatpush.bf16.msrb.mxu1 %v9004_v62  ;;  %v6528_v56 = vor.u32 %v9728_v51, %v6527_v50  ;;  %v6511_v62 = vld [vmem:[%s15619_s1 + $0x88] sm:$0xf]  ;;  %v5186_v27 = vpop.f32.mrf.mxu1  ;;  %v9516_v28 = vor.u32 %v10473_v58, %v9513_v59  ;;  %v9828_v41 = vld [vmem:[%s15619_s1 + $0x3d4] sm:$0xf0] }
 0x18d   :  { %5405 = vmatpush.bf16.msrb.mxu2 %v9132_v63  ;;  %v9724_v63 = vld [vmem:[%s15619_s1 + $0x94] sm:$0xf0]  ;;  %v5187_v30 = vadd.f32 %v5186_v27, %v13009_v44  ;;  %v6623_v36 = vld [vmem:[%s15619_s1 + $0x168] sm:$0xf] }
 0x18e   :  { %5418 = vmatpush.bf16.msrb.mxu3 %v9260_v8  ;;  %v6815_v8 = vld [vmem:[%s15619_s1 + $0x2e8] sm:$0xf]  ;;  %v9752_v44 = vld [vmem:[%s15619_s1 + $0x174] sm:$0xf0] }
 0x18f   :  { %5428 = vmatpush.bf16.msra.mxu0 %v9436_v10  ;;  %5393 = vmatmul.bf16.vlgmr.msrb.gmra.mxu1 %v11738_v4  ;;  %v9800_v10 = vld [vmem:[%s15619_s1 + $0x2f4] sm:$0xf0]  ;;  %v6927_v40 = vld [vmem:[%s15619_s1 + $0x3c8] sm:$0xf]  ;;  %v6624_v45 = vor.u32 %v9752_v44, %v6623_v36 }
 0x190   :  { %5441 = vmatpush.bf16.msra.mxu1 %v9564_v11  ;;  %5406 = vmatmul.bf16.vlgmr.msrb.gmra.mxu2 %v11742_v6  ;;  %v9388_v11 = vor.u32 %v10441_v54, %v9385_v57  ;;  %v6816_v33 = vor.u32 %v9800_v10, %v6815_v8  ;;  %v6479_v51 = vld [vmem:[%s15619_s1 + $0x48] sm:$0xf]  ;;  %v9716_v52 = vld [vmem:[%s15619_s1 + $0x54] sm:$0xf0] }
 0x191   :  { %5450 = vmatpush.bf16.msra.mxu2 %v6560_v24  ;;  %5419 = vmatmul.bf16.vlgmr.msrb.gmra.mxu3 %v11740_v5  ;;  %v6943_v24 = vld [vmem:[%s15619_s1 + $0x3e8] sm:$0xf]  ;;  %v9792_v58 = vld [vmem:[%s15619_s1 + $0x2b4] sm:$0xf0]  ;;  %v6480_v3 = vor.u32 %v9716_v52, %v6479_v51 }
 0x192   :  { %5463 = vmatpush.bf16.msra.mxu3 %v6688_v29  ;;  %v6512_v29 = vor.u32 %v9724_v63, %v6511_v62  ;;  %v6607_v53 = vld [vmem:[%s15619_s1 + $0x148] sm:$0xf]  ;;  %v9744_v27 = vld [vmem:[%s15619_s1 + $0x134] sm:$0xf0] }
 0x193   :  { %5429 = vmatpush.bf16.msra.mxu0 %v9420_v37  ;;  %v6944_v37 = vor.u32 %v9832_v25, %v6943_v24  ;;  %v6783_v57 = vld [vmem:[%s15619_s1 + $0x2a8] sm:$0xf]  ;;  %v9820_v31 = vld [vmem:[%s15619_s1 + $0x394] sm:$0xf0] }
 0x194   :  { %5442 = vmatpush.bf16.msra.mxu1 %v9548_v38  ;;  %v6799_v38 = vld [vmem:[%s15619_s1 + $0x2c8] sm:$0xf]  ;;  %v5212_v54 = vpop.f32.mrf.mxu3  ;;  %v5188_v63 = vpop.f32.mrf.mxu1  ;;  %v6784_v8 = vor.u32 %v9792_v58, %v6783_v57  ;;  %v9784_v51 = vld [vmem:[%s15619_s1 + $0x274] sm:$0xf0] }
 0x195   :  { %5451 = vmatpush.bf16.msra.mxu2 %v6544_v39  ;;  %v9796_v39 = vld [vmem:[%s15619_s1 + $0x2d4] sm:$0xf0]  ;;  %v6911_v59 = vld [vmem:[%s15619_s1 + $0x3a8] sm:$0xf] }
 0x196   :  { %5464 = vmatpush.bf16.msra.mxu3 %v6672_v34  ;;  %v5199_v34 = vpop.f32.mrf.mxu2  ;;  %v6800_v50 = vor.u32 %v9796_v39, %v6799_v38  ;;  %v6463_v10 = vld [vmem:[%s15619_s1 + $0x28] sm:$0xf]  ;;  %v9896_v57 = vld [vmem:[%s15619_s1 + $0x5f4] sm:$0xf0] }
 0x197   :  { %5430 = vmatpush.bf16.msra.mxu0 %v9404_v43  ;;  %v5200_v43 = vadd.f32 %v5199_v34, %v5187_v30  ;;  %v6591_v24 = vld [vmem:[%s15619_s1 + $0x128] sm:$0xf]  ;;  %v10524_v30 = vld [vmem:[#allocation1] sm:$0xff] }
 0x198   :  { %5443 = vmatpush.bf16.msra.mxu1 %v9532_v55  ;;  %v6928_v55 = vor.u32 %v9828_v41, %v6927_v40  ;;  %v6592_v38 = vor.u32 %v9744_v27, %v6591_v24  ;;  %v9708_v40 = vld [vmem:[%s15619_s1 + $0x14] sm:$0xf0]  ;;  %v6575_v41 = vld [vmem:[%s15619_s1 + $0x108] sm:$0xf] }
 0x199   :  { %5452 = vmatpush.bf16.msra.mxu2 %v6528_v56  ;;  %v9748_v56 = vld [vmem:[%s15619_s1 + $0x154] sm:$0xf0]  ;;  %v5213_v62 = vadd.f32 %v5212_v54, %v5200_v43  ;;  %v6879_v52 = vld [vmem:[%s15619_s1 + $0x368] sm:$0xf] }
 0x19a   :  { %5465 = vmatpush.bf16.msra.mxu3 %v6656_v61  ;;  %v9824_v61 = vld [vmem:[%s15619_s1 + $0x3b4] sm:$0xf0]  ;;  %v6608_v32 = vor.u32 %v9748_v56, %v6607_v53  ;;  %v7071_v43 = vld [vmem:[%s15619_s1 + $0x4e8] sm:$0xf] }
 0x19b   :  { %5431 = vmatpush.bf16.msra.mxu0 %v9388_v11  ;;  %v9712_v11 = vld [vmem:[%s15619_s1 + $0x34] sm:$0xf0]  ;;  %v6912_v25 = vor.u32 %v9824_v61, %v6911_v59  ;;  %v7199_v56 = vld [vmem:[%s15619_s1 + $0x5e8] sm:$0xf] }
 0x19c   :  { %5444 = vmatpush.bf16.msra.mxu1 %v9516_v28  ;;  %v6767_v28 = vld [vmem:[%s15619_s1 + $0x288] sm:$0xf]  ;;  %v6464_v35 = vor.u32 %v9712_v11, %v6463_v10  ;;  %v5214_v34 = vpop.f32.mrf.mxu3  ;;  %v9816_v53 = vld [vmem:[%s15619_s1 + $0x374] sm:$0xf0] }
 0x19d   :  { %5453 = vmatpush.bf16.msra.mxu2 %v6512_v29  ;;  %v9788_v29 = vld [vmem:[%s15619_s1 + $0x294] sm:$0xf0]  ;;  %v6880_v61 = vor.u32 %v9816_v53, %v6879_v52  ;;  %v6735_v63 = vld [vmem:[%s15619_s1 + $0x248] sm:$0xf] }
 0x19e   :  { %5466 = vmatpush.bf16.msra.mxu3 %v6640_v23  ;;  %5432 = vmatmul.bf16.vlgmr.msra.gmra.mxu0 %v11744_v7  ;;  %v5225_v23 = vpop.f32.mrf.mxu0  ;;  %v5201_v44 = vpop.f32.mrf.mxu2  ;;  %v6768_v39 = vor.u32 %v9788_v29, %v6767_v28  ;;  %v9864_v54 = vld [vmem:[%s15619_s1 + $0x4f4] sm:$0xf0]  ;;  %v7055_v11 = vld [vmem:[%s15619_s1 + $0x4c8] sm:$0xf] }
 0x19f   :  { %5476 = vmatpush.bf16.msrb.mxu0 %v6816_v33  ;;  %9574 = vmatmul.msk.bf16.vlgmr.msra.gmra.mxu1 %vm4797_vm0, %v10524_v30  ;;  %v6895_v33 = vld [vmem:[%s15619_s1 + $0x388] sm:$0xf]  ;;  %v13206_v36 = vadd.f32 %v5225_v23, %v5213_v62  ;;  %v7072_v62 = vor.u32 %v9864_v54, %v7071_v43  ;;  %v9812_v10 = vld [vmem:[%s15619_s1 + $0x354] sm:$0xf0] }
 0x1a0   :  { %5489 = vmatpush.bf16.msrb.mxu1 %v6944_v37  ;;  %v6447_v37 = vld [vmem:[%s15619_s1 + $0x8] sm:$0xf]  ;;  %v9860_v24 = vld [vmem:[%s15619_s1 + $0x4d4] sm:$0xf0] }
 0x1a1   :  { %5454 = vmatpush.bf16.msra.mxu2 %v6496_v42  ;;  %v9740_v42 = vld [vmem:[%s15619_s1 + $0x114] sm:$0xf0]  ;;  %v7183_v27 = vld [vmem:[%s15619_s1 + $0x5c8] sm:$0xf]  ;;  %v7056_v23 = vor.u32 %v9860_v24, %v7055_v11 }
 0x1a2   :  { %5467 = vmatpush.bf16.msra.mxu3 %v6624_v45  ;;  %v6896_v45 = vor.u32 %v9820_v31, %v6895_v33  ;;  %v6576_v58 = vor.u32 %v9740_v42, %v6575_v41  ;;  %v9892_v28 = vld [vmem:[%s15619_s1 + $0x5d4] sm:$0xf0]  ;;  %v6719_v33 = vld [vmem:[%s15619_s1 + $0x228] sm:$0xf] }
 0x1a3   :  { %5477 = vmatpush.bf16.msrb.mxu0 %v6800_v50  ;;  %v6751_v50 = vld [vmem:[%s15619_s1 + $0x268] sm:$0xf]  ;;  %v9776_v31 = vld [vmem:[%s15619_s1 + $0x234] sm:$0xf0] }
 0x1a4   :  { %5490 = vmatpush.bf16.msrb.mxu1 %v6928_v55  ;;  %v6448_v55 = vor.u32 %v9708_v40, %v6447_v37  ;;  %v6752_v59 = vor.u32 %v9784_v51, %v6751_v50  ;;  %v7184_v37 = vor.u32 %v9892_v28, %v7183_v27  ;;  %v9808_v44 = vld [vmem:[%s15619_s1 + $0x334] sm:$0xf0]  ;;  %v7167_v40 = vld [vmem:[%s15619_s1 + $0x5a8] sm:$0xf]  ;;  %v6720_v42 = vor.u32 %v9776_v31, %v6719_v33 }
 0x1a5   :  { %5455 = vmatpush.bf16.msra.mxu2 %v6480_v3  ;;  %v9780_v3 = vld [vmem:[%s15619_s1 + $0x254] sm:$0xf0]  ;;  %v6703_v34 = vld [vmem:[%s15619_s1 + $0x208] sm:$0xf] }
 0x1a6   :  { %5468 = vmatpush.bf16.msra.mxu3 %v6608_v32  ;;  %v6863_v32 = vld [vmem:[%s15619_s1 + $0x348] sm:$0xf]  ;;  %v6736_v29 = vor.u32 %v9780_v3, %v6735_v63  ;;  %v9888_v41 = vld [vmem:[%s15619_s1 + $0x5b4] sm:$0xf0] }
 0x1a7   :  { %5478 = vmatpush.bf16.msrb.mxu0 %v6784_v8  ;;  %v7200_v8 = vor.u32 %v9896_v57, %v7199_v56  ;;  %v6864_v30 = vor.u32 %v9812_v10, %v6863_v32  ;;  %v9772_v51 = vld [vmem:[%s15619_s1 + $0x214] sm:$0xf0]  ;;  %v6831_v52 = vld [vmem:[%s15619_s1 + $0x308] sm:$0xf]  ;;  %v7168_v43 = vor.u32 %v9888_v41, %v7167_v40 }
 0x1a8   :  { %5491 = vmatpush.bf16.msrb.mxu1 %v6912_v25  ;;  %v5227_v25 = vpop.f32.mrf.mxu0  ;;  %v9804_v53 = vld [vmem:[%s15619_s1 + $0x314] sm:$0xf0]  ;;  %v7023_v54 = vld [vmem:[%s15619_s1 + $0x488] sm:$0xf]  ;;  %v6704_v63 = vor.u32 %v9772_v51, %v6703_v34 }
 0x1a9   :  { %5456 = vmatpush.bf16.msra.mxu2 %v6464_v35  ;;  %v6847_v35 = vld [vmem:[%s15619_s1 + $0x328] sm:$0xf]  ;;  %v9960_v32 = vld [vmem:[%s15619_s1 + $0x7f4] sm:$0xf0] }
 0x1aa   :  { %5469 = vmatpush.bf16.msra.mxu3 %v6592_v38  ;;  %v7039_v38 = vld [vmem:[%s15619_s1 + $0x4a8] sm:$0xf]  ;;  %v9848_v25 = vld [vmem:[%s15619_s1 + $0x474] sm:$0xf0] }
 0x1ab   :  { %5479 = vmatpush.bf16.msrb.mxu0 %v6768_v39  ;;  %v9856_v39 = vld [vmem:[%s15619_s1 + $0x4b4] sm:$0xf0]  ;;  %v7151_v56 = vld [vmem:[%s15619_s1 + $0x588] sm:$0xf] }
 0x1ac   :  { %5492 = vmatpush.bf16.msrb.mxu1 %v6896_v45  ;;  %v6848_v45 = vor.u32 %v9808_v44, %v6847_v35  ;;  %v7040_v50 = vor.u32 %v9856_v39, %v7039_v38  ;;  %v5238_v57 = vpop.f32.mrf.mxu1  ;;  %v7455_v3 = vld [vmem:[%s15619_s1 + $0x7e8] sm:$0xf]  ;;  %v9956_v31 = vld [vmem:[%s15619_s1 + $0x7d4] sm:$0xf0] }
 0x1ad   :  { %5457 = vmatpush.bf16.msra.mxu2 %v6448_v55  ;;  %v9852_v55 = vld [vmem:[%s15619_s1 + $0x494] sm:$0xf0]  ;;  %v7135_v27 = vld [vmem:[%s15619_s1 + $0x568] sm:$0xf]  ;;  %v7456_v28 = vor.u32 %v9960_v32, %v7455_v3 }
 0x1ae   :  { %5470 = vmatpush.bf16.msra.mxu3 %v6576_v58  ;;  %v9884_v58 = vld [vmem:[%s15619_s1 + $0x594] sm:$0xf0]  ;;  %v7024_v10 = vor.u32 %v9852_v55, %v7023_v54  ;;  %v7439_v33 = vld [vmem:[%s15619_s1 + $0x7c8] sm:$0xf] }
 0x1af   :  { %5480 = vmatpush.bf16.msrb.mxu0 %v6752_v59  ;;  %v7327_v59 = vld [vmem:[%s15619_s1 + $0x6e8] sm:$0xf]  ;;  %v7152_v11 = vor.u32 %v9884_v58, %v7151_v56  ;;  %v9844_v41 = vld [vmem:[%s15619_s1 + $0x454] sm:$0xf0] }
 0x1b0   :  { %5493 = vmatpush.bf16.msrb.mxu1 %v6880_v61  ;;  %5458 = vmatmul.bf16.vlgmr.msra.gmra.mxu2 %v10891_v21  ;;  %v9928_v61 = vld [vmem:[%s15619_s1 + $0x6f4] sm:$0xf0]  ;;  %v6991_v40 = vld [vmem:[%s15619_s1 + $0x448] sm:$0xf] }
 0x1b1   :  { %5502 = vmatpush.bf16.msrb.mxu2 %v7072_v62  ;;  %5471 = vmatmul.bf16.vlgmr.msra.gmra.mxu3 %v10902_v26  ;;  %v5239_v62 = vadd.f32 %v5238_v57, %v13206_v36  ;;  %v7328_v24 = vor.u32 %v9928_v61, %v7327_v59  ;;  %v7007_v36 = vld [vmem:[%s15619_s1 + $0x468] sm:$0xf]  ;;  %v9952_v54 = vld [vmem:[%s15619_s1 + $0x7b4] sm:$0xf0]  ;;  %v6992_v56 = vor.u32 %v9844_v41, %v6991_v40 }
 0x1b2   :  { %5515 = vmatpush.bf16.msrb.mxu3 %v7200_v8  ;;  %v6832_v8 = vor.u32 %v9804_v53, %v6831_v52  ;;  %v7008_v35 = vor.u32 %v9848_v25, %v7007_v36  ;;  %v7295_v51 = vld [vmem:[%s15619_s1 + $0x6a8] sm:$0xf]  ;;  %v9920_v52 = vld [vmem:[%s15619_s1 + $0x6b4] sm:$0xf0] }
 0x1b3   :  { %5481 = vmatpush.bf16.msrb.mxu0 %v6736_v29  ;;  %v9880_v29 = vld [vmem:[%s15619_s1 + $0x574] sm:$0xf0]  ;;  %v5251_v44 = vpop.f32.mrf.mxu2  ;;  %v7296_v58 = vor.u32 %v9920_v52, %v7295_v51  ;;  %v6975_v59 = vld [vmem:[%s15619_s1 + $0x428] sm:$0xf] }
 0x1b4   :  { %5494 = vmatpush.bf16.msrb.mxu1 %v6864_v30  ;;  %v7311_v30 = vld [vmem:[%s15619_s1 + $0x6c8] sm:$0xf]  ;;  %v5264_v39 = vpop.f32.mrf.mxu3  ;;  %v5252_v34 = vadd.f32 %v5251_v44, %v5239_v62  ;;  %v5240_v53 = vpop.f32.mrf.mxu1  ;;  %v9840_v61 = vld [vmem:[%s15619_s1 + $0x434] sm:$0xf0] }
 0x1b5   :  { %5503 = vmatpush.bf16.msrb.mxu2 %v7056_v23  ;;  %v9924_v23 = vld [vmem:[%s15619_s1 + $0x6d4] sm:$0xf0]  ;;  %v7103_v62 = vld [vmem:[%s15619_s1 + $0x528] sm:$0xf]  ;;  %v6976_v25 = vor.u32 %v9840_v61, %v6975_v59 }
 0x1b6   :  { %5516 = vmatpush.bf16.msrb.mxu3 %v7184_v37  ;;  %v7136_v37 = vor.u32 %v9880_v29, %v7135_v27  ;;  %v7312_v38 = vor.u32 %v9924_v23, %v7311_v30  ;;  %v5265_v55 = vadd.f32 %v5264_v39, %v5252_v34  ;;  %v9872_v3 = vld [vmem:[%s15619_s1 + $0x534] sm:$0xf0]  ;;  %v7279_v32 = vld [vmem:[%s15619_s1 + $0x688] sm:$0xf] }
 0x1b7   :  { %5482 = vmatpush.bf16.msrb.mxu0 %v6720_v42  ;;  %v7119_v42 = vld [vmem:[%s15619_s1 + $0x548] sm:$0xf]  ;;  %v9836_v30 = vld [vmem:[%s15619_s1 + $0x414] sm:$0xf0] }
 0x1b8   :  { %5495 = vmatpush.bf16.msrb.mxu1 %v6848_v45  ;;  %v7440_v45 = vor.u32 %v9956_v31, %v7439_v33  ;;  %v6959_v27 = vld [vmem:[%s15619_s1 + $0x408] sm:$0xf]  ;;  %v9868_v33 = vld [vmem:[%s15619_s1 + $0x514] sm:$0xf0] }
 0x1b9   :  { %5504 = vmatpush.bf16.msrb.mxu2 %v7040_v50  ;;  %v9876_v50 = vld [vmem:[%s15619_s1 + $0x554] sm:$0xf0]  ;;  %v7087_v23 = vld [vmem:[%s15619_s1 + $0x508] sm:$0xf]  ;;  %v6960_v34 = vor.u32 %v9836_v30, %v6959_v27 }
 0x1ba   :  { %5517 = vmatpush.bf16.msrb.mxu3 %v7168_v43  ;;  %v7423_v43 = vld [vmem:[%s15619_s1 + $0x7a8] sm:$0xf]  ;;  %v7120_v57 = vor.u32 %v9876_v50, %v7119_v42  ;;  %v9944_v40 = vld [vmem:[%s15619_s1 + $0x774] sm:$0xf0]  ;;  %v7088_v51 = vor.u32 %v9868_v33, %v7087_v23 }
 0x1bb   :  { %5483 = vmatpush.bf16.msrb.mxu0 %v6704_v63  ;;  %v7424_v63 = vor.u32 %v9952_v54, %v7423_v43  ;;  %v5253_v31 = vpop.f32.mrf.mxu2  ;;  %v7263_v44 = vld [vmem:[%s15619_s1 + $0x668] sm:$0xf]  ;;  %v9992_v42 = vld [vmem:[%s15619_s1 + $0x8f4] sm:$0xf0] }
 0x1bc   :  { %5496 = vmatpush.bf16.msrb.mxu1 %v6832_v8  ;;  %v9916_v8 = vld [vmem:[%s15619_s1 + $0x694] sm:$0xf0]  ;;  %v7391_v39 = vld [vmem:[%s15619_s1 + $0x768] sm:$0xf] }
 0x1bd   :  { %5505 = vmatpush.bf16.msrb.mxu2 %v7024_v10  ;;  %v5277_v10 = vpop.f32.mrf.mxu0  ;;  %v7280_v29 = vor.u32 %v9916_v8, %v7279_v32  ;;  %v7583_v41 = vld [vmem:[%s15619_s1 + $0x8e8] sm:$0xf]  ;;  %v10024_v50 = vld [vmem:[%s15619_s1 + $0x9f4] sm:$0xf0]  ;;  %v7392_v53 = vor.u32 %v9944_v40, %v7391_v39 }
 0x1be   :  { %5518 = vmatpush.bf16.msrb.mxu3 %v7152_v11  ;;  %5484 = vmatmul.bf16.vlgmr.msrb.gmra.mxu0 %v10889_v20  ;;  %v7407_v11 = vld [vmem:[%s15619_s1 + $0x788] sm:$0xf]  ;;  %v13405_v36 = vadd.f32 %v5277_v10, %v5265_v55  ;;  %v7584_v43 = vor.u32 %v9992_v42, %v7583_v41  ;;  %v9908_v55 = vld [vmem:[%s15619_s1 + $0x654] sm:$0xf0] }
 0x1bf   :  { %5528 = vmatpush.bf16.msra.mxu0 %v7328_v24  ;;  %5497 = vmatmul.bf16.vlgmr.msrb.gmra.mxu1 %v10893_v22  ;;  %v9948_v24 = vld [vmem:[%s15619_s1 + $0x794] sm:$0xf0]  ;;  %v7247_v54 = vld [vmem:[%s15619_s1 + $0x648] sm:$0xf] }
 0x1c0   :  { %5541 = vmatpush.bf16.msra.mxu1 %v7456_v28  ;;  %v7104_v28 = vor.u32 %v9872_v3, %v7103_v62  ;;  %v7567_v59 = vld [vmem:[%s15619_s1 + $0x8c8] sm:$0xf]  ;;  %v9988_v61 = vld [vmem:[%s15619_s1 + $0x8d4] sm:$0xf0]  ;;  %v7248_v32 = vor.u32 %v9908_v55, %v7247_v54 }
 0x1c1   :  { %5506 = vmatpush.bf16.msrb.mxu2 %v7008_v35  ;;  %v5266_v35 = vpop.f32.mrf.mxu3  ;;  %v10020_v3 = vld [vmem:[%s15619_s1 + $0x9d4] sm:$0xf0]  ;;  %v7568_v10 = vor.u32 %v9988_v61, %v7567_v59  ;;  %v7679_v23 = vld [vmem:[%s15619_s1 + $0x9a8] sm:$0xf] }
 0x1c2   :  { %5519 = vmatpush.bf16.msrb.mxu3 %v7136_v37  ;;  %v7408_v37 = vor.u32 %v9948_v24, %v7407_v11  ;;  %v7231_v11 = vld [vmem:[%s15619_s1 + $0x628] sm:$0xf]  ;;  %v9904_v24 = vld [vmem:[%s15619_s1 + $0x634] sm:$0xf0] }
 0x1c3   :  { %5529 = vmatpush.bf16.msra.mxu0 %v7312_v38  ;;  %v9912_v38 = vld [vmem:[%s15619_s1 + $0x674] sm:$0xf0]  ;;  %v7232_v31 = vor.u32 %v9904_v24, %v7231_v11  ;;  %v7215_v35 = vld [vmem:[%s15619_s1 + $0x608] sm:$0xf] }
 0x1c4   :  { %5542 = vmatpush.bf16.msra.mxu1 %v7440_v45  ;;  %v7711_v45 = vld [vmem:[%s15619_s1 + $0x9e8] sm:$0xf]  ;;  %v7264_v52 = vor.u32 %v9912_v38, %v7263_v44  ;;  %v9984_v30 = vld [vmem:[%s15619_s1 + $0x8b4] sm:$0xf0] }
 0x1c5   :  { %5507 = vmatpush.bf16.msrb.mxu2 %v6992_v56  ;;  %v7375_v56 = vld [vmem:[%s15619_s1 + $0x748] sm:$0xf]  ;;  %v5279_v62 = vpop.f32.mrf.mxu0  ;;  %v10016_v33 = vld [vmem:[%s15619_s1 + $0x9b4] sm:$0xf0] }
 0x1c6   :  { %5520 = vmatpush.bf16.msrb.mxu3 %v7120_v57  ;;  %v7712_v57 = vor.u32 %v10024_v50, %v7711_v45  ;;  %v9900_v38 = vld [vmem:[%s15619_s1 + $0x614] sm:$0xf0]  ;;  %v7343_v39 = vld [vmem:[%s15619_s1 + $0x708] sm:$0xf]  ;;  %v7680_v41 = vor.u32 %v10016_v33, %v7679_v23 }
 0x1c7   :  { %5530 = vmatpush.bf16.msra.mxu0 %v7296_v58  ;;  %v9940_v58 = vld [vmem:[%s15619_s1 + $0x754] sm:$0xf0]  ;;  %v7535_v42 = vld [vmem:[%s15619_s1 + $0x888] sm:$0xf]  ;;  %v7216_v54 = vor.u32 %v9900_v38, %v7215_v35 }
 0x1c8   :  { %5543 = vmatpush.bf16.msra.mxu1 %v7424_v63  ;;  %v7695_v63 = vld [vmem:[%s15619_s1 + $0x9c8] sm:$0xf]  ;;  %v7376_v8 = vor.u32 %v9940_v58, %v7375_v56  ;;  %v9932_v40 = vld [vmem:[%s15619_s1 + $0x714] sm:$0xf0] }
 0x1c9   :  { %5508 = vmatpush.bf16.msrb.mxu2 %v6976_v25  ;;  %v7359_v25 = vld [vmem:[%s15619_s1 + $0x728] sm:$0xf]  ;;  %v7696_v27 = vor.u32 %v10020_v3, %v7695_v63  ;;  %v10088_v56 = vld [vmem:[%s15619_s1 + $0xbf4] sm:$0xf0] }
 0x1ca   :  { %5521 = vmatpush.bf16.msrb.mxu3 %v7104_v28  ;;  %v9936_v28 = vld [vmem:[%s15619_s1 + $0x734] sm:$0xf0]  ;;  %v7663_v45 = vld [vmem:[%s15619_s1 + $0x988] sm:$0xf] }
 0x1cb   :  { %5531 = vmatpush.bf16.msra.mxu0 %v7280_v29  ;;  %v7551_v29 = vld [vmem:[%s15619_s1 + $0x8a8] sm:$0xf]  ;;  %v9976_v62 = vld [vmem:[%s15619_s1 + $0x874] sm:$0xf0] }
 0x1cc   :  { %5544 = vmatpush.bf16.msra.mxu1 %v7408_v37  ;;  %v7360_v37 = vor.u32 %v9936_v28, %v7359_v25  ;;  %v7552_v44 = vor.u32 %v9984_v30, %v7551_v29  ;;  %v5290_v50 = vpop.f32.mrf.mxu1  ;;  %v7967_v55 = vld [vmem:[%s15619_s1 + $0xbe8] sm:$0xf]  ;;  %v10084_v24 = vld [vmem:[%s15619_s1 + $0xbd4] sm:$0xf0] }
 0x1cd   :  { %5509 = vmatpush.bf16.msrb.mxu2 %v6960_v34  ;;  %v9980_v34 = vld [vmem:[%s15619_s1 + $0x894] sm:$0xf0]  ;;  %v7647_v63 = vld [vmem:[%s15619_s1 + $0x968] sm:$0xf]  ;;  %v7968_v3 = vor.u32 %v10088_v56, %v7967_v55 }
 0x1ce   :  { %5522 = vmatpush.bf16.msrb.mxu3 %v7088_v51  ;;  %v10012_v51 = vld [vmem:[%s15619_s1 + $0x994] sm:$0xf0]  ;;  %v7536_v58 = vor.u32 %v9980_v34, %v7535_v42  ;;  %v7951_v11 = vld [vmem:[%s15619_s1 + $0xbc8] sm:$0xf] }
 0x1cf   :  { %5532 = vmatpush.bf16.msra.mxu0 %v7264_v52  ;;  %v7839_v52 = vld [vmem:[%s15619_s1 + $0xae8] sm:$0xf]  ;;  %v7664_v59 = vor.u32 %v10012_v51, %v7663_v45  ;;  %v9972_v33 = vld [vmem:[%s15619_s1 + $0x854] sm:$0xf0] }
 0x1d0   :  { %5545 = vmatpush.bf16.msra.mxu1 %v7392_v53  ;;  %5510 = vmatmul.bf16.vlgmr.msrb.gmra.mxu2 %v10984_v0  ;;  %v10056_v53 = vld [vmem:[%s15619_s1 + $0xaf4] sm:$0xf0]  ;;  %v7503_v23 = vld [vmem:[%s15619_s1 + $0x848] sm:$0xf] }
 0x1d1   :  { %5554 = vmatpush.bf16.msra.mxu2 %v7584_v43  ;;  %5523 = vmatmul.bf16.vlgmr.msrb.gmra.mxu3 %v10988_v2  ;;  %v5291_v43 = vadd.f32 %v5290_v50, %v13405_v36  ;;  %v7840_v61 = vor.u32 %v10056_v53, %v7839_v52  ;;  %v7519_v36 = vld [vmem:[%s15619_s1 + $0x868] sm:$0xf]  ;;  %v10080_v42 = vld [vmem:[%s15619_s1 + $0xbb4] sm:$0xf0]  ;;  %v7504_v45 = vor.u32 %v9972_v33, %v7503_v23 }
 0x1d2   :  { %5567 = vmatpush.bf16.msra.mxu3 %v7712_v57  ;;  %v7344_v57 = vor.u32 %v9932_v40, %v7343_v39  ;;  %v7520_v25 = vor.u32 %v9976_v62, %v7519_v36  ;;  %v7807_v38 = vld [vmem:[%s15619_s1 + $0xaa8] sm:$0xf]  ;;  %v10048_v39 = vld [vmem:[%s15619_s1 + $0xab4] sm:$0xf0] }
 0x1d3   :  { %5533 = vmatpush.bf16.msra.mxu0 %v7248_v32  ;;  %v10008_v32 = vld [vmem:[%s15619_s1 + $0x974] sm:$0xf0]  ;;  %v5303_v28 = vpop.f32.mrf.mxu2  ;;  %v7808_v51 = vor.u32 %v10048_v39, %v7807_v38  ;;  %v7487_v52 = vld [vmem:[%s15619_s1 + $0x828] sm:$0xf] }
 0x1d4   :  { %5546 = vmatpush.bf16.msra.mxu1 %v7376_v8  ;;  %v7823_v8 = vld [vmem:[%s15619_s1 + $0xac8] sm:$0xf]  ;;  %v5316_v30 = vpop.f32.mrf.mxu3  ;;  %v5304_v35 = vadd.f32 %v5303_v28, %v5291_v43  ;;  %v5292_v40 = vpop.f32.mrf.mxu1  ;;  %v9968_v53 = vld [vmem:[%s15619_s1 + $0x834] sm:$0xf0] }
 0x1d5   :  { %5555 = vmatpush.bf16.msra.mxu2 %v7568_v10  ;;  %v10052_v10 = vld [vmem:[%s15619_s1 + $0xad4] sm:$0xf0]  ;;  %v7615_v43 = vld [vmem:[%s15619_s1 + $0x928] sm:$0xf]  ;;  %v7488_v62 = vor.u32 %v9968_v53, %v7487_v52 }
 0x1d6   :  { %5568 = vmatpush.bf16.msra.mxu3 %v7696_v27  ;;  %v7648_v27 = vor.u32 %v10008_v32, %v7647_v63  ;;  %v7824_v29 = vor.u32 %v10052_v10, %v7823_v8  ;;  %v5317_v34 = vadd.f32 %v5316_v30, %v5304_v35  ;;  %v10000_v55 = vld [vmem:[%s15619_s1 + $0x934] sm:$0xf0]  ;;  %v7791_v56 = vld [vmem:[%s15619_s1 + $0xa88] sm:$0xf] }
 0x1d7   :  { %5534 = vmatpush.bf16.msra.mxu0 %v7232_v31  ;;  %v7631_v31 = vld [vmem:[%s15619_s1 + $0x948] sm:$0xf]  ;;  %v9964_v8 = vld [vmem:[%s15619_s1 + $0x814] sm:$0xf0] }
 0x1d8   :  { %5547 = vmatpush.bf16.msra.mxu1 %v7360_v37  ;;  %v7952_v37 = vor.u32 %v10084_v24, %v7951_v11  ;;  %v7471_v63 = vld [vmem:[%s15619_s1 + $0x808] sm:$0xf]  ;;  %v9996_v11 = vld [vmem:[%s15619_s1 + $0x914] sm:$0xf0] }
 0x1d9   :  { %5556 = vmatpush.bf16.msra.mxu2 %v7552_v44  ;;  %v10004_v44 = vld [vmem:[%s15619_s1 + $0x954] sm:$0xf0]  ;;  %v7599_v10 = vld [vmem:[%s15619_s1 + $0x908] sm:$0xf]  ;;  %v7472_v35 = vor.u32 %v9964_v8, %v7471_v63 }
 0x1da   :  { %5569 = vmatpush.bf16.msra.mxu3 %v7680_v41  ;;  %v7935_v41 = vld [vmem:[%s15619_s1 + $0xba8] sm:$0xf]  ;;  %v7632_v50 = vor.u32 %v10004_v44, %v7631_v31  ;;  %v10072_v23 = vld [vmem:[%s15619_s1 + $0xb74] sm:$0xf0]  ;;  %v7600_v38 = vor.u32 %v9996_v11, %v7599_v10 }
 0x1db   :  { %5535 = vmatpush.bf16.msra.mxu0 %v7216_v54  ;;  %v7936_v54 = vor.u32 %v10080_v42, %v7935_v41  ;;  %v5305_v24 = vpop.f32.mrf.mxu2  ;;  %v7775_v28 = vld [vmem:[%s15619_s1 + $0xa68] sm:$0xf]  ;;  %v10120_v31 = vld [vmem:[%s15619_s1 + $0xcf4] sm:$0xf0] }
 0x1dc   :  { %5548 = vmatpush.bf16.msra.mxu1 %v7344_v57  ;;  %v10044_v57 = vld [vmem:[%s15619_s1 + $0xa94] sm:$0xf0]  ;;  %v7903_v30 = vld [vmem:[%s15619_s1 + $0xb68] sm:$0xf] }
 0x1dd   :  { %5557 = vmatpush.bf16.msra.mxu2 %v7536_v58  ;;  %v5329_v58 = vpop.f32.mrf.mxu0  ;;  %v7792_v32 = vor.u32 %v10044_v57, %v7791_v56  ;;  %v8095_v33 = vld [vmem:[%s15619_s1 + $0xce8] sm:$0xf]  ;;  %v10152_v44 = vld [vmem:[%s15619_s1 + $0xdf4] sm:$0xf0]  ;;  %v7904_v40 = vor.u32 %v10072_v23, %v7903_v30 }
 0x1de   :  { %5570 = vmatpush.bf16.msra.mxu3 %v7664_v59  ;;  %5536 = vmatmul.bf16.vlgmr.msra.gmra.mxu0 %v10979_v60  ;;  %v7919_v59 = vld [vmem:[%s15619_s1 + $0xb88] sm:$0xf]  ;;  %v13604_v36 = vadd.f32 %v5329_v58, %v5317_v34  ;;  %v8096_v41 = vor.u32 %v10120_v31, %v8095_v33  ;;  %v10036_v34 = vld [vmem:[%s15619_s1 + $0xa54] sm:$0xf0] }
 0x1df   :  { %5580 = vmatpush.bf16.msrb.mxu0 %v7840_v61  ;;  %5549 = vmatmul.bf16.vlgmr.msra.gmra.mxu1 %v10986_v1  ;;  %v10076_v61 = vld [vmem:[%s15619_s1 + $0xb94] sm:$0xf0]  ;;  %v7759_v42 = vld [vmem:[%s15619_s1 + $0xa48] sm:$0xf] }
 0x1e0   :  { %5593 = vmatpush.bf16.msrb.mxu1 %v7968_v3  ;;  %v7616_v3 = vor.u32 %v10000_v55, %v7615_v43  ;;  %v8079_v52 = vld [vmem:[%s15619_s1 + $0xcc8] sm:$0xf]  ;;  %v10116_v53 = vld [vmem:[%s15619_s1 + $0xcd4] sm:$0xf0]  ;;  %v7760_v56 = vor.u32 %v10036_v34, %v7759_v42 }
 0x1e1   :  { %5558 = vmatpush.bf16.msra.mxu2 %v7520_v25  ;;  %v5318_v25 = vpop.f32.mrf.mxu3  ;;  %v10148_v55 = vld [vmem:[%s15619_s1 + $0xdd4] sm:$0xf0]  ;;  %v8080_v58 = vor.u32 %v10116_v53, %v8079_v52  ;;  %v8191_v10 = vld [vmem:[%s15619_s1 + $0xda8] sm:$0xf] }
 0x1e2   :  { %5571 = vmatpush.bf16.msra.mxu3 %v7648_v27  ;;  %v7920_v27 = vor.u32 %v10076_v61, %v7919_v59  ;;  %v7743_v59 = vld [vmem:[%s15619_s1 + $0xa28] sm:$0xf]  ;;  %v10032_v61 = vld [vmem:[%s15619_s1 + $0xa34] sm:$0xf0] }
 0x1e3   :  { %5581 = vmatpush.bf16.msrb.mxu0 %v7824_v29  ;;  %v10040_v29 = vld [vmem:[%s15619_s1 + $0xa74] sm:$0xf0]  ;;  %v7744_v24 = vor.u32 %v10032_v61, %v7743_v59  ;;  %v7727_v25 = vld [vmem:[%s15619_s1 + $0xa08] sm:$0xf] }
 0x1e4   :  { %5594 = vmatpush.bf16.msrb.mxu1 %v7952_v37  ;;  %v8223_v37 = vld [vmem:[%s15619_s1 + $0xde8] sm:$0xf]  ;;  %v7776_v39 = vor.u32 %v10040_v29, %v7775_v28  ;;  %v10112_v8 = vld [vmem:[%s15619_s1 + $0xcb4] sm:$0xf0] }
 0x1e5   :  { %5559 = vmatpush.bf16.msra.mxu2 %v7504_v45  ;;  %v7887_v45 = vld [vmem:[%s15619_s1 + $0xb48] sm:$0xf]  ;;  %v5331_v43 = vpop.f32.mrf.mxu0  ;;  %v10144_v11 = vld [vmem:[%s15619_s1 + $0xdb4] sm:$0xf0] }
 0x1e6   :  { %5572 = vmatpush.bf16.msra.mxu3 %v7632_v50  ;;  %v8224_v50 = vor.u32 %v10152_v44, %v8223_v37  ;;  %v10028_v29 = vld [vmem:[%s15619_s1 + $0xa14] sm:$0xf0]  ;;  %v7855_v30 = vld [vmem:[%s15619_s1 + $0xb08] sm:$0xf]  ;;  %v8192_v33 = vor.u32 %v10144_v11, %v8191_v10 }
 0x1e7   :  { %5582 = vmatpush.bf16.msrb.mxu0 %v7808_v51  ;;  %v10068_v51 = vld [vmem:[%s15619_s1 + $0xb54] sm:$0xf0]  ;;  %v8047_v31 = vld [vmem:[%s15619_s1 + $0xc88] sm:$0xf]  ;;  %v7728_v42 = vor.u32 %v10028_v29, %v7727_v25 }
 0x1e8   :  { %5595 = vmatpush.bf16.msrb.mxu1 %v7936_v54  ;;  %v8207_v54 = vld [vmem:[%s15619_s1 + $0xdc8] sm:$0xf]  ;;  %v7888_v57 = vor.u32 %v10068_v51, %v7887_v45  ;;  %v10060_v23 = vld [vmem:[%s15619_s1 + $0xb14] sm:$0xf0] }
 0x1e9   :  { %5560 = vmatpush.bf16.msra.mxu2 %v7488_v62  ;;  %v7871_v62 = vld [vmem:[%s15619_s1 + $0xb28] sm:$0xf]  ;;  %v8208_v63 = vor.u32 %v10148_v55, %v8207_v54  ;;  %v10216_v45 = vld [vmem:[%s15619_s1 + $0xff4] sm:$0xf0] }
 0x1ea   :  { %5573 = vmatpush.bf16.msra.mxu3 %v7616_v3  ;;  %v10064_v3 = vld [vmem:[%s15619_s1 + $0xb34] sm:$0xf0]  ;;  %v8175_v37 = vld [vmem:[%s15619_s1 + $0xd88] sm:$0xf] }
 0x1eb   :  { %5583 = vmatpush.bf16.msrb.mxu0 %v7792_v32  ;;  %v8063_v32 = vld [vmem:[%s15619_s1 + $0xca8] sm:$0xf]  ;;  %v10104_v43 = vld [vmem:[%s15619_s1 + $0xc74] sm:$0xf0] }
 0x1ec   :  { %5596 = vmatpush.bf16.msrb.mxu1 %v7920_v27  ;;  %v7872_v27 = vor.u32 %v10064_v3, %v7871_v62  ;;  %v8064_v28 = vor.u32 %v10112_v8, %v8063_v32  ;;  %v5342_v44 = vpop.f32.mrf.mxu1  ;;  %v8479_v34 = vld [vmem:[%s15619_s1 + $0xfe8] sm:$0xf]  ;;  %v10212_v61 = vld [vmem:[%s15619_s1 + $0xfd4] sm:$0xf0] }
 0x1ed   :  { %5561 = vmatpush.bf16.msra.mxu2 %v7472_v35  ;;  %v10108_v35 = vld [vmem:[%s15619_s1 + $0xc94] sm:$0xf0]  ;;  %v8159_v54 = vld [vmem:[%s15619_s1 + $0xd68] sm:$0xf]  ;;  %v8480_v55 = vor.u32 %v10216_v45, %v8479_v34 }
 0x1ee   :  { %5574 = vmatpush.bf16.msra.mxu3 %v7600_v38  ;;  %v10140_v38 = vld [vmem:[%s15619_s1 + $0xd94] sm:$0xf0]  ;;  %v8048_v51 = vor.u32 %v10108_v35, %v8047_v31  ;;  %v8463_v59 = vld [vmem:[%s15619_s1 + $0xfc8] sm:$0xf] }
 0x1ef   :  { %5584 = vmatpush.bf16.msrb.mxu0 %v7776_v39  ;;  %v8351_v39 = vld [vmem:[%s15619_s1 + $0xee8] sm:$0xf]  ;;  %v8176_v52 = vor.u32 %v10140_v38, %v8175_v37  ;;  %v10100_v11 = vld [vmem:[%s15619_s1 + $0xc54] sm:$0xf0] }
 0x1f0   :  { %5597 = vmatpush.bf16.msrb.mxu1 %v7904_v40  ;;  %5562 = vmatmul.bf16.vlgmr.msra.gmra.mxu2 %v11234_v12  ;;  %v10184_v40 = vld [vmem:[%s15619_s1 + $0xef4] sm:$0xf0]  ;;  %v8015_v10 = vld [vmem:[%s15619_s1 + $0xc48] sm:$0xf] }
 0x1f1   :  { %5606 = vmatpush.bf16.msrb.mxu2 %v8096_v41  ;;  %5575 = vmatmul.bf16.vlgmr.msra.gmra.mxu3 %v11244_v16  ;;  %v5343_v41 = vadd.f32 %v5342_v44, %v13604_v36  ;;  %v8352_v53 = vor.u32 %v10184_v40, %v8351_v39  ;;  %v8031_v36 = vld [vmem:[%s15619_s1 + $0xc68] sm:$0xf]  ;;  %v10208_v31 = vld [vmem:[%s15619_s1 + $0xfb4] sm:$0xf0]  ;;  %v8016_v37 = vor.u32 %v10100_v11, %v8015_v10 }
 0x1f2   :  { %5619 = vmatpush.bf16.msrb.mxu3 %v8224_v50  ;;  %v7856_v50 = vor.u32 %v10060_v23, %v7855_v30  ;;  %v8032_v62 = vor.u32 %v10104_v43, %v8031_v36  ;;  %v8319_v29 = vld [vmem:[%s15619_s1 + $0xea8] sm:$0xf]  ;;  %v10176_v30 = vld [vmem:[%s15619_s1 + $0xeb4] sm:$0xf0] }
 0x1f3   :  { %5585 = vmatpush.bf16.msrb.mxu0 %v7760_v56  ;;  %v10136_v56 = vld [vmem:[%s15619_s1 + $0xd74] sm:$0xf0]  ;;  %v5355_v3 = vpop.f32.mrf.mxu2  ;;  %v8320_v38 = vor.u32 %v10176_v30, %v8319_v29  ;;  %v7999_v39 = vld [vmem:[%s15619_s1 + $0xc28] sm:$0xf] }
 0x1f4   :  { %5598 = vmatpush.bf16.msrb.mxu1 %v7888_v57  ;;  %v8335_v57 = vld [vmem:[%s15619_s1 + $0xec8] sm:$0xf]  ;;  %v5368_v8 = vpop.f32.mrf.mxu3  ;;  %v5356_v25 = vadd.f32 %v5355_v3, %v5343_v41  ;;  %v5344_v23 = vpop.f32.mrf.mxu1  ;;  %v10096_v40 = vld [vmem:[%s15619_s1 + $0xc34] sm:$0xf0] }
 0x1f5   :  { %5607 = vmatpush.bf16.msrb.mxu2 %v8080_v58  ;;  %v10180_v58 = vld [vmem:[%s15619_s1 + $0xed4] sm:$0xf0]  ;;  %v8127_v41 = vld [vmem:[%s15619_s1 + $0xd28] sm:$0xf]  ;;  %v8000_v43 = vor.u32 %v10096_v40, %v7999_v39 }
 0x1f6   :  { %5620 = vmatpush.bf16.msrb.mxu3 %v8208_v63  ;;  %v8160_v63 = vor.u32 %v10136_v56, %v8159_v54  ;;  %v8336_v32 = vor.u32 %v10180_v58, %v8335_v57  ;;  %v5369_v35 = vadd.f32 %v5368_v8, %v5356_v25  ;;  %v10128_v34 = vld [vmem:[%s15619_s1 + $0xd34] sm:$0xf0]  ;;  %v8303_v45 = vld [vmem:[%s15619_s1 + $0xe88] sm:$0xf] }
 0x1f7   :  { %5586 = vmatpush.bf16.msrb.mxu0 %v7744_v24  ;;  %v8143_v24 = vld [vmem:[%s15619_s1 + $0xd48] sm:$0xf]  ;;  %v10092_v57 = vld [vmem:[%s15619_s1 + $0xc14] sm:$0xf0] }
 0x1f8   :  { %5599 = vmatpush.bf16.msrb.mxu1 %v7872_v27  ;;  %v8464_v27 = vor.u32 %v10212_v61, %v8463_v59  ;;  %v7983_v54 = vld [vmem:[%s15619_s1 + $0xc08] sm:$0xf]  ;;  %v10124_v59 = vld [vmem:[%s15619_s1 + $0xd14] sm:$0xf0] }
 0x1f9   :  { %5608 = vmatpush.bf16.msrb.mxu2 %v8064_v28  ;;  %v10132_v28 = vld [vmem:[%s15619_s1 + $0xd54] sm:$0xf0]  ;;  %v8111_v58 = vld [vmem:[%s15619_s1 + $0xd08] sm:$0xf]  ;;  %v7984_v25 = vor.u32 %v10092_v57, %v7983_v54 }
 0x1fa   :  { %5621 = vmatpush.bf16.msrb.mxu3 %v8192_v33  ;;  %v8447_v33 = vld [vmem:[%s15619_s1 + $0xfa8] sm:$0xf]  ;;  %v8144_v44 = vor.u32 %v10132_v28, %v8143_v24  ;;  %v10200_v10 = vld [vmem:[%s15619_s1 + $0xf74] sm:$0xf0]  ;;  %v8112_v29 = vor.u32 %v10124_v59, %v8111_v58 }
 0x1fb   :  { %5587 = vmatpush.bf16.msrb.mxu0 %v7728_v42  ;;  %v8448_v42 = vor.u32 %v10208_v31, %v8447_v33  ;;  %v5357_v61 = vpop.f32.mrf.mxu2  ;;  %v8287_v3 = vld [vmem:[%s15619_s1 + $0xe68] sm:$0xf]  ;;  %v10248_v24 = vld [vmem:[%s15619_s1 + $0x10f4] sm:$0xf0] }
 0x1fc   :  { %5600 = vmatpush.bf16.msrb.mxu1 %v7856_v50  ;;  %v10172_v50 = vld [vmem:[%s15619_s1 + $0xe94] sm:$0xf0]  ;;  %v8415_v8 = vld [vmem:[%s15619_s1 + $0xf68] sm:$0xf] }
 0x1fd   :  { %5609 = vmatpush.bf16.msrb.mxu2 %v8048_v51  ;;  %v5381_v51 = vpop.f32.mrf.mxu0  ;;  %v8304_v56 = vor.u32 %v10172_v50, %v8303_v45  ;;  %v8607_v11 = vld [vmem:[%s15619_s1 + $0x10e8] sm:$0xf]  ;;  %v10280_v28 = vld [vmem:[%s15619_s1 + $0x11f4] sm:$0xf0]  ;;  %v8416_v23 = vor.u32 %v10200_v10, %v8415_v8 }
 0x1fe   :  { %5622 = vmatpush.bf16.msrb.mxu3 %v8176_v52  ;;  %5588 = vmatmul.bf16.vlgmr.msrb.gmra.mxu0 %v11242_v15  ;;  %v8431_v52 = vld [vmem:[%s15619_s1 + $0xf88] sm:$0xf]  ;;  %v13803_v36 = vadd.f32 %v5381_v51, %v5369_v35  ;;  %v8608_v33 = vor.u32 %v10248_v24, %v8607_v11  ;;  %v10164_v35 = vld [vmem:[%s15619_s1 + $0xe54] sm:$0xf0] }
 0x1ff   :  { %5632 = vmatpush.bf16.msra.mxu0 %v8352_v53  ;;  %5601 = vmatmul.bf16.vlgmr.msrb.gmra.mxu1 %v11246_v17  ;;  %v10204_v53 = vld [vmem:[%s15619_s1 + $0xf94] sm:$0xf0]  ;;  %v8271_v31 = vld [vmem:[%s15619_s1 + $0xe48] sm:$0xf] }
 0x200   :  { %5645 = vmatpush.bf16.msra.mxu1 %v8480_v55  ;;  %v8128_v55 = vor.u32 %v10128_v34, %v8127_v41  ;;  %v8591_v39 = vld [vmem:[%s15619_s1 + $0x10c8] sm:$0xf]  ;;  %v10244_v40 = vld [vmem:[%s15619_s1 + $0x10d4] sm:$0xf0]  ;;  %v8272_v45 = vor.u32 %v10164_v35, %v8271_v31 }
 0x201   :  { %5610 = vmatpush.bf16.msrb.mxu2 %v8032_v62  ;;  %v5370_v62 = vpop.f32.mrf.mxu3  ;;  %v10276_v34 = vld [vmem:[%s15619_s1 + $0x11d4] sm:$0xf0]  ;;  %v8592_v51 = vor.u32 %v10244_v40, %v8591_v39  ;;  %v8703_v58 = vld [vmem:[%s15619_s1 + $0x11a8] sm:$0xf] }
 0x202   :  { %5623 = vmatpush.bf16.msrb.mxu3 %v8160_v63  ;;  %v8432_v63 = vor.u32 %v10204_v53, %v8431_v52  ;;  %v8255_v52 = vld [vmem:[%s15619_s1 + $0xe28] sm:$0xf]  ;;  %v10160_v53 = vld [vmem:[%s15619_s1 + $0xe34] sm:$0xf0] }
 0x203   :  { %5633 = vmatpush.bf16.msra.mxu0 %v8336_v32  ;;  %v10168_v32 = vld [vmem:[%s15619_s1 + $0xe74] sm:$0xf0]  ;;  %v8256_v61 = vor.u32 %v10160_v53, %v8255_v52  ;;  %v8239_v62 = vld [vmem:[%s15619_s1 + $0xe08] sm:$0xf] }
 0x204   :  { %5646 = vmatpush.bf16.msra.mxu1 %v8464_v27  ;;  %v8735_v27 = vld [vmem:[%s15619_s1 + $0x11e8] sm:$0xf]  ;;  %v8288_v30 = vor.u32 %v10168_v32, %v8287_v3  ;;  %v10240_v57 = vld [vmem:[%s15619_s1 + $0x10b4] sm:$0xf0] }
 0x205   :  { %5611 = vmatpush.bf16.msrb.mxu2 %v8016_v37  ;;  %v8399_v37 = vld [vmem:[%s15619_s1 + $0xf48] sm:$0xf]  ;;  %v5383_v41 = vpop.f32.mrf.mxu0  ;;  %v10272_v59 = vld [vmem:[%s15619_s1 + $0x11b4] sm:$0xf0] }
 0x206   :  { %5624 = vmatpush.bf16.msrb.mxu3 %v8144_v44  ;;  %v8736_v44 = vor.u32 %v10280_v28, %v8735_v27  ;;  %v10156_v32 = vld [vmem:[%s15619_s1 + $0xe14] sm:$0xf0]  ;;  %v8367_v8 = vld [vmem:[%s15619_s1 + $0xf08] sm:$0xf]  ;;  %v8704_v11 = vor.u32 %v10272_v59, %v8703_v58 }
 0x207   :  { %5634 = vmatpush.bf16.msra.mxu0 %v8320_v38  ;;  %v10196_v38 = vld [vmem:[%s15619_s1 + $0xf54] sm:$0xf0]  ;;  %v8559_v24 = vld [vmem:[%s15619_s1 + $0x1088] sm:$0xf]  ;;  %v8240_v31 = vor.u32 %v10156_v32, %v8239_v62 }
 0x208   :  { %5647 = vmatpush.bf16.msra.mxu1 %v8448_v42  ;;  %v8719_v42 = vld [vmem:[%s15619_s1 + $0x11c8] sm:$0xf]  ;;  %v8400_v50 = vor.u32 %v10196_v38, %v8399_v37  ;;  %v10188_v10 = vld [vmem:[%s15619_s1 + $0xf14] sm:$0xf0] }
 0x209   :  { %5612 = vmatpush.bf16.msrb.mxu2 %v8000_v43  ;;  %v8383_v43 = vld [vmem:[%s15619_s1 + $0xf28] sm:$0xf]  ;;  %v8720_v54 = vor.u32 %v10276_v34, %v8719_v42  ;;  %v10344_v37 = vld [vmem:[%s15619_s1 + $0x13f4] sm:$0xf0] }
 0x20a   :  { %5625 = vmatpush.bf16.msrb.mxu3 %v8128_v55  ;;  %v10192_v55 = vld [vmem:[%s15619_s1 + $0xf34] sm:$0xf0]  ;;  %v8687_v27 = vld [vmem:[%s15619_s1 + $0x1188] sm:$0xf] }
 0x20b   :  { %5635 = vmatpush.bf16.msra.mxu0 %v8304_v56  ;;  %v8575_v56 = vld [vmem:[%s15619_s1 + $0x10a8] sm:$0xf]  ;;  %v10232_v41 = vld [vmem:[%s15619_s1 + $0x1074] sm:$0xf0] }
 0x20c   :  { %5648 = vmatpush.bf16.msra.mxu1 %v8432_v63  ;;  %v8384_v63 = vor.u32 %v10192_v55, %v8383_v43  ;;  %v8576_v3 = vor.u32 %v10240_v57, %v8575_v56  ;;  %v5394_v28 = vpop.f32.mrf.mxu1  ;;  %v8991_v35 = vld [vmem:[%s15619_s1 + $0x13e8] sm:$0xf]  ;;  %v10340_v53 = vld [vmem:[%s15619_s1 + $0x13d4] sm:$0xf0] }
 0x20d   :  { %5613 = vmatpush.bf16.msrb.mxu2 %v7984_v25  ;;  %v10236_v25 = vld [vmem:[%s15619_s1 + $0x1094] sm:$0xf0]  ;;  %v8671_v42 = vld [vmem:[%s15619_s1 + $0x1168] sm:$0xf]  ;;  %v8992_v34 = vor.u32 %v10344_v37, %v8991_v35 }
 0x20e   :  { %5626 = vmatpush.bf16.msrb.mxu3 %v8112_v29  ;;  %v10268_v29 = vld [vmem:[%s15619_s1 + $0x1194] sm:$0xf0]  ;;  %v8560_v38 = vor.u32 %v10236_v25, %v8559_v24  ;;  %v8975_v52 = vld [vmem:[%s15619_s1 + $0x13c8] sm:$0xf] }
 0x20f   :  { %5636 = vmatpush.bf16.msra.mxu0 %v8288_v30  ;;  %v8863_v30 = vld [vmem:[%s15619_s1 + $0x12e8] sm:$0xf]  ;;  %v8688_v39 = vor.u32 %v10268_v29, %v8687_v27  ;;  %v10228_v59 = vld [vmem:[%s15619_s1 + $0x1054] sm:$0xf0] }
 0x210   :  { %5649 = vmatpush.bf16.msra.mxu1 %v8416_v23  ;;  %5614 = vmatmul.bf16.vlgmr.msrb.gmra.mxu2 %v11408_v46  ;;  %v10312_v23 = vld [vmem:[%s15619_s1 + $0x12f4] sm:$0xf0]  ;;  %v8527_v58 = vld [vmem:[%s15619_s1 + $0x1048] sm:$0xf] }
 0x211   :  { %5658 = vmatpush.bf16.msra.mxu2 %v8608_v33  ;;  %5627 = vmatmul.bf16.vlgmr.msrb.gmra.mxu3 %v11412_v48  ;;  %v5395_v33 = vadd.f32 %v5394_v28, %v13803_v36  ;;  %v8864_v40 = vor.u32 %v10312_v23, %v8863_v30  ;;  %v8543_v36 = vld [vmem:[%s15619_s1 + $0x1068] sm:$0xf]  ;;  %v10260_v32 = vld [vmem:[%s15619_s1 + $0x1154] sm:$0xf0]  ;;  %v8528_v27 = vor.u32 %v10228_v59, %v8527_v58 }
 0x212   :  { %5671 = vmatpush.bf16.msra.mxu3 %v8736_v44  ;;  %v8368_v44 = vor.u32 %v10188_v10, %v8367_v8  ;;  %v8544_v43 = vor.u32 %v10232_v41, %v8543_v36  ;;  %v8831_v8 = vld [vmem:[%s15619_s1 + $0x12a8] sm:$0xf]  ;;  %v10304_v10 = vld [vmem:[%s15619_s1 + $0x12b4] sm:$0xf0] }
 0x213   :  { %5637 = vmatpush.bf16.msra.mxu0 %v8272_v45  ;;  %v10264_v45 = vld [vmem:[%s15619_s1 + $0x1174] sm:$0xf0]  ;;  %v5407_v55 = vpop.f32.mrf.mxu2  ;;  %v8832_v29 = vor.u32 %v10304_v10, %v8831_v8  ;;  %v8511_v30 = vld [vmem:[%s15619_s1 + $0x1028] sm:$0xf] }
 0x214   :  { %5650 = vmatpush.bf16.msra.mxu1 %v8400_v50  ;;  %v8847_v50 = vld [vmem:[%s15619_s1 + $0x12c8] sm:$0xf]  ;;  %v5420_v57 = vpop.f32.mrf.mxu3  ;;  %v5408_v62 = vadd.f32 %v5407_v55, %v5395_v33  ;;  %v10336_v24 = vld [vmem:[%s15619_s1 + $0x13b4] sm:$0xf0] }
 0x215   :  { %5659 = vmatpush.bf16.msra.mxu2 %v8592_v51  ;;  %v10308_v51 = vld [vmem:[%s15619_s1 + $0x12d4] sm:$0xf0]  ;;  %v8639_v33 = vld [vmem:[%s15619_s1 + $0x1128] sm:$0xf] }
 0x216   :  { %5672 = vmatpush.bf16.msra.mxu3 %v8720_v54  ;;  %v8672_v54 = vor.u32 %v10264_v45, %v8671_v42  ;;  %v8848_v56 = vor.u32 %v10308_v51, %v8847_v50  ;;  %v5421_v25 = vadd.f32 %v5420_v57, %v5408_v62  ;;  %v10224_v23 = vld [vmem:[%s15619_s1 + $0x1034] sm:$0xf0]  ;;  %v8815_v37 = vld [vmem:[%s15619_s1 + $0x1288] sm:$0xf] }
 0x217   :  { %5638 = vmatpush.bf16.msra.mxu0 %v8256_v61  ;;  %v8655_v61 = vld [vmem:[%s15619_s1 + $0x1148] sm:$0xf]  ;;  %v10256_v35 = vld [vmem:[%s15619_s1 + $0x1134] sm:$0xf0]  ;;  %v8512_v41 = vor.u32 %v10224_v23, %v8511_v30 }
 0x218   :  { %5651 = vmatpush.bf16.msra.mxu1 %v8384_v63  ;;  %v8976_v63 = vor.u32 %v10340_v53, %v8975_v52  ;;  %v8656_v28 = vor.u32 %v10260_v32, %v8655_v61  ;;  %v8495_v42 = vld [vmem:[%s15619_s1 + $0x1008] sm:$0xf]  ;;  %v10220_v50 = vld [vmem:[%s15619_s1 + $0x1014] sm:$0xf0] }
 0x219   :  { %5660 = vmatpush.bf16.msra.mxu2 %v8576_v3  ;;  %v5396_v3 = vpop.f32.mrf.mxu1  ;;  %v8623_v51 = vld [vmem:[%s15619_s1 + $0x1108] sm:$0xf]  ;;  %v10252_v52 = vld [vmem:[%s15619_s1 + $0x1114] sm:$0xf0] }
 0x21a   :  { %5673 = vmatpush.bf16.msra.mxu3 %v8704_v11  ;;  %v8959_v11 = vld [vmem:[%s15619_s1 + $0x13a8] sm:$0xf]  ;;  %v10328_v58 = vld [vmem:[%s15619_s1 + $0x1374] sm:$0xf0]  ;;  %v8624_v10 = vor.u32 %v10252_v52, %v8623_v51 }
 0x21b   :  { %5639 = vmatpush.bf16.msra.mxu0 %v8240_v31  ;;  %v8960_v31 = vor.u32 %v10336_v24, %v8959_v11  ;;  %v8799_v55 = vld [vmem:[%s15619_s1 + $0x1268] sm:$0xf]  ;;  %v10376_v61 = vld [vmem:[%s15619_s1 + $0x14f4] sm:$0xf0] }
 0x21c   :  { %5652 = vmatpush.bf16.msra.mxu1 %v8368_v44  ;;  %v10300_v44 = vld [vmem:[%s15619_s1 + $0x1294] sm:$0xf0]  ;;  %v5422_v53 = vpop.f32.mrf.mxu3  ;;  %v8927_v57 = vld [vmem:[%s15619_s1 + $0x1368] sm:$0xf] }
 0x21d   :  { %5661 = vmatpush.bf16.msra.mxu2 %v8560_v38  ;;  %v5433_v38 = vpop.f32.mrf.mxu0  ;;  %v8816_v45 = vor.u32 %v10300_v44, %v8815_v37  ;;  %v9119_v59 = vld [vmem:[%s15619_s1 + $0x14e8] sm:$0xf]  ;;  %v10408_v32 = vld [vmem:[%s15619_s1 + $0x15f4] sm:$0xf0]  ;;  %v8928_v24 = vor.u32 %v10328_v58, %v8927_v57 }
 0x21e   :  { %5674 = vmatpush.bf16.msra.mxu3 %v8688_v39  ;;  %5640 = vmatmul.bf16.vlgmr.msra.gmra.mxu0 %v11410_v47  ;;  %v8943_v39 = vld [vmem:[%s15619_s1 + $0x1388] sm:$0xf]  ;;  %v5434_v36 = vadd.f32 %v5433_v38, %v5421_v25  ;;  %v9120_v25 = vor.u32 %v10376_v61, %v9119_v59  ;;  %v10324_v23 = vld [vmem:[%s15619_s1 + $0x1354] sm:$0xf0] }
 0x21f   :  { %5684 = vmatpush.bf16.msrb.mxu0 %v8864_v40  ;;  %5653 = vmatmul.bf16.vlgmr.msra.gmra.mxu1 %v11414_v49  ;;  %v10332_v40 = vld [vmem:[%s15619_s1 + $0x1394] sm:$0xf0]  ;;  %v9247_v3 = vld [vmem:[%s15619_s1 + $0x15e8] sm:$0xf] }
 0x220   :  { %5697 = vmatpush.bf16.msrb.mxu1 %v8992_v34  ;;  %v8640_v34 = vor.u32 %v10256_v35, %v8639_v33  ;;  %v9248_v30 = vor.u32 %v10408_v32, %v9247_v3  ;;  %v9103_v33 = vld [vmem:[%s15619_s1 + $0x14c8] sm:$0xf]  ;;  %v10404_v44 = vld [vmem:[%s15619_s1 + $0x15d4] sm:$0xf0] }
 0x221   :  { %5662 = vmatpush.bf16.msra.mxu2 %v8544_v43  ;;  %v5409_v43 = vpop.f32.mrf.mxu2  ;;  %v5446_v62 = vpop.f32.mrf.mxu1  ;;  %v9231_v37 = vld [vmem:[%s15619_s1 + $0x15c8] sm:$0xf]  ;;  %v10368_v51 = vld [vmem:[%s15619_s1 + $0x14b4] sm:$0xf0] }
 0x222   :  { %5675 = vmatpush.bf16.msra.mxu3 %v8672_v54  ;;  %v8944_v54 = vor.u32 %v10332_v40, %v8943_v39  ;;  %v14038_v8 = vadd.f32 %v5446_v62, %v5434_v36  ;;  %v8767_v36 = vld [vmem:[%s15619_s1 + $0x1228] sm:$0xf]  ;;  %v10400_v53 = vld [vmem:[%s15619_s1 + $0x15b4] sm:$0xf0] }
 0x223   :  { %5685 = vmatpush.bf16.msrb.mxu0 %v8848_v56  ;;  %v10296_v56 = vld [vmem:[%s15619_s1 + $0x1274] sm:$0xf0]  ;;  %v9215_v52 = vld [vmem:[%s15619_s1 + $0x15a8] sm:$0xf] }
 0x224   :  { %5698 = vmatpush.bf16.msrb.mxu1 %v8976_v63  ;;  %v8496_v63 = vor.u32 %v10220_v50, %v8495_v42  ;;  %v8800_v11 = vor.u32 %v10296_v56, %v8799_v55  ;;  %v8895_v42 = vld [vmem:[%s15619_s1 + $0x1328] sm:$0xf]  ;;  %v10284_v58 = vld [vmem:[%s15619_s1 + $0x1214] sm:$0xf0]  ;;  %v9216_v62 = vor.u32 %v10400_v53, %v9215_v52 }
 0x225   :  { %5663 = vmatpush.bf16.msra.mxu2 %v8528_v27  ;;  %v8783_v27 = vld [vmem:[%s15619_s1 + $0x1248] sm:$0xf]  ;;  %v5435_v35 = vpop.f32.mrf.mxu0  ;;  %v10316_v61 = vld [vmem:[%s15619_s1 + $0x1314] sm:$0xf0] }
 0x226   :  { %5676 = vmatpush.bf16.msra.mxu3 %v8656_v28  ;;  %v10292_v28 = vld [vmem:[%s15619_s1 + $0x1254] sm:$0xf0]  ;;  %v9087_v50 = vld [vmem:[%s15619_s1 + $0x14a8] sm:$0xf] }
 0x227   :  { %5686 = vmatpush.bf16.msrb.mxu0 %v8832_v29  ;;  %v8911_v29 = vld [vmem:[%s15619_s1 + $0x1348] sm:$0xf]  ;;  %v8784_v38 = vor.u32 %v10292_v28, %v8783_v27  ;;  %v9088_v57 = vor.u32 %v10368_v51, %v9087_v50  ;;  %v10364_v3 = vld [vmem:[%s15619_s1 + $0x1494] sm:$0xf0] }
 0x228   :  { %5699 = vmatpush.bf16.msrb.mxu1 %v8960_v31  ;;  %v10372_v31 = vld [vmem:[%s15619_s1 + $0x14d4] sm:$0xf0]  ;;  %v8912_v39 = vor.u32 %v10324_v23, %v8911_v29  ;;  %v8751_v55 = vld [vmem:[%s15619_s1 + $0x1208] sm:$0xf] }
 0x229   :  { %5664 = vmatpush.bf16.msra.mxu2 %v8512_v41  ;;  %v9104_v40 = vor.u32 %v10372_v31, %v9103_v33  ;;  %v10288_v41 = vld [vmem:[%s15619_s1 + $0x1234] sm:$0xf0]  ;;  %v5448_v43 = vpop.f32.mrf.mxu1  ;;  %v8879_v59 = vld [vmem:[%s15619_s1 + $0x1308] sm:$0xf] }
 0x22a   :  { %5677 = vmatpush.bf16.msra.mxu3 %v8640_v34  ;;  %v9232_v34 = vor.u32 %v10404_v44, %v9231_v37  ;;  %v9199_v32 = vld [vmem:[%s15619_s1 + $0x1588] sm:$0xf]  ;;  %v10472_v28 = vld [vmem:[%s15619_s1 + $0x17f4] sm:$0xf0]  ;;  %v8880_v29 = vor.u32 %v10316_v61, %v8879_v59  ;;  %v10525_v44 = vld [vmem:[%s15620_s2] sm:$0xf] }
 0x22b   :  { %5687 = vmatpush.bf16.msrb.mxu0 %v8816_v45  ;;  %v10320_v45 = vld [vmem:[%s15619_s1 + $0x1334] sm:$0xf0]  ;;  %v9503_v27 = vld [vmem:[%s15619_s1 + $0x17e8] sm:$0xf] }
 0x22c   :  { %5700 = vmatpush.bf16.msrb.mxu1 %v8944_v54  ;;  %v8768_v54 = vor.u32 %v10288_v41, %v8767_v36  ;;  %v8896_v56 = vor.u32 %v10320_v45, %v8895_v42  ;;  %v9055_v23 = vld [vmem:[%s15619_s1 + $0x1468] sm:$0xf]  ;;  %v10360_v35 = vld [vmem:[%s15619_s1 + $0x1474] sm:$0xf0] }
 0x22d   :  { %5665 = vmatpush.bf16.msra.mxu2 %v8496_v63  ;;  %v9071_v63 = vld [vmem:[%s15619_s1 + $0x1488] sm:$0xf]  ;;  %v10436_v41 = vld [vmem:[%s15619_s1 + $0x16d4] sm:$0xf0]  ;;  %v9056_v45 = vor.u32 %v10360_v35, %v9055_v23 }
 0x22e   :  { %5678 = vmatpush.bf16.msra.mxu3 %v8624_v10  ;;  %v10396_v10 = vld [vmem:[%s15619_s1 + $0x1594] sm:$0xf0]  ;;  %v9183_v37 = vld [vmem:[%s15619_s1 + $0x1568] sm:$0xf] }
 0x22f   :  { %5688 = vmatpush.bf16.msrb.mxu0 %v8800_v11  ;;  %v9375_v11 = vld [vmem:[%s15619_s1 + $0x16e8] sm:$0xf]  ;;  %v9200_v33 = vor.u32 %v10396_v10, %v9199_v32  ;;  %v10356_v43 = vld [vmem:[%s15619_s1 + $0x1454] sm:$0xf0] }
 0x230   :  { %5701 = vmatpush.bf16.msrb.mxu1 %v8928_v24  ;;  %5666 = vmatmul.bf16.vlgmr.msra.gmra.mxu2 %v11645_v9  ;;  %v10440_v24 = vld [vmem:[%s15619_s1 + $0x16f4] sm:$0xf0]  ;;  %v9359_v36 = vld [vmem:[%s15619_s1 + $0x16c8] sm:$0xf] }
 0x231   :  { %5710 = vmatpush.bf16.msrb.mxu2 %v9120_v25  ;;  %5679 = vmatmul.bf16.vlgmr.msra.gmra.mxu3 %v11655_v14  ;;  %v8752_v25 = vor.u32 %v10284_v58, %v8751_v55  ;;  %v9376_v31 = vor.u32 %v10440_v24, %v9375_v11  ;;  %v9487_v42 = vld [vmem:[%s15619_s1 + $0x17c8] sm:$0xf]  ;;  %v9360_v52 = vor.u32 %v10436_v41, %v9359_v36  ;;  %v10388_v58 = vld [vmem:[%s15619_s1 + $0x1554] sm:$0xf0] }
 0x232   :  { %5723 = vmatpush.bf16.msrb.mxu3 %v9248_v30  ;;  %v9072_v30 = vor.u32 %v10364_v3, %v9071_v63  ;;  %v9039_v53 = vld [vmem:[%s15619_s1 + $0x1448] sm:$0xf]  ;;  %v10432_v61 = vld [vmem:[%s15619_s1 + $0x16b4] sm:$0xf0] }
 0x233   :  { %5689 = vmatpush.bf16.msrb.mxu0 %v8784_v38  ;;  %v814_v38 = vperm.slane %v10525_v44, 2  ;;  %v5459_v50 = vpop.f32.mrf.mxu2  ;;  %v9343_v59 = vld [vmem:[%s15619_s1 + $0x16a8] sm:$0xf]  ;;  %v10464_v63 = vld [vmem:[%s15619_s1 + $0x17b4] sm:$0xf0]  ;;  %v9040_v32 = vor.u32 %v10356_v43, %v9039_v53 }
 0x234   :  { %5702 = vmatpush.bf16.msrb.mxu1 %v8912_v39  ;;  %v9504_v39 = vor.u32 %v10472_v28, %v9503_v27  ;;  %v9344_v11 = vor.u32 %v10432_v61, %v9343_v59  ;;  %v9023_v24 = vld [vmem:[%s15619_s1 + $0x1428] sm:$0xf]  ;;  %v10428_v23 = vld [vmem:[%s15619_s1 + $0x1694] sm:$0xf0]  ;;  %v9734_v59 = vld [vmem:[%s15619_s1 + $0xec] sm:$0xf] }
 0x235   :  { %5711 = vmatpush.bf16.msrb.mxu2 %v9104_v40  ;;  %v10392_v40 = vld [vmem:[%s15619_s1 + $0x1574] sm:$0xf0]  ;;  %v5460_v55 = vadd.f32 %v5459_v50, %v814_v38  ;;  %v9151_v27 = vld [vmem:[%s15619_s1 + $0x1528] sm:$0xf]  ;;  %v6561_v61 = vld [vmem:[%s15619_s1 + $0xf8] sm:$0xf0] }
 0x236   :  { %5724 = vmatpush.bf16.msrb.mxu3 %v9232_v34  ;;  %v10468_v34 = vld [vmem:[%s15619_s1 + $0x17d4] sm:$0xf0]  ;;  %v9184_v51 = vor.u32 %v10392_v40, %v9183_v37  ;;  %v9007_v44 = vld [vmem:[%s15619_s1 + $0x1408] sm:$0xf] }
 0x237   :  { %5690 = vmatpush.bf16.msrb.mxu0 %v8768_v54  ;;  %v9167_v54 = vld [vmem:[%s15619_s1 + $0x1548] sm:$0xf]  ;;  %v10424_v53 = vld [vmem:[%s15619_s1 + $0x1674] sm:$0xf0] }
 0x238   :  { %5703 = vmatpush.bf16.msrb.mxu1 %v8896_v56  ;;  %v5472_v56 = vpop.f32.mrf.mxu3  ;;  %v9168_v10 = vor.u32 %v10388_v58, %v9167_v54  ;;  %v9439_v43 = vld [vmem:[%s15619_s1 + $0x1768] sm:$0xf] }
 0x239   :  { %5712 = vmatpush.bf16.msrb.mxu2 %v9088_v57  ;;  %v9488_v57 = vor.u32 %v10468_v34, %v9487_v42  ;;  %v5473_v3 = vadd.f32 %v5472_v56, %v5460_v55  ;;  %v10348_v42 = vld [vmem:[%s15619_s1 + $0x1414] sm:$0xf0]  ;;  %v9135_v34 = vld [vmem:[%s15619_s1 + $0x1508] sm:$0xf] }
 0x23a   :  { %5725 = vmatpush.bf16.msrb.mxu3 %v9216_v62  ;;  %v9471_v62 = vld [vmem:[%s15619_s1 + $0x17a8] sm:$0xf]  ;;  %v10456_v55 = vld [vmem:[%s15619_s1 + $0x1774] sm:$0xf0]  ;;  %v9008_v58 = vor.u32 %v10348_v42, %v9007_v44 }
 0x23b   :  { %5691 = vmatpush.bf16.msrb.mxu0 %v8752_v25  ;;  %v10352_v25 = vld [vmem:[%s15619_s1 + $0x1434] sm:$0xf0]  ;;  %v9472_v28 = vor.u32 %v10464_v63, %v9471_v62  ;;  %v5485_v35 = vpop.f32.mrf.mxu0  ;;  %v5461_v40 = vpop.f32.mrf.mxu2  ;;  %v9567_v56 = vld [vmem:[%s15619_s1 + $0x1868] sm:$0xf] }
 0x23c   :  { %5704 = vmatpush.bf16.msrb.mxu1 %v8880_v29  ;;  %v10384_v29 = vld [vmem:[%s15619_s1 + $0x1534] sm:$0xf0]  ;;  %v9024_v37 = vor.u32 %v10352_v25, %v9023_v24  ;;  %v5486_v38 = vadd.f32 %v5485_v35, %v5473_v3  ;;  %v9440_v3 = vor.u32 %v10456_v55, %v9439_v43  ;;  %v9423_v24 = vld [vmem:[%s15619_s1 + $0x1748] sm:$0xf]  ;;  %v6564_v25 = vor.u32 %v9734_v59, %v6561_v61 }
 0x23d   :  { %5713 = vmatpush.bf16.msrb.mxu2 %v9072_v30  ;;  %v9327_v30 = vld [vmem:[%s15619_s1 + $0x1688] sm:$0xf]  ;;  %v9152_v36 = vor.u32 %v10384_v29, %v9151_v27  ;;  %v10452_v27 = vld [vmem:[%s15619_s1 + $0x1754] sm:$0xf0] }
 0x23e   :  { %5726 = vmatpush.bf16.msrb.mxu3 %v9200_v33  ;;  %5692 = vmatmul.bf16.vlgmr.msrb.gmra.mxu0 %v11653_v13  ;;  %v9455_v33 = vld [vmem:[%s15619_s1 + $0x1788] sm:$0xf]  ;;  %v9328_v41 = vor.u32 %v10428_v23, %v9327_v30  ;;  %v10484_v29 = vld [vmem:[%s15619_s1 + $0x1854] sm:$0xf0]  ;;  %v9730_v23 = vld [vmem:[%s15619_s1 + $0xcc] sm:$0xf] }
 0x23f   :  { %5736 = vmatpush.bf16.msra.mxu0 %v9376_v31  ;;  %5705 = vmatmul.bf16.vlgmr.msrb.gmra.mxu1 %v11657_v18  ;;  %v10460_v31 = vld [vmem:[%s15619_s1 + $0x1794] sm:$0xf0]  ;;  %v9407_v40 = vld [vmem:[%s15619_s1 + $0x1728] sm:$0xf] }
 0x240   :  { %5749 = vmatpush.bf16.msra.mxu1 %v9504_v39  ;;  %v5498_v39 = vpop.f32.mrf.mxu1  ;;  %v5474_v50 = vpop.f32.mrf.mxu3  ;;  %v9535_v42 = vld [vmem:[%s15619_s1 + $0x1828] sm:$0xf]  ;;  %v10476_v61 = vld [vmem:[%s15619_s1 + $0x1814] sm:$0xf0] }
 0x241   :  { %5714 = vmatpush.bf16.msrb.mxu2 %v9056_v45  ;;  %v10380_v45 = vld [vmem:[%s15619_s1 + $0x1514] sm:$0xf0]  ;;  %v14224_v54 = vadd.f32 %v5498_v39, %v5486_v38  ;;  %v9279_v38 = vld [vmem:[%s15619_s1 + $0x1628] sm:$0xf]  ;;  %v6529_v50 = vld [vmem:[%s15619_s1 + $0xb8] sm:$0xf0] }
 0x242   :  { %5727 = vmatpush.bf16.msrb.mxu3 %v9184_v51  ;;  %v9456_v51 = vor.u32 %v10460_v31, %v9455_v33  ;;  %v9136_v62 = vor.u32 %v10380_v45, %v9135_v34  ;;  %v6545_v33 = vld [vmem:[%s15619_s1 + $0xd8] sm:$0xf0]  ;;  %v10416_v39 = vld [vmem:[%s15619_s1 + $0x1634] sm:$0xf0]  ;;  %v9726_v45 = vld [vmem:[%s15619_s1 + $0xac] sm:$0xf] }
 0x243   :  { %5737 = vmatpush.bf16.msra.mxu0 %v9360_v52  ;;  %v9311_v52 = vld [vmem:[%s15619_s1 + $0x1668] sm:$0xf]  ;;  %v5487_v30 = vpop.f32.mrf.mxu0  ;;  %v10480_v34 = vld [vmem:[%s15619_s1 + $0x1834] sm:$0xf0]  ;;  %v6532_v59 = vor.u32 %v9726_v45, %v6529_v50  ;;  %v9714_v50 = vld [vmem:[%s15619_s1 + $0x4c] sm:$0xf] }
 0x244   :  { %5750 = vmatpush.bf16.msra.mxu1 %v9488_v57  ;;  %v10488_v57 = vld [vmem:[%s15619_s1 + $0x1874] sm:$0xf0]  ;;  %v9312_v63 = vor.u32 %v10424_v53, %v9311_v52  ;;  %v9263_v52 = vld [vmem:[%s15619_s1 + $0x1608] sm:$0xf]  ;;  %v9536_v55 = vor.u32 %v10480_v34, %v9535_v42 }
 0x245   :  { %5715 = vmatpush.bf16.msrb.mxu2 %v9040_v32  ;;  %v9568_v32 = vor.u32 %v10488_v57, %v9567_v56  ;;  %v10412_v53 = vld [vmem:[%s15619_s1 + $0x1614] sm:$0xf0]  ;;  %v9391_v56 = vld [vmem:[%s15619_s1 + $0x1708] sm:$0xf] }
 0x246   :  { %5728 = vmatpush.bf16.msrb.mxu3 %v9168_v10  ;;  %v9295_v10 = vld [vmem:[%s15619_s1 + $0x1648] sm:$0xf]  ;;  %v10444_v57 = vld [vmem:[%s15619_s1 + $0x1714] sm:$0xf0] }
 0x247   :  { %5738 = vmatpush.bf16.msra.mxu0 %v9344_v11  ;;  %v10420_v11 = vld [vmem:[%s15619_s1 + $0x1654] sm:$0xf0] }
 0x248   :  { %5751 = vmatpush.bf16.msra.mxu1 %v9472_v28  ;;  %v9551_v28 = vld [vmem:[%s15619_s1 + $0x1848] sm:$0xf]  ;;  %v5500_v31 = vpop.f32.mrf.mxu1  ;;  %v9296_v35 = vor.u32 %v10420_v11, %v9295_v10  ;;  %v9798_v10 = vld [vmem:[%s15619_s1 + $0x2ec] sm:$0xf]  ;;  %v9264_v11 = vor.u32 %v10412_v53, %v9263_v52 }
 0x249   :  { %5716 = vmatpush.bf16.msrb.mxu2 %v9024_v37  ;;  %v9424_v37 = vor.u32 %v10452_v27, %v9423_v24  ;;  %v9552_v44 = vor.u32 %v10484_v29, %v9551_v28  ;;  %v6817_v24 = vld [vmem:[%s15619_s1 + $0x2f8] sm:$0xf0]  ;;  %v9392_v28 = vor.u32 %v10444_v57, %v9391_v56  ;;  %v9758_v56 = vld [vmem:[%s15619_s1 + $0x1ac] sm:$0xf] }
 0x24a   :  { %5729 = vmatpush.bf16.msrb.mxu3 %v9152_v36  ;;  %v6548_v36 = vor.u32 %v9730_v23, %v6545_v33  ;;  %v6945_v27 = vld [vmem:[%s15619_s1 + $0x3f8] sm:$0xf0]  ;;  %v9718_v33 = vld [vmem:[%s15619_s1 + $0x6c] sm:$0xf] }
 0x24b   :  { %5739 = vmatpush.bf16.msra.mxu0 %v9328_v41  ;;  %v10448_v41 = vld [vmem:[%s15619_s1 + $0x1734] sm:$0xf0]  ;;  %v6497_v31 = vld [vmem:[%s15619_s1 + $0x78] sm:$0xf0] }
 0x24c   :  { %5752 = vmatpush.bf16.msra.mxu1 %v9456_v51  ;;  %v9280_v51 = vor.u32 %v10416_v39, %v9279_v38  ;;  %v9408_v43 = vor.u32 %v10448_v41, %v9407_v40  ;;  %v6673_v38 = vld [vmem:[%s15619_s1 + $0x1d8] sm:$0xf0]  ;;  %v9794_v39 = vld [vmem:[%s15619_s1 + $0x2cc] sm:$0xf]  ;;  %v6500_v34 = vor.u32 %v9718_v33, %v6497_v31 }
 0x24d   :  { %5717 = vmatpush.bf16.msrb.mxu2 %v9008_v58  ;;  %v9519_v58 = vld [vmem:[%s15619_s1 + $0x1808] sm:$0xf]  ;;  %v6801_v40 = vld [vmem:[%s15619_s1 + $0x2d8] sm:$0xf0]  ;;  %v9818_v33 = vld [vmem:[%s15619_s1 + $0x38c] sm:$0xf] }
 0x24e   :  { %5730 = vmatpush.bf16.msrb.mxu3 %v9136_v62  ;;  %v9722_v62 = vld [vmem:[%s15619_s1 + $0x8c] sm:$0xf]  ;;  %v9520_v29 = vor.u32 %v10476_v61, %v9519_v58  ;;  %v6929_v41 = vld [vmem:[%s15619_s1 + $0x3d8] sm:$0xf0] }
 0x24f   :  { %5740 = vmatpush.bf16.msra.mxu0 %v9312_v63  ;;  %v6513_v63 = vld [vmem:[%s15619_s1 + $0x98] sm:$0xf0]  ;;  %v9790_v58 = vld [vmem:[%s15619_s1 + $0x2ac] sm:$0xf] }
 0x250   :  { %5753 = vmatpush.bf16.msra.mxu1 %v9440_v3  ;;  %5718 = vmatmul.bf16.vlgmr.msrb.gmra.mxu2 %v11738_v4  ;;  %v9766_v3 = vld [vmem:[%s15619_s1 + $0x1ec] sm:$0xf]  ;;  %v6516_v30 = vor.u32 %v9722_v62, %v6513_v63  ;;  %v6657_v57 = vld [vmem:[%s15619_s1 + $0x1b8] sm:$0xf0] }
 0x251   :  { %5766 = vmatpush.bf16.msra.mxu2 %v9568_v32  ;;  %5731 = vmatmul.bf16.vlgmr.msrb.gmra.mxu3 %v11742_v6  ;;  %v6689_v32 = vld [vmem:[%s15619_s1 + $0x1f8] sm:$0xf0] }
 0x252   :  { %5775 = vmatpush.bf16.msra.mxu3 %v6564_v25  ;;  %v9830_v25 = vld [vmem:[%s15619_s1 + $0x3ec] sm:$0xf]  ;;  %v6692_v23 = vor.u32 %v9766_v3, %v6689_v32  ;;  %v6913_v61 = vld [vmem:[%s15619_s1 + $0x3b8] sm:$0xf0]  ;;  %v6660_v3 = vor.u32 %v9758_v56, %v6657_v57 }
 0x253   :  { %5741 = vmatpush.bf16.msra.mxu0 %v9296_v35  ;;  %v6820_v35 = vor.u32 %v9798_v10, %v6817_v24  ;;  %v5511_v42 = vpop.f32.mrf.mxu2  ;;  %v9710_v32 = vld [vmem:[%s15619_s1 + $0x2c] sm:$0xf]  ;;  %v6465_v10 = vld [vmem:[%s15619_s1 + $0x38] sm:$0xf0] }
 0x254   :  { %5754 = vmatpush.bf16.msra.mxu1 %v9424_v37  ;;  %v6948_v37 = vor.u32 %v9830_v25, %v6945_v27  ;;  %v5512_v52 = vadd.f32 %v5511_v42, %v14224_v54  ;;  %v5524_v53 = vpop.f32.mrf.mxu3  ;;  %v6785_v54 = vld [vmem:[%s15619_s1 + $0x2b8] sm:$0xf0]  ;;  %v9754_v25 = vld [vmem:[%s15619_s1 + $0x18c] sm:$0xf] }
 0x255   :  { %5767 = vmatpush.bf16.msra.mxu2 %v9552_v44  ;;  %v9762_v44 = vld [vmem:[%s15619_s1 + $0x1cc] sm:$0xf]  ;;  %v6641_v27 = vld [vmem:[%s15619_s1 + $0x198] sm:$0xf0] }
 0x256   :  { %5776 = vmatpush.bf16.msra.mxu3 %v6548_v36  ;;  %v9826_v36 = vld [vmem:[%s15619_s1 + $0x3cc] sm:$0xf]  ;;  %v6676_v45 = vor.u32 %v9762_v44, %v6673_v38  ;;  %v5525_v62 = vadd.f32 %v5524_v53, %v5512_v52  ;;  %v6897_v31 = vld [vmem:[%s15619_s1 + $0x398] sm:$0xf0]  ;;  %v6468_v38 = vor.u32 %v9710_v32, %v6465_v10 }
 0x257   :  { %5742 = vmatpush.bf16.msra.mxu0 %v9280_v51  ;;  %v6481_v51 = vld [vmem:[%s15619_s1 + $0x58] sm:$0xf0]  ;;  %v9782_v52 = vld [vmem:[%s15619_s1 + $0x26c] sm:$0xf] }
 0x258   :  { %5755 = vmatpush.bf16.msra.mxu1 %v9408_v43  ;;  %v6804_v43 = vor.u32 %v9794_v39, %v6801_v40  ;;  %v6484_v63 = vor.u32 %v9714_v50, %v6481_v51  ;;  %v6644_v39 = vor.u32 %v9754_v25, %v6641_v27  ;;  %v9706_v40 = vld [vmem:[%s15619_s1 + $0xc] sm:$0xf]  ;;  %v6625_v51 = vld [vmem:[%s15619_s1 + $0x178] sm:$0xf0] }
 0x259   :  { %5768 = vmatpush.bf16.msra.mxu2 %v9536_v55  ;;  %v6932_v55 = vor.u32 %v9826_v36, %v6929_v41  ;;  %v6449_v36 = vld [vmem:[%s15619_s1 + $0x18] sm:$0xf0]  ;;  %v9750_v50 = vld [vmem:[%s15619_s1 + $0x16c] sm:$0xf] }
 0x25a   :  { %5777 = vmatpush.bf16.msra.mxu3 %v6532_v59  ;;  %v9822_v59 = vld [vmem:[%s15619_s1 + $0x3ac] sm:$0xf]  ;;  %v6753_v53 = vld [vmem:[%s15619_s1 + $0x278] sm:$0xf0] }
 0x25b   :  { %5743 = vmatpush.bf16.msra.mxu0 %v9264_v11  ;;  %v6788_v11 = vor.u32 %v9790_v58, %v6785_v54  ;;  %v6916_v24 = vor.u32 %v9822_v59, %v6913_v61  ;;  %v5513_v44 = vpop.f32.mrf.mxu2  ;;  %v9862_v56 = vld [vmem:[%s15619_s1 + $0x4ec] sm:$0xf]  ;;  %v7073_v57 = vld [vmem:[%s15619_s1 + $0x4f8] sm:$0xf0]  ;;  %v6452_v58 = vor.u32 %v9706_v40, %v6449_v36  ;;  %v6628_v54 = vor.u32 %v9750_v50, %v6625_v51 }
 0x25c   :  { %5756 = vmatpush.bf16.msra.mxu1 %v9392_v28  ;;  %v9786_v28 = vld [vmem:[%s15619_s1 + $0x28c] sm:$0xf]  ;;  %v5526_v41 = vpop.f32.mrf.mxu3  ;;  %v6756_v59 = vor.u32 %v9782_v52, %v6753_v53  ;;  %v7076_v32 = vor.u32 %v9862_v56, %v7073_v57  ;;  %v6737_v10 = vld [vmem:[%s15619_s1 + $0x258] sm:$0xf0] }
 0x25d   :  { %5769 = vmatpush.bf16.msra.mxu2 %v9520_v29  ;;  %v10526_v29 = vld [vmem:[#allocation1] sm:$0xff]  ;;  %v9858_v27 = vld [vmem:[%s15619_s1 + $0x4cc] sm:$0xf]  ;;  %v6849_v40 = vld [vmem:[%s15619_s1 + $0x338] sm:$0xf0] }
 0x25e   :  { %5778 = vmatpush.bf16.msra.mxu3 %v6516_v30  ;;  %5744 = vmatmul.bf16.vlgmr.msra.gmra.mxu0 %v11740_v5  ;;  %v5537_v30 = vpop.f32.mrf.mxu0  ;;  %v9854_v36 = vld [vmem:[%s15619_s1 + $0x4ac] sm:$0xf]  ;;  %v7041_v41 = vld [vmem:[%s15619_s1 + $0x4b8] sm:$0xf0] }
 0x25f   :  { %5788 = vmatpush.bf16.msrb.mxu0 %v6692_v23  ;;  %5757 = vmatmul.bf16.vlgmr.msra.gmra.mxu1 %v11744_v7  ;;  %v6769_v23 = vld [vmem:[%s15619_s1 + $0x298] sm:$0xf0]  ;;  %v9770_v53 = vld [vmem:[%s15619_s1 + $0x20c] sm:$0xf] }
 0x260   :  { %5801 = vmatpush.bf16.msrb.mxu1 %v6820_v35  ;;  %9575 = vmatmul.msk.bf16.vlgmr.msra.gmra.mxu2 %vm4797_vm0, %v10526_v29  ;;  %v5538_v35 = vadd.f32 %v5537_v30, %v5525_v62  ;;  %v6772_v42 = vor.u32 %v9786_v28, %v6769_v23  ;;  %v9746_v62 = vld [vmem:[%s15619_s1 + $0x14c] sm:$0xf]  ;;  %v7057_v28 = vld [vmem:[%s15619_s1 + $0x4d8] sm:$0xf0] }
 0x261   :  { %5814 = vmatpush.bf16.msrb.mxu2 %v6948_v37  ;;  %v5550_v37 = vpop.f32.mrf.mxu1  ;;  %v7060_v44 = vor.u32 %v9858_v27, %v7057_v28  ;;  %v6577_v50 = vld [vmem:[%s15619_s1 + $0x118] sm:$0xf0]  ;;  %v9850_v57 = vld [vmem:[%s15619_s1 + $0x48c] sm:$0xf] }
 0x262   :  { %5779 = vmatpush.bf16.msra.mxu3 %v6500_v34  ;;  %v6900_v34 = vor.u32 %v9818_v33, %v6897_v31  ;;  %v9742_v31 = vld [vmem:[%s15619_s1 + $0x12c] sm:$0xf]  ;;  %v6833_v56 = vld [vmem:[%s15619_s1 + $0x318] sm:$0xf0] }
 0x263   :  { %5789 = vmatpush.bf16.msrb.mxu0 %v6676_v45  ;;  %v14415_v45 = vadd.f32 %v5550_v37, %v5538_v35  ;;  %v6593_v35 = vld [vmem:[%s15619_s1 + $0x138] sm:$0xf0]  ;;  %v9774_v37 = vld [vmem:[%s15619_s1 + $0x22c] sm:$0xf] }
 0x264   :  { %5802 = vmatpush.bf16.msrb.mxu1 %v6804_v43  ;;  %v9814_v43 = vld [vmem:[%s15619_s1 + $0x36c] sm:$0xf]  ;;  %v7009_v28 = vld [vmem:[%s15619_s1 + $0x478] sm:$0xf0] }
 0x265   :  { %5815 = vmatpush.bf16.msrb.mxu2 %v6932_v55  ;;  %v6881_v55 = vld [vmem:[%s15619_s1 + $0x378] sm:$0xf0]  ;;  %v9846_v27 = vld [vmem:[%s15619_s1 + $0x46c] sm:$0xf] }
 0x266   :  { %5780 = vmatpush.bf16.msra.mxu3 %v6484_v63  ;;  %v6884_v61 = vor.u32 %v9814_v43, %v6881_v55  ;;  %v6609_v63 = vld [vmem:[%s15619_s1 + $0x158] sm:$0xf0]  ;;  %v5539_v25 = vpop.f32.mrf.mxu0  ;;  %v9802_v43 = vld [vmem:[%s15619_s1 + $0x30c] sm:$0xf]  ;;  %v7044_v55 = vor.u32 %v9854_v36, %v7041_v41 }
 0x267   :  { %5790 = vmatpush.bf16.msrb.mxu0 %v6660_v3  ;;  %v9778_v3 = vld [vmem:[%s15619_s1 + $0x24c] sm:$0xf]  ;;  %v6612_v30 = vor.u32 %v9746_v62, %v6609_v63  ;;  %v7329_v63 = vld [vmem:[%s15619_s1 + $0x6f8] sm:$0xf0] }
 0x268   :  { %5803 = vmatpush.bf16.msrb.mxu1 %v6788_v11  ;;  %v9810_v11 = vld [vmem:[%s15619_s1 + $0x34c] sm:$0xf]  ;;  %v6740_v23 = vor.u32 %v9778_v3, %v6737_v10 }
 0x269   :  { %5816 = vmatpush.bf16.msrb.mxu2 %v6916_v24  ;;  %v6865_v24 = vld [vmem:[%s15619_s1 + $0x358] sm:$0xf0]  ;;  %v5552_v29 = vpop.f32.mrf.mxu1  ;;  %v9958_v3 = vld [vmem:[%s15619_s1 + $0x7ec] sm:$0xf] }
 0x26a   :  { %5781 = vmatpush.bf16.msra.mxu3 %v6468_v38  ;;  %v6868_v33 = vor.u32 %v9810_v11, %v6865_v24  ;;  %v6721_v38 = vld [vmem:[%s15619_s1 + $0x238] sm:$0xf0]  ;;  %v6836_v11 = vor.u32 %v9802_v43, %v6833_v56 }
 0x26b   :  { %5791 = vmatpush.bf16.msrb.mxu0 %v6644_v39  ;;  %v9806_v39 = vld [vmem:[%s15619_s1 + $0x32c] sm:$0xf]  ;;  %v6724_v51 = vor.u32 %v9774_v37, %v6721_v38  ;;  %v7297_v43 = vld [vmem:[%s15619_s1 + $0x6b8] sm:$0xf0] }
 0x26c   :  { %5804 = vmatpush.bf16.msrb.mxu1 %v6772_v42  ;;  %v6596_v42 = vor.u32 %v9742_v31, %v6593_v35  ;;  %v6852_v52 = vor.u32 %v9806_v39, %v6849_v40  ;;  %v9922_v31 = vld [vmem:[%s15619_s1 + $0x6cc] sm:$0xf]  ;;  %v7313_v35 = vld [vmem:[%s15619_s1 + $0x6d8] sm:$0xf0]  ;;  %v7012_v39 = vor.u32 %v9846_v27, %v7009_v28 }
 0x26d   :  { %5817 = vmatpush.bf16.msrb.mxu2 %v6900_v34  ;;  %v9738_v34 = vld [vmem:[%s15619_s1 + $0x10c] sm:$0xf]  ;;  %v7425_v56 = vld [vmem:[%s15619_s1 + $0x7b8] sm:$0xf0] }
 0x26e   :  { %5782 = vmatpush.bf16.msra.mxu3 %v6452_v58  ;;  %v7025_v58 = vld [vmem:[%s15619_s1 + $0x498] sm:$0xf0]  ;;  %v6580_v62 = vor.u32 %v9738_v34, %v6577_v50  ;;  %v9954_v37 = vld [vmem:[%s15619_s1 + $0x7cc] sm:$0xf]  ;;  %v7316_v50 = vor.u32 %v9922_v31, %v7313_v35 }
 0x26f   :  { %5792 = vmatpush.bf16.msrb.mxu0 %v6628_v54  ;;  %v9894_v54 = vld [vmem:[%s15619_s1 + $0x5ec] sm:$0xf]  ;;  %v7028_v24 = vor.u32 %v9850_v57, %v7025_v58  ;;  %v6993_v34 = vld [vmem:[%s15619_s1 + $0x458] sm:$0xf0] }
 0x270   :  { %5805 = vmatpush.bf16.msrb.mxu1 %v6756_v59  ;;  %v7201_v59 = vld [vmem:[%s15619_s1 + $0x5f8] sm:$0xf0] }
 0x271   :  { %5818 = vmatpush.bf16.msrb.mxu2 %v6884_v61  ;;  %5783 = vmatmul.bf16.vlgmr.msra.gmra.mxu3 %v10891_v21  ;;  %v6705_v21 = vld [vmem:[%s15619_s1 + $0x218] sm:$0xf0]  ;;  %v9926_v61 = vld [vmem:[%s15619_s1 + $0x6ec] sm:$0xf]  ;;  %v7204_v25 = vor.u32 %v9894_v54, %v7201_v59 }
 0x272   :  { %5827 = vmatpush.bf16.msrb.mxu3 %v7076_v32  ;;  %v7457_v32 = vld [vmem:[%s15619_s1 + $0x7f8] sm:$0xf0]  ;;  %v6708_v10 = vor.u32 %v9770_v53, %v6705_v21  ;;  %v7332_v29 = vor.u32 %v9926_v61, %v7329_v63  ;;  %v9918_v53 = vld [vmem:[%s15619_s1 + $0x6ac] sm:$0xf] }
 0x273   :  { %5793 = vmatpush.bf16.msrb.mxu0 %v6612_v30  ;;  %v7460_v30 = vor.u32 %v9958_v3, %v7457_v32  ;;  %v5563_v38 = vpop.f32.mrf.mxu2  ;;  %v9838_v54 = vld [vmem:[%s15619_s1 + $0x42c] sm:$0xf]  ;;  %v6977_v59 = vld [vmem:[%s15619_s1 + $0x438] sm:$0xf0]  ;;  %v7300_v61 = vor.u32 %v9918_v53, %v7297_v43 }
 0x274   :  { %5806 = vmatpush.bf16.msrb.mxu1 %v6740_v23  ;;  %v9890_v23 = vld [vmem:[%s15619_s1 + $0x5cc] sm:$0xf]  ;;  %v5564_v40 = vadd.f32 %v5563_v38, %v14415_v45  ;;  %v5576_v41 = vpop.f32.mrf.mxu3  ;;  %v7169_v45 = vld [vmem:[%s15619_s1 + $0x5b8] sm:$0xf0]  ;;  %v6980_v27 = vor.u32 %v9838_v54, %v6977_v59 }
 0x275   :  { %5819 = vmatpush.bf16.msrb.mxu2 %v6868_v33  ;;  %v7185_v33 = vld [vmem:[%s15619_s1 + $0x5d8] sm:$0xf0]  ;;  %v9946_v32 = vld [vmem:[%s15619_s1 + $0x78c] sm:$0xf] }
 0x276   :  { %5828 = vmatpush.bf16.msrb.mxu3 %v7060_v44  ;;  %v7441_v44 = vld [vmem:[%s15619_s1 + $0x7d8] sm:$0xf0]  ;;  %v7188_v36 = vor.u32 %v9890_v23, %v7185_v33  ;;  %v5577_v21 = vadd.f32 %v5576_v41, %v5564_v40  ;;  %v9910_v38 = vld [vmem:[%s15619_s1 + $0x66c] sm:$0xf] }
 0x277   :  { %5794 = vmatpush.bf16.msrb.mxu0 %v6596_v42  ;;  %v9842_v42 = vld [vmem:[%s15619_s1 + $0x44c] sm:$0xf]  ;;  %v7281_v3 = vld [vmem:[%s15619_s1 + $0x698] sm:$0xf0] }
 0x278   :  { %5807 = vmatpush.bf16.msrb.mxu1 %v6724_v51  ;;  %v7444_v51 = vor.u32 %v9954_v37, %v7441_v44  ;;  %v6996_v57 = vor.u32 %v9842_v42, %v6993_v34  ;;  %v9878_v37 = vld [vmem:[%s15619_s1 + $0x56c] sm:$0xf]  ;;  %v7137_v44 = vld [vmem:[%s15619_s1 + $0x578] sm:$0xf0] }
 0x279   :  { %5820 = vmatpush.bf16.msrb.mxu2 %v6852_v52  ;;  %v9886_v52 = vld [vmem:[%s15619_s1 + $0x5ac] sm:$0xf]  ;;  %v7585_v42 = vld [vmem:[%s15619_s1 + $0x8f8] sm:$0xf0] }
 0x27a   :  { %5829 = vmatpush.bf16.msrb.mxu3 %v7044_v55  ;;  %v9950_v55 = vld [vmem:[%s15619_s1 + $0x7ac] sm:$0xf]  ;;  %v7172_v58 = vor.u32 %v9886_v52, %v7169_v45  ;;  %v7121_v53 = vld [vmem:[%s15619_s1 + $0x558] sm:$0xf0] }
 0x27b   :  { %5795 = vmatpush.bf16.msrb.mxu0 %v6580_v62  ;;  %v9914_v62 = vld [vmem:[%s15619_s1 + $0x68c] sm:$0xf]  ;;  %v5589_v63 = vpop.f32.mrf.mxu0  ;;  %v7569_v59 = vld [vmem:[%s15619_s1 + $0x8d8] sm:$0xf0] }
 0x27c   :  { %5808 = vmatpush.bf16.msrb.mxu1 %v6708_v10  ;;  %v7409_v10 = vld [vmem:[%s15619_s1 + $0x798] sm:$0xf0]  ;;  %v5578_v23 = vpop.f32.mrf.mxu3  ;;  %v7284_v33 = vor.u32 %v9914_v62, %v7281_v3  ;;  %v9942_v40 = vld [vmem:[%s15619_s1 + $0x76c] sm:$0xf] }
 0x27d   :  { %5821 = vmatpush.bf16.msrb.mxu2 %v6836_v11  ;;  %v5590_v11 = vadd.f32 %v5589_v63, %v5577_v21  ;;  %v7412_v31 = vor.u32 %v9946_v32, %v7409_v10  ;;  %v9990_v41 = vld [vmem:[%s15619_s1 + $0x8ec] sm:$0xf]  ;;  %v7105_v63 = vld [vmem:[%s15619_s1 + $0x538] sm:$0xf0] }
 0x27e   :  { %5830 = vmatpush.bf16.msrb.mxu3 %v7028_v24  ;;  %5796 = vmatmul.bf16.vlgmr.msrb.gmra.mxu0 %v10902_v26  ;;  %v7153_v26 = vld [vmem:[%s15619_s1 + $0x598] sm:$0xf0]  ;;  %v5602_v24 = vpop.f32.mrf.mxu1  ;;  %v9874_v45 = vld [vmem:[%s15619_s1 + $0x54c] sm:$0xf]  ;;  %v7588_v43 = vor.u32 %v9990_v41, %v7585_v42 }
 0x27f   :  { %5840 = vmatpush.bf16.msra.mxu0 %v7204_v25  ;;  %5809 = vmatmul.bf16.vlgmr.msrb.gmra.mxu1 %v10889_v20  ;;  %v9882_v20 = vld [vmem:[%s15619_s1 + $0x58c] sm:$0xf]  ;;  %v5565_v25 = vpop.f32.mrf.mxu2  ;;  %v14614_v35 = vadd.f32 %v5602_v24, %v5590_v11  ;;  %v7233_v10 = vld [vmem:[%s15619_s1 + $0x638] sm:$0xf0] }
 0x280   :  { %5853 = vmatpush.bf16.msra.mxu1 %v7332_v29  ;;  %5822 = vmatmul.bf16.vlgmr.msrb.gmra.mxu2 %v10893_v22  ;;  %v7428_v22 = vor.u32 %v9950_v55, %v7425_v56  ;;  %v7156_v28 = vor.u32 %v9882_v20, %v7153_v26  ;;  %v9834_v29 = vld [vmem:[%s15619_s1 + $0x40c] sm:$0xf]  ;;  %v7249_v55 = vld [vmem:[%s15619_s1 + $0x658] sm:$0xf0] }
 0x281   :  { %5866 = vmatpush.bf16.msra.mxu2 %v7460_v30  ;;  %v6961_v30 = vld [vmem:[%s15619_s1 + $0x418] sm:$0xf0]  ;;  %v9906_v21 = vld [vmem:[%s15619_s1 + $0x64c] sm:$0xf] }
 0x282   :  { %5831 = vmatpush.bf16.msrb.mxu3 %v7012_v39  ;;  %v7265_v39 = vld [vmem:[%s15619_s1 + $0x678] sm:$0xf0]  ;;  %v6964_v34 = vor.u32 %v9834_v29, %v6961_v30  ;;  %v9938_v56 = vld [vmem:[%s15619_s1 + $0x74c] sm:$0xf]  ;;  %v7252_v20 = vor.u32 %v9906_v21, %v7249_v55 }
 0x283   :  { %5841 = vmatpush.bf16.msra.mxu0 %v7188_v36  ;;  %v7393_v36 = vld [vmem:[%s15619_s1 + $0x778] sm:$0xf0]  ;;  %v9986_v54 = vld [vmem:[%s15619_s1 + $0x8cc] sm:$0xf] }
 0x284   :  { %5854 = vmatpush.bf16.msra.mxu1 %v7316_v50  ;;  %v7140_v50 = vor.u32 %v9878_v37, %v7137_v44  ;;  %v7396_v52 = vor.u32 %v9942_v40, %v7393_v36  ;;  %v9870_v62 = vld [vmem:[%s15619_s1 + $0x52c] sm:$0xf]  ;;  %v7572_v32 = vor.u32 %v9986_v54, %v7569_v59  ;;  %v7361_v24 = vld [vmem:[%s15619_s1 + $0x738] sm:$0xf0] }
 0x285   :  { %5867 = vmatpush.bf16.msra.mxu2 %v7444_v51  ;;  %v7268_v51 = vor.u32 %v9910_v38, %v7265_v39  ;;  %v9902_v3 = vld [vmem:[%s15619_s1 + $0x62c] sm:$0xf]  ;;  %v7089_v30 = vld [vmem:[%s15619_s1 + $0x518] sm:$0xf0] }
 0x286   :  { %5832 = vmatpush.bf16.msrb.mxu3 %v6996_v57  ;;  %v7377_v57 = vld [vmem:[%s15619_s1 + $0x758] sm:$0xf0]  ;;  %v9934_v11 = vld [vmem:[%s15619_s1 + $0x72c] sm:$0xf] }
 0x287   :  { %5842 = vmatpush.bf16.msra.mxu0 %v7172_v58  ;;  %v5591_v58 = vpop.f32.mrf.mxu0  ;;  %v7380_v26 = vor.u32 %v9938_v56, %v7377_v57  ;;  %v9982_v25 = vld [vmem:[%s15619_s1 + $0x8ac] sm:$0xf]  ;;  %v7364_v23 = vor.u32 %v9934_v11, %v7361_v24  ;;  %v7345_v38 = vld [vmem:[%s15619_s1 + $0x718] sm:$0xf0] }
 0x288   :  { %5855 = vmatpush.bf16.msra.mxu1 %v7300_v61  ;;  %v5604_v61 = vpop.f32.mrf.mxu1  ;;  %v9866_v29 = vld [vmem:[%s15619_s1 + $0x50c] sm:$0xf]  ;;  %v7537_v40 = vld [vmem:[%s15619_s1 + $0x898] sm:$0xf0] }
 0x289   :  { %5868 = vmatpush.bf16.msra.mxu2 %v7428_v22  ;;  %v7124_v22 = vor.u32 %v9874_v45, %v7121_v53  ;;  %v9930_v37 = vld [vmem:[%s15619_s1 + $0x70c] sm:$0xf]  ;;  %v7713_v41 = vld [vmem:[%s15619_s1 + $0x9f8] sm:$0xf0] }
 0x28a   :  { %5833 = vmatpush.bf16.msrb.mxu3 %v6980_v27  ;;  %v7553_v27 = vld [vmem:[%s15619_s1 + $0x8b8] sm:$0xf0]  ;;  %v9978_v39 = vld [vmem:[%s15619_s1 + $0x88c] sm:$0xf]  ;;  %v7348_v53 = vor.u32 %v9930_v37, %v7345_v38 }
 0x28b   :  { %5843 = vmatpush.bf16.msra.mxu0 %v7156_v28  ;;  %v7108_v28 = vor.u32 %v9870_v62, %v7105_v63  ;;  %v7556_v44 = vor.u32 %v9982_v25, %v7553_v27  ;;  %v10022_v36 = vld [vmem:[%s15619_s1 + $0x9ec] sm:$0xf]  ;;  %v7540_v21 = vor.u32 %v9978_v39, %v7537_v40  ;;  %v7521_v56 = vld [vmem:[%s15619_s1 + $0x878] sm:$0xf0] }
 0x28c   :  { %5856 = vmatpush.bf16.msra.mxu1 %v7284_v33  ;;  %v9898_v33 = vld [vmem:[%s15619_s1 + $0x60c] sm:$0xf]  ;;  %v7697_v59 = vld [vmem:[%s15619_s1 + $0x9d8] sm:$0xf0] }
 0x28d   :  { %5869 = vmatpush.bf16.msra.mxu2 %v7412_v31  ;;  %v7217_v31 = vld [vmem:[%s15619_s1 + $0x618] sm:$0xf0]  ;;  %v10054_v42 = vld [vmem:[%s15619_s1 + $0xaec] sm:$0xf] }
 0x28e   :  { %5834 = vmatpush.bf16.msrb.mxu3 %v6964_v34  ;;  %v7092_v34 = vor.u32 %v9866_v29, %v7089_v30  ;;  %v7220_v45 = vor.u32 %v9898_v33, %v7217_v31  ;;  %v9974_v55 = vld [vmem:[%s15619_s1 + $0x86c] sm:$0xf]  ;;  %v7505_v24 = vld [vmem:[%s15619_s1 + $0x858] sm:$0xf0] }
 0x28f   :  { %5844 = vmatpush.bf16.msra.mxu0 %v7140_v50  ;;  %v7841_v50 = vld [vmem:[%s15619_s1 + $0xaf8] sm:$0xf0]  ;;  %v10018_v54 = vld [vmem:[%s15619_s1 + $0x9cc] sm:$0xf]  ;;  %v7524_v63 = vor.u32 %v9974_v55, %v7521_v56 }
 0x290   :  { %5857 = vmatpush.bf16.msra.mxu1 %v7268_v51  ;;  %v10086_v51 = vld [vmem:[%s15619_s1 + $0xbec] sm:$0xf]  ;;  %v7844_v57 = vor.u32 %v10054_v42, %v7841_v50  ;;  %v7937_v33 = vld [vmem:[%s15619_s1 + $0xbb8] sm:$0xf0] }
 0x291   :  { %5870 = vmatpush.bf16.msra.mxu2 %v7396_v52  ;;  %5835 = vmatmul.bf16.vlgmr.msrb.gmra.mxu3 %v10984_v0  ;;  %v7236_v0 = vor.u32 %v9902_v3, %v7233_v10  ;;  %v7969_v52 = vld [vmem:[%s15619_s1 + $0xbf8] sm:$0xf0]  ;;  %v10050_v61 = vld [vmem:[%s15619_s1 + $0xacc] sm:$0xf] }
 0x292   :  { %5879 = vmatpush.bf16.msra.mxu3 %v7588_v43  ;;  %v7716_v43 = vor.u32 %v10022_v36, %v7713_v41  ;;  %v7972_v58 = vor.u32 %v10086_v51, %v7969_v52  ;;  %v9970_v11 = vld [vmem:[%s15619_s1 + $0x84c] sm:$0xf]  ;;  %v7489_v37 = vld [vmem:[%s15619_s1 + $0x838] sm:$0xf0] }
 0x293   :  { %5845 = vmatpush.bf16.msra.mxu0 %v7124_v22  ;;  %v7825_v22 = vld [vmem:[%s15619_s1 + $0xad8] sm:$0xf0]  ;;  %v5615_v62 = vpop.f32.mrf.mxu2  ;;  %v10046_v29 = vld [vmem:[%s15619_s1 + $0xaac] sm:$0xf] }
 0x294   :  { %5858 = vmatpush.bf16.msra.mxu1 %v7252_v20  ;;  %v10082_v20 = vld [vmem:[%s15619_s1 + $0xbcc] sm:$0xf]  ;;  %v5616_v3 = vadd.f32 %v5615_v62, %v14614_v35  ;;  %v5628_v10 = vpop.f32.mrf.mxu3  ;;  %v7828_v25 = vor.u32 %v10050_v61, %v7825_v22  ;;  %v7681_v35 = vld [vmem:[%s15619_s1 + $0x9b8] sm:$0xf0] }
 0x295   :  { %5871 = vmatpush.bf16.msra.mxu2 %v7380_v26  ;;  %v7953_v26 = vld [vmem:[%s15619_s1 + $0xbd8] sm:$0xf0]  ;;  %v10042_v40 = vld [vmem:[%s15619_s1 + $0xa8c] sm:$0xf] }
 0x296   :  { %5880 = vmatpush.bf16.msra.mxu3 %v7572_v32  ;;  %v7700_v32 = vor.u32 %v10018_v54, %v7697_v59  ;;  %v7956_v27 = vor.u32 %v10082_v20, %v7953_v26  ;;  %v5629_v30 = vadd.f32 %v5628_v10, %v5616_v3  ;;  %v7665_v39 = vld [vmem:[%s15619_s1 + $0x998] sm:$0xf0]  ;;  %v10074_v42 = vld [vmem:[%s15619_s1 + $0xb8c] sm:$0xf] }
 0x297   :  { %5846 = vmatpush.bf16.msra.mxu0 %v7108_v28  ;;  %v10014_v28 = vld [vmem:[%s15619_s1 + $0x9ac] sm:$0xf]  ;;  %v7793_v41 = vld [vmem:[%s15619_s1 + $0xa98] sm:$0xf0] }
 0x298   :  { %5859 = vmatpush.bf16.msra.mxu1 %v7236_v0  ;;  %v7809_v0 = vld [vmem:[%s15619_s1 + $0xab8] sm:$0xf0]  ;;  %v7684_v31 = vor.u32 %v10014_v28, %v7681_v35  ;;  %v7796_v56 = vor.u32 %v10042_v40, %v7793_v41  ;;  %v10006_v54 = vld [vmem:[%s15619_s1 + $0x96c] sm:$0xf] }
 0x299   :  { %5872 = vmatpush.bf16.msra.mxu2 %v7364_v23  ;;  %v10078_v23 = vld [vmem:[%s15619_s1 + $0xbac] sm:$0xf]  ;;  %v7649_v59 = vld [vmem:[%s15619_s1 + $0x978] sm:$0xf0] }
 0x29a   :  { %5881 = vmatpush.bf16.msra.mxu3 %v7556_v44  ;;  %v7812_v44 = vor.u32 %v10046_v29, %v7809_v0  ;;  %v7940_v38 = vor.u32 %v10078_v23, %v7937_v33  ;;  %v10038_v61 = vld [vmem:[%s15619_s1 + $0xa6c] sm:$0xf]  ;;  %v7777_v22 = vld [vmem:[%s15619_s1 + $0xa78] sm:$0xf0] }
 0x29b   :  { %5847 = vmatpush.bf16.msra.mxu0 %v7092_v34  ;;  %v5641_v36 = vpop.f32.mrf.mxu0  ;;  %v7921_v34 = vld [vmem:[%s15619_s1 + $0xb98] sm:$0xf0]  ;;  %v5617_v52 = vpop.f32.mrf.mxu2  ;;  %v10070_v20 = vld [vmem:[%s15619_s1 + $0xb6c] sm:$0xf]  ;;  %v7780_v10 = vor.u32 %v10038_v61, %v7777_v22 }
 0x29c   :  { %5860 = vmatpush.bf16.msra.mxu1 %v7220_v45  ;;  %v5642_v50 = vadd.f32 %v5641_v36, %v5629_v30  ;;  %v5654_v51 = vpop.f32.mrf.mxu1  ;;  %v5630_v55 = vpop.f32.mrf.mxu3  ;;  %v7905_v26 = vld [vmem:[%s15619_s1 + $0xb78] sm:$0xf0]  ;;  %v10118_v62 = vld [vmem:[%s15619_s1 + $0xcec] sm:$0xf] }
 0x29d   :  { %5873 = vmatpush.bf16.msra.mxu2 %v7348_v53  ;;  %v7761_v35 = vld [vmem:[%s15619_s1 + $0xa58] sm:$0xf0]  ;;  %v10066_v29 = vld [vmem:[%s15619_s1 + $0xb4c] sm:$0xf] }
 0x29e   :  { %5882 = vmatpush.bf16.msra.mxu3 %v7540_v21  ;;  %5848 = vmatmul.bf16.vlgmr.msra.gmra.mxu0 %v10988_v2  ;;  %v9966_v2 = vld [vmem:[%s15619_s1 + $0x82c] sm:$0xf]  ;;  %v7889_v30 = vld [vmem:[%s15619_s1 + $0xb58] sm:$0xf0] }
 0x29f   :  { %5892 = vmatpush.bf16.msrb.mxu0 %v7716_v43  ;;  %5861 = vmatmul.bf16.vlgmr.msra.gmra.mxu1 %v10979_v60  ;;  %v10010_v60 = vld [vmem:[%s15619_s1 + $0x98c] sm:$0xf]  ;;  %v7492_v45 = vor.u32 %v9966_v2, %v7489_v37  ;;  %v7473_v43 = vld [vmem:[%s15619_s1 + $0x818] sm:$0xf0]  ;;  %v7892_v37 = vor.u32 %v10066_v29, %v7889_v30 }
 0x2a0   :  { %5905 = vmatpush.bf16.msrb.mxu1 %v7844_v57  ;;  %5874 = vmatmul.bf16.vlgmr.msra.gmra.mxu2 %v10986_v1  ;;  %v7508_v1 = vor.u32 %v9970_v11, %v7505_v24  ;;  %v7668_v53 = vor.u32 %v10010_v60, %v7665_v39  ;;  %v9962_v21 = vld [vmem:[%s15619_s1 + $0x80c] sm:$0xf]  ;;  %v7924_v57 = vor.u32 %v10074_v42, %v7921_v34  ;;  %v8081_v33 = vld [vmem:[%s15619_s1 + $0xcd8] sm:$0xf0] }
 0x2a1   :  { %5918 = vmatpush.bf16.msrb.mxu2 %v7972_v58  ;;  %v14813_v58 = vadd.f32 %v5654_v51, %v5642_v50  ;;  %v7476_v3 = vor.u32 %v9962_v21, %v7473_v43  ;;  %v7908_v11 = vor.u32 %v10070_v20, %v7905_v26  ;;  %v10002_v24 = vld [vmem:[%s15619_s1 + $0x94c] sm:$0xf]  ;;  %v7745_v40 = vld [vmem:[%s15619_s1 + $0xa38] sm:$0xf0] }
 0x2a2   :  { %5883 = vmatpush.bf16.msra.mxu3 %v7524_v63  ;;  %v8097_v63 = vld [vmem:[%s15619_s1 + $0xcf8] sm:$0xf0]  ;;  %v10114_v23 = vld [vmem:[%s15619_s1 + $0xccc] sm:$0xf] }
 0x2a3   :  { %5893 = vmatpush.bf16.msrb.mxu0 %v7700_v32  ;;  %v7652_v32 = vor.u32 %v10006_v54, %v7649_v59  ;;  %v8100_v28 = vor.u32 %v10118_v62, %v8097_v63  ;;  %v5643_v0 = vpop.f32.mrf.mxu0  ;;  %v10030_v60 = vld [vmem:[%s15619_s1 + $0xa2c] sm:$0xf]  ;;  %v8084_v39 = vor.u32 %v10114_v23, %v8081_v33  ;;  %v7873_v41 = vld [vmem:[%s15619_s1 + $0xb38] sm:$0xf0] }
 0x2a4   :  { %5906 = vmatpush.bf16.msrb.mxu1 %v7828_v25  ;;  %v7633_v25 = vld [vmem:[%s15619_s1 + $0x958] sm:$0xf0]  ;;  %v10062_v36 = vld [vmem:[%s15619_s1 + $0xb2c] sm:$0xf] }
 0x2a5   :  { %5919 = vmatpush.bf16.msrb.mxu2 %v7956_v27  ;;  %v10034_v27 = vld [vmem:[%s15619_s1 + $0xa4c] sm:$0xf]  ;;  %v8065_v34 = vld [vmem:[%s15619_s1 + $0xcb8] sm:$0xf0] }
 0x2a6   :  { %5884 = vmatpush.bf16.msra.mxu3 %v7508_v1  ;;  %v5656_v1 = vpop.f32.mrf.mxu1  ;;  %v7764_v2 = vor.u32 %v10034_v27, %v7761_v35  ;;  %v10110_v42 = vld [vmem:[%s15619_s1 + $0xcac] sm:$0xf]  ;;  %v7601_v52 = vld [vmem:[%s15619_s1 + $0x918] sm:$0xf0] }
 0x2a7   :  { %5894 = vmatpush.bf16.msrb.mxu0 %v7684_v31  ;;  %v7636_v31 = vor.u32 %v10002_v24, %v7633_v25  ;;  %v9994_v51 = vld [vmem:[%s15619_s1 + $0x90c] sm:$0xf]  ;;  %v7729_v21 = vld [vmem:[%s15619_s1 + $0xa18] sm:$0xf0]  ;;  %v8068_v55 = vor.u32 %v10110_v42, %v8065_v34 }
 0x2a8   :  { %5907 = vmatpush.bf16.msrb.mxu1 %v7812_v44  ;;  %v9998_v44 = vld [vmem:[%s15619_s1 + $0x92c] sm:$0xf]  ;;  %v8049_v54 = vld [vmem:[%s15619_s1 + $0xc98] sm:$0xf0]  ;;  %v7604_v20 = vor.u32 %v9994_v51, %v7601_v52 }
 0x2a9   :  { %5920 = vmatpush.bf16.msrb.mxu2 %v7940_v38  ;;  %v7617_v38 = vld [vmem:[%s15619_s1 + $0x938] sm:$0xf0]  ;;  %v10058_v43 = vld [vmem:[%s15619_s1 + $0xb0c] sm:$0xf] }
 0x2aa   :  { %5885 = vmatpush.bf16.msra.mxu3 %v7492_v45  ;;  %v7620_v50 = vor.u32 %v9998_v44, %v7617_v38  ;;  %v7876_v45 = vor.u32 %v10062_v36, %v7873_v41  ;;  %v10150_v59 = vld [vmem:[%s15619_s1 + $0xdec] sm:$0xf]  ;;  %v8225_v61 = vld [vmem:[%s15619_s1 + $0xdf8] sm:$0xf0] }
 0x2ab   :  { %5895 = vmatpush.bf16.msrb.mxu0 %v7668_v53  ;;  %v10026_v53 = vld [vmem:[%s15619_s1 + $0xa0c] sm:$0xf]  ;;  %v8353_v26 = vld [vmem:[%s15619_s1 + $0xef8] sm:$0xf0] }
 0x2ac   :  { %5908 = vmatpush.bf16.msrb.mxu1 %v7796_v56  ;;  %v7857_v56 = vld [vmem:[%s15619_s1 + $0xb18] sm:$0xf0]  ;;  %v10182_v22 = vld [vmem:[%s15619_s1 + $0xeec] sm:$0xf] }
 0x2ad   :  { %5921 = vmatpush.bf16.msrb.mxu2 %v7924_v57  ;;  %v10106_v57 = vld [vmem:[%s15619_s1 + $0xc8c] sm:$0xf]  ;;  %v8481_v63 = vld [vmem:[%s15619_s1 + $0xff8] sm:$0xf0]  ;;  %v8356_v27 = vor.u32 %v10182_v22, %v8353_v26 }
 0x2ae   :  { %5886 = vmatpush.bf16.msra.mxu3 %v7476_v3  ;;  %v10214_v62 = vld [vmem:[%s15619_s1 + $0xfec] sm:$0xf]  ;;  %v7732_v3 = vor.u32 %v10026_v53, %v7729_v21  ;;  %v8033_v25 = vld [vmem:[%s15619_s1 + $0xc78] sm:$0xf0] }
 0x2af   :  { %5896 = vmatpush.bf16.msrb.mxu0 %v7652_v32  ;;  %v7860_v32 = vor.u32 %v10058_v43, %v7857_v56  ;;  %v10102_v24 = vld [vmem:[%s15619_s1 + $0xc6c] sm:$0xf]  ;;  %v8209_v29 = vld [vmem:[%s15619_s1 + $0xdd8] sm:$0xf0] }
 0x2b0   :  { %5909 = vmatpush.bf16.msrb.mxu1 %v7780_v10  ;;  %v8052_v10 = vor.u32 %v10106_v57, %v8049_v54  ;;  %v10146_v35 = vld [vmem:[%s15619_s1 + $0xdcc] sm:$0xf]  ;;  %v8337_v0 = vld [vmem:[%s15619_s1 + $0xed8] sm:$0xf0] }
 0x2b1   :  { %5922 = vmatpush.bf16.msrb.mxu2 %v7908_v11  ;;  %5887 = vmatmul.bf16.vlgmr.msra.gmra.mxu3 %v11234_v12  ;;  %v7748_v12 = vor.u32 %v10030_v60, %v7745_v40  ;;  %v8228_v11 = vor.u32 %v10150_v59, %v8225_v61  ;;  %v10178_v30 = vld [vmem:[%s15619_s1 + $0xecc] sm:$0xf]  ;;  %v8465_v33 = vld [vmem:[%s15619_s1 + $0xfd8] sm:$0xf0] }
 0x2b2   :  { %5931 = vmatpush.bf16.msrb.mxu3 %v8100_v28  ;;  %v8484_v28 = vor.u32 %v10214_v62, %v8481_v63  ;;  %v10210_v23 = vld [vmem:[%s15619_s1 + $0xfcc] sm:$0xf]  ;;  %v8017_v60 = vld [vmem:[%s15619_s1 + $0xc58] sm:$0xf0] }
 0x2b3   :  { %5897 = vmatpush.bf16.msrb.mxu0 %v7636_v31  ;;  %v5667_v1 = vpop.f32.mrf.mxu2  ;;  %v8036_v31 = vor.u32 %v10102_v24, %v8033_v25  ;;  %v10098_v38 = vld [vmem:[%s15619_s1 + $0xc4c] sm:$0xf]  ;;  %v8468_v40 = vor.u32 %v10210_v23, %v8465_v33  ;;  %v8321_v34 = vld [vmem:[%s15619_s1 + $0xeb8] sm:$0xf0] }
 0x2b4   :  { %5910 = vmatpush.bf16.msrb.mxu1 %v7764_v2  ;;  %v5668_v2 = vadd.f32 %v5667_v1, %v14813_v58  ;;  %v5680_v44 = vpop.f32.mrf.mxu3  ;;  %v10142_v36 = vld [vmem:[%s15619_s1 + $0xdac] sm:$0xf]  ;;  %v8193_v58 = vld [vmem:[%s15619_s1 + $0xdb8] sm:$0xf0] }
 0x2b5   :  { %5923 = vmatpush.bf16.msrb.mxu2 %v7892_v37  ;;  %v8212_v37 = vor.u32 %v10146_v35, %v8209_v29  ;;  %v10174_v41 = vld [vmem:[%s15619_s1 + $0xeac] sm:$0xf]  ;;  %v8449_v51 = vld [vmem:[%s15619_s1 + $0xfb8] sm:$0xf0]  ;;  %v8196_v52 = vor.u32 %v10142_v36, %v8193_v58 }
 0x2b6   :  { %5932 = vmatpush.bf16.msrb.mxu3 %v8084_v39  ;;  %v8340_v39 = vor.u32 %v10178_v30, %v8337_v0  ;;  %v5681_v42 = vadd.f32 %v5680_v44, %v5668_v2  ;;  %v8177_v21 = vld [vmem:[%s15619_s1 + $0xd98] sm:$0xf0]  ;;  %v10170_v43 = vld [vmem:[%s15619_s1 + $0xe8c] sm:$0xf] }
 0x2b7   :  { %5898 = vmatpush.bf16.msrb.mxu0 %v7620_v50  ;;  %v10206_v50 = vld [vmem:[%s15619_s1 + $0xfac] sm:$0xf]  ;;  %v8305_v56 = vld [vmem:[%s15619_s1 + $0xe98] sm:$0xf0] }
 0x2b8   :  { %5911 = vmatpush.bf16.msrb.mxu1 %v7748_v12  ;;  %v8001_v12 = vld [vmem:[%s15619_s1 + $0xc38] sm:$0xf0]  ;;  %v8452_v53 = vor.u32 %v10206_v50, %v8449_v51  ;;  %v10202_v57 = vld [vmem:[%s15619_s1 + $0xf8c] sm:$0xf] }
 0x2b9   :  { %5924 = vmatpush.bf16.msrb.mxu2 %v7876_v45  ;;  %v8324_v45 = vor.u32 %v10174_v41, %v8321_v34  ;;  %v8433_v54 = vld [vmem:[%s15619_s1 + $0xf98] sm:$0xf0]  ;;  %v10090_v62 = vld [vmem:[%s15619_s1 + $0xc0c] sm:$0xf] }
 0x2ba   :  { %5933 = vmatpush.bf16.msrb.mxu3 %v8068_v55  ;;  %v7985_v63 = vld [vmem:[%s15619_s1 + $0xc18] sm:$0xf0]  ;;  %v10134_v24 = vld [vmem:[%s15619_s1 + $0xd6c] sm:$0xf] }
 0x2bb   :  { %5899 = vmatpush.bf16.msrb.mxu0 %v7604_v20  ;;  %v5693_v55 = vpop.f32.mrf.mxu0  ;;  %v5669_v22 = vpop.f32.mrf.mxu2  ;;  %v8161_v25 = vld [vmem:[%s15619_s1 + $0xd78] sm:$0xf0]  ;;  %v10198_v35 = vld [vmem:[%s15619_s1 + $0xf6c] sm:$0xf]  ;;  %v7988_v23 = vor.u32 %v10090_v62, %v7985_v63 }
 0x2bc   :  { %5912 = vmatpush.bf16.msrb.mxu1 %v7732_v3  ;;  %v5694_v59 = vadd.f32 %v5693_v55, %v5681_v42  ;;  %v5706_v61 = vpop.f32.mrf.mxu1  ;;  %v5682_v3 = vpop.f32.mrf.mxu3  ;;  %v8417_v29 = vld [vmem:[%s15619_s1 + $0xf78] sm:$0xf0]  ;;  %v10246_v30 = vld [vmem:[%s15619_s1 + $0x10ec] sm:$0xf]  ;;  %v8164_v33 = vor.u32 %v10134_v24, %v8161_v25 }
 0x2bd   :  { %5925 = vmatpush.bf16.msrb.mxu2 %v7860_v32  ;;  %v8308_v32 = vor.u32 %v10170_v43, %v8305_v56  ;;  %v8609_v0 = vld [vmem:[%s15619_s1 + $0x10f8] sm:$0xf0]  ;;  %v10130_v2 = vld [vmem:[%s15619_s1 + $0xd4c] sm:$0xf] }
 0x2be   :  { %5934 = vmatpush.bf16.msrb.mxu3 %v8052_v10  ;;  %5900 = vmatmul.bf16.vlgmr.msrb.gmra.mxu0 %v11244_v16  ;;  %v8020_v16 = vor.u32 %v10098_v38, %v8017_v60  ;;  %v8436_v10 = vor.u32 %v10202_v57, %v8433_v54  ;;  %v10162_v44 = vld [vmem:[%s15619_s1 + $0xe4c] sm:$0xf]  ;;  %v8612_v38 = vor.u32 %v10246_v30, %v8609_v0  ;;  %v8273_v60 = vld [vmem:[%s15619_s1 + $0xe58] sm:$0xf0] }
 0x2bf   :  { %5944 = vmatpush.bf16.msra.mxu0 %v8228_v11  ;;  %5913 = vmatmul.bf16.vlgmr.msrb.gmra.mxu1 %v11242_v15  ;;  %v10138_v15 = vld [vmem:[%s15619_s1 + $0xd8c] sm:$0xf]  ;;  %v15012_v11 = vadd.f32 %v5706_v61, %v5694_v59  ;;  %v8593_v41 = vld [vmem:[%s15619_s1 + $0x10d8] sm:$0xf0]  ;;  %v8276_v50 = vor.u32 %v10162_v44, %v8273_v60 }
 0x2c0   :  { %5957 = vmatpush.bf16.msra.mxu1 %v8356_v27  ;;  %5926 = vmatmul.bf16.vlgmr.msrb.gmra.mxu2 %v11246_v17  ;;  %v10094_v17 = vld [vmem:[%s15619_s1 + $0xc2c] sm:$0xf]  ;;  %v8180_v26 = vor.u32 %v10138_v15, %v8177_v21  ;;  %v8385_v15 = vld [vmem:[%s15619_s1 + $0xf38] sm:$0xf0] }
 0x2c1   :  { %5970 = vmatpush.bf16.msra.mxu2 %v8484_v28  ;;  %v8004_v20 = vor.u32 %v10094_v17, %v8001_v12  ;;  %v10166_v27 = vld [vmem:[%s15619_s1 + $0xe6c] sm:$0xf]  ;;  %v8289_v28 = vld [vmem:[%s15619_s1 + $0xe78] sm:$0xf0] }
 0x2c2   :  { %5935 = vmatpush.bf16.msrb.mxu3 %v8036_v31  ;;  %v8292_v1 = vor.u32 %v10166_v27, %v8289_v28  ;;  %v8420_v31 = vor.u32 %v10198_v35, %v8417_v29  ;;  %v10242_v58 = vld [vmem:[%s15619_s1 + $0x10cc] sm:$0xf]  ;;  %v8577_v43 = vld [vmem:[%s15619_s1 + $0x10b8] sm:$0xf0] }
 0x2c3   :  { %5945 = vmatpush.bf16.msra.mxu0 %v8212_v37  ;;  %v8145_v37 = vld [vmem:[%s15619_s1 + $0xd58] sm:$0xf0]  ;;  %v5695_v36 = vpop.f32.mrf.mxu0  ;;  %v10158_v17 = vld [vmem:[%s15619_s1 + $0xe2c] sm:$0xf]  ;;  %v8596_v12 = vor.u32 %v10242_v58, %v8593_v41 }
 0x2c4   :  { %5958 = vmatpush.bf16.msra.mxu1 %v8340_v39  ;;  %v10194_v39 = vld [vmem:[%s15619_s1 + $0xf4c] sm:$0xf]  ;;  %v5708_v42 = vpop.f32.mrf.mxu1  ;;  %v8148_v34 = vor.u32 %v10130_v2, %v8145_v37  ;;  %v8113_v57 = vld [vmem:[%s15619_s1 + $0xd18] sm:$0xf0] }
 0x2c5   :  { %5971 = vmatpush.bf16.msra.mxu2 %v8468_v40  ;;  %v8401_v40 = vld [vmem:[%s15619_s1 + $0xf58] sm:$0xf0]  ;;  %v10238_v21 = vld [vmem:[%s15619_s1 + $0x10ac] sm:$0xf] }
 0x2c6   :  { %5936 = vmatpush.bf16.msrb.mxu3 %v8020_v16  ;;  %v8404_v51 = vor.u32 %v10194_v39, %v8401_v40  ;;  %v10126_v16 = vld [vmem:[%s15619_s1 + $0xd2c] sm:$0xf]  ;;  %v8241_v61 = vld [vmem:[%s15619_s1 + $0xe18] sm:$0xf0] }
 0x2c7   :  { %5946 = vmatpush.bf16.msra.mxu0 %v8196_v52  ;;  %v8129_v52 = vld [vmem:[%s15619_s1 + $0xd38] sm:$0xf0]  ;;  %v10122_v56 = vld [vmem:[%s15619_s1 + $0xd0c] sm:$0xf] }
 0x2c8   :  { %5959 = vmatpush.bf16.msra.mxu1 %v8324_v45  ;;  %v8257_v45 = vld [vmem:[%s15619_s1 + $0xe38] sm:$0xf0]  ;;  %v8132_v55 = vor.u32 %v10126_v16, %v8129_v52  ;;  %v10154_v59 = vld [vmem:[%s15619_s1 + $0xe0c] sm:$0xf]  ;;  %v8116_v24 = vor.u32 %v10122_v56, %v8113_v57 }
 0x2c9   :  { %5972 = vmatpush.bf16.msra.mxu2 %v8452_v53  ;;  %v10190_v53 = vld [vmem:[%s15619_s1 + $0xf2c] sm:$0xf]  ;;  %v8561_v63 = vld [vmem:[%s15619_s1 + $0x1098] sm:$0xf0]  ;;  %v8244_v35 = vor.u32 %v10154_v59, %v8241_v61 }
 0x2ca   :  { %5937 = vmatpush.bf16.msrb.mxu3 %v8004_v20  ;;  %v8388_v54 = vor.u32 %v10190_v53, %v8385_v15  ;;  %v10186_v22 = vld [vmem:[%s15619_s1 + $0xf0c] sm:$0xf]  ;;  %v8580_v20 = vor.u32 %v10238_v21, %v8577_v43  ;;  %v8865_v25 = vld [vmem:[%s15619_s1 + $0x12f8] sm:$0xf0] }
 0x2cb   :  { %5947 = vmatpush.bf16.msra.mxu0 %v8180_v26  ;;  %v8369_v26 = vld [vmem:[%s15619_s1 + $0xf18] sm:$0xf0]  ;;  %v10234_v62 = vld [vmem:[%s15619_s1 + $0x108c] sm:$0xf] }
 0x2cc   :  { %5960 = vmatpush.bf16.msra.mxu1 %v8308_v32  ;;  %v10278_v3 = vld [vmem:[%s15619_s1 + $0x11ec] sm:$0xf]  ;;  %v8737_v32 = vld [vmem:[%s15619_s1 + $0x11f8] sm:$0xf0]  ;;  %v8372_v29 = vor.u32 %v10186_v22, %v8369_v26  ;;  %v8564_v30 = vor.u32 %v10234_v62, %v8561_v63 }
 0x2cd   :  { %5973 = vmatpush.bf16.msra.mxu2 %v8436_v10  ;;  %v10310_v10 = vld [vmem:[%s15619_s1 + $0x12ec] sm:$0xf]  ;;  %v8993_v28 = vld [vmem:[%s15619_s1 + $0x13f8] sm:$0xf0]  ;;  %v8740_v0 = vor.u32 %v10278_v3, %v8737_v32 }
 0x2ce   :  { %5938 = vmatpush.bf16.msrb.mxu3 %v7988_v23  ;;  %v10342_v27 = vld [vmem:[%s15619_s1 + $0x13ec] sm:$0xf]  ;;  %v8721_v37 = vld [vmem:[%s15619_s1 + $0x11d8] sm:$0xf0] }
 0x2cf   :  { %5948 = vmatpush.bf16.msra.mxu0 %v8164_v33  ;;  %v10230_v23 = vld [vmem:[%s15619_s1 + $0x106c] sm:$0xf]  ;;  %v8545_v33 = vld [vmem:[%s15619_s1 + $0x1078] sm:$0xf0] }
 0x2d0   :  { %5961 = vmatpush.bf16.msra.mxu1 %v8292_v1  ;;  %v8868_v1 = vor.u32 %v10310_v10, %v8865_v25  ;;  %v10274_v2 = vld [vmem:[%s15619_s1 + $0x11cc] sm:$0xf]  ;;  %v8977_v39 = vld [vmem:[%s15619_s1 + $0x13d8] sm:$0xf0]  ;;  %v8548_v36 = vor.u32 %v10230_v23, %v8545_v33 }
 0x2d1   :  { %5974 = vmatpush.bf16.msra.mxu2 %v8420_v31  ;;  %5939 = vmatmul.bf16.vlgmr.msrb.gmra.mxu3 %v11408_v46  ;;  %v8260_v46 = vor.u32 %v10158_v17, %v8257_v45  ;;  %v8996_v31 = vor.u32 %v10342_v27, %v8993_v28  ;;  %v10306_v44 = vld [vmem:[%s15619_s1 + $0x12cc] sm:$0xf]  ;;  %v8724_v41 = vor.u32 %v10274_v2, %v8721_v37  ;;  %v8833_v45 = vld [vmem:[%s15619_s1 + $0x12b8] sm:$0xf0] }
 0x2d2   :  { %5983 = vmatpush.bf16.msra.mxu3 %v8612_v38  ;;  %v8849_v38 = vld [vmem:[%s15619_s1 + $0x12d8] sm:$0xf0]  ;;  %v10338_v60 = vld [vmem:[%s15619_s1 + $0x13cc] sm:$0xf] }
 0x2d3   :  { %5949 = vmatpush.bf16.msra.mxu0 %v8148_v34  ;;  %v5719_v40 = vpop.f32.mrf.mxu2  ;;  %v10226_v34 = vld [vmem:[%s15619_s1 + $0x104c] sm:$0xf]  ;;  %v8980_v16 = vor.u32 %v10338_v60, %v8977_v39  ;;  %v8961_v15 = vld [vmem:[%s15619_s1 + $0x13b8] sm:$0xf0] }
 0x2d4   :  { %5962 = vmatpush.bf16.msra.mxu1 %v8276_v50  ;;  %v5720_v58 = vadd.f32 %v5719_v40, %v15012_v11  ;;  %v5732_v42 = vpop.f32.mrf.mxu3  ;;  %v8529_v50 = vld [vmem:[%s15619_s1 + $0x1058] sm:$0xf0]  ;;  %v10270_v52 = vld [vmem:[%s15619_s1 + $0x11ac] sm:$0xf] }
 0x2d5   :  { %5975 = vmatpush.bf16.msra.mxu2 %v8404_v51  ;;  %v8852_v51 = vor.u32 %v10306_v44, %v8849_v38  ;;  %v8705_v11 = vld [vmem:[%s15619_s1 + $0x11b8] sm:$0xf0]  ;;  %v10302_v17 = vld [vmem:[%s15619_s1 + $0x12ac] sm:$0xf] }
 0x2d6   :  { %5984 = vmatpush.bf16.msra.mxu3 %v8596_v12  ;;  %v5733_v12 = vadd.f32 %v5732_v42, %v5720_v58  ;;  %v10334_v53 = vld [vmem:[%s15619_s1 + $0x13ac] sm:$0xf]  ;;  %v8708_v21 = vor.u32 %v10270_v52, %v8705_v11  ;;  %v8513_v43 = vld [vmem:[%s15619_s1 + $0x1038] sm:$0xf0] }
 0x2d7   :  { %5950 = vmatpush.bf16.msra.mxu0 %v8132_v55  ;;  %v8836_v55 = vor.u32 %v10302_v17, %v8833_v45  ;;  %v8964_v56 = vor.u32 %v10334_v53, %v8961_v15  ;;  %v8689_v57 = vld [vmem:[%s15619_s1 + $0x1198] sm:$0xf0]  ;;  %v10330_v59 = vld [vmem:[%s15619_s1 + $0x138c] sm:$0xf] }
 0x2d8   :  { %5963 = vmatpush.bf16.msra.mxu1 %v8260_v46  ;;  %v10298_v46 = vld [vmem:[%s15619_s1 + $0x128c] sm:$0xf]  ;;  %v8945_v61 = vld [vmem:[%s15619_s1 + $0x1398] sm:$0xf0] }
 0x2d9   :  { %5976 = vmatpush.bf16.msra.mxu2 %v8388_v54  ;;  %v8817_v54 = vld [vmem:[%s15619_s1 + $0x1298] sm:$0xf0]  ;;  %v10218_v32 = vld [vmem:[%s15619_s1 + $0x100c] sm:$0xf]  ;;  %v8948_v27 = vor.u32 %v10330_v59, %v8945_v61 }
 0x2da   :  { %5985 = vmatpush.bf16.msra.mxu3 %v8580_v20  ;;  %v8497_v10 = vld [vmem:[%s15619_s1 + $0x1018] sm:$0xf0]  ;;  %v8820_v25 = vor.u32 %v10298_v46, %v8817_v54  ;;  %v10262_v28 = vld [vmem:[%s15619_s1 + $0x116c] sm:$0xf] }
 0x2db   :  { %5951 = vmatpush.bf16.msra.mxu0 %v8116_v24  ;;  %v5745_v22 = vpop.f32.mrf.mxu0  ;;  %v5721_v20 = vpop.f32.mrf.mxu2  ;;  %v10326_v23 = vld [vmem:[%s15619_s1 + $0x136c] sm:$0xf]  ;;  %v8929_v33 = vld [vmem:[%s15619_s1 + $0x1378] sm:$0xf0]  ;;  %v8500_v2 = vor.u32 %v10218_v32, %v8497_v10 }
 0x2dc   :  { %5964 = vmatpush.bf16.msra.mxu1 %v8244_v35  ;;  %v5746_v26 = vadd.f32 %v5745_v22, %v5733_v12  ;;  %v5758_v3 = vpop.f32.mrf.mxu1  ;;  %v5734_v24 = vpop.f32.mrf.mxu3  ;;  %v8673_v35 = vld [vmem:[%s15619_s1 + $0x1178] sm:$0xf0]  ;;  %v8932_v38 = vor.u32 %v10326_v23, %v8929_v33  ;;  %v10258_v60 = vld [vmem:[%s15619_s1 + $0x114c] sm:$0xf] }
 0x2dd   :  { %5977 = vmatpush.bf16.msra.mxu2 %v8372_v29  ;;  %v10294_v29 = vld [vmem:[%s15619_s1 + $0x126c] sm:$0xf]  ;;  %v8676_v37 = vor.u32 %v10262_v28, %v8673_v35  ;;  %v8657_v39 = vld [vmem:[%s15619_s1 + $0x1158] sm:$0xf0] }
 0x2de   :  { %5986 = vmatpush.bf16.msra.mxu3 %v8564_v30  ;;  %5952 = vmatmul.bf16.vlgmr.msra.gmra.mxu0 %v11412_v48  ;;  %v8532_v48 = vor.u32 %v10226_v34, %v8529_v50  ;;  %v5759_v30 = vadd.f32 %v5758_v3, %v5746_v26  ;;  %v10290_v40 = vld [vmem:[%s15619_s1 + $0x124c] sm:$0xf]  ;;  %v8785_v58 = vld [vmem:[%s15619_s1 + $0x1258] sm:$0xf0] }
 0x2df   :  { %5996 = vmatpush.bf16.msrb.mxu0 %v8740_v0  ;;  %5965 = vmatmul.bf16.vlgmr.msra.gmra.mxu1 %v11410_v47  ;;  %v10266_v47 = vld [vmem:[%s15619_s1 + $0x118c] sm:$0xf]  ;;  %v8801_v0 = vld [vmem:[%s15619_s1 + $0x1278] sm:$0xf0]  ;;  %v8788_v17 = vor.u32 %v10290_v40, %v8785_v58 }
 0x2e0   :  { %6009 = vmatpush.bf16.msrb.mxu1 %v8868_v1  ;;  %5978 = vmatmul.bf16.vlgmr.msra.gmra.mxu2 %v11414_v49  ;;  %v10222_v49 = vld [vmem:[%s15619_s1 + $0x102c] sm:$0xf]  ;;  %v8692_v63 = vor.u32 %v10266_v47, %v8689_v57  ;;  %v8804_v44 = vor.u32 %v10294_v29, %v8801_v0  ;;  %v8913_v42 = vld [vmem:[%s15619_s1 + $0x1358] sm:$0xf0] }
 0x2e1   :  { %6022 = vmatpush.bf16.msrb.mxu2 %v8996_v31  ;;  %v8516_v62 = vor.u32 %v10222_v49, %v8513_v43  ;;  %v10374_v1 = vld [vmem:[%s15619_s1 + $0x14ec] sm:$0xf]  ;;  %v9121_v31 = vld [vmem:[%s15619_s1 + $0x14f8] sm:$0xf0] }
 0x2e2   :  { %5987 = vmatpush.bf16.msra.mxu3 %v8548_v36  ;;  %v9124_v36 = vor.u32 %v10374_v1, %v9121_v31  ;;  %v10370_v34 = vld [vmem:[%s15619_s1 + $0x14cc] sm:$0xf]  ;;  %v9105_v50 = vld [vmem:[%s15619_s1 + $0x14d8] sm:$0xf0] }
 0x2e3   :  { %5997 = vmatpush.bf16.msrb.mxu0 %v8724_v41  ;;  %v10322_v41 = vld [vmem:[%s15619_s1 + $0x134c] sm:$0xf]  ;;  %v5771_v11 = vpop.f32.mrf.mxu2  ;;  %v8641_v53 = vld [vmem:[%s15619_s1 + $0x1138] sm:$0xf0] }
 0x2e4   :  { %6010 = vmatpush.bf16.msrb.mxu1 %v8852_v51  ;;  %v5747_v51 = vpop.f32.mrf.mxu0  ;;  %v5760_v52 = vpop.f32.mrf.mxu1  ;;  %v8916_v12 = vor.u32 %v10322_v41, %v8913_v42  ;;  %v10254_v45 = vld [vmem:[%s15619_s1 + $0x112c] sm:$0xf]  ;;  %v8769_v49 = vld [vmem:[%s15619_s1 + $0x1238] sm:$0xf0] }
 0x2e5   :  { %6023 = vmatpush.bf16.msrb.mxu2 %v8980_v16  ;;  %v8660_v16 = vor.u32 %v10258_v60, %v8657_v39  ;;  %v10286_v15 = vld [vmem:[%s15619_s1 + $0x122c] sm:$0xf]  ;;  %v9089_v47 = vld [vmem:[%s15619_s1 + $0x14b8] sm:$0xf0]  ;;  %v8644_v57 = vor.u32 %v10254_v45, %v8641_v53 }
 0x2e6   :  { %5988 = vmatpush.bf16.msra.mxu3 %v8532_v48  ;;  %v15268_v48 = vadd.f32 %v5771_v11, %v5759_v30  ;;  %v10318_v43 = vld [vmem:[%s15619_s1 + $0x132c] sm:$0xf]  ;;  %v8625_v54 = vld [vmem:[%s15619_s1 + $0x1118] sm:$0xf0] }
 0x2e7   :  { %5998 = vmatpush.bf16.msrb.mxu0 %v8708_v21  ;;  %v9108_v21 = vor.u32 %v10370_v34, %v9105_v50  ;;  %v10250_v46 = vld [vmem:[%s15619_s1 + $0x110c] sm:$0xf]  ;;  %v8753_v22 = vld [vmem:[%s15619_s1 + $0x1218] sm:$0xf0]  ;;  %v10527_v50 = vld [vmem:[%s15620_s2] sm:$0xf] }
 0x2e8   :  { %6011 = vmatpush.bf16.msrb.mxu1 %v8836_v55  ;;  %v8897_v55 = vld [vmem:[%s15619_s1 + $0x1338] sm:$0xf0]  ;;  %v10282_v61 = vld [vmem:[%s15619_s1 + $0x120c] sm:$0xf]  ;;  %v815_v51 = vperm.slane %v10527_v50, 3 }
 0x2e9   :  { %6024 = vmatpush.bf16.msrb.mxu2 %v8964_v56  ;;  %v10366_v56 = vld [vmem:[%s15619_s1 + $0x14ac] sm:$0xf]  ;;  %v8900_v59 = vor.u32 %v10318_v43, %v8897_v55  ;;  %v9073_v3 = vld [vmem:[%s15619_s1 + $0x1498] sm:$0xf0]  ;;  %v8756_v29 = vor.u32 %v10282_v61, %v8753_v22 }
 0x2ea   :  { %5989 = vmatpush.bf16.msra.mxu3 %v8516_v62  ;;  %v10314_v20 = vld [vmem:[%s15619_s1 + $0x130c] sm:$0xf]  ;;  %v9092_v26 = vor.u32 %v10366_v56, %v9089_v47  ;;  %v8881_v62 = vld [vmem:[%s15619_s1 + $0x1318] sm:$0xf0] }
 0x2eb   :  { %5999 = vmatpush.bf16.msrb.mxu0 %v8692_v63  ;;  %v10362_v63 = vld [vmem:[%s15619_s1 + $0x148c] sm:$0xf]  ;;  %v9249_v10 = vld [vmem:[%s15619_s1 + $0x15f8] sm:$0xf0]  ;;  %v8884_v30 = vor.u32 %v10314_v20, %v8881_v62  ;;  %v5773_v0 = vpop.f32.mrf.mxu2 }
 0x2ec   :  { %6012 = vmatpush.bf16.msrb.mxu1 %v8820_v25  ;;  %v10406_v32 = vld [vmem:[%s15619_s1 + $0x15ec] sm:$0xf]  ;;  %v8628_v25 = vor.u32 %v10250_v46, %v8625_v54  ;;  %v9505_v35 = vld [vmem:[%s15619_s1 + $0x17f8] sm:$0xf0]  ;;  %v9076_v23 = vor.u32 %v10362_v63, %v9073_v3 }
 0x2ed   :  { %6025 = vmatpush.bf16.msrb.mxu2 %v8948_v27  ;;  %v10438_v24 = vld [vmem:[%s15619_s1 + $0x16ec] sm:$0xf]  ;;  %v9377_v27 = vld [vmem:[%s15619_s1 + $0x16f8] sm:$0xf0]  ;;  %v9252_v33 = vor.u32 %v10406_v32, %v9249_v10 }
 0x2ee   :  { %5990 = vmatpush.bf16.msra.mxu3 %v8500_v2  ;;  %v10470_v28 = vld [vmem:[%s15619_s1 + $0x17ec] sm:$0xf]  ;;  %v9057_v31 = vld [vmem:[%s15619_s1 + $0x1478] sm:$0xf0]  ;;  %v9380_v2 = vor.u32 %v10438_v24, %v9377_v27 }
 0x2ef   :  { %6000 = vmatpush.bf16.msrb.mxu0 %v8676_v37  ;;  %v10358_v1 = vld [vmem:[%s15619_s1 + $0x146c] sm:$0xf]  ;;  %v9508_v37 = vor.u32 %v10470_v28, %v9505_v35  ;;  %v9361_v39 = vld [vmem:[%s15619_s1 + $0x16d8] sm:$0xf0] }
 0x2f0   :  { %6013 = vmatpush.bf16.msrb.mxu1 %v8804_v44  ;;  %v10402_v44 = vld [vmem:[%s15619_s1 + $0x15cc] sm:$0xf]  ;;  %v9060_v58 = vor.u32 %v10358_v1, %v9057_v31  ;;  %v9041_v34 = vld [vmem:[%s15619_s1 + $0x1458] sm:$0xf0] }
 0x2f1   :  { %6026 = vmatpush.bf16.msrb.mxu2 %v8932_v38  ;;  %5991 = vmatmul.bf16.vlgmr.msra.gmra.mxu3 %v11645_v9  ;;  %v8772_v9 = vor.u32 %v10286_v15, %v8769_v49  ;;  %v9233_v38 = vld [vmem:[%s15619_s1 + $0x15d8] sm:$0xf0]  ;;  %v10434_v60 = vld [vmem:[%s15619_s1 + $0x16cc] sm:$0xf] }
 0x2f2   :  { %6035 = vmatpush.bf16.msrb.mxu3 %v9124_v36  ;;  %v10466_v40 = vld [vmem:[%s15619_s1 + $0x17cc] sm:$0xf]  ;;  %v9489_v36 = vld [vmem:[%s15619_s1 + $0x17d8] sm:$0xf0]  ;;  %v9236_v41 = vor.u32 %v10402_v44, %v9233_v38  ;;  %v9364_v52 = vor.u32 %v10434_v60, %v9361_v39 }
 0x2f3   :  { %6001 = vmatpush.bf16.msrb.mxu0 %v8660_v16  ;;  %v10354_v42 = vld [vmem:[%s15619_s1 + $0x144c] sm:$0xf]  ;;  %v9492_v11 = vor.u32 %v10466_v40, %v9489_v36  ;;  %v9345_v53 = vld [vmem:[%s15619_s1 + $0x16b8] sm:$0xf0] }
 0x2f4   :  { %6014 = vmatpush.bf16.msrb.mxu1 %v8788_v17  ;;  %v5784_v16 = vpop.f32.mrf.mxu3  ;;  %v10398_v17 = vld [vmem:[%s15619_s1 + $0x15ac] sm:$0xf]  ;;  %v9044_v49 = vor.u32 %v10354_v42, %v9041_v34  ;;  %v9025_v43 = vld [vmem:[%s15619_s1 + $0x1438] sm:$0xf0] }
 0x2f5   :  { %6027 = vmatpush.bf16.msrb.mxu2 %v8916_v12  ;;  %v9217_v12 = vld [vmem:[%s15619_s1 + $0x15b8] sm:$0xf0]  ;;  %v10430_v45 = vld [vmem:[%s15619_s1 + $0x16ac] sm:$0xf]  ;;  %v5785_v55 = vadd.f32 %v5784_v16, %v815_v51 }
 0x2f6   :  { %6036 = vmatpush.bf16.msrb.mxu3 %v9108_v21  ;;  %v10462_v15 = vld [vmem:[%s15619_s1 + $0x17ac] sm:$0xf]  ;;  %v9473_v21 = vld [vmem:[%s15619_s1 + $0x17b8] sm:$0xf0]  ;;  %v9348_v56 = vor.u32 %v10430_v45, %v9345_v53 }
 0x2f7   :  { %6002 = vmatpush.bf16.msrb.mxu0 %v8644_v57  ;;  %v9476_v47 = vor.u32 %v10462_v15, %v9473_v21  ;;  %v9201_v57 = vld [vmem:[%s15619_s1 + $0x1598] sm:$0xf0]  ;;  %v10426_v46 = vld [vmem:[%s15619_s1 + $0x168c] sm:$0xf] }
 0x2f8   :  { %6015 = vmatpush.bf16.msrb.mxu1 %v8772_v9  ;;  %v9329_v54 = vld [vmem:[%s15619_s1 + $0x1698] sm:$0xf0]  ;;  %v10458_v9 = vld [vmem:[%s15619_s1 + $0x178c] sm:$0xf] }
 0x2f9   :  { %6028 = vmatpush.bf16.msrb.mxu2 %v8900_v59  ;;  %v9457_v59 = vld [vmem:[%s15619_s1 + $0x1798] sm:$0xf0]  ;;  %v9332_v10 = vor.u32 %v10426_v46, %v9329_v54  ;;  %v10422_v28 = vld [vmem:[%s15619_s1 + $0x166c] sm:$0xf] }
 0x2fa   :  { %6037 = vmatpush.bf16.msrb.mxu3 %v9092_v26  ;;  %v10346_v26 = vld [vmem:[%s15619_s1 + $0x140c] sm:$0xf]  ;;  %v9009_v62 = vld [vmem:[%s15619_s1 + $0x1418] sm:$0xf0]  ;;  %v9460_v24 = vor.u32 %v10458_v9, %v9457_v59 }
 0x2fb   :  { %6003 = vmatpush.bf16.msrb.mxu0 %v8628_v25  ;;  %v5797_v61 = vpop.f32.mrf.mxu0  ;;  %v10390_v25 = vld [vmem:[%s15619_s1 + $0x156c] sm:$0xf]  ;;  %v9185_v27 = vld [vmem:[%s15619_s1 + $0x1578] sm:$0xf0]  ;;  %v9012_v1 = vor.u32 %v10346_v26, %v9009_v62 }
 0x2fc   :  { %6016 = vmatpush.bf16.msrb.mxu1 %v8756_v29  ;;  %v5798_v63 = vadd.f32 %v5797_v61, %v5785_v55  ;;  %v5810_v3 = vpop.f32.mrf.mxu1  ;;  %v5786_v32 = vpop.f32.mrf.mxu3  ;;  %v9313_v35 = vld [vmem:[%s15619_s1 + $0x1678] sm:$0xf0]  ;;  %v10454_v29 = vld [vmem:[%s15619_s1 + $0x176c] sm:$0xf]  ;;  %v9188_v31 = vor.u32 %v10390_v25, %v9185_v27  ;;  %v10495_v25 = vld [vmem:[%s15621_s3 + $0x30] sm:$0xff] }
 0x2fd   :  { %6029 = vmatpush.bf16.msrb.mxu2 %v8884_v30  ;;  %v9441_v30 = vld [vmem:[%s15619_s1 + $0x1778] sm:$0xf0]  ;;  %v10386_v44 = vld [vmem:[%s15619_s1 + $0x154c] sm:$0xf]  ;;  %v10503_v27 = vld [vmem:[%s15621_s3 + $0x70] sm:$0xff] }
 0x2fe   :  { %6038 = vmatpush.bf16.msrb.mxu3 %v9076_v23  ;;  %6004 = vmatmul.bf16.vlgmr.msrb.gmra.mxu0 %v11655_v14  ;;  %v9220_v14 = vor.u32 %v10398_v17, %v9217_v12  ;;  %v5811_v0 = vadd.f32 %v5810_v3, %v5798_v63  ;;  %v10486_v23 = vld [vmem:[%s15619_s1 + $0x186c] sm:$0xf]  ;;  %v9169_v38 = vld [vmem:[%s15619_s1 + $0x1558] sm:$0xf0] }
 0x2ff   :  { %6048 = vmatpush.bf16.msra.mxu0 %v9252_v33  ;;  %6017 = vmatmul.bf16.vlgmr.msrb.gmra.mxu1 %v11653_v13  ;;  %v10394_v13 = vld [vmem:[%s15619_s1 + $0x158c] sm:$0xf]  ;;  %v9569_v33 = vld [vmem:[%s15619_s1 + $0x1878] sm:$0xf0]  ;;  %v9172_v16 = vor.u32 %v10386_v44, %v9169_v38 }
 0x300   :  { %6061 = vmatpush.bf16.msra.mxu1 %v9380_v2  ;;  %6030 = vmatmul.bf16.vlgmr.msrb.gmra.mxu2 %v11657_v18  ;;  %v10350_v18 = vld [vmem:[%s15619_s1 + $0x142c] sm:$0xf]  ;;  %v9204_v20 = vor.u32 %v10394_v13, %v9201_v57  ;;  %v9316_v2 = vor.u32 %v10422_v28, %v9313_v35  ;;  %v9572_v40 = vor.u32 %v10486_v23, %v9569_v33  ;;  %v9297_v36 = vld [vmem:[%s15619_s1 + $0x1658] sm:$0xf0]  ;;  %v10511_v35 = vld [vmem:[%s15621_s3 + $0xb0] sm:$0xff] }
 0x301   :  { %6074 = vmatpush.bf16.msra.mxu2 %v9508_v37  ;;  %v9028_v22 = vor.u32 %v10350_v18, %v9025_v43  ;;  %v9444_v37 = vor.u32 %v10454_v29, %v9441_v30  ;;  %v10418_v60 = vld [vmem:[%s15619_s1 + $0x164c] sm:$0xf]  ;;  %v9553_v50 = vld [vmem:[%s15619_s1 + $0x1858] sm:$0xf0]  ;;  %v10528_v23 = vld [vmem:[#allocation1] sm:$0xff] }
 0x302   :  { %6039 = vmatpush.bf16.msrb.mxu3 %v9060_v58  ;;  %v10450_v58 = vld [vmem:[%s15619_s1 + $0x174c] sm:$0xf]  ;;  %v9153_v45 = vld [vmem:[%s15619_s1 + $0x1538] sm:$0xf0]  ;;  %v10493_v33 = vld [vmem:[%s15621_s3 + $0x20] sm:$0xff] }
 0x303   :  { %6049 = vmatpush.bf16.msra.mxu0 %v9236_v41  ;;  %v5823_v39 = vpop.f32.mrf.mxu2  ;;  %v9425_v41 = vld [vmem:[%s15619_s1 + $0x1758] sm:$0xf0]  ;;  %v10482_v34 = vld [vmem:[%s15619_s1 + $0x184c] sm:$0xf]  ;;  %v5799_v51 = vpop.f32.mrf.mxu0 }
 0x304   :  { %6062 = vmatpush.bf16.msra.mxu1 %v9364_v52  ;;  %v5824_v42 = vadd.f32 %v5823_v39, %v5811_v0  ;;  %v5812_v52 = vpop.f32.mrf.mxu1  ;;  %v9428_v17 = vor.u32 %v10450_v58, %v9425_v41  ;;  %v10382_v12 = vld [vmem:[%s15619_s1 + $0x152c] sm:$0xf]  ;;  %v9556_v15 = vor.u32 %v10482_v34, %v9553_v50  ;;  %v9281_v21 = vld [vmem:[%s15619_s1 + $0x1638] sm:$0xf0]  ;;  %v10491_v41 = vld [vmem:[%s15621_s3 + $0x10] sm:$0xff] }
 0x305   :  { %6075 = vmatpush.bf16.msra.mxu2 %v9492_v11  ;;  %v9300_v11 = vor.u32 %v10418_v60, %v9297_v36  ;;  %v10414_v53 = vld [vmem:[%s15619_s1 + $0x162c] sm:$0xf]  ;;  %v9537_v43 = vld [vmem:[%s15619_s1 + $0x1838] sm:$0xf0]  ;;  %v9156_v55 = vor.u32 %v10382_v12, %v9153_v45  ;;  %v10507_v50 = vld [vmem:[%s15621_s3 + $0x90] sm:$0xff]  ;;  %v6100_v45 = vmax.f32 %v12835_v19, 0.0 }
 0x306   :  { %6040 = vmatpush.bf16.msrb.mxu3 %v9044_v49  ;;  %v10446_v49 = vld [vmem:[%s15619_s1 + $0x172c] sm:$0xf]  ;;  %v9265_v9 = vld [vmem:[%s15619_s1 + $0x1618] sm:$0xf0]  ;;  %v10497_v12 = vld [vmem:[%s15621_s3 + $0x40] sm:$0xff] }
 0x307   :  { %6050 = vmatpush.bf16.msra.mxu0 %v9220_v14  ;;  %v9409_v14 = vld [vmem:[%s15619_s1 + $0x1738] sm:$0xf0]  ;;  %v10478_v18 = vld [vmem:[%s15619_s1 + $0x182c] sm:$0xf] }
 0x308   :  { %6063 = vmatpush.bf16.msra.mxu1 %v9348_v56  ;;  %v9284_v56 = vor.u32 %v10414_v53, %v9281_v21  ;;  %v10378_v13 = vld [vmem:[%s15619_s1 + $0x150c] sm:$0xf]  ;;  %v9540_v54 = vor.u32 %v10478_v18, %v9537_v43  ;;  %v9393_v61 = vld [vmem:[%s15619_s1 + $0x1718] sm:$0xf0]  ;;  %v6101_v53 = vmax.f32 %v14038_v8, 0.0  ;;  %v6102_v21 = vmax.f32 %v15268_v48, 0.0 }
 0x309   :  { %6076 = vmatpush.bf16.msra.mxu2 %v9476_v47  ;;  %v9412_v47 = vor.u32 %v10446_v49, %v9409_v14  ;;  %v10410_v57 = vld [vmem:[%s15619_s1 + $0x160c] sm:$0xf]  ;;  %v9521_v26 = vld [vmem:[%s15619_s1 + $0x1818] sm:$0xf0]  ;;  %v6104_v49 = vpack.c.bf16 %v6100_v45, %v6100_v45 }
 0x30a   :  { %6041 = vmatpush.bf16.msrb.mxu3 %v9028_v22  ;;  %v10442_v59 = vld [vmem:[%s15619_s1 + $0x170c] sm:$0xf]  ;;  %v9268_v62 = vor.u32 %v10410_v57, %v9265_v9  ;;  %v10496_v3 = vld [vmem:[%s15621_s3 + $0x38] sm:$0xff]  ;;  %v6105_v14 = vpack.c.bf16 %v6101_v53, %v6101_v53  ;;  %v6106_v18 = vpack.c.bf16 %v6102_v21, %v6102_v21 }
 0x30b   :  { %6051 = vmatpush.bf16.msra.mxu0 %v9204_v20  ;;  %v5825_v46 = vpop.f32.mrf.mxu2  ;;  %v10474_v20 = vld [vmem:[%s15619_s1 + $0x180c] sm:$0xf]  ;;  %v9396_v63 = vor.u32 %v10442_v59, %v9393_v61  ;;  %v10504_v32 = vld [vmem:[%s15621_s3 + $0x78] sm:$0xff] }
 0x30c   :  { %6064 = vmatpush.bf16.msra.mxu1 %v9332_v10  ;;  %v10512_v10 = vld [vmem:[%s15621_s3 + $0xb8] sm:$0xff]  ;;  %v10494_v30 = vld [vmem:[%s15621_s3 + $0x28] sm:$0xff] }
 0x30d   :  { %6077 = vmatpush.bf16.msra.mxu2 %v9460_v24  ;;  %v9524_v24 = vor.u32 %v10474_v20, %v9521_v26  ;;  %v10502_v0 = vld [vmem:[%s15621_s3 + $0x68] sm:$0xff]  ;;  %v10492_v38 = vld [vmem:[%s15621_s3 + $0x18] sm:$0xff] }
 0x30e   :  { %6042 = vmatpush.bf16.msrb.mxu3 %v9012_v1  ;;  %v10501_v1 = vld [vmem:[%s15621_s3 + $0x60] sm:$0xff]  ;;  %v10500_v60 = vld [vmem:[%s15621_s3 + $0x58] sm:$0xff]  ;;  %v10490_v51 = vld [vmem:[%s15621_s3 + $0x8] sm:$0xff] }
 0x30f   :  { %6052 = vmatpush.bf16.msra.mxu0 %v9188_v31  ;;  %v10508_v39 = vld [vmem:[%s15621_s3 + $0x98] sm:$0xff]  ;;  %v10506_v52 = vld [vmem:[%s15621_s3 + $0x88] sm:$0xff] }
 0x310   :  { %6065 = vmatpush.bf16.msra.mxu1 %v9316_v2  ;;  %v10520_v20 = vld [vmem:[%s15621_s3 + $0xf8] sm:$0xff] }
 0x311   :  { %6078 = vmatpush.bf16.msra.mxu2 %v9444_v37  ;;  %6043 = vmatmul.bf16.vlgmr.msrb.gmra.mxu3 %v11738_v4  ;;  %v9137_v4 = vld [vmem:[%s15619_s1 + $0x1518] sm:$0xf0]  ;;  %v10509_v37 = vld [vmem:[%s15621_s3 + $0xa0] sm:$0xff] }
 0x312   :  { %6091 = vmatpush.bf16.msra.mxu3 %v9572_v40  ;;  %v9140_v22 = vor.u32 %v10378_v13, %v9137_v4 }
 0x313   :  { %6053 = vmatpush.bf16.msra.mxu0 %v9172_v16  ;;  %v10498_v16 = vld [vmem:[%s15621_s3 + $0x48] sm:$0xff] }
 0x314   :  { %6066 = vmatpush.bf16.msra.mxu1 %v9300_v11  ;;  %v5836_v28 = vpop.f32.mrf.mxu3 }
 0x315   :  { %6079 = vmatpush.bf16.msra.mxu2 %v9428_v17  ;;  %v5837_v29 = vadd.f32 %v5836_v28, %v5824_v42  ;;  %v10499_v42 = vld [vmem:[%s15621_s3 + $0x50] sm:$0xff]  ;;  %v10489_v17 = vld [vmem:[%s15621_s3] sm:$0xff] }
 0x316   :  { %6092 = vmatpush.bf16.msra.mxu3 %v9556_v15  ;;  %v10505_v15 = vld [vmem:[%s15621_s3 + $0x80] sm:$0xff] }
 0x317   :  { %6054 = vmatpush.bf16.msra.mxu0 %v9156_v55 }
 0x318   :  { %6067 = vmatpush.bf16.msra.mxu1 %v9284_v56 }
 0x319   :  { %6080 = vmatpush.bf16.msra.mxu2 %v9412_v47 }
 0x31a   :  { %6093 = vmatpush.bf16.msra.mxu3 %v9540_v54 }
 0x31b   :  { %6055 = vmatpush.bf16.msra.mxu0 %v9140_v22 }
 0x31c   :  { %6068 = vmatpush.bf16.msra.mxu1 %v9268_v62  ;;  %v5862_v31 = vpop.f32.mrf.mxu1  ;;  %v5838_v2 = vpop.f32.mrf.mxu3  ;;  %v10519_v62 = vld [vmem:[%s15621_s3 + $0xf0] sm:$0xff] }
 0x31d   :  { %6081 = vmatpush.bf16.msra.mxu2 %v9396_v63 }
 0x31e   :  { %6094 = vmatpush.bf16.msra.mxu3 %v9524_v24  ;;  %6056 = vmatmul.bf16.vlgmr.msra.gmra.mxu0 %v11742_v6  ;;  %v5849_v6 = vpop.f32.mrf.mxu0  ;;  %v10517_v24 = vld [vmem:[%s15621_s3 + $0xe0] sm:$0xff] }
 0x31f   :  { %6368 = vmatpush.bf16.msrb.mxu0 %v10496_v3  ;;  %6069 = vmatmul.bf16.vlgmr.msra.gmra.mxu1 %v11740_v5  ;;  %v10510_v5 = vld [vmem:[%s15621_s3 + $0xa8] sm:$0xff] }
 0x320   :  { %6381 = vmatpush.bf16.msrb.mxu1 %v10504_v32  ;;  %6082 = vmatmul.bf16.vlgmr.msra.gmra.mxu2 %v11744_v7  ;;  %v5850_v7 = vadd.f32 %v5849_v6, %v5837_v29 }
 0x321   :  { %6394 = vmatpush.bf16.msrb.mxu2 %v10512_v10  ;;  %9576 = vmatmul.msk.bf16.vlgmr.msra.gmra.mxu3 %vm4797_vm0, %v10528_v23  ;;  %v10518_v10 = vld [vmem:[%s15621_s3 + $0xe8] sm:$0xff] }
 0x322   :  { %v5863_v44 = vadd.f32 %v5862_v31, %v5850_v7  ;;  %6407 = vmatpush.bf16.msrb.mxu3 %v10520_v20  ;;  %v10514_v23 = vld [vmem:[%s15621_s3 + $0xc8] sm:$0xff] }
 0x323   :  { %6369 = vmatpush.bf16.msrb.mxu0 %v10495_v25  ;;  %v5875_v40 = vpop.f32.mrf.mxu2 }
 0x324   :  { %6382 = vmatpush.bf16.msrb.mxu1 %v10503_v27  ;;  %v5876_v36 = vadd.f32 %v5875_v40, %v5863_v44  ;;  %v5864_v34 = vpop.f32.mrf.mxu1  ;;  %v10516_v27 = vld [vmem:[%s15621_s3 + $0xd8] sm:$0xff] }
 0x325   :  { %6395 = vmatpush.bf16.msrb.mxu2 %v10511_v35 }
 0x326   :  { %v5851_v58 = vpop.f32.mrf.mxu0  ;;  %6408 = vmatpush.bf16.msrb.mxu3 %v10519_v62 }
 0x327   :  { %6370 = vmatpush.bf16.msrb.mxu0 %v10494_v30  ;;  %v10515_v30 = vld [vmem:[%s15621_s3 + $0xd0] sm:$0xff] }
 0x328   :  { %6383 = vmatpush.bf16.msrb.mxu1 %v10502_v0 }
 0x329   :  { %6396 = vmatpush.bf16.msrb.mxu2 %v10510_v5 }
 0x32a   :  { %6409 = vmatpush.bf16.msrb.mxu3 %v10518_v10 }
 0x32b   :  { %6371 = vmatpush.bf16.msrb.mxu0 %v10493_v33  ;;  %v5877_v11 = vpop.f32.mrf.mxu2  ;;  %v10513_v33 = vld [vmem:[%s15621_s3 + $0xc0] sm:$0xff] }
 0x32c   :  { %6384 = vmatpush.bf16.msrb.mxu1 %v10501_v1 }
 0x32d   :  { %6397 = vmatpush.bf16.msrb.mxu2 %v10509_v37 }
 0x32e   :  { %6410 = vmatpush.bf16.msrb.mxu3 %v10517_v24 }
 0x32f   :  { %6372 = vmatpush.bf16.msrb.mxu0 %v10492_v38 }
 0x330   :  { %6385 = vmatpush.bf16.msrb.mxu1 %v10500_v60 }
 0x331   :  { %6398 = vmatpush.bf16.msrb.mxu2 %v10508_v39 }
 0x332   :  { %6411 = vmatpush.bf16.msrb.mxu3 %v10516_v27 }
 0x333   :  { %6373 = vmatpush.bf16.msrb.mxu0 %v10491_v41 }
 0x334   :  { %6386 = vmatpush.bf16.msrb.mxu1 %v10499_v42  ;;  %v5888_v43 = vpop.f32.mrf.mxu3 }
 0x335   :  { %6399 = vmatpush.bf16.msrb.mxu2 %v10507_v50  ;;  %v5889_v55 = vadd.f32 %v5888_v43, %v5876_v36 }
 0x336   :  { %6412 = vmatpush.bf16.msrb.mxu3 %v10515_v30 }
 0x337   :  { %6374 = vmatpush.bf16.msrb.mxu0 %v10490_v51 }
 0x338   :  { %6387 = vmatpush.bf16.msrb.mxu1 %v10498_v16 }
 0x339   :  { %6400 = vmatpush.bf16.msrb.mxu2 %v10506_v52 }
 0x33a   :  { %6413 = vmatpush.bf16.msrb.mxu3 %v10514_v23 }
 0x33b   :  { %6375 = vmatpush.bf16.msrb.mxu0 %v10489_v17  ;;  %v5901_v19 = vpop.f32.mrf.mxu0 }
 0x33c   :  { %6388 = vmatpush.bf16.msrb.mxu1 %v10497_v12  ;;  %v5902_v8 = vadd.f32 %v5901_v19, %v5889_v55  ;;  %v5914_v56 = vpop.f32.mrf.mxu1  ;;  %v5890_v47 = vpop.f32.mrf.mxu3 }
 0x33d   :  { %6401 = vmatpush.bf16.msrb.mxu2 %v10505_v15 }
 0x33e   :  { %6376 = vmatmul.bf16.vlgmr.msrb.gmra.mxu0 %v6104_v49  ;;  %v5915_v13 = vadd.f32 %v5914_v56, %v5902_v8  ;;  %6414 = vmatpush.bf16.msrb.mxu3 %v10513_v33  ;;  %v10522_v49 = vld [vmem:[%s15622_s4] ss:$0 sm:$0xff] }
 0x33f   :  { %6389 = vmatmul.bf16.vlgmr.msrb.gmra.mxu1 %v6105_v14 }
 0x340   :  { %6402 = vmatmul.bf16.vlgmr.msrb.gmra.mxu2 %v6106_v18 }
 0x343   :  { %v5927_v4 = vpop.f32.mrf.mxu2  ;;  %v5903_v46 = vpop.f32.mrf.mxu0 }
 0x344   :  { %v5928_v57 = vadd.f32 %v5927_v4, %v5915_v13  ;;  %v5916_v48 = vpop.f32.mrf.mxu1 }
 0x34b   :  { %v5929_v54 = vpop.f32.mrf.mxu2 }
 0x354   :  { %v5940_v9 = vpop.f32.mrf.mxu3 }
 0x355   :  { %v5941_v7 = vadd.f32 %v5940_v9, %v5928_v57 }
 0x35b   :  { %v5953_v59 = vpop.f32.mrf.mxu0 }
 0x35c   :  { %v5966_v61 = vpop.f32.mrf.mxu1  ;;  %v5942_v22 = vpop.f32.mrf.mxu3  ;;  %v5954_v1 = vadd.f32 %v5953_v59, %v5941_v7 }
 0x35e   :  { %v5967_v2 = vadd.f32 %v5966_v61, %v5954_v1 }
 0x363   :  { %v5979_v26 = vpop.f32.mrf.mxu2  ;;  %v5955_v63 = vpop.f32.mrf.mxu0 }
 0x364   :  { %v5968_v3 = vpop.f32.mrf.mxu1  ;;  %v5980_v37 = vadd.f32 %v5979_v26, %v5967_v2 }
 0x36b   :  { %v5981_v32 = vpop.f32.mrf.mxu2 }
 0x374   :  { %v5992_v25 = vpop.f32.mrf.mxu3 }
 0x375   :  { %v5993_v44 = vadd.f32 %v5992_v25, %v5980_v37 }
 0x37b   :  { %v6005_v28 = vpop.f32.mrf.mxu0 }
 0x37c   :  { %v6018_v35 = vpop.f32.mrf.mxu1  ;;  %v5994_v29 = vpop.f32.mrf.mxu3  ;;  %v6006_v38 = vadd.f32 %v6005_v28, %v5993_v44 }
 0x37e   :  { %v6019_v39 = vadd.f32 %v6018_v35, %v6006_v38 }
 0x383   :  { %v6031_v0 = vpop.f32.mrf.mxu2  ;;  %v6007_v5 = vpop.f32.mrf.mxu0 }
 0x384   :  { %v6020_v6 = vpop.f32.mrf.mxu1  ;;  %v6032_v40 = vadd.f32 %v6031_v0, %v6019_v39 }
 0x38b   :  { %v6033_v31 = vpop.f32.mrf.mxu2 }
 0x394   :  { %v6044_v60 = vpop.f32.mrf.mxu3 }
 0x395   :  { %v6045_v36 = vadd.f32 %v6044_v60, %v6032_v40 }
 0x39b   :  { %v6057_v58 = vpop.f32.mrf.mxu0 }
 0x39c   :  { %v6070_v41 = vpop.f32.mrf.mxu1  ;;  %v6046_v42 = vpop.f32.mrf.mxu3  ;;  %v6058_v34 = vadd.f32 %v6057_v58, %v6045_v36 }
 0x39e   :  { %v6071_v50 = vadd.f32 %v6070_v41, %v6058_v34 }
 0x3a3   :  { %v6083_v51 = vpop.f32.mrf.mxu2  ;;  %v6059_v52 = vpop.f32.mrf.mxu0 }
 0x3a4   :  { %v6084_v16 = vadd.f32 %v6083_v51, %v6071_v50  ;;  %v6072_v11 = vpop.f32.mrf.mxu1  ;;  %v6096_v17 = vpop.f32.mrf.mxu3 }
 0x3a6   :  { %v6097_v12 = vadd.f32 %v6096_v17, %v6084_v16 }
 0x3a8   :  { %v6103_v45 = vmax.f32 %v6097_v12, 0.0 }
 0x3aa   :  { %v6107_v53 = vpack.c.bf16 %v6103_v45, %v6103_v45 }
 0x3ab   :  { %v6085_v15 = vpop.f32.mrf.mxu2 }
 0x3ac   :  { %6415 = vmatmul.bf16.vlgmr.msrb.gmra.mxu3 %v6107_v53  ;;  %v6098_v21 = vpop.f32.mrf.mxu3 }
 0x3bb   :  { %v6377_v14 = vpop.f32.mrf.mxu0 }
 0x3bc   :  { %v6390_v18 = vpop.f32.mrf.mxu1  ;;  %v6378_v43 = vadd.f32 %v10522_v49, %v6377_v14 }
 0x3be   :  { %v6391_v55 = vadd.f32 %v6390_v18, %v6378_v43 }
 0x3c3   :  { %v6403_v19 = vpop.f32.mrf.mxu2  ;;  %v6379_v56 = vpop.f32.mrf.mxu0 }
 0x3c4   :  { %v6404_v8 = vadd.f32 %v6403_v19, %v6391_v55  ;;  %v6392_v47 = vpop.f32.mrf.mxu1 }
 0x3cb   :  { %v6405_v13 = vpop.f32.mrf.mxu2 }
 0x42f   :  { %v6416_v4 = vpop.f32.mrf.mxu3 }
 0x430   :  { %v6417_v57 = vadd.f32 %v6416_v4, %v6404_v8 }
 0x432   :  { %6420 = vst [vmem:[#allocation2] sm:$0x3] %v6417_v57 }
 0x433   :  { %6431 = dma.vmem_to_hbm [thread:$0]  %s6427_s6, 32, %s6429_s9, [#allocation3]  }
 0x437   :  { %v6418_v46 = vpop.f32.mrf.mxu3 }
 0x438   :  { %10553 = dma.done.wait [#allocation3], 32  }
 0x439   :  { %10554 = vsyncadd [#allocation3], 4294967264 }
 0x43a   :  { %6436 = vsyncpa [#allocation3], 1 }

</bundles_post_ra>
